<compile_context>
chip_gen: v7x
topology: tpu7x:2x2x1
jax: 0.10.0
libtpu: 0.0.40
codegen_flags: <defaults>
</compile_context>

<pallas_src>
import functools
import math

import jax
import jax.numpy as jnp
from jax.experimental import pallas as pl
from jax.experimental.pallas import tpu as pltpu

EPS = 1e-5  # torch.nn.LayerNorm default


def _round_up(x, m):
    return (x + m - 1) // m * m


def _layernorm(x, gamma, beta):
    # Single-pass mean/variance (one XLU cross-lane reduction pair per LN).
    # Activations here are post-ReLU and O(1); switch to two-pass if scales grow.
    mu = jnp.mean(x, axis=-1, keepdims=True)
    msq = jnp.mean(x * x, axis=-1, keepdims=True)
    var = jnp.maximum(msq - mu * mu, 0.0)
    return (x - mu) * jax.lax.rsqrt(var + EPS) * gamma + beta


def iqn_kernel(
    tau_ref, pik_ref, f_ref,
    w1_ref, b1_ref, g1_ref, beta1_ref,      # phi layer 1
    w2_ref, b2_ref, g2_ref, beta2_ref,      # phi layer 2
    gl_ref, betal_ref,                      # lastNorm
    wlast_ref, blast_ref,                   # last Linear
    out_ref,
    *, row_block, compute_dtype,
):
    cd = compute_dtype

    # Row window of the resident quantile column for this grid step.
    start = pl.multiple_of(pl.program_id(0) * row_block, 8)
    tau = tau_ref[pl.ds(start, row_block), :]                    # (rows, 1) f32

    # Cosine quantile embedding, 2-D and lane-dense: (rows, Dq).
    cos = jnp.cos(tau * pik_ref[...])

    # phi MLP: (Linear -> ReLU -> Dropout(id) -> LayerNorm) x 2, f32 accumulate.
    h = jnp.dot(cos.astype(cd), w1_ref[...], preferred_element_type=jnp.float32)
    h = _layernorm(jnp.maximum(h + b1_ref[...], 0.0), g1_ref[...], beta1_ref[...])
    h = jnp.dot(h.astype(cd), w2_ref[...], preferred_element_type=jnp.float32)
    h = _layernorm(jnp.maximum(h + b2_ref[...], 0.0), g2_ref[...], beta2_ref[...])

    # Combine with pre-broadcast state feature rows, lastNorm, last Linear.
    x = f_ref[...] * jnp.maximum(h, 0.0)                         # (rows, H) f32
    x = _layernorm(x, gl_ref[...], betal_ref[...])               # lastDrop = id
    out = jnp.dot(x.astype(cd), wlast_ref[...], preferred_element_type=jnp.float32)
    out_ref[...] = (out + blast_ref[...]).astype(out_ref.dtype)


def prepare_params(params, compute_dtype=jnp.bfloat16):
    """Pre-cast the MXU weights once (outside the per-call path).
    LayerNorm / bias / feature-MLP params stay float32."""
    p = dict(params)
    for k in ("w1", "w2", "wlast"):
        p[k] = params[k].astype(compute_dtype)
    return p


def _vmem_block_bytes(shape, dtype):
    itemsize = jnp.dtype(dtype).itemsize
    sub = 8 * max(1, 4 // itemsize)          # f32: 8 sublanes, bf16: 16
    r = shape[0] if len(shape) == 2 else 1
    c = shape[-1]
    return _round_up(r, sub) * _round_up(c, 128) * itemsize


def iqn_forward(state, quantiles, params, *, row_block=256,
                out_dtype=jnp.float32):
    """IQN forward (eval mode). `params` should come from prepare_params()."""
    B, in_dim = state.shape
    Bq, N = quantiles.shape
    assert B == Bq
    Dq, H = params["w1"].shape
    out_dim = params["wlast"].shape[1]
    compute_dtype = params["w1"].dtype

    # --- feature MLP hoisted out of the kernel: f = LN(relu(state @ wf + bf)).
    f = jnp.maximum(state @ params["wf"] + params["bf"], 0.0)
    mu = jnp.mean(f, axis=-1, keepdims=True)
    var = jnp.mean((f - mu) ** 2, axis=-1, keepdims=True)
    f = (f - mu) / jnp.sqrt(var + EPS) * params["gf"] + params["betaf"]  # (B, H)

    # --- flatten B*N quantile rows onto one tiled axis (pad to the tile grid).
    R = B * N
    n_tiles = max(1, -(-R // max(int(row_block), 8)))
    rb = _round_up(-(-R // n_tiles), 8)
    R_pad = rb * n_tiles
    pad = R_pad - R

    tau = quantiles.reshape(R, 1).astype(jnp.float32)
    f_rows = jnp.broadcast_to(f[:, None, :], (B, N, H)).reshape(R, H)
    if pad:
        tau = jnp.pad(tau, ((0, pad), (0, 0)))
        f_rows = jnp.pad(f_rows, ((0, pad), (0, 0)))

    pik = (math.pi * jnp.arange(1, Dq + 1, dtype=jnp.float32)).reshape(1, Dq)

    args = (
        tau, pik, f_rows,
        params["w1"], params["b1"], params["g1"], params["beta1"],
        params["w2"], params["b2"], params["g2"], params["beta2"],
        params["gl"], params["betal"],
        params["wlast"], params["blast"],
    )

    def resident(a):
        # Full-array block + constant index_map -> loaded once, reused.
        return pl.BlockSpec(a.shape, lambda i: (0, 0))

    in_specs = (
        [resident(tau), resident(pik),
         pl.BlockSpec((rb, H), lambda i: (i, 0))]       # feature rows tile
        + [resident(a) for a in args[3:]]
    )
    out_spec = pl.BlockSpec((rb, out_dim), lambda i: (i, 0))

    # VMEM budget: assume the pipeline double-buffers every block; request an
    # explicit limit only when the default scoped VMEM is clearly too small
    # (v7x: 64 MiB physical / ~32 MiB default scoped).
    block_shapes = [tau.shape, pik.shape, (rb, H)] + [a.shape for a in args[3:]]
    footprint = 2 * sum(_vmem_block_bytes(s, a.dtype)
                        for s, a in zip(block_shapes, args))
    footprint += 2 * _vmem_block_bytes((rb, out_dim), out_dtype)
    vmem_limit = int(footprint * 1.5) if footprint > 24 * 2**20 else None

    out = pl.pallas_call(
        functools.partial(iqn_kernel, row_block=rb, compute_dtype=compute_dtype),
        out_shape=jax.ShapeDtypeStruct((R_pad, out_dim), out_dtype),
        grid_spec=pltpu.PrefetchScalarGridSpec(
            num_scalar_prefetch=0,
            grid=(n_tiles,),
            in_specs=in_specs,
            out_specs=out_spec,
        ),
        compiler_params=pltpu.CompilerParams(
            dimension_semantics=("parallel",),
            vmem_limit_bytes=vmem_limit),
    )(*args)
    return out[:R].reshape(B, N, out_dim)


def iqn_reference(state, quantiles, params):
    """Plain-JAX f32 reference mirroring the PyTorch forward (eval mode)."""
    Dq = params["w1"].shape[0]

    def ln(x, g, b):
        mu = jnp.mean(x, axis=-1, keepdims=True)
        var = jnp.mean((x - mu) ** 2, axis=-1, keepdims=True)
        return (x - mu) / jnp.sqrt(var + EPS) * g + b

    f = ln(jnp.maximum(state @ params["wf"] + params["bf"], 0.0),
           params["gf"], params["betaf"])
    k = jnp.arange(1, Dq + 1, dtype=jnp.float32)[None, None, :]
    cos = jnp.cos(math.pi * k * quantiles[:, :, None])
    h = ln(jnp.maximum(cos @ params["w1"] + params["b1"], 0.0),
           params["g1"], params["beta1"])
    h = ln(jnp.maximum(h @ params["w2"] + params["b2"], 0.0),
           params["g2"], params["beta2"])
    x = f[:, None, :] * jnp.maximum(h, 0.0)
    x = ln(x, params["gl"], params["betal"])
    return x @ params["wlast"] + params["blast"]


def make_params(key, in_dim, hidden_dim, quantile_dim, out_dim):
    ks = jax.random.split(key, 4)

    def lin(k, fan_in, fan_out):
        bound = 1.0 / math.sqrt(fan_in)
        kw, kb = jax.random.split(k)
        w = jax.random.uniform(kw, (fan_in, fan_out), jnp.float32, -bound, bound)
        b = jax.random.uniform(kb, (1, fan_out), jnp.float32, -bound, bound)
        return w, b

    wf, bf = lin(ks[0], in_dim, hidden_dim)
    w1, b1 = lin(ks[1], quantile_dim, hidden_dim)
    w2, b2 = lin(ks[2], hidden_dim, hidden_dim)
    wlast, blast = lin(ks[3], hidden_dim, out_dim)
    ones = jnp.ones((1, hidden_dim), jnp.float32)
    zeros = jnp.zeros((1, hidden_dim), jnp.float32)
    return dict(
        wf=wf, bf=bf, gf=ones, betaf=zeros,
        w1=w1, b1=b1, g1=ones, beta1=zeros,
        w2=w2, b2=b2, g2=ones, beta2=zeros,
        gl=ones, betal=zeros,
        wlast=wlast, blast=blast,
    )


if __name__ == "__main__":
    # Small, forward-consistent shapes.  quantile_dim=256 matches the module
    # default and keeps the phi contractions MXU-friendly on v6e/v7x.
    in_dim, hidden_dim, quantile_dim, out_dim = 32, 128, 256, 256

    key = jax.random.PRNGKey(0)
    k1, k2, k3, k4, k5 = jax.random.split(key, 5)
    params = make_params(k5, in_dim, hidden_dim, quantile_dim, out_dim)

    # Case 1: ragged row count (B*N=150 -> padded tile), f32 MXU path,
    # tight structural check against the plain-JAX reference.
    B1, N1 = 3, 50
    state1 = jax.random.normal(k1, (B1, in_dim), jnp.float32)
    quant1 = jax.random.uniform(k2, (B1, N1), jnp.float32)
    ref1 = iqn_reference(state1, quant1, params)
    p_f32 = prepare_params(params, jnp.float32)
    out1 = jax.block_until_ready(iqn_forward(state1, quant1, p_f32))
    assert out1.shape == (B1, N1, out_dim), out1.shape
    err1 = float(jnp.max(jnp.abs(out1 - ref1)))
    assert jnp.allclose(out1, ref1, rtol=1e-3, atol=1e-3), err1

    # Case 2: two 256-row tiles, bf16 MXU path (performance config), looser check.
    B2, N2 = 4, 128
    state2 = jax.random.normal(k3, (B2, in_dim), jnp.float32)
    quant2 = jax.random.uniform(k4, (B2, N2), jnp.float32)
    ref2 = iqn_reference(state2, quant2, params)
    p_bf16 = prepare_params(params, jnp.bfloat16)
    out2 = jax.block_until_ready(iqn_forward(state2, quant2, p_bf16))
    assert out2.shape == (B2, N2, out_dim), out2.shape
    err2 = float(jnp.max(jnp.abs(out2 - ref2)))
    assert jnp.allclose(out2, ref2, rtol=5e-2, atol=5e-2), err2

    print("KERNEL_OK")
</pallas_src>

<mosaic_0001>
module attributes {stable_mosaic.version = 11 : i64} {
  func.func @iqn_kernel(%arg0: i32, %arg1: memref<152x1xf32, #tpu.memory_space<vmem>>, %arg2: memref<1x256xf32, #tpu.memory_space<vmem>>, %arg3: memref<152x128xf32, #tpu.memory_space<vmem>>, %arg4: memref<256x128xf32, #tpu.memory_space<vmem>>, %arg5: memref<1x128xf32, #tpu.memory_space<vmem>>, %arg6: memref<1x128xf32, #tpu.memory_space<vmem>>, %arg7: memref<1x128xf32, #tpu.memory_space<vmem>>, %arg8: memref<128x128xf32, #tpu.memory_space<vmem>>, %arg9: memref<1x128xf32, #tpu.memory_space<vmem>>, %arg10: memref<1x128xf32, #tpu.memory_space<vmem>>, %arg11: memref<1x128xf32, #tpu.memory_space<vmem>>, %arg12: memref<1x128xf32, #tpu.memory_space<vmem>>, %arg13: memref<1x128xf32, #tpu.memory_space<vmem>>, %arg14: memref<128x256xf32, #tpu.memory_space<vmem>>, %arg15: memref<1x256xf32, #tpu.memory_space<vmem>>, %arg16: memref<152x256xf32, #tpu.memory_space<vmem>>) attributes {dimension_semantics = [#tpu.dimension_semantics<parallel>], iteration_bounds = array<i64: 1>, scalar_prefetch = 0 : i64, scratch_operands = 0 : i64, tpu.core_type = #tpu.core_type<tc>, window_params = [{pipeline_mode = #tpu.pipeline_mode<synchronous>, transform_indices = @transform_0, window_bounds = array<i64: 152, 1>}, {pipeline_mode = #tpu.pipeline_mode<synchronous>, transform_indices = @transform_1, window_bounds = array<i64: 1, 256>}, {transform_indices = @transform_2, window_bounds = array<i64: 152, 128>}, {pipeline_mode = #tpu.pipeline_mode<synchronous>, transform_indices = @transform_3, window_bounds = array<i64: 256, 128>}, {pipeline_mode = #tpu.pipeline_mode<synchronous>, transform_indices = @transform_4, window_bounds = array<i64: 1, 128>}, {pipeline_mode = #tpu.pipeline_mode<synchronous>, transform_indices = @transform_5, window_bounds = array<i64: 1, 128>}, {pipeline_mode = #tpu.pipeline_mode<synchronous>, transform_indices = @transform_6, window_bounds = array<i64: 1, 128>}, {pipeline_mode = #tpu.pipeline_mode<synchronous>, transform_indices = @transform_7, window_bounds = array<i64: 128, 128>}, {pipeline_mode = #tpu.pipeline_mode<synchronous>, transform_indices = @transform_8, window_bounds = array<i64: 1, 128>}, {pipeline_mode = #tpu.pipeline_mode<synchronous>, transform_indices = @transform_9, window_bounds = array<i64: 1, 128>}, {pipeline_mode = #tpu.pipeline_mode<synchronous>, transform_indices = @transform_10, window_bounds = array<i64: 1, 128>}, {pipeline_mode = #tpu.pipeline_mode<synchronous>, transform_indices = @transform_11, window_bounds = array<i64: 1, 128>}, {pipeline_mode = #tpu.pipeline_mode<synchronous>, transform_indices = @transform_12, window_bounds = array<i64: 1, 128>}, {pipeline_mode = #tpu.pipeline_mode<synchronous>, transform_indices = @transform_13, window_bounds = array<i64: 128, 256>}, {pipeline_mode = #tpu.pipeline_mode<synchronous>, transform_indices = @transform_14, window_bounds = array<i64: 1, 256>}, {transform_indices = @transform_15, window_bounds = array<i64: 152, 256>}]} {
    %c152_i32 = arith.constant 152 : i32
    %0 = arith.muli %arg0, %c152_i32 : i32
    %1 = tpu.assume_multiple %0, 8 : i32
    %2 = arith.index_cast %1 : i32 to index
    %c0 = arith.constant 0 : index
    %3 = vector.load %arg1[%2, %c0] : memref<152x1xf32, #tpu.memory_space<vmem>>, vector<152x1xf32>
    %c0_0 = arith.constant 0 : index
    %c0_1 = arith.constant 0 : index
    %4 = vector.load %arg2[%c0_0, %c0_1] : memref<1x256xf32, #tpu.memory_space<vmem>>, vector<1x256xf32>
    %5 = vector.broadcast %3 : vector<152x1xf32> to vector<152x256xf32>
    %6 = vector.broadcast %4 : vector<1x256xf32> to vector<152x256xf32>
    %7 = arith.mulf %5, %6 : vector<152x256xf32>
    %8 = math.cos %7 : vector<152x256xf32>
    %c0_2 = arith.constant 0 : index
    %c0_3 = arith.constant 0 : index
    %9 = vector.load %arg4[%c0_2, %c0_3] : memref<256x128xf32, #tpu.memory_space<vmem>>, vector<256x128xf32>
    %cst = arith.constant dense<0.000000e+00> : vector<152x128xf32>
    %10 = tpu.matmul %8, %9, %cst {dimension_numbers = #tpu.dot_dimension_numbers<[1], [0], [0], [1], [0, 0, 1, 1], [], []>} : vector<152x256xf32>, vector<256x128xf32>, vector<152x128xf32> -> vector<152x128xf32>
    %c0_4 = arith.constant 0 : index
    %c0_5 = arith.constant 0 : index
    %11 = vector.load %arg5[%c0_4, %c0_5] : memref<1x128xf32, #tpu.memory_space<vmem>>, vector<1x128xf32>
    %12 = vector.broadcast %11 : vector<1x128xf32> to vector<152x128xf32>
    %13 = arith.addf %10, %12 : vector<152x128xf32>
    %cst_6 = arith.constant 0.000000e+00 : f32
    %14 = vector.broadcast %cst_6 : f32 to vector<152x128xf32>
    %15 = arith.maximumf %13, %14 : vector<152x128xf32>
    %c0_7 = arith.constant 0 : index
    %c0_8 = arith.constant 0 : index
    %16 = vector.load %arg6[%c0_7, %c0_8] : memref<1x128xf32, #tpu.memory_space<vmem>>, vector<1x128xf32>
    %c0_9 = arith.constant 0 : index
    %c0_10 = arith.constant 0 : index
    %17 = vector.load %arg7[%c0_9, %c0_10] : memref<1x128xf32, #tpu.memory_space<vmem>>, vector<1x128xf32>
    %cst_11 = arith.constant dense<0.000000e+00> : vector<152xf32>
    %18 = vector.multi_reduction <add>, %15, %cst_11 [1] : vector<152x128xf32> to vector<152xf32>
    %19 = vector.shape_cast %18 : vector<152xf32> to vector<152x1xf32>
    %cst_12 = arith.constant 1.280000e+02 : f32
    %20 = vector.broadcast %cst_12 : f32 to vector<152x1xf32>
    %21 = arith.divf %19, %20 : vector<152x1xf32>
    %22 = arith.mulf %15, %15 : vector<152x128xf32>
    %cst_13 = arith.constant dense<0.000000e+00> : vector<152xf32>
    %23 = vector.multi_reduction <add>, %22, %cst_13 [1] : vector<152x128xf32> to vector<152xf32>
    %24 = vector.shape_cast %23 : vector<152xf32> to vector<152x1xf32>
    %cst_14 = arith.constant 1.280000e+02 : f32
    %25 = vector.broadcast %cst_14 : f32 to vector<152x1xf32>
    %26 = arith.divf %24, %25 : vector<152x1xf32>
    %27 = arith.mulf %21, %21 : vector<152x1xf32>
    %28 = arith.subf %26, %27 : vector<152x1xf32>
    %cst_15 = arith.constant 0.000000e+00 : f32
    %29 = vector.broadcast %cst_15 : f32 to vector<152x1xf32>
    %30 = arith.maximumf %28, %29 : vector<152x1xf32>
    %31 = vector.broadcast %21 : vector<152x1xf32> to vector<152x128xf32>
    %32 = arith.subf %15, %31 : vector<152x128xf32>
    %cst_16 = arith.constant 9.99999974E-6 : f32
    %33 = vector.broadcast %cst_16 : f32 to vector<152x1xf32>
    %34 = arith.addf %30, %33 : vector<152x1xf32>
    %35 = math.rsqrt %34 : vector<152x1xf32>
    %36 = vector.broadcast %35 : vector<152x1xf32> to vector<152x128xf32>
    %37 = arith.mulf %32, %36 : vector<152x128xf32>
    %38 = vector.broadcast %16 : vector<1x128xf32> to vector<152x128xf32>
    %39 = arith.mulf %37, %38 : vector<152x128xf32>
    %40 = vector.broadcast %17 : vector<1x128xf32> to vector<152x128xf32>
    %41 = arith.addf %39, %40 : vector<152x128xf32>
    %c0_17 = arith.constant 0 : index
    %c0_18 = arith.constant 0 : index
    %42 = vector.load %arg8[%c0_17, %c0_18] : memref<128x128xf32, #tpu.memory_space<vmem>>, vector<128x128xf32>
    %cst_19 = arith.constant dense<0.000000e+00> : vector<152x128xf32>
    %43 = tpu.matmul %41, %42, %cst_19 {dimension_numbers = #tpu.dot_dimension_numbers<[1], [0], [0], [1], [0, 0, 1, 1], [], []>} : vector<152x128xf32>, vector<128x128xf32>, vector<152x128xf32> -> vector<152x128xf32>
    %c0_20 = arith.constant 0 : index
    %c0_21 = arith.constant 0 : index
    %44 = vector.load %arg9[%c0_20, %c0_21] : memref<1x128xf32, #tpu.memory_space<vmem>>, vector<1x128xf32>
    %45 = vector.broadcast %44 : vector<1x128xf32> to vector<152x128xf32>
    %46 = arith.addf %43, %45 : vector<152x128xf32>
    %cst_22 = arith.constant 0.000000e+00 : f32
    %47 = vector.broadcast %cst_22 : f32 to vector<152x128xf32>
    %48 = arith.maximumf %46, %47 : vector<152x128xf32>
    %c0_23 = arith.constant 0 : index
    %c0_24 = arith.constant 0 : index
    %49 = vector.load %arg10[%c0_23, %c0_24] : memref<1x128xf32, #tpu.memory_space<vmem>>, vector<1x128xf32>
    %c0_25 = arith.constant 0 : index
    %c0_26 = arith.constant 0 : index
    %50 = vector.load %arg11[%c0_25, %c0_26] : memref<1x128xf32, #tpu.memory_space<vmem>>, vector<1x128xf32>
    %cst_27 = arith.constant dense<0.000000e+00> : vector<152xf32>
    %51 = vector.multi_reduction <add>, %48, %cst_27 [1] : vector<152x128xf32> to vector<152xf32>
    %52 = vector.shape_cast %51 : vector<152xf32> to vector<152x1xf32>
    %cst_28 = arith.constant 1.280000e+02 : f32
    %53 = vector.broadcast %cst_28 : f32 to vector<152x1xf32>
    %54 = arith.divf %52, %53 : vector<152x1xf32>
    %55 = arith.mulf %48, %48 : vector<152x128xf32>
    %cst_29 = arith.constant dense<0.000000e+00> : vector<152xf32>
    %56 = vector.multi_reduction <add>, %55, %cst_29 [1] : vector<152x128xf32> to vector<152xf32>
    %57 = vector.shape_cast %56 : vector<152xf32> to vector<152x1xf32>
    %cst_30 = arith.constant 1.280000e+02 : f32
    %58 = vector.broadcast %cst_30 : f32 to vector<152x1xf32>
    %59 = arith.divf %57, %58 : vector<152x1xf32>
    %60 = arith.mulf %54, %54 : vector<152x1xf32>
    %61 = arith.subf %59, %60 : vector<152x1xf32>
    %cst_31 = arith.constant 0.000000e+00 : f32
    %62 = vector.broadcast %cst_31 : f32 to vector<152x1xf32>
    %63 = arith.maximumf %61, %62 : vector<152x1xf32>
    %64 = vector.broadcast %54 : vector<152x1xf32> to vector<152x128xf32>
    %65 = arith.subf %48, %64 : vector<152x128xf32>
    %cst_32 = arith.constant 9.99999974E-6 : f32
    %66 = vector.broadcast %cst_32 : f32 to vector<152x1xf32>
    %67 = arith.addf %63, %66 : vector<152x1xf32>
    %68 = math.rsqrt %67 : vector<152x1xf32>
    %69 = vector.broadcast %68 : vector<152x1xf32> to vector<152x128xf32>
    %70 = arith.mulf %65, %69 : vector<152x128xf32>
    %71 = vector.broadcast %49 : vector<1x128xf32> to vector<152x128xf32>
    %72 = arith.mulf %70, %71 : vector<152x128xf32>
    %73 = vector.broadcast %50 : vector<1x128xf32> to vector<152x128xf32>
    %74 = arith.addf %72, %73 : vector<152x128xf32>
    %c0_33 = arith.constant 0 : index
    %c0_34 = arith.constant 0 : index
    %75 = vector.load %arg3[%c0_33, %c0_34] : memref<152x128xf32, #tpu.memory_space<vmem>>, vector<152x128xf32>
    %cst_35 = arith.constant 0.000000e+00 : f32
    %76 = vector.broadcast %cst_35 : f32 to vector<152x128xf32>
    %77 = arith.maximumf %74, %76 : vector<152x128xf32>
    %78 = arith.mulf %75, %77 : vector<152x128xf32>
    %c0_36 = arith.constant 0 : index
    %c0_37 = arith.constant 0 : index
    %79 = vector.load %arg12[%c0_36, %c0_37] : memref<1x128xf32, #tpu.memory_space<vmem>>, vector<1x128xf32>
    %c0_38 = arith.constant 0 : index
    %c0_39 = arith.constant 0 : index
    %80 = vector.load %arg13[%c0_38, %c0_39] : memref<1x128xf32, #tpu.memory_space<vmem>>, vector<1x128xf32>
    %cst_40 = arith.constant dense<0.000000e+00> : vector<152xf32>
    %81 = vector.multi_reduction <add>, %78, %cst_40 [1] : vector<152x128xf32> to vector<152xf32>
    %82 = vector.shape_cast %81 : vector<152xf32> to vector<152x1xf32>
    %cst_41 = arith.constant 1.280000e+02 : f32
    %83 = vector.broadcast %cst_41 : f32 to vector<152x1xf32>
    %84 = arith.divf %82, %83 : vector<152x1xf32>
    %85 = arith.mulf %78, %78 : vector<152x128xf32>
    %cst_42 = arith.constant dense<0.000000e+00> : vector<152xf32>
    %86 = vector.multi_reduction <add>, %85, %cst_42 [1] : vector<152x128xf32> to vector<152xf32>
    %87 = vector.shape_cast %86 : vector<152xf32> to vector<152x1xf32>
    %cst_43 = arith.constant 1.280000e+02 : f32
    %88 = vector.broadcast %cst_43 : f32 to vector<152x1xf32>
    %89 = arith.divf %87, %88 : vector<152x1xf32>
    %90 = arith.mulf %84, %84 : vector<152x1xf32>
    %91 = arith.subf %89, %90 : vector<152x1xf32>
    %cst_44 = arith.constant 0.000000e+00 : f32
    %92 = vector.broadcast %cst_44 : f32 to vector<152x1xf32>
    %93 = arith.maximumf %91, %92 : vector<152x1xf32>
    %94 = vector.broadcast %84 : vector<152x1xf32> to vector<152x128xf32>
    %95 = arith.subf %78, %94 : vector<152x128xf32>
    %cst_45 = arith.constant 9.99999974E-6 : f32
    %96 = vector.broadcast %cst_45 : f32 to vector<152x1xf32>
    %97 = arith.addf %93, %96 : vector<152x1xf32>
    %98 = math.rsqrt %97 : vector<152x1xf32>
    %99 = vector.broadcast %98 : vector<152x1xf32> to vector<152x128xf32>
    %100 = arith.mulf %95, %99 : vector<152x128xf32>
    %101 = vector.broadcast %79 : vector<1x128xf32> to vector<152x128xf32>
    %102 = arith.mulf %100, %101 : vector<152x128xf32>
    %103 = vector.broadcast %80 : vector<1x128xf32> to vector<152x128xf32>
    %104 = arith.addf %102, %103 : vector<152x128xf32>
    %c0_46 = arith.constant 0 : index
    %c0_47 = arith.constant 0 : index
    %105 = vector.load %arg14[%c0_46, %c0_47] : memref<128x256xf32, #tpu.memory_space<vmem>>, vector<128x256xf32>
    %cst_48 = arith.constant dense<0.000000e+00> : vector<152x256xf32>
    %106 = tpu.matmul %104, %105, %cst_48 {dimension_numbers = #tpu.dot_dimension_numbers<[1], [0], [0], [1], [0, 0, 1, 1], [], []>} : vector<152x128xf32>, vector<128x256xf32>, vector<152x256xf32> -> vector<152x256xf32>
    %c0_49 = arith.constant 0 : index
    %c0_50 = arith.constant 0 : index
    %107 = vector.load %arg15[%c0_49, %c0_50] : memref<1x256xf32, #tpu.memory_space<vmem>>, vector<1x256xf32>
    %108 = vector.broadcast %107 : vector<1x256xf32> to vector<152x256xf32>
    %109 = arith.addf %106, %108 : vector<152x256xf32>
    %c0_51 = arith.constant 0 : index
    %c0_52 = arith.constant 0 : index
    %110 = vector.load %arg16[%c0_51, %c0_52] : memref<152x256xf32, #tpu.memory_space<vmem>>, vector<152x256xf32>
    tpu.vector_store %arg16[%c0_51, %c0_52], %109 {strides = array<i32>} : memref<152x256xf32, #tpu.memory_space<vmem>>, vector<152x256xf32>,
    return
  }
  func.func @transform_0(%arg0: i32) -> (i32, i32) {
    %c0_i32 = arith.constant 0 : i32
    %c0_i32_0 = arith.constant 0 : i32
    %c0_i32_1 = arith.constant 0 : i32
    return %c0_i32, %c0_i32_0 : i32, i32
  }
  func.func @transform_1(%arg0: i32) -> (i32, i32) {
    %c0_i32 = arith.constant 0 : i32
    %c0_i32_0 = arith.constant 0 : i32
    %c0_i32_1 = arith.constant 0 : i32
    return %c0_i32, %c0_i32_0 : i32, i32
  }
  func.func @transform_2(%arg0: i32) -> (i32, i32) {
    %c0_i32 = arith.constant 0 : i32
    %c0_i32_0 = arith.constant 0 : i32
    return %arg0, %c0_i32 : i32, i32
  }
  func.func @transform_3(%arg0: i32) -> (i32, i32) {
    %c0_i32 = arith.constant 0 : i32
    %c0_i32_0 = arith.constant 0 : i32
    %c0_i32_1 = arith.constant 0 : i32
    return %c0_i32, %c0_i32_0 : i32, i32
  }
  func.func @transform_4(%arg0: i32) -> (i32, i32) {
    %c0_i32 = arith.constant 0 : i32
    %c0_i32_0 = arith.constant 0 : i32
    %c0_i32_1 = arith.constant 0 : i32
    return %c0_i32, %c0_i32_0 : i32, i32
  }
  func.func @transform_5(%arg0: i32) -> (i32, i32) {
    %c0_i32 = arith.constant 0 : i32
    %c0_i32_0 = arith.constant 0 : i32
    %c0_i32_1 = arith.constant 0 : i32
    return %c0_i32, %c0_i32_0 : i32, i32
  }
  func.func @transform_6(%arg0: i32) -> (i32, i32) {
    %c0_i32 = arith.constant 0 : i32
    %c0_i32_0 = arith.constant 0 : i32
    %c0_i32_1 = arith.constant 0 : i32
    return %c0_i32, %c0_i32_0 : i32, i32
  }
  func.func @transform_7(%arg0: i32) -> (i32, i32) {
    %c0_i32 = arith.constant 0 : i32
    %c0_i32_0 = arith.constant 0 : i32
    %c0_i32_1 = arith.constant 0 : i32
    return %c0_i32, %c0_i32_0 : i32, i32
  }
  func.func @transform_8(%arg0: i32) -> (i32, i32) {
    %c0_i32 = arith.constant 0 : i32
    %c0_i32_0 = arith.constant 0 : i32
    %c0_i32_1 = arith.constant 0 : i32
    return %c0_i32, %c0_i32_0 : i32, i32
  }
  func.func @transform_9(%arg0: i32) -> (i32, i32) {
    %c0_i32 = arith.constant 0 : i32
    %c0_i32_0 = arith.constant 0 : i32
    %c0_i32_1 = arith.constant 0 : i32
    return %c0_i32, %c0_i32_0 : i32, i32
  }
  func.func @transform_10(%arg0: i32) -> (i32, i32) {
    %c0_i32 = arith.constant 0 : i32
    %c0_i32_0 = arith.constant 0 : i32
    %c0_i32_1 = arith.constant 0 : i32
    return %c0_i32, %c0_i32_0 : i32, i32
  }
  func.func @transform_11(%arg0: i32) -> (i32, i32) {
    %c0_i32 = arith.constant 0 : i32
    %c0_i32_0 = arith.constant 0 : i32
    %c0_i32_1 = arith.constant 0 : i32
    return %c0_i32, %c0_i32_0 : i32, i32
  }
  func.func @transform_12(%arg0: i32) -> (i32, i32) {
    %c0_i32 = arith.constant 0 : i32
    %c0_i32_0 = arith.constant 0 : i32
    %c0_i32_1 = arith.constant 0 : i32
    return %c0_i32, %c0_i32_0 : i32, i32
  }
  func.func @transform_13(%arg0: i32) -> (i32, i32) {
    %c0_i32 = arith.constant 0 : i32
    %c0_i32_0 = arith.constant 0 : i32
    %c0_i32_1 = arith.constant 0 : i32
    return %c0_i32, %c0_i32_0 : i32, i32
  }
  func.func @transform_14(%arg0: i32) -> (i32, i32) {
    %c0_i32 = arith.constant 0 : i32
    %c0_i32_0 = arith.constant 0 : i32
    %c0_i32_1 = arith.constant 0 : i32
    return %c0_i32, %c0_i32_0 : i32, i32
  }
  func.func @transform_15(%arg0: i32) -> (i32, i32) {
    %c0_i32 = arith.constant 0 : i32
    %c0_i32_0 = arith.constant 0 : i32
    return %arg0, %c0_i32 : i32, i32
  }
}

</mosaic_0001>

<bundles_post_ra>
// kernel: tpu_custom_call.1
= control target key start
LH: loop header
LB: loop body
LE: loop exit
PB: predicated region body
PF: predicated region fallthrough
CT: control target
= control target key end

     0   :  { %20 = vsyncpa [#allocation3], 0  ;;  %s12356_s0 = inlined_call_operand.vmem [shape: f32[152,1], index: 0, kind: input, shape index: {}]   ;;  %s12357_s1 = inlined_call_operand.vmem [shape: f32[1,256], index: 1, kind: input, shape index: {}]   ;;  %s12358_s2 = inlined_call_operand.vmem [shape: f32[152,128], index: 2, kind: input, shape index: {}]   ;;  %s12359_s3 = inlined_call_operand.hbm [shape: f32[256,128], index: 3, kind: input, shape index: {}]   ;;  %s12360_s4 = inlined_call_operand.vmem [shape: f32[1,128], index: 4, kind: input, shape index: {}]   ;;  %s12361_s5 = inlined_call_operand.vmem [shape: f32[1,128], index: 5, kind: input, shape index: {}]   ;;  %s12362_s6 = inlined_call_operand.vmem [shape: f32[1,128], index: 6, kind: input, shape index: {}]   ;;  %s12363_s7 = inlined_call_operand.hbm [shape: f32[128,128], index: 7, kind: input, shape index: {}]   ;;  %s12364_s8 = inlined_call_operand.vmem [shape: f32[1,128], index: 8, kind: input, shape index: {}]   ;;  %s12365_s9 = inlined_call_operand.vmem [shape: f32[1,128], index: 9, kind: input, shape index: {}]   ;;  %s12366_s10 = inlined_call_operand.vmem [shape: f32[1,128], index: 10, kind: input, shape index: {}]   ;;  %s12367_s11 = inlined_call_operand.vmem [shape: f32[1,128], index: 11, kind: input, shape index: {}]   ;;  %s12368_s12 = inlined_call_operand.vmem [shape: f32[1,128], index: 12, kind: input, shape index: {}]   ;;  %s12369_s13 = inlined_call_operand.hbm [shape: f32[128,256], index: 13, kind: input, shape index: {}]   ;;  %s12370_s14 = inlined_call_operand.vmem [shape: f32[1,256], index: 14, kind: input, shape index: {}]   ;;  %s12371_s15 = inlined_call_operand.hbm [shape: f32[152,256], index: 15, kind: output, shape index: {}]  }
   0x1   :  { %21 = vsyncpa [#allocation6], 0 }
   0x2   :  { %22 = vsyncpa [#allocation4], 0  ;;  %s6819_s18 = smov [#allocation5]   ;;  %s6820_s20 = smov [#allocation2]  }
   0x3   :  { %s52_s19 = sshll.u32 %s6819_s18, 4  ;;  %s34_s21 = sshll.u32 %s6820_s20, 4  ;;  %s53_s19 = int_to_ptr.vmem [resolvable:$true] %s52_s19  ;;  %s6917_s21 = int_to_ptr.vmem [resolvable:$true] %s34_s21 }
   0x4   :  { %s6725_s24 = scalar_lea.hbm %s12363_s7, 2048 }
   0x5   :  { %p6726_p0 = scmp.ne.s32.totalorder %s12363_s7, %s6725_s24  ;;  %p6729_p1 = scmp.lt.u32.totalorder %s6725_s24, %s12363_s7 }
   0x7   :  { %p6731_p2 = pnand %p6729_p1, %p6726_p0 }
   0x9   :  { %6734 = shalt.err (!%p6731_p2)
}
   0xa   :  { %s6735_s29 = scalar_lea.vmem %s53_s19, 2048  ;;  %p6740_p4 = scmp.lt.s32.totalorder %s53_s19, %s53_s19 }
   0xb   :  { %p6736_p3 = scmp.ne.s32.totalorder %s53_s19, %s6735_s29  ;;  %p6741_p5 = scmp.lt.s32.totalorder %s6735_s29, %s6735_s29 }
   0xd   :  { %p6742_p6 = por %p6741_p5, %p6740_p4 }
   0xf   :  { %p6743_p7 = pnand %p6742_p6, %p6736_p3 }
  0x11   :  { %6746 = shalt.err (!%p6743_p7)
}
  0x12   :  { %s6821_s30 = smov 128   ;;  %s6822_s16 = smov 8  }
  0x13   :  { %58 = dma.hbm_to_vmem [thread:$0]  %s12363_s7, 2048, %s53_s19, [#allocation6], %s6821_s30, %s6821_s30, %s6822_s16  }
  0x14   :  { %s6747_s23 = scalar_lea.hbm %s12359_s3, 4096 }
  0x15   :  { %p6748_p8 = scmp.ne.s32.totalorder %s12359_s3, %s6747_s23  ;;  %p6751_p9 = scmp.lt.u32.totalorder %s6747_s23, %s12359_s3 }
  0x17   :  { %p6753_p10 = pnand %p6751_p9, %p6748_p8 }
  0x19   :  { %6756 = shalt.err (!%p6753_p10)
}
  0x1a   :  { %s6757_s28 = scalar_lea.vmem %s6917_s21, 4096  ;;  %p6762_p12 = scmp.lt.s32.totalorder %s6917_s21, %s6917_s21 }
  0x1b   :  { %p6758_p11 = scmp.ne.s32.totalorder %s6917_s21, %s6757_s28  ;;  %p6763_p13 = scmp.lt.s32.totalorder %s6757_s28, %s6757_s28 }
  0x1d   :  { %p6764_p0 = por %p6763_p13, %p6762_p12 }
  0x1f   :  { %p6765_p1 = pnand %p6764_p0, %p6758_p11 }
  0x21   :  { %6768 = shalt.err (!%p6765_p1)
}
  0x22   :  { %40 = dma.hbm_to_vmem [thread:$0]  %s12359_s3, 4096, %s6917_s21, [#allocation3], %s6821_s30, %s6821_s30, %s6822_s16  }
  0x23   :  { %s6823_s29 = smov [#allocation7]   ;;  %s6769_s22 = scalar_lea.hbm %s12369_s13, 4096 }
  0x24   :  { %s74_s17 = sshll.u32 %s6823_s29, 4  ;;  %p6770_p2 = scmp.ne.s32.totalorder %s12369_s13, %s6769_s22  ;;  %s75_s17 = int_to_ptr.vmem [resolvable:$true] %s74_s17 }
  0x25   :  { %p6773_p3 = scmp.lt.u32.totalorder %s6769_s22, %s12369_s13 }
  0x27   :  { %p6775_p4 = pnand %p6773_p3, %p6770_p2 }
  0x29   :  { %6778 = shalt.err (!%p6775_p4)
}
  0x2a   :  { %s6779_s27 = scalar_lea.vmem %s75_s17, 4096  ;;  %p6784_p6 = scmp.lt.s32.totalorder %s75_s17, %s75_s17 }
  0x2b   :  { %p6780_p5 = scmp.ne.s32.totalorder %s75_s17, %s6779_s27  ;;  %p6785_p7 = scmp.lt.s32.totalorder %s6779_s27, %s6779_s27 }
  0x2d   :  { %p6786_p8 = por %p6785_p7, %p6784_p6 }
  0x2f   :  { %p6787_p9 = pnand %p6786_p8, %p6780_p5 }
  0x31   :  { %6790 = shalt.err (!%p6787_p9)
}
  0x32   :  { %s6824_s3 = smov 256   ;;  %s6825_s21 = smov 16  }
  0x33   :  { %80 = dma.hbm_to_vmem [thread:$0]  %s12369_s13, 4096, %s75_s17, [#allocation6], %s6824_s3, %s6824_s3, %s6825_s21  }
  0x34   :  { %6813 = dma.done.wait [#allocation3], 4096  }
  0x35   :  { %6814 = vsyncadd [#allocation3], 4294963200 }
  0x36   :  { %6815 = dma.done.wait [#allocation6], 6144  }
  0x37   :  { %6816 = vsyncadd [#allocation6], 4294961152  ;;  %v6826_v0 = vmov 0   ;;  %v96_v1 = vld [vmem:[%s12356_s0 + $0x10] sm:$0xff]  ;;  %v94_v2 = vld [vmem:[%s12356_s0] sm:$0xff]  ;;  %v12374_v20 = vmov 0.0|0.0  }
  0x38   :  { %6458 = vset.pattern.permute.xlu1 %v6826_v0  ;;  %6457 = vset.pattern.permute.xlu0 %v6826_v0  ;;  %v97_v3 = vld [vmem:[%s12356_s0 + $0x18] sm:$0xff]  ;;  %v95_v4 = vld [vmem:[%s12356_s0 + $0x8] sm:$0xff]  ;;  %v98_v6 = vld [vmem:[%s12356_s0 + $0x20] sm:$0xff] }
  0x39   :  { %126 = vperm.xlu1 %6458, %v96_v1   ;;  %116 = vperm.xlu0 %6457, %v94_v2   ;;  %v99_v5 = vld [vmem:[%s12356_s0 + $0x28] sm:$0xff]  ;;  %v101_v7 = vld [vmem:[%s12356_s0 + $0x38] sm:$0xff]  ;;  %v100_v8 = vld [vmem:[%s12356_s0 + $0x30] sm:$0xff] }
  0x3a   :  { %v103_v9 = vld [vmem:[%s12356_s0 + $0x48] sm:$0xff]  ;;  %v102_v10 = vld [vmem:[%s12356_s0 + $0x40] sm:$0xff]  ;;  %v105_v11 = vld [vmem:[%s12356_s0 + $0x58] sm:$0xff]  ;;  %6167 = vmatprep.subr.bf16.mxu0 %v12374_v20  ;;  %6271 = vmatprep.subr.bf16.mxu1 %v12374_v20 }
  0x3b   :  { %v104_v12 = vld [vmem:[%s12356_s0 + $0x50] sm:$0xff]  ;;  %v107_v13 = vld [vmem:[%s12356_s0 + $0x68] sm:$0xff]  ;;  %v106_v14 = vld [vmem:[%s12356_s0 + $0x60] sm:$0xff] }
  0x3c   :  { %v109_v15 = vld [vmem:[%s12356_s0 + $0x78] sm:$0xff]  ;;  %v108_v16 = vld [vmem:[%s12356_s0 + $0x70] sm:$0xff]  ;;  %v111_v17 = vld [vmem:[%s12356_s0 + $0x88] sm:$0xff] }
  0x3d   :  { %131 = vperm.xlu1 %6458, %v97_v3   ;;  %121 = vperm.xlu0 %6457, %v95_v4   ;;  %v110_v18 = vld [vmem:[%s12356_s0 + $0x80] sm:$0xff]  ;;  %v112_v19 = vld [vmem:[%s12356_s0 + $0x90] sm:$0xff]  ;;  %v4172_v21 = vld [vmem:[#allocation2] sm:$0xff] }
  0x3e   :  { %v4173_v22 = vld [vmem:[#allocation2 + $0x8] sm:$0xff]  ;;  %v4174_v24 = vld [vmem:[#allocation2 + $0x10] sm:$0xff]  ;;  %v4175_v25 = vld [vmem:[#allocation2 + $0x18] sm:$0xff] }
  0x3f   :  { %v6168_v23 = vpack.c.bf16 %v4173_v22, %v4172_v21  ;;  %v6171_v26 = vpack.c.bf16 %v4175_v25, %v4174_v24  ;;  %v4176_v27 = vld [vmem:[#allocation2 + $0x20] sm:$0xff]  ;;  %v4177_v28 = vld [vmem:[#allocation2 + $0x28] sm:$0xff]  ;;  %v4178_v30 = vld [vmem:[#allocation2 + $0x30] sm:$0xff] }
  0x40   :  { %v6174_v29 = vpack.c.bf16 %v4177_v28, %v4176_v27  ;;  %v4179_v31 = vld [vmem:[#allocation2 + $0x38] sm:$0xff]  ;;  %v4180_v33 = vld [vmem:[#allocation2 + $0x40] sm:$0xff]  ;;  %v4181_v34 = vld [vmem:[#allocation2 + $0x48] sm:$0xff] }
  0x41   :  { %141 = vperm.xlu1 %6458, %v99_v5   ;;  %136 = vperm.xlu0 %6457, %v98_v6   ;;  %v6177_v32 = vpack.c.bf16 %v4179_v31, %v4178_v30  ;;  %v6180_v35 = vpack.c.bf16 %v4181_v34, %v4180_v33  ;;  %v4182_v36 = vld [vmem:[#allocation2 + $0x50] sm:$0xff]  ;;  %v4183_v37 = vld [vmem:[#allocation2 + $0x58] sm:$0xff]  ;;  %v4184_v39 = vld [vmem:[#allocation2 + $0x60] sm:$0xff]  ;;  %v210_v5 = vlaneseq }
  0x42   :  { %6169 = vmatpush1.bf16.msra.mxu0 %v6168_v23  ;;  %v6183_v38 = vpack.c.bf16 %v4183_v37, %v4182_v36  ;;  %v4185_v40 = vld [vmem:[#allocation2 + $0x68] sm:$0xff]  ;;  %v4186_v42 = vld [vmem:[#allocation2 + $0x70] sm:$0xff]  ;;  %v4187_v43 = vld [vmem:[#allocation2 + $0x78] sm:$0xff] }
  0x43   :  { %6170 = vmatprep.subr.bf16.mxu0 %v12374_v20  ;;  %v6186_v41 = vpack.c.bf16 %v4185_v40, %v4184_v39  ;;  %v6189_v44 = vpack.c.bf16 %v4187_v43, %v4186_v42  ;;  %v4188_v45 = vld [vmem:[#allocation2 + $0x80] sm:$0xff]  ;;  %v4189_v46 = vld [vmem:[#allocation2 + $0x88] sm:$0xff]  ;;  %v4190_v48 = vld [vmem:[#allocation2 + $0x90] sm:$0xff]  ;;  %v7038_v6 = vshrl.u32 %v210_v5, 7 }
  0x44   :  { %v6192_v47 = vpack.c.bf16 %v4189_v46, %v4188_v45  ;;  %v4191_v49 = vld [vmem:[#allocation2 + $0x98] sm:$0xff]  ;;  %v4192_v51 = vld [vmem:[#allocation2 + $0xa0] sm:$0xff]  ;;  %v4193_v52 = vld [vmem:[#allocation2 + $0xa8] sm:$0xff] }
  0x45   :  { %151 = vperm.xlu1 %6458, %v101_v7   ;;  %146 = vperm.xlu0 %6457, %v100_v8   ;;  %v6195_v50 = vpack.c.bf16 %v4191_v49, %v4190_v48  ;;  %v6198_v53 = vpack.c.bf16 %v4193_v52, %v4192_v51  ;;  %v4194_v54 = vld [vmem:[#allocation2 + $0xb0] sm:$0xff]  ;;  %v4195_v55 = vld [vmem:[#allocation2 + $0xb8] sm:$0xff]  ;;  %v4196_v57 = vld [vmem:[#allocation2 + $0xc0] sm:$0xff]  ;;  %12537 = vst [vmem:[#allocation12_spill] sm:$0xff] %v7038_v6  ;;  %v12373_v7 = vsub.s32 0, %v7038_v6  ;;  %v12372_v8 = vsub.s32 1, %v7038_v6 }
  0x46   :  { %6172 = vmatpush1.bf16.msra.mxu0 %v6171_v26  ;;  %v6201_v56 = vpack.c.bf16 %v4195_v55, %v4194_v54  ;;  %v4197_v58 = vld [vmem:[#allocation2 + $0xc8] sm:$0xff]  ;;  %v4198_v60 = vld [vmem:[#allocation2 + $0xd0] sm:$0xff]  ;;  %v4199_v61 = vld [vmem:[#allocation2 + $0xd8] sm:$0xff] }
  0x47   :  { %6173 = vmatprep.subr.bf16.mxu0 %v12374_v20  ;;  %v6204_v59 = vpack.c.bf16 %v4197_v58, %v4196_v57  ;;  %v6207_v62 = vpack.c.bf16 %v4199_v61, %v4198_v60  ;;  %v4200_v63 = vld [vmem:[#allocation2 + $0xe0] sm:$0xff]  ;;  %v4201_v0 = vld [vmem:[#allocation2 + $0xe8] sm:$0xff]  ;;  %v4202_v2 = vld [vmem:[#allocation2 + $0xf0] sm:$0xff] }
  0x48   :  { %v6210_v1 = vpack.c.bf16 %v4201_v0, %v4200_v63  ;;  %v4203_v3 = vld [vmem:[#allocation2 + $0xf8] sm:$0xff] }
  0x49   :  { %161 = vperm.xlu1 %6458, %v103_v9   ;;  %156 = vperm.xlu0 %6457, %v102_v10   ;;  %v6213_v4 = vpack.c.bf16 %v4203_v3, %v4202_v2  ;;  %v113_v9 = vld [vmem:[%s12357_s1] sm:$0x3] }
  0x4a   :  { %6175 = vmatpush1.bf16.msra.mxu0 %v6174_v29  ;;  %v7047_v10 = vrot.slane %v113_v9, %v12373_v7 }
  0x4b   :  { %6176 = vmatprep.subr.bf16.mxu0 %v12374_v20 }
  0x4c   :  { %12538 = vst [vmem:[#allocation13_spill] sm:$0xff] %v7047_v10 }
  0x4d   :  { %171 = vperm.xlu1 %6458, %v105_v11   ;;  %166 = vperm.xlu0 %6457, %v104_v12   ;;  %v7051_v11 = vrot.slane %v113_v9, %v12372_v8 }
  0x4e   :  { %6178 = vmatpush1.bf16.msra.mxu0 %v6177_v32 }
  0x4f   :  { %6179 = vmatprep.subr.bf16.mxu0 %v12374_v20  ;;  %12539 = vst [vmem:[#allocation14_spill] sm:$0xff] %v7051_v11 }
  0x51   :  { %181 = vperm.xlu1 %6458, %v107_v13   ;;  %176 = vperm.xlu0 %6457, %v106_v14  }
  0x52   :  { %6181 = vmatpush1.bf16.msra.mxu0 %v6180_v35 }
  0x53   :  { %6182 = vmatprep.subr.bf16.mxu0 %v12374_v20 }
  0x55   :  { %191 = vperm.xlu1 %6458, %v109_v15   ;;  %186 = vperm.xlu0 %6457, %v108_v16  }
  0x56   :  { %6184 = vmatpush1.bf16.msra.mxu0 %v6183_v38 }
  0x57   :  { %6185 = vmatprep.subr.bf16.mxu0 %v12374_v20 }
  0x59   :  { %201 = vperm.xlu1 %6458, %v111_v17   ;;  %196 = vperm.xlu0 %6457, %v110_v18  }
  0x5a   :  { %6187 = vmatpush1.bf16.msra.mxu0 %v6186_v41 }
  0x5b   :  { %6188 = vmatprep.subr.bf16.mxu0 %v12374_v20 }
  0x5d   :  { %206 = vperm.xlu0 %6457, %v112_v19  }
  0x5e   :  { %6190 = vmatpush1.bf16.msra.mxu0 %v6189_v44 }
  0x5f   :  { %6191 = vmatprep.subr.bf16.mxu0 %v12374_v20 }
  0x62   :  { %6193 = vmatpush1.bf16.msra.mxu0 %v6192_v47 }
  0x63   :  { %6194 = vmatprep.subr.bf16.mxu0 %v12374_v20 }
  0x66   :  { %6196 = vmatpush1.bf16.msra.mxu0 %v6195_v50 }
  0x67   :  { %6197 = vmatprep.subr.bf16.mxu0 %v12374_v20 }
  0x6a   :  { %6199 = vmatpush1.bf16.msra.mxu0 %v6198_v53 }
  0x6b   :  { %6200 = vmatprep.subr.bf16.mxu0 %v12374_v20 }
  0x6e   :  { %6202 = vmatpush1.bf16.msra.mxu0 %v6201_v56 }
  0x6f   :  { %6203 = vmatprep.subr.bf16.mxu0 %v12374_v20 }
  0x72   :  { %6205 = vmatpush1.bf16.msra.mxu0 %v6204_v59 }
  0x73   :  { %6206 = vmatprep.subr.bf16.mxu0 %v12374_v20 }
  0x76   :  { %6208 = vmatpush1.bf16.msra.mxu0 %v6207_v62 }
  0x77   :  { %6209 = vmatprep.subr.bf16.mxu0 %v12374_v20 }
  0x7a   :  { %6211 = vmatpush1.bf16.msra.mxu0 %v6210_v1 }
  0x7b   :  { %6212 = vmatprep.subr.bf16.mxu0 %v12374_v20 }
  0x7e   :  { %6214 = vmatpush1.bf16.msra.mxu0 %v6213_v4 }
  0x7f   :  { %6215 = vmatprep.subr.bf16.mxu0 %v12374_v20 }
  0xb8   :  { %v127_v12 = vpop.permute.xlu1 %126  ;;  %v117_v13 = vpop.permute.xlu0 %116 }
  0xb9   :  { %v7054_v14 = vmul.f32 %v7047_v10, %v127_v12  ;;  %v7057_v15 = vmul.f32 %v7051_v11, %v127_v12  ;;  %v7060_v16 = vmul.f32 %v7047_v10, %v117_v13  ;;  %v7063_v17 = vmul.f32 %v7051_v11, %v117_v13 }
  0xbb   :  { %v673_v18 = vand.u32 2139095040, %v7054_v14  ;;  %v776_v19 = vand.u32 2139095040, %v7057_v15  ;;  %v261_v21 = vand.u32 2139095040, %v7060_v16  ;;  %v364_v22 = vand.u32 2139095040, %v7063_v17 }
  0xbc   :  { %v132_v23 = vpop.permute.xlu1 %131  ;;  %v122_v30 = vpop.permute.xlu0 %121 }
  0xbd   :  { %v674_v24 = vshrl.u32 %v673_v18, 23  ;;  %v777_v25 = vshrl.u32 %v776_v19, 23  ;;  %v262_v26 = vshrl.u32 %v261_v21, 23  ;;  %v365_v27 = vshrl.u32 %v364_v22, 23 }
  0xbe   :  { %v7070_v28 = vmul.f32 %v7047_v10, %v132_v23  ;;  %v7073_v29 = vmul.f32 %v7051_v11, %v132_v23  ;;  %v7076_v34 = vmul.f32 %v7047_v10, %v122_v30  ;;  %v7081_v38 = vmul.f32 %v7051_v11, %v122_v30 }
  0xbf   :  { %v5899_v31 = vadd.s32 4294967169, %v674_v24  ;;  %v5903_v32 = vadd.s32 4294967169, %v777_v25  ;;  %v5883_v33 = vadd.s32 4294967169, %v262_v26  ;;  %v5887_v35 = vadd.s32 4294967169, %v365_v27 }
  0xc0   :  { %12540 = vst [vmem:[#allocation15_spill] sm:$0xff] %v7070_v28  ;;  %v879_v36 = vand.u32 2139095040, %v7070_v28  ;;  %v982_v37 = vand.u32 2139095040, %v7073_v29  ;;  %v467_v42 = vand.u32 2139095040, %v7076_v34  ;;  %v142_v43 = vpop.permute.xlu1 %141  ;;  %v570_v47 = vand.u32 2139095040, %v7081_v38  ;;  %v137_v59 = vpop.permute.xlu0 %136 }
  0xc1   :  { %v680_v39 = vadd.s32 1, %v5899_v31  ;;  %v783_v40 = vadd.s32 1, %v5903_v32  ;;  %v268_v41 = vadd.s32 1, %v5883_v33  ;;  %v371_v44 = vadd.s32 1, %v5887_v35 }
  0xc2   :  { %v880_v45 = vshrl.u32 %v879_v36, 23  ;;  %v983_v46 = vshrl.u32 %v982_v37, 23  ;;  %v7086_v48 = vmul.f32 %v7047_v10, %v142_v43  ;;  %v468_v49 = vshrl.u32 %v467_v42, 23 }
  0xc3   :  { %vm681_vm0 = vcmp.gt.s32.totalorder %v680_v39, 0  ;;  %vm784_vm1 = vcmp.gt.s32.totalorder %v783_v40, 0  ;;  %vm269_vm2 = vcmp.gt.s32.totalorder %v268_v41, 0  ;;  %vm372_vm3 = vcmp.gt.s32.totalorder %v371_v44, 0 }
  0xc4   :  { %12541 = vst [vmem:[#allocation16_spill] sm:$0xff] %v7086_v48  ;;  %v5907_v50 = vadd.s32 4294967169, %v880_v45  ;;  %v5911_v51 = vadd.s32 4294967169, %v983_v46  ;;  %v7089_v52 = vmul.f32 %v7051_v11, %v142_v43  ;;  %v571_v53 = vshrl.u32 %v570_v47, 23  ;;  %v152_v12 = vpop.permute.xlu1 %151  ;;  %v147_v35 = vpop.permute.xlu0 %146 }
  0xc5   :  { %v1291_v54 = vand.u32 2139095040, %v7086_v48  ;;  %v682_v55 = vsel %vm681_vm0, %v680_v39, 0  ;;  %v785_v56 = vsel %vm784_vm1, %v783_v40, 0  ;;  %v270_v57 = vsel %vm269_vm2, %v268_v41, 0 }
  0xc6   :  { %12542 = vst [vmem:[#allocation17_spill] sm:$0xff] %v7089_v52  ;;  %v373_v58 = vsel %vm372_vm3, %v371_v44, 0  ;;  %v886_v60 = vadd.s32 1, %v5907_v50  ;;  %v989_v61 = vadd.s32 1, %v5911_v51  ;;  %v5891_v62 = vadd.s32 4294967169, %v468_v49 }
  0xc7   :  { %v1394_v63 = vand.u32 2139095040, %v7089_v52  ;;  %v5895_v0 = vadd.s32 4294967169, %v571_v53  ;;  %v7095_v3 = vand.u32 31, %v682_v55  ;;  %v7097_v4 = vand.u32 31, %v785_v56 }
  0xc8   :  { %v1292_v5 = vshrl.u32 %v1291_v54, 23  ;;  %v7100_v9 = vmul.f32 %v7047_v10, %v137_v59  ;;  %v7102_v13 = vshrl.u32 %v682_v55, 5  ;;  %v7104_v18 = vshrl.u32 %v785_v56, 5  ;;  %v162_v44 = vpop.permute.xlu1 %161 }
  0xc9   :  { %v7106_v19 = vand.u32 31, %v270_v57  ;;  %v7108_v21 = vand.u32 31, %v373_v58  ;;  %vm887_vm4 = vcmp.gt.s32.totalorder %v886_v60, 0  ;;  %vm990_vm5 = vcmp.gt.s32.totalorder %v989_v61, 0 }
  0xca   :  { %12543 = vst [vmem:[#allocation18_spill] sm:$0xff] %v7100_v9  ;;  %v474_v22 = vadd.s32 1, %v5891_v62  ;;  %v1395_v23 = vshrl.u32 %v1394_v63, 23  ;;  %v7110_v24 = vshrl.u32 %v270_v57, 5  ;;  %v7112_v25 = vshrl.u32 %v373_v58, 5 }
  0xcb   :  { %v577_v26 = vadd.s32 1, %v5895_v0  ;;  %v7115_v27 = vmul.f32 %v7051_v11, %v137_v59  ;;  %v7118_v30 = vsub.s32 32, %v7095_v3  ;;  %v7121_v31 = vsub.s32 32, %v7097_v4 }
  0xcc   :  { %v5923_v32 = vadd.s32 4294967169, %v1292_v5  ;;  %v1085_v33 = vand.u32 2139095040, %v7100_v9  ;;  %v888_v36 = vsel %vm887_vm4, %v886_v60, 0  ;;  %v991_v37 = vsel %vm990_vm5, %v989_v61, 0 }
  0xcd   :  { %12544 = vst [vmem:[#allocation19_spill] sm:$0xff] %v7115_v27  ;;  %v7125_v39 = vmul.f32 %v7047_v10, %v152_v12  ;;  %v7128_v40 = vmul.f32 %v7051_v11, %v152_v12  ;;  %v7131_v41 = vsub.s32 32, %v7106_v19  ;;  %v7134_v42 = vsub.s32 32, %v7108_v21 }
  0xce   :  { %vm475_vm6 = vcmp.gt.s32.totalorder %v474_v22, 0  ;;  %v5927_v43 = vadd.s32 4294967169, %v1395_v23  ;;  %vm578_vm7 = vcmp.gt.s32.totalorder %v577_v26, 0  ;;  %v1188_v45 = vand.u32 2139095040, %v7115_v27 }
  0xcf   :  { %12545 = vst [vmem:[#allocation20_spill] sm:$0xff] %v7125_v39  ;;  %12546 = vst [vmem:[#allocation21_spill] sm:$0xff] %v7128_v40  ;;  %v7138_v46 = vmul.f32 %v7047_v10, %v147_v35  ;;  %v7141_v47 = vmul.f32 %v7051_v11, %v147_v35  ;;  %v7143_v49 = vand.u32 31, %v888_v36  ;;  %v7145_v50 = vand.u32 31, %v991_v37 }
  0xd0   :  { %v1298_v51 = vadd.s32 1, %v5923_v32  ;;  %v1086_v53 = vshrl.u32 %v1085_v33, 23  ;;  %v1703_v54 = vand.u32 2139095040, %v7125_v39  ;;  %v1806_v55 = vand.u32 2139095040, %v7128_v40  ;;  %v157_v33 = vpop.permute.xlu0 %156 }
  0xd1   :  { %12547 = vst [vmem:[#allocation22_spill] sm:$0xff] %v7138_v46  ;;  %12548 = vst [vmem:[#allocation23_spill] sm:$0xff] %v7141_v47  ;;  %v7150_v56 = vmul.f32 %v7047_v10, %v162_v44  ;;  %v7153_v57 = vmul.f32 %v7051_v11, %v162_v44  ;;  %v7155_v58 = vshrl.u32 %v888_v36, 5  ;;  %v7157_v59 = vshrl.u32 %v991_v37, 5 }
  0xd2   :  { %12549 = vst [vmem:[#allocation24_spill] sm:$0xff] %v7143_v49  ;;  %v476_v60 = vsel %vm475_vm6, %v474_v22, 0  ;;  %v1401_v61 = vadd.s32 1, %v5927_v43  ;;  %v579_v62 = vsel %vm578_vm7, %v577_v26, 0  ;;  %v1189_v63 = vshrl.u32 %v1188_v45, 23 }
  0xd3   :  { %12550 = vst [vmem:[#allocation25_spill] sm:$0xff] %v7150_v56  ;;  %12551 = vst [vmem:[#allocation26_spill] sm:$0xff] %v7153_v57  ;;  %v1497_v0 = vand.u32 2139095040, %v7138_v46  ;;  %v1600_v5 = vand.u32 2139095040, %v7141_v47  ;;  %v7164_v12 = vsub.s32 32, %v7143_v49  ;;  %v7167_v23 = vsub.s32 32, %v7145_v50 }
  0xd4   :  { %12552 = vst [vmem:[#allocation27_spill] sm:$0xff] %v7155_v58  ;;  %vm1299_vm8 = vcmp.gt.s32.totalorder %v1298_v51, 0  ;;  %v5915_v32 = vadd.s32 4294967169, %v1086_v53  ;;  %v1704_v35 = vshrl.u32 %v1703_v54, 23  ;;  %v1807_v36 = vshrl.u32 %v1806_v55, 23  ;;  %v172_v53 = vpop.permute.xlu1 %171 }
  0xd5   :  { %12553 = vst [vmem:[#allocation28_spill] sm:$0xff] %v7164_v12  ;;  %v2115_v22 = vand.u32 2139095040, %v7150_v56  ;;  %v2218_v26 = vand.u32 2139095040, %v7153_v57  ;;  %v7171_v37 = vshrl.u32 %v476_v60, 5  ;;  %v7173_v43 = vand.u32 31, %v476_v60 }
  0xd6   :  { %v7175_v44 = vshrl.u32 %v579_v62, 5  ;;  %vm1402_vm9 = vcmp.gt.s32.totalorder %v1401_v61, 0  ;;  %v5919_v45 = vadd.s32 4294967169, %v1189_v63  ;;  %v1498_v8 = vshrl.u32 %v1497_v0, 23 }
  0xd7   :  { %v1601_v7 = vshrl.u32 %v1600_v5, 23  ;;  %v7178_v20 = vmul.f32 %v7047_v10, %v157_v33  ;;  %v7180_v54 = vand.u32 31, %v579_v62  ;;  %v1300_v55 = vsel %vm1299_vm8, %v1298_v51, 0 }
  0xd8   :  { %v1092_v2 = vadd.s32 1, %v5915_v32  ;;  %v7184_v1 = vmul.f32 %v7051_v11, %v157_v33  ;;  %v5939_v60 = vadd.s32 4294967169, %v1704_v35  ;;  %v5943_v6 = vadd.s32 4294967169, %v1807_v36 }
  0xd9   :  { %12554 = vst [vmem:[#allocation29_spill] sm:$0xff] %v7178_v20  ;;  %v2116_v56 = vshrl.u32 %v2115_v22, 23  ;;  %v2219_v57 = vshrl.u32 %v2218_v26, 23  ;;  %v7187_v63 = vsub.s32 32, %v7173_v43  ;;  %v1403_v0 = vsel %vm1402_vm9, %v1401_v61, 0 }
  0xda   :  { %12555 = vst [vmem:[#allocation30_spill] sm:$0xff] %v7184_v1  ;;  %v7190_v5 = vmul.f32 %v7047_v10, %v172_v53  ;;  %v7193_v62 = vmul.f32 %v7051_v11, %v172_v53  ;;  %v1195_v39 = vadd.s32 1, %v5919_v45  ;;  %v5931_v51 = vadd.s32 4294967169, %v1498_v8 }
  0xdb   :  { %v5935_v32 = vadd.s32 4294967169, %v1601_v7  ;;  %v1909_v33 = vand.u32 2139095040, %v7178_v20  ;;  %v7197_v35 = vsub.s32 32, %v7180_v54  ;;  %v7199_v36 = vand.u32 31, %v1300_v55 }
  0xdc   :  { %12556 = vst [vmem:[#allocation31_spill] sm:$0xff] %v7190_v5  ;;  %12557 = vst [vmem:[#allocation32_spill] sm:$0xff] %v7193_v62  ;;  %vm1093_vm10 = vcmp.gt.s32.totalorder %v1092_v2, 0  ;;  %v2012_v22 = vand.u32 2139095040, %v7184_v1  ;;  %v1710_v61 = vadd.s32 1, %v5939_v60  ;;  %v1813_v26 = vadd.s32 1, %v5943_v6 }
  0xdd   :  { %12558 = vst [vmem:[#allocation33_spill] sm:$0xff] %v7199_v36  ;;  %v5955_v40 = vadd.s32 4294967169, %v2116_v56  ;;  %v5959_v46 = vadd.s32 4294967169, %v2219_v57  ;;  %v7202_v47 = vshrl.u32 %v1300_v55, 5  ;;  %v7204_v53 = vand.u32 31, %v1403_v0 }
  0xde   :  { %v2527_v7 = vand.u32 2139095040, %v7190_v5  ;;  %v2630_v8 = vand.u32 2139095040, %v7193_v62  ;;  %vm1196_vm11 = vcmp.gt.s32.totalorder %v1195_v39, 0  ;;  %v1504_v45 = vadd.s32 1, %v5931_v51 }
  0xdf   :  { %12559 = vst [vmem:[#allocation34_spill] sm:$0xff] %v7202_v47  ;;  %12560 = vst [vmem:[#allocation35_spill] sm:$0xff] %v7204_v53  ;;  %v1607_v20 = vadd.s32 1, %v5935_v32  ;;  %v1910_v48 = vshrl.u32 %v1909_v33, 23  ;;  %v7209_v52 = vsub.s32 32, %v7199_v36  ;;  %v7211_v1 = vshrl.u32 %v1403_v0, 5 }
  0xe0   :  { %v1094_v6 = vsel %vm1093_vm10, %v1092_v2, 0  ;;  %v2013_v56 = vshrl.u32 %v2012_v22, 23  ;;  %vm1711_vm12 = vcmp.gt.s32.totalorder %v1710_v61, 0  ;;  %vm1814_vm13 = vcmp.gt.s32.totalorder %v1813_v26, 0 }
  0xe1   :  { %12561 = vst [vmem:[#allocation36_spill] sm:$0xff] %v7209_v52  ;;  %12562 = vst [vmem:[#allocation37_spill] sm:$0xff] %v7211_v1  ;;  %v2122_v57 = vadd.s32 1, %v5955_v40  ;;  %v2225_v55 = vadd.s32 1, %v5959_v46  ;;  %v7215_v60 = vsub.s32 32, %v7204_v53  ;;  %v1197_v5 = vsel %vm1196_vm11, %v1195_v39, 0  ;;  %v167_v52 = vpop.permute.xlu0 %166 }
  0xe2   :  { %v2528_v62 = vshrl.u32 %v2527_v7, 23  ;;  %v2631_v51 = vshrl.u32 %v2630_v8, 23  ;;  %v7217_v32 = vshrl.u32 %v1094_v6, 5  ;;  %vm1505_vm14 = vcmp.gt.s32.totalorder %v1504_v45, 0 }
  0xe3   :  { %12563 = vst [vmem:[#allocation38_spill] sm:$0xff] %v7215_v60  ;;  %vm1608_vm15 = vcmp.gt.s32.totalorder %v1607_v20, 0  ;;  %v5947_v33 = vadd.s32 4294967169, %v1910_v48  ;;  %v7219_v0 = vand.u32 31, %v1094_v6  ;;  %v1712_v47 = vsel %vm1711_vm12, %v1710_v61, 0 }
  0xe4   :  { %12564 = vst [vmem:[#allocation39_spill] sm:$0xff] %v7217_v32  ;;  %v1815_v2 = vsel %vm1814_vm13, %v1813_v26, 0  ;;  %v5951_v22 = vadd.s32 4294967169, %v2013_v56  ;;  %v7221_v36 = vshrl.u32 %v1197_v5, 5  ;;  %v7223_v40 = vand.u32 31, %v1197_v5 }
  0xe5   :  { %12565 = vst [vmem:[#allocation40_spill] sm:$0xff] %v7219_v0  ;;  %vm2123_vm0 = vcmp.gt.s32.totalorder %v2122_v57, 0  ;;  %vm2226_vm1 = vcmp.gt.s32.totalorder %v2225_v55, 0  ;;  %v1506_v39 = vsel %vm1505_vm14, %v1504_v45, 0  ;;  %v1609_v46 = vsel %vm1608_vm15, %v1607_v20, 0 }
  0xe6   :  { %12566 = vst [vmem:[#allocation41_spill] sm:$0xff] %v7221_v36  ;;  %12567 = vst [vmem:[#allocation42_spill] sm:$0xff] %v7223_v40  ;;  %v5971_v7 = vadd.s32 4294967169, %v2528_v62  ;;  %v5975_v8 = vadd.s32 4294967169, %v2631_v51  ;;  %v7225_v1 = vand.u32 31, %v1712_v47  ;;  %v7227_v60 = vand.u32 31, %v1815_v2 }
  0xe7   :  { %v1916_v48 = vadd.s32 1, %v5947_v33  ;;  %v7230_v61 = vmul.f32 %v7047_v10, %v167_v52  ;;  %v2124_v26 = vsel %vm2123_vm0, %v2122_v57, 0  ;;  %v2227_v6 = vsel %vm2226_vm1, %v2225_v55, 0 }
  0xe8   :  { %12568 = vst [vmem:[#allocation43_spill] sm:$0xff] %v7225_v1  ;;  %12569 = vst [vmem:[#allocation44_spill] sm:$0xff] %v7227_v60  ;;  %v2019_v56 = vadd.s32 1, %v5951_v22  ;;  %v7233_v5 = vmul.f32 %v7051_v11, %v167_v52  ;;  %v7236_v53 = vsub.s32 32, %v7219_v0  ;;  %v7239_v20 = vsub.s32 32, %v7223_v40 }
  0xe9   :  { %12570 = vst [vmem:[#allocation45_spill] sm:$0xff] %v7230_v61  ;;  %v7241_v62 = vand.u32 31, %v1506_v39  ;;  %v7243_v45 = vand.u32 31, %v1609_v46  ;;  %v7245_v51 = vshrl.u32 %v1712_v47, 5  ;;  %v7247_v33 = vshrl.u32 %v1815_v2, 5 }
  0xea   :  { %12571 = vst [vmem:[#allocation46_spill] sm:$0xff] %v7233_v5  ;;  %12572 = vst [vmem:[#allocation47_spill] sm:$0xff] %v7236_v53  ;;  %v2534_v57 = vadd.s32 1, %v5971_v7  ;;  %v2637_v55 = vadd.s32 1, %v5975_v8  ;;  %v7250_v22 = vsub.s32 32, %v7225_v1  ;;  %v7252_v52 = vand.u32 31, %v2124_v26  ;;  %v182_v1 = vpop.permute.xlu1 %181 }
  0xeb   :  { %12573 = vst [vmem:[#allocation48_spill] sm:$0xff] %v7239_v20  ;;  %12574 = vst [vmem:[#allocation49_spill] sm:$0xff] %v7241_v62  ;;  %v7254_v32 = vand.u32 31, %v2227_v6  ;;  %vm1917_vm2 = vcmp.gt.s32.totalorder %v1916_v48, 0  ;;  %v7257_v0 = vsub.s32 32, %v7227_v60  ;;  %vm2020_vm3 = vcmp.gt.s32.totalorder %v2019_v56, 0 }
  0xec   :  { %12575 = vst [vmem:[#allocation50_spill] sm:$0xff] %v7243_v45  ;;  %12576 = vst [vmem:[#allocation51_spill] sm:$0xff] %v7245_v51  ;;  %v2321_v53 = vand.u32 2139095040, %v7230_v61  ;;  %v2424_v47 = vand.u32 2139095040, %v7233_v5  ;;  %v7261_v2 = vshrl.u32 %v1506_v39, 5  ;;  %v7264_v7 = vsub.s32 32, %v7241_v62 }
  0xed   :  { %12577 = vst [vmem:[#allocation52_spill] sm:$0xff] %v7247_v33  ;;  %12578 = vst [vmem:[#allocation53_spill] sm:$0xff] %v7250_v22  ;;  %v7266_v8 = vshrl.u32 %v1609_v46, 5  ;;  %v7269_v51 = vsub.s32 32, %v7243_v45  ;;  %v7271_v22 = vshrl.u32 %v2124_v26, 5  ;;  %v1918_v33 = vsel %vm1917_vm2, %v1916_v48, 0 }
  0xee   :  { %12579 = vst [vmem:[#allocation54_spill] sm:$0xff] %v7252_v52  ;;  %12580 = vst [vmem:[#allocation55_spill] sm:$0xff] %v7254_v32  ;;  %vm2535_vm4 = vcmp.gt.s32.totalorder %v2534_v57, 0  ;;  %vm2638_vm5 = vcmp.gt.s32.totalorder %v2637_v55, 0  ;;  %v7274_v61 = vsub.s32 32, %v7252_v52  ;;  %v7276_v5 = vshrl.u32 %v2227_v6, 5 }
  0xef   :  { %12581 = vst [vmem:[#allocation56_spill] sm:$0xff] %v7257_v0  ;;  %12582 = vst [vmem:[#allocation57_spill] sm:$0xff] %v7261_v2  ;;  %v7279_v39 = vsub.s32 32, %v7254_v32  ;;  %v2021_v60 = vsel %vm2020_vm3, %v2019_v56, 0  ;;  %v2322_v46 = vshrl.u32 %v2321_v53, 23  ;;  %v2425_v0 = vshrl.u32 %v2424_v47, 23 }
  0xf0   :  { %12583 = vst [vmem:[#allocation58_spill] sm:$0xff] %v7264_v7  ;;  %12584 = vst [vmem:[#allocation59_spill] sm:$0xff] %v7266_v8  ;;  %v7282_v2 = vmul.f32 %v7047_v10, %v182_v1  ;;  %v7285_v26 = vmul.f32 %v7051_v11, %v182_v1  ;;  %v7287_v48 = vshrl.u32 %v1918_v33, 5  ;;  %v2639_v62 = vsel %vm2638_vm5, %v2637_v55, 0 }
  0xf1   :  { %12585 = vst [vmem:[#allocation60_spill] sm:$0xff] %v7269_v51  ;;  %12586 = vst [vmem:[#allocation61_spill] sm:$0xff] %v7271_v22  ;;  %v2536_v22 = vsel %vm2535_vm4, %v2534_v57, 0  ;;  %v12451_v52 = vmov 2475754826   ;;  %v7315_v45 = vand.u32 31, %v2639_v62 }
  0xf2   :  { %12587 = vst [vmem:[#allocation62_spill] sm:$0xff] %v7274_v61  ;;  %12588 = vst [vmem:[#allocation63_spill] sm:$0xff] %v7276_v5  ;;  %v379_v6 = vshrl.u32 %v12451_v52, %v7134_v42  ;;  %v7291_v61 = vand.u32 31, %v1918_v33  ;;  %v7293_v5 = vshrl.u32 %v2021_v60, 5  ;;  %v12453_v53 = vmov 2131351028  }
  0xf3   :  { %12589 = vst [vmem:[#allocation64_spill] sm:$0xff] %v7279_v39  ;;  %12590 = vst [vmem:[#allocation65_spill] sm:$0xff] %v7282_v2  ;;  %v382_v56 = vshrl.u32 %v12453_v53, %v7134_v42  ;;  %v12441_v47 = vmov 2102212464   ;;  %v12595_v32 = vand.u32 2147483647, %v7063_v17  ;;  %v381_v33 = vshll.u32 %v12451_v52, %v7108_v21 }
  0xf4   :  { %12591 = vst [vmem:[#allocation66_spill] sm:$0xff] %v7285_v26  ;;  %12592 = vst [vmem:[#allocation67_spill] sm:$0xff] %v7287_v48  ;;  %v385_v1 = vshrl.u32 %v12441_v47, %v7134_v42  ;;  %v12448_v55 = vmov 683565275   ;;  %v384_v48 = vshll.u32 %v12453_v53, %v7108_v21  ;;  %v7309_v7 = vshrl.u32 %v2536_v22, 5 }
  0xf5   :  { %12593 = vst [vmem:[#allocation68_spill] sm:$0xff] %v7291_v61  ;;  %12594 = vst [vmem:[#allocation69_spill] sm:$0xff] %v7293_v5  ;;  %v368_v57 = vand.u32 8388607, %v12595_v32  ;;  %v378_v39 = vshll.u32 %v12448_v55, %v7108_v21  ;;  %v7307_v5 = vand.u32 31, %v2021_v60  ;;  %v7311_v8 = vand.u32 31, %v2536_v22 }
  0xf6   :  { %12597 = vst [vmem:[#allocation71_spill] sm:$0xff] %v7309_v7  ;;  %v7313_v47 = vshrl.u32 %v2639_v62, 5  ;;  %12600 = vst [vmem:[#allocation74_spill] sm:$0xff] %v7315_v45  ;;  %v383_v51 = vor.u32 %v382_v56, %v381_v33  ;;  %v386_v9 = vor.u32 %v385_v1, %v384_v48  ;;  %v12601_v55 = vmov 2102212464  }
  0xf7   :  { %12596 = vst [vmem:[#allocation70_spill] sm:$0xff] %v7307_v5  ;;  %12598 = vst [vmem:[#allocation72_spill] sm:$0xff] %v7311_v8  ;;  %v380_v32 = vor.u32 %v379_v6, %v378_v39  ;;  %v387_v36 = vshll.u32 %v12601_v55, %v7108_v21  ;;  %v12456_v52 = vmov 920167782   ;;  %v12459_v7 = vmov 1326507024  }
  0xf8   :  { %12599 = vst [vmem:[#allocation73_spill] sm:$0xff] %v7313_v47  ;;  %v388_v53 = vshrl.u32 %v12456_v52, %v7134_v42  ;;  %v390_v60 = vshll.u32 %v12456_v52, %v7108_v21  ;;  %v391_v22 = vshrl.u32 %v12459_v7, %v7134_v42  ;;  %v7326_v62 = vsub.s32 32, %v7291_v61 }
  0xf9   :  { %v369_v39 = vor.u32 8388608, %v368_v57  ;;  %v12603_v48 = vmov 683565275   ;;  %vm393_vm6 = vcmp.lt.s32.totalorder %v7112_v25, 1  ;;  %vm395_vm7 = vcmp.lt.s32.totalorder %v7112_v25, 3 }
  0xfa   :  { %12602 = vst [vmem:[#allocation75_spill] sm:$0xff] %v7326_v62  ;;  %v377_v6 = vshrl.u32 %v12603_v48, %v7134_v42  ;;  %v389_v56 = vor.u32 %v388_v53, %v387_v36  ;;  %v392_v1 = vor.u32 %v391_v22, %v390_v60  ;;  %vm396_vm8 = vcmp.lt.s32.totalorder %v7112_v25, 4 }
  0xfb   :  { %v398_v33 = vsel %vm396_vm8, %v386_v9, 2102212464  ;;  %v401_v52 = vsel %vm393_vm6, %v380_v32, %v383_v51  ;;  %v405_v47 = vsel %vm393_vm6, %v383_v51, %v386_v9  ;;  %v7334_v7 = vsub.s32 32, %v7307_v5 }
  0xfc   :  { %v397_v21 = vsel %vm393_vm6, %v377_v6, %v380_v32  ;;  %v399_v61 = vsel %vm395_vm7, %v383_v51, %v398_v33  ;;  %v402_v57 = vsel %vm396_vm8, %v389_v56, 920167782  ;;  %v406_v62 = vsel %vm396_vm8, %v392_v1, 1326507024 }
  0xfd   :  { %12604 = vst [vmem:[#allocation76_spill] sm:$0xff] %v7334_v7  ;;  %vm394_vm9 = vcmp.lt.s32.totalorder %v7112_v25, 2  ;;  %v403_v42 = vsel %vm395_vm7, %v386_v9, %v402_v57  ;;  %v407_v40 = vsel %vm395_vm7, %v389_v56, %v406_v62  ;;  %v409_v36 = vshll.u32 %v369_v39, 8 }
  0xfe   :  { %v5963_v53 = vadd.s32 4294967169, %v2322_v46  ;;  %v400_v60 = vsel %vm394_vm9, %v397_v21, %v399_v61  ;;  %v404_v22 = vsel %vm394_vm9, %v401_v52, %v403_v42  ;;  %v408_v20 = vsel %vm394_vm9, %v405_v47, %v407_v40 }
  0xff   :  { %v7337_v27 = vmul.u32.u64.low %v409_v36, %v408_v20  ;;  %v7338_v6 = vmul.u32.u64.high %v409_v36, %v408_v20, %v7337_v27  ;;  %v7340_v32 = vmul.u32.u64.low %v409_v36, %v404_v22  ;;  %v7341_v58 = vmul.u32.u64.high %v409_v36, %v404_v22, %v7340_v32 }
 0x100   :  { %v5967_v5 = vadd.s32 4294967169, %v2425_v0  ;;  %v2939_v51 = vand.u32 2139095040, %v7282_v2  ;;  %v12605_v1 = vand.u32 2147483647, %v7060_v16  ;;  %v12606_v9 = vmov 2475754826  }
 0x101   :  { %v276_v62 = vshrl.u32 %v12606_v9, %v7131_v41  ;;  %v275_v61 = vshll.u32 %v12603_v48, %v7106_v19  ;;  %v278_v40 = vshll.u32 %v12606_v9, %v7106_v19  ;;  %v12607_v27 = vmov 2131351028  }
 0x102   :  { %v265_v25 = vand.u32 8388607, %v12605_v1  ;;  %v279_v20 = vshrl.u32 %v12607_v27, %v7131_v41  ;;  %v282_v0 = vshrl.u32 %v12601_v55, %v7131_v41  ;;  %v416_v52 = vmul.u32 %v409_v36, %v400_v60 }
 0x103   :  { %v281_v46 = vshll.u32 %v12607_v27, %v7106_v19  ;;  %v284_v47 = vshll.u32 %v12601_v55, %v7106_v19  ;;  %v12608_v39 = vmov 920167782   ;;  %vm418_vm10 = vc.u32 %v7338_v6, %v7340_v32 }
 0x104   :  { %v285_v56 = vshrl.u32 %v12608_v39, %v7131_v41  ;;  %v419_v21 = vadd.s32 1, %v7341_v58  ;;  %v277_v33 = vor.u32 %v276_v62, %v275_v61  ;;  %v280_v57 = vor.u32 %v279_v20, %v278_v40  ;;  %v177_v20 = vpop.permute.xlu0 %176 }
 0x105   :  { %v283_v42 = vor.u32 %v282_v0, %v281_v46  ;;  %v287_v36 = vshll.u32 %v12608_v39, %v7106_v19  ;;  %v12609_v60 = vmov 1326507024   ;;  %v266_v7 = vor.u32 8388608, %v265_v25 }
 0x106   :  { %v286_v22 = vor.u32 %v285_v56, %v284_v47  ;;  %v288_v1 = vshrl.u32 %v12609_v60, %v7131_v41  ;;  %v420_v2 = vsel %vm418_vm10, %v419_v21, %v7341_v58  ;;  %v274_v12 = vshrl.u32 %v12603_v48, %v7131_v41 }
 0x107   :  { %vm290_vm11 = vcmp.lt.s32.totalorder %v7110_v24, 1  ;;  %v421_v49 = vadd.s32 %v420_v2, %v416_v52  ;;  %vm292_vm12 = vcmp.lt.s32.totalorder %v7110_v24, 3  ;;  %vm293_vm13 = vcmp.lt.s32.totalorder %v7110_v24, 4 }
 0x108   :  { %v289_v28 = vor.u32 %v288_v1, %v287_v36  ;;  %v295_v62 = vsel %vm293_vm13, %v283_v42, 2102212464  ;;  %v298_v19 = vsel %vm290_vm11, %v277_v33, %v280_v57  ;;  %v299_v61 = vsel %vm293_vm13, %v286_v22, 920167782 }
 0x109   :  { %v302_v58 = vsel %vm290_vm11, %v280_v57, %v283_v42  ;;  %v422_v25 = vadd.s32 536870912, %v421_v49  ;;  %vm291_vm14 = vcmp.lt.s32.totalorder %v7110_v24, 2  ;;  %v300_v41 = vsel %vm292_vm12, %v283_v42, %v299_v61 }
 0x10a   :  { %v303_v2 = vsel %vm293_vm13, %v289_v28, 1326507024  ;;  %v3042_v40 = vand.u32 2139095040, %v7285_v26  ;;  %v301_v0 = vsel %vm291_vm14, %v298_v19, %v300_v41  ;;  %v306_v46 = vshll.u32 %v266_v7, 8 }
 0x10b   :  { %v304_v52 = vsel %vm292_vm12, %v286_v22, %v303_v2  ;;  %v423_v47 = vshrl.u32 %v422_v25, 30  ;;  %v294_v56 = vsel %vm290_vm11, %v274_v12, %v277_v33  ;;  %v296_v21 = vsel %vm292_vm12, %v280_v57, %v295_v62  ;;  %v192_v33 = vpop.permute.xlu1 %191 }
 0x10c   :  { %v305_v28 = vsel %vm291_vm14, %v302_v58, %v304_v52  ;;  %v7397_v1 = vmul.u32.u64.low %v306_v46, %v301_v0  ;;  %v7398_v61 = vmul.u32.u64.high %v306_v46, %v301_v0, %v7397_v1  ;;  %v7402_v22 = vsub.s32 32, %v7311_v8 }
 0x10d   :  { %v7394_v42 = vmul.u32.u64.low %v306_v46, %v305_v28  ;;  %v7395_v36 = vmul.u32.u64.high %v306_v46, %v305_v28, %v7394_v42  ;;  %v7405_v7 = vsub.s32 32, %v7315_v45  ;;  %v7408_v12 = vmul.f32 %v7047_v10, %v177_v20 }
 0x10e   :  { %12610 = vst [vmem:[#allocation77_spill] sm:$0xff] %v7402_v22  ;;  %v424_v57 = vshll.u32 %v423_v47, 30  ;;  %v7410_v62 = vadd.s32 1, %v5963_v53  ;;  %v7412_v19 = vadd.s32 1, %v5967_v5  ;;  %v7414_v58 = vshrl.u32 %v2939_v51, 23 }
 0x10f   :  { %12611 = vst [vmem:[#allocation78_spill] sm:$0xff] %v7405_v7  ;;  %12612 = vst [vmem:[#allocation79_spill] sm:$0xff] %v7408_v12  ;;  %v7417_v25 = vmul.f32 %v7051_v11, %v177_v20  ;;  %v7419_v41 = vshrl.u32 %v3042_v40, 23  ;;  %vm363_vm15 = vcmp.lt.s32.totalorder %v7063_v17, 0  ;;  %v297_v0 = vsel %vm291_vm14, %v294_v56, %v296_v21 }
 0x110   :  { %v7422_v2 = vsub.s32 %v421_v49, %v424_v57  ;;  %v12480_v52 = vand.u32 2147483647, %v7081_v38  ;;  %v7428_v53 = vmul.f32 %v7047_v10, %v192_v33  ;;  %v7431_v5 = vmul.f32 %v7051_v11, %v192_v33 }
 0x111   :  { %vm315_vm0 = vc.u32 %v7395_v36, %v7397_v1  ;;  %v316_v51 = vadd.s32 1, %v7398_v61  ;;  %v417_v49 = vadd.s32 %v7340_v32, %v7338_v6  ;;  %v585_v20 = vshrl.u32 %v12606_v9, %v7197_v35 }
 0x112   :  { %12613 = vst [vmem:[#allocation80_spill] sm:$0xff] %v7428_v53  ;;  %12614 = vst [vmem:[#allocation81_spill] sm:$0xff] %v7431_v5  ;;  %v427_v24 = vsub.s32 0, %v7422_v2  ;;  %v447_v56 = vsub.s32 4, %v423_v47  ;;  %v313_v21 = vmul.u32 %v306_v46, %v297_v0  ;;  %v588_v42 = vshrl.u32 %v12607_v27, %v7197_v35 }
 0x113   :  { %v317_v28 = vsel %vm315_vm0, %v316_v51, %v7398_v61  ;;  %v574_v57 = vand.u32 8388607, %v12480_v52  ;;  %v584_v6 = vshll.u32 %v12603_v48, %v7180_v54  ;;  %v591_v32 = vshrl.u32 %v12601_v55, %v7197_v35 }
 0x114   :  { %v5888_v33 = vmin.u32 %v427_v24, %v7422_v2  ;;  %v318_v40 = vadd.s32 %v317_v28, %v313_v21  ;;  %v587_v46 = vshll.u32 %v12606_v9, %v7180_v54  ;;  %v593_v61 = vshll.u32 %v12601_v55, %v7180_v54 }
 0x115   :  { %v594_v0 = vshrl.u32 %v12608_v39, %v7197_v35  ;;  %v586_v24 = vor.u32 %v585_v20, %v584_v6  ;;  %v590_v52 = vshll.u32 %v12607_v27, %v7180_v54  ;;  %v597_v26 = vshrl.u32 %v12609_v60, %v7197_v35 }
 0x116   :  { %v429_v51 = vclz %v5888_v33  ;;  %v319_v8 = vadd.s32 536870912, %v318_v40  ;;  %v589_v22 = vor.u32 %v588_v42, %v587_v46  ;;  %v596_v28 = vshll.u32 %v12608_v39, %v7180_v54 }
 0x117   :  { %v595_v21 = vor.u32 %v594_v0, %v593_v61  ;;  %v583_v7 = vshrl.u32 %v12603_v48, %v7197_v35  ;;  %v592_v11 = vor.u32 %v591_v32, %v590_v52  ;;  %vm602_vm1 = vcmp.lt.s32.totalorder %v7175_v44, 4 }
 0x118   :  { %v5889_v45 = vadd.s32 4294967294, %v429_v51  ;;  %v448_v20 = vsel %vm363_vm15, %v447_v56, %v423_v47  ;;  %v320_v33 = vshrl.u32 %v319_v8, 30  ;;  %v598_v6 = vor.u32 %v597_v26, %v596_v28 }
 0x119   :  { %v608_v10 = vsel %vm602_vm1, %v595_v21, 920167782  ;;  %vm2329_vm2 = vcmp.gt.s32.totalorder %v7410_v62, 0  ;;  %v575_v42 = vor.u32 8388608, %v574_v57  ;;  %vm599_vm4 = vcmp.lt.s32.totalorder %v7175_v44, 1 }
 0x11a   :  { %vm5890_vm3 = vcmp.lt.s32.totalorder %v5889_v45, 0  ;;  %vm600_vm5 = vcmp.lt.s32.totalorder %v7175_v44, 2  ;;  %v321_v35 = vshll.u32 %v320_v33, 30  ;;  %vm601_vm6 = vcmp.lt.s32.totalorder %v7175_v44, 3 }
 0x11b   :  { %v432_v54 = vsel %vm5890_vm3, 0, %v5889_v45  ;;  %v607_v47 = vsel %vm599_vm4, %v586_v24, %v589_v22  ;;  %v609_v52 = vsel %vm601_vm6, %v592_v11, %v608_v10  ;;  %v611_v56 = vsel %vm599_vm4, %v589_v22, %v592_v11 }
 0x11c   :  { %v433_v8 = vsub.s32 32, %v432_v54  ;;  %v437_v26 = vsub.s32 4294967266, %v432_v54  ;;  %v434_v57 = vshll.u32 %v7422_v2, %v432_v54  ;;  %v7482_v32 = vsub.s32 %v318_v40, %v321_v35 }
 0x11d   :  { %v604_v45 = vsel %vm602_vm1, %v592_v11, 2102212464  ;;  %v612_v46 = vsel %vm602_vm1, %v598_v6, 1326507024  ;;  %v615_v28 = vshll.u32 %v575_v42, 8  ;;  %v344_v5 = vsub.s32 4, %v320_v33 }
 0x11e   :  { %v435_v61 = vshrl.u32 %v417_v49, %v433_v8  ;;  %v438_v0 = vadd.s32 127, %v437_v26  ;;  %v613_v51 = vsel %vm601_vm6, %v595_v21, %v612_v46  ;;  %v324_v10 = vsub.s32 0, %v7482_v32 }
 0x11f   :  { %v610_v2 = vsel %vm600_vm5, %v607_v47, %v609_v52  ;;  %v614_v40 = vsel %vm600_vm5, %v611_v56, %v613_v51  ;;  %v2836_v49 = vand.u32 2139095040, %v7417_v25  ;;  %v603_v21 = vsel %vm599_vm4, %v583_v7, %v586_v24 }
 0x120   :  { %v436_v54 = vor.u32 %v435_v61, %v434_v57  ;;  %v439_v11 = vshll.u32 %v438_v0, 23  ;;  %v7495_v35 = vmul.u32.u64.low %v615_v28, %v614_v40  ;;  %v7496_v53 = vmul.u32.u64.high %v615_v28, %v614_v40, %v7495_v35 }
 0x121   :  { %v5884_v6 = vmin.u32 %v324_v10, %v7482_v32  ;;  %v605_v42 = vsel %vm601_vm6, %v589_v22, %v604_v45  ;;  %v12615_v47 = vand.u32 2147483647, %v7063_v17  ;;  %vm260_vm8 = vcmp.lt.s32.totalorder %v7060_v16, 0 }
 0x122   :  { %v440_v26 = vor.u32 4788187, %v439_v11  ;;  %v7510_v52 = vmul.u32.u64.low %v615_v28, %v610_v2  ;;  %v7511_v56 = vmul.u32.u64.high %v615_v28, %v610_v2, %v7510_v52  ;;  %v464_v24 = vand.u32 2147483647, %v7076_v34 }
 0x123   :  { %vm7506_vm7 = vcmp.le.f32.partialorder %v12615_v47, 0.7853982  ;;  %v326_v7 = vclz %v5884_v6  ;;  %v443_v45 = vcvt.s32.f32 %v436_v54  ;;  %v345_v46 = vsel %vm260_vm8, %v344_v5, %v320_v33 }
 0x124   :  { %v450_v57 = vsel %vm7506_vm7, 0, %v448_v20  ;;  %v441_v22 = vand.u32 2147483647, %v440_v26  ;;  %v606_v61 = vsel %vm600_vm5, %v603_v21, %v605_v42  ;;  %v7525_v0 = vsel %vm2329_vm2, %v7410_v62, 0 }
 0x125   :  { %v12618_v20 = vand.u32 2147483647, %v7060_v16  ;;  %v5885_v10 = vadd.s32 4294967294, %v326_v7  ;;  %vm624_vm10 = vc.u32 %v7496_v53, %v7510_v52  ;;  %v7535_v5 = vand.u32 3, %v450_v57 }
 0x126   :  { %v444_v2 = vmul.f32 %v443_v45, %v441_v22  ;;  %v314_v44 = vadd.s32 %v7397_v1, %v7395_v36  ;;  %v625_v33 = vadd.s32 1, %v7511_v56  ;;  %v622_v40 = vmul.u32 %v615_v28, %v606_v61 }
 0x127   :  { %vm7529_vm9 = vcmp.le.f32.partialorder %v12618_v20, 0.7853982  ;;  %vm5886_vm11 = vcmp.lt.s32.totalorder %v5885_v10, 0  ;;  %v7544_v54 = vand.u32 8388607, %v464_v24  ;;  %v481_v21 = vshll.u32 %v12603_v48, %v7173_v43 }
 0x128   :  { %v347_v62 = vsel %vm7529_vm9, 0, %v345_v46  ;;  %v445_v11 = vxor.u32 2147483648, %v444_v2  ;;  %v329_v35 = vsel %vm5886_vm11, 0, %v5885_v10  ;;  %v626_v6 = vsel %vm624_vm10, %v625_v33, %v7511_v56 }
 0x129   :  { %v330_v42 = vsub.s32 32, %v329_v35  ;;  %v334_v36 = vsub.s32 4294967266, %v329_v35  ;;  %v627_v1 = vadd.s32 %v626_v6, %v622_v40  ;;  %v482_v47 = vshrl.u32 %v12606_v9, %v7187_v63 }
 0x12a   :  { %v446_v28 = vsel %vm363_vm15, %v445_v11, %v444_v2  ;;  %v331_v26 = vshll.u32 %v7482_v32, %v329_v35  ;;  %v484_v57 = vshll.u32 %v12606_v9, %v7173_v43  ;;  %v485_v56 = vshrl.u32 %v12607_v27, %v7187_v63 }
 0x12b   :  { %v449_v7 = vsel %vm7506_vm7, %v7063_v17, %v446_v28  ;;  %v332_v22 = vshrl.u32 %v314_v44, %v330_v42  ;;  %v335_v45 = vadd.s32 127, %v334_v36  ;;  %v628_v46 = vadd.s32 536870912, %v627_v1 }
 0x12c   :  { %6459 = vcosq.f32 %v449_v7  ;;  %v488_v61 = vshrl.u32 %v12601_v55, %v7187_v63  ;;  %v490_v32 = vshll.u32 %v12601_v55, %v7173_v43  ;;  %v491_v20 = vshrl.u32 %v12608_v39, %v7187_v63 }
 0x12d   :  { %6461 = vsinq.f32 %v449_v7  ;;  %v333_v10 = vor.u32 %v332_v22, %v331_v26  ;;  %v336_v2 = vshll.u32 %v335_v45, 23  ;;  %v7567_v33 = vshrl.u32 %v628_v46, 30 }
 0x12e   :  { %v487_v8 = vshll.u32 %v12607_v27, %v7173_v43  ;;  %v492_v44 = vor.u32 %v491_v20, %v490_v32  ;;  %v493_v40 = vshll.u32 %v12608_v39, %v7173_v43  ;;  %v494_v11 = vshrl.u32 %v12609_v60, %v7187_v63 }
 0x12f   :  { %v337_v35 = vor.u32 4788187, %v336_v2  ;;  %v630_v6 = vshll.u32 %v7567_v33, 30  ;;  %v483_v42 = vor.u32 %v482_v47, %v481_v21  ;;  %v486_v36 = vor.u32 %v485_v56, %v484_v57 }
 0x130   :  { %vm2432_vm12 = vcmp.gt.s32.totalorder %v7412_v19, 0  ;;  %vm459_vm13 = vcmp.eq.s32.totalorder %v7535_v5, 2  ;;  %v7578_v28 = vand.u32 3, %v347_v62  ;;  %v489_v26 = vor.u32 %v488_v61, %v487_v8 }
 0x131   :  { %v495_v7 = vor.u32 %v494_v11, %v493_v40  ;;  %vm456_vm14 = vcmp.eq.s32.totalorder %v7535_v5, 0  ;;  %v338_v22 = vand.u32 2147483647, %v337_v35  ;;  %v340_v43 = vcvt.s32.f32 %v333_v10 }
 0x132   :  { %v7581_v45 = vsub.s32 %v627_v1, %v630_v6  ;;  %vm499_vm15 = vcmp.lt.s32.totalorder %v7171_v37, 4  ;;  %vm455_vm0 = vcmp.lt.s32.totalorder %v7535_v5, 2  ;;  %v472_v21 = vor.u32 8388608, %v7544_v54 }
 0x133   :  { %v480_v47 = vshrl.u32 %v12603_v48, %v7187_v63  ;;  %vm496_vm1 = vcmp.lt.s32.totalorder %v7171_v37, 1  ;;  %v505_v62 = vsel %vm499_vm15, %v492_v44, 920167782  ;;  %vm453_vm2 = vweird.f32 %v7063_v17 }
 0x134   :  { %v341_v57 = vmul.f32 %v340_v43, %v338_v22  ;;  %v633_v1 = vsub.s32 0, %v7581_v45  ;;  %vm498_vm3 = vcmp.lt.s32.totalorder %v7171_v37, 3  ;;  %v504_v56 = vsel %vm496_vm1, %v483_v42, %v486_v36 }
 0x135   :  { %vm497_vm4 = vcmp.lt.s32.totalorder %v7171_v37, 2  ;;  %v506_v54 = vsel %vm498_vm3, %v489_v26, %v505_v62  ;;  %v508_v46 = vsel %vm496_vm1, %v486_v36, %v489_v26  ;;  %v509_v63 = vsel %vm499_vm15, %v495_v7, 1326507024 }
 0x136   :  { %v342_v61 = vxor.u32 2147483648, %v341_v57  ;;  %v5896_v32 = vmin.u32 %v633_v1, %v7581_v45  ;;  %v653_v20 = vsub.s32 4, %v7567_v33  ;;  %v500_v10 = vsel %vm496_vm1, %v480_v47, %v483_v42  ;;  %v6460_v2 = vpop.eup %6459 }
 0x137   :  { %v501_v8 = vsel %vm499_vm15, %v489_v26, 2102212464  ;;  %v507_v40 = vsel %vm497_vm4, %v504_v56, %v506_v54  ;;  %v510_v11 = vsel %vm498_vm3, %v492_v44, %v509_v63  ;;  %v512_v35 = vshll.u32 %v472_v21, 8  ;;  %v6462_v6 = vpop.eup %6461 }
 0x138   :  { %v460_v22 = vxor.u32 2147483648, %v6460_v2  ;;  %v343_v7 = vsel %vm260_vm8, %v342_v61, %v341_v57  ;;  %v635_v43 = vclz %v5896_v32  ;;  %v511_v42 = vsel %vm497_vm4, %v508_v46, %v510_v11 }
 0x139   :  { %v457_v47 = vxor.u32 2147483648, %v6462_v6  ;;  %v346_v26 = vsel %vm7529_vm9, %v7060_v16, %v343_v7  ;;  %v7614_v62 = vmul.u32.u64.low %v512_v35, %v511_v42  ;;  %v7615_v1 = vmul.u32.u64.high %v512_v35, %v511_v42, %v7614_v62 }
 0x13a   :  { %v461_v44 = vsel %vm459_vm13, %v460_v22, %v6462_v6  ;;  %6463 = vcosq.f32 %v346_v26  ;;  %v5897_v21 = vadd.s32 4294967294, %v635_v43  ;;  %v502_v57 = vsel %vm498_vm3, %v486_v36, %v501_v8 }
 0x13b   :  { %v458_v56 = vsel %vm456_vm14, %v6460_v2, %v457_v47  ;;  %6465 = vsinq.f32 %v346_v26  ;;  %v7623_v54 = vmul.u32.u64.low %v512_v35, %v507_v40  ;;  %v7624_v46 = vmul.u32.u64.high %v512_v35, %v507_v40, %v7623_v54 }
 0x13c   :  { %v7630_v51 = vsel %vm2432_vm12, %v7412_v19, 0  ;;  %v462_v63 = vsel %vm455_vm0, %v458_v56, %v461_v44  ;;  %vm569_vm5 = vcmp.lt.s32.totalorder %v7081_v38, 0  ;;  %vm5898_vm6 = vcmp.lt.s32.totalorder %v5897_v21, 0 }
 0x13d   :  { %v463_v36 = vsel %vm453_vm2, nan, %v462_v63  ;;  %v623_v61 = vadd.s32 %v7510_v52, %v7496_v53  ;;  %v638_v32 = vsel %vm5898_vm6, 0, %v5897_v21  ;;  %v503_v2 = vsel %vm497_vm4, %v500_v10, %v502_v57 }
 0x13e   :  { %4275 = vmatprep.mubr.f32.mxu0 %v463_v36  ;;  %v639_v8 = vsub.s32 32, %v638_v32  ;;  %v643_v19 = vsub.s32 4294967266, %v638_v32  ;;  %v7644_v5 = vsel %vm569_vm5, %v653_v20, %v7567_v33  ;;  %vm521_vm7 = vc.u32 %v7615_v1, %v7623_v54 }
 0x13f   :  { %vm353_vm8 = vcmp.eq.s32.totalorder %v7578_v28, 0  ;;  %vm356_vm9 = vcmp.eq.s32.totalorder %v7578_v28, 2  ;;  %v12621_v17 = vand.u32 2147483647, %v7081_v38  ;;  %v522_v53 = vadd.s32 1, %v7624_v46 }
 0x140   :  { %vm352_vm11 = vcmp.lt.s32.totalorder %v7578_v28, 2  ;;  %v640_v52 = vshll.u32 %v7581_v45, %v638_v32  ;;  %v641_v33 = vshrl.u32 %v623_v61, %v639_v8  ;;  %v644_v20 = vadd.s32 127, %v643_v19 }
 0x141   :  { %vm7652_vm10 = vcmp.le.f32.partialorder %v12621_v17, 0.7853982  ;;  %v519_v10 = vmul.u32 %v512_v35, %v503_v2  ;;  %vm350_vm12 = vweird.f32 %v7060_v16  ;;  %v523_v11 = vsel %vm521_vm7, %v522_v53, %v7624_v46 }
 0x142   :  { %v656_v40 = vsel %vm7652_vm10, 0, %v7644_v5  ;;  %v12495_v6 = vand.u32 2147483647, %v7057_v15  ;;  %v790_v22 = vshll.u32 %v12603_v48, %v7097_v4  ;;  %v642_v7 = vor.u32 %v641_v33, %v640_v52 }
 0x143   :  { %v645_v43 = vshll.u32 %v644_v20, 23  ;;  %v524_v42 = vadd.s32 %v523_v11, %v519_v10  ;;  %v791_v45 = vshrl.u32 %v12606_v9, %v7121_v31  ;;  %v793_v35 = vshll.u32 %v12606_v9, %v7097_v4 }
 0x144   :  { %v794_v47 = vshrl.u32 %v12607_v27, %v7121_v31  ;;  %v799_v26 = vshll.u32 %v12601_v55, %v7097_v4  ;;  %v800_v62 = vshrl.u32 %v12608_v39, %v7121_v31  ;;  %v6464_v44 = vpop.eup %6463  ;;  %v796_v56 = vshll.u32 %v12607_v27, %v7097_v4 }
 0x145   :  { %v646_v21 = vor.u32 4788187, %v645_v43  ;;  %v525_v57 = vadd.s32 536870912, %v524_v42  ;;  %v797_v46 = vshrl.u32 %v12601_v55, %v7121_v31  ;;  %v6466_v63 = vpop.eup %6465  ;;  %v357_v36 = vxor.u32 2147483648, %v6464_v44 }
 0x146   :  { %v780_v61 = vand.u32 8388607, %v12495_v6  ;;  %v802_v32 = vshll.u32 %v12608_v39, %v7097_v4  ;;  %v803_v2 = vshrl.u32 %v12609_v60, %v7121_v31  ;;  %v354_v8 = vxor.u32 2147483648, %v6466_v63 }
 0x147   :  { %v647_v19 = vand.u32 2147483647, %v646_v21  ;;  %v649_v5 = vcvt.s32.f32 %v642_v7  ;;  %v7687_v17 = vshrl.u32 %v525_v57, 30  ;;  %v358_v53 = vsel %vm356_vm9, %v357_v36, %v6466_v63 }
 0x148   :  { %v792_v52 = vor.u32 %v791_v45, %v790_v22  ;;  %v795_v33 = vor.u32 %v794_v47, %v793_v35  ;;  %v801_v20 = vor.u32 %v800_v62, %v799_v26  ;;  %v355_v10 = vsel %vm353_vm8, %v6464_v44, %v354_v8 }
 0x149   :  { %v650_v11 = vmul.f32 %v649_v5, %v647_v19  ;;  %v527_v4 = vshll.u32 %v7687_v17, 30  ;;  %v798_v43 = vor.u32 %v797_v46, %v796_v56  ;;  %v359_v6 = vsel %vm352_vm11, %v355_v10, %v358_v53 }
 0x14a   :  { %v804_v21 = vor.u32 %v803_v2, %v802_v32  ;;  %vm805_vm13 = vcmp.lt.s32.totalorder %v7104_v18, 1  ;;  %vm808_vm14 = vcmp.lt.s32.totalorder %v7104_v18, 4  ;;  %v360_v22 = vsel %vm350_vm12, nan, %v359_v6 }
 0x14b   :  { %v651_v7 = vxor.u32 2147483648, %v650_v11  ;;  %v7700_v45 = vsub.s32 %v524_v42, %v527_v4  ;;  %vm807_vm15 = vcmp.lt.s32.totalorder %v7104_v18, 3  ;;  %4276 = vmatmul.mubr.f32.vlgmr.msra.gmra.mrb[0].mxu0 %v360_v22  ;;  %v781_v35 = vor.u32 8388608, %v780_v61 }
 0x14c   :  { %v789_v47 = vshrl.u32 %v12603_v48, %v7121_v31  ;;  %vm806_vm0 = vcmp.lt.s32.totalorder %v7104_v18, 2  ;;  %v814_v28 = vsel %vm808_vm14, %v801_v20, 920167782  ;;  %v810_v6 = vsel %vm808_vm14, %v798_v43, 2102212464 }
 0x14d   :  { %v652_v26 = vsel %vm569_vm5, %v651_v7, %v650_v11  ;;  %v530_v16 = vsub.s32 0, %v7700_v45  ;;  %v813_v42 = vsel %vm805_vm13, %v792_v52, %v795_v33  ;;  %v815_v62 = vsel %vm807_vm15, %v798_v43, %v814_v28 }
 0x14e   :  { %v655_v31 = vsel %vm7652_vm10, %v7081_v38, %v652_v26  ;;  %v817_v44 = vsel %vm805_vm13, %v795_v33, %v798_v43  ;;  %v818_v57 = vsel %vm808_vm14, %v804_v21, 1326507024  ;;  %v7725_v56 = vadd.s32 4294967169, %v7414_v58 }
 0x14f   :  { %6467 = vcosq.f32 %v655_v31  ;;  %v7727_v46 = vand.u32 3, %v656_v40  ;;  %v5892_v63 = vmin.u32 %v530_v16, %v7700_v45  ;;  %v809_v37 = vsel %vm805_vm13, %v789_v47, %v792_v52 }
 0x150   :  { %6469 = vsinq.f32 %v655_v31  ;;  %v811_v36 = vsel %vm807_vm15, %v795_v33, %v810_v6  ;;  %v819_v61 = vsel %vm807_vm15, %v801_v20, %v818_v57  ;;  %v816_v58 = vsel %vm806_vm0, %v813_v42, %v815_v62 }
 0x151   :  { %v532_v32 = vclz %v5892_v63  ;;  %v820_v40 = vsel %vm806_vm0, %v817_v44, %v819_v61  ;;  %v821_v2 = vshll.u32 %v781_v35, 8  ;;  %v7741_v8 = vshrl.u32 %v7525_v0, 5 }
 0x152   :  { %v7744_v19 = vand.u32 31, %v7525_v0  ;;  %v7747_v5 = vadd.s32 4294967169, %v7419_v41  ;;  %v670_v53 = vand.u32 2147483647, %v7054_v14  ;;  %vm665_vm1 = vcmp.eq.s32.totalorder %v7727_v46, 2 }
 0x153   :  { %v5893_v52 = vadd.s32 4294967294, %v532_v32  ;;  %v812_v33 = vsel %vm806_vm0, %v809_v37, %v811_v36  ;;  %v7753_v20 = vmul.u32.u64.low %v821_v2, %v820_v40  ;;  %v7754_v10 = vmul.u32.u64.high %v821_v2, %v820_v40, %v7753_v20 }
 0x154   :  { %vm662_vm2 = vcmp.eq.s32.totalorder %v7727_v46, 0  ;;  %v520_v0 = vadd.s32 %v7623_v54, %v7615_v1  ;;  %v7759_v11 = vmul.u32.u64.low %v821_v2, %v816_v58  ;;  %v7760_v4 = vmul.u32.u64.high %v821_v2, %v816_v58, %v7759_v11 }
 0x155   :  { %v687_v41 = vshll.u32 %v12603_v48, %v7095_v3  ;;  %vm661_vm3 = vcmp.lt.s32.totalorder %v7727_v46, 2  ;;  %vm5894_vm4 = vcmp.lt.s32.totalorder %v5893_v52, 0  ;;  %v688_v18 = vshrl.u32 %v12606_v9, %v7118_v30 }
 0x156   :  { %v690_v43 = vshll.u32 %v12606_v9, %v7095_v3  ;;  %v691_v21 = vshrl.u32 %v12607_v27, %v7118_v30  ;;  %vm659_vm5 = vweird.f32 %v7081_v38  ;;  %v535_v1 = vsel %vm5894_vm4, 0, %v5893_v52 }
 0x157   :  { %v550_v54 = vsub.s32 4, %v7687_v17  ;;  %v828_v22 = vmul.u32 %v821_v2, %v812_v33  ;;  %v677_v7 = vand.u32 8388607, %v670_v53  ;;  %vm466_vm6 = vcmp.lt.s32.totalorder %v7076_v34, 0 }
 0x158   :  { %v536_v35 = vsub.s32 32, %v535_v1  ;;  %v540_v47 = vsub.s32 4294967266, %v535_v1  ;;  %v693_v28 = vshll.u32 %v12607_v27, %v7095_v3  ;;  %v694_v26 = vshrl.u32 %v12601_v55, %v7118_v30 }
 0x159   :  { %v537_v16 = vshll.u32 %v7700_v45, %v535_v1  ;;  %vm830_vm7 = vc.u32 %v7754_v10, %v7759_v11  ;;  %v831_v6 = vadd.s32 1, %v7760_v4  ;;  %v689_v42 = vor.u32 %v688_v18, %v687_v41  ;;  %v6468_v31 = vpop.eup %6467 }
 0x15a   :  { %v538_v62 = vshrl.u32 %v520_v0, %v536_v35  ;;  %v541_v44 = vadd.s32 127, %v540_v47  ;;  %v692_v57 = vor.u32 %v691_v21, %v690_v43  ;;  %v696_v63 = vshll.u32 %v12601_v55, %v7095_v3  ;;  %v6470_v37 = vpop.eup %6469 }
 0x15b   :  { %v666_v36 = vxor.u32 2147483648, %v6468_v31  ;;  %v832_v61 = vsel %vm830_vm7, %v831_v6, %v7760_v4  ;;  %v697_v45 = vshrl.u32 %v12608_v39, %v7118_v30  ;;  %v699_v32 = vshll.u32 %v12608_v39, %v7095_v3 }
 0x15c   :  { %v663_v58 = vxor.u32 2147483648, %v6470_v37  ;;  %v539_v40 = vor.u32 %v538_v62, %v537_v16  ;;  %v542_v2 = vshll.u32 %v541_v44, 23  ;;  %v833_v52 = vadd.s32 %v832_v61, %v828_v22 }
 0x15d   :  { %v667_v33 = vsel %vm665_vm1, %v666_v36, %v6470_v37  ;;  %v695_v20 = vor.u32 %v694_v26, %v693_v28  ;;  %v698_v0 = vor.u32 %v697_v45, %v696_v63  ;;  %v700_v41 = vshrl.u32 %v12609_v60, %v7118_v30 }
 0x15e   :  { %v664_v4 = vsel %vm662_vm2, %v6468_v31, %v663_v58  ;;  %v543_v18 = vor.u32 4788187, %v542_v2  ;;  %v834_v43 = vadd.s32 536870912, %v833_v52  ;;  %vm702_vm8 = vcmp.lt.s32.totalorder %v7102_v13, 1 }
 0x15f   :  { %v668_v3 = vsel %vm661_vm3, %v664_v4, %v667_v33  ;;  %v546_v21 = vcvt.s32.f32 %v539_v40  ;;  %v701_v1 = vor.u32 %v700_v41, %v699_v32  ;;  %vm704_vm9 = vcmp.lt.s32.totalorder %v7102_v13, 3 }
 0x160   :  { %v669_v22 = vsel %vm659_vm5, nan, %v668_v3  ;;  %v544_v35 = vand.u32 2147483647, %v543_v18  ;;  %v835_v47 = vshrl.u32 %v834_v43, 30  ;;  %vm705_vm10 = vcmp.lt.s32.totalorder %v7102_v13, 4 }
 0x161   :  { %v7806_v28 = vshrl.u32 %v7630_v51, 5  ;;  %4280 = vmatprep.mubr.f32.mxu0 %v669_v22  ;;  %v551_v46 = vsel %vm466_vm6, %v550_v54, %v7687_v17  ;;  %v678_v26 = vor.u32 8388608, %v677_v7  ;;  %v711_v16 = vsel %vm705_vm10, %v698_v0, 920167782 }
 0x162   :  { %vm7815_vm11 = vcmp.le.f32.partialorder %v464_v24, 0.7853982  ;;  %v547_v6 = vmul.f32 %v546_v21, %v544_v35  ;;  %v836_v31 = vshll.u32 %v835_v47, 30  ;;  %vm703_vm12 = vcmp.lt.s32.totalorder %v7102_v13, 2 }
 0x163   :  { %v710_v62 = vsel %vm702_vm8, %v689_v42, %v692_v57  ;;  %v712_v17 = vsel %vm704_vm9, %v695_v20, %v711_v16  ;;  %v714_v54 = vsel %vm702_vm8, %v692_v57, %v695_v20  ;;  %v715_v7 = vsel %vm705_vm10, %v701_v1, 1326507024 }
 0x164   :  { %v548_v24 = vxor.u32 2147483648, %v547_v6  ;;  %v553_v44 = vsel %vm7815_vm11, 0, %v551_v46  ;;  %v7830_v63 = vsub.s32 %v833_v52, %v836_v31  ;;  %v686_v37 = vshrl.u32 %v12603_v48, %v7118_v30 }
 0x165   :  { %v7835_v36 = vand.u32 31, %v7630_v51  ;;  %v707_v61 = vsel %vm705_vm10, %v695_v20, 2102212464  ;;  %v716_v45 = vsel %vm704_vm9, %v698_v0, %v715_v7  ;;  %v718_v32 = vshll.u32 %v678_v26, 8 }
 0x166   :  { %v549_v58 = vsel %vm466_vm6, %v548_v24, %v547_v6  ;;  %v839_v40 = vsub.s32 0, %v7830_v63  ;;  %v713_v2 = vsel %vm703_vm12, %v710_v62, %v712_v17  ;;  %v717_v30 = vsel %vm703_vm12, %v714_v54, %v716_v45 }
 0x167   :  { %v552_v51 = vsel %vm7815_vm11, %v7076_v34, %v549_v58  ;;  %v7851_v52 = vand.u32 3, %v553_v44  ;;  %v7853_v33 = vmul.u32.u64.low %v718_v32, %v717_v30  ;;  %v7854_v20 = vmul.u32.u64.high %v718_v32, %v717_v30, %v7853_v33 }
 0x168   :  { %6471 = vcosq.f32 %v552_v51  ;;  %v5904_v0 = vmin.u32 %v839_v40, %v7830_v63  ;;  %v706_v41 = vsel %vm702_vm8, %v686_v37, %v689_v42  ;;  %v708_v4 = vsel %vm704_vm9, %v692_v57, %v707_v61 }
 0x169   :  { %v7862_v18 = vadd.s32 1, %v7725_v56  ;;  %6473 = vsinq.f32 %v552_v51  ;;  %v7864_v43 = vmul.u32.u64.low %v718_v32, %v713_v2  ;;  %v7865_v3 = vmul.u32.u64.high %v718_v32, %v713_v2, %v7864_v43 }
 0x16a   :  { %v7869_v21 = vadd.s32 1, %v7747_v5  ;;  %v12626_v1 = vand.u32 2139095040, %v7408_v12  ;;  %v841_v35 = vclz %v5904_v0  ;;  %v859_v42 = vsub.s32 4, %v835_v47 }
 0x16b   :  { %v7877_v57 = vshrl.u32 %v2836_v49, 23  ;;  %vm775_vm13 = vcmp.lt.s32.totalorder %v7057_v15, 0  ;;  %v709_v56 = vsel %vm703_vm12, %v706_v41, %v708_v4  ;;  %v979_v46 = vand.u32 2147483647, %v7073_v29 }
 0x16c   :  { %v7873_v22 = vshrl.u32 %v12626_v1, 23  ;;  %vm562_vm14 = vcmp.eq.s32.totalorder %v7851_v52, 2  ;;  %v5905_v5 = vadd.s32 4294967294, %v841_v35  ;;  %vm727_vm15 = vc.u32 %v7854_v20, %v7864_v43 }
 0x16d   :  { %v996_v26 = vshll.u32 %v12603_v48, %v7145_v50  ;;  %v997_v49 = vshrl.u32 %v12606_v9, %v7167_v23  ;;  %vm559_vm0 = vcmp.eq.s32.totalorder %v7851_v52, 0  ;;  %v829_v13 = vadd.s32 %v7759_v11, %v7754_v10 }
 0x16e   :  { %v728_v16 = vadd.s32 1, %v7865_v3  ;;  %v999_v38 = vshll.u32 %v12606_v9, %v7145_v50  ;;  %v1000_v6 = vshrl.u32 %v12607_v27, %v7167_v23  ;;  %vm558_vm1 = vcmp.lt.s32.totalorder %v7851_v52, 2 }
 0x16f   :  { %vm5906_vm2 = vcmp.lt.s32.totalorder %v5905_v5, 0  ;;  %v7901_v31 = vsel %vm775_vm13, %v859_v42, %v835_v47  ;;  %v725_v62 = vmul.u32 %v718_v32, %v709_v56  ;;  %v1005_v17 = vshll.u32 %v12601_v55, %v7145_v50 }
 0x170   :  { %vm556_vm3 = vweird.f32 %v7076_v34  ;;  %v844_v10 = vsel %vm5906_vm2, 0, %v5905_v5  ;;  %v729_v11 = vsel %vm727_vm15, %v728_v16, %v7865_v3  ;;  %v986_v54 = vand.u32 8388607, %v979_v46 }
 0x171   :  { %v1006_v7 = vshrl.u32 %v12608_v39, %v7167_v23  ;;  %v845_v24 = vsub.s32 32, %v844_v10  ;;  %v849_v44 = vsub.s32 4294967266, %v844_v10  ;;  %v730_v37 = vadd.s32 %v729_v11, %v725_v62 }
 0x172   :  { %v998_v47 = vor.u32 %v997_v49, %v996_v26  ;;  %v846_v61 = vshll.u32 %v7830_v63, %v844_v10  ;;  %v1001_v45 = vor.u32 %v1000_v6, %v999_v38  ;;  %v1002_v32 = vshll.u32 %v12607_v27, %v7145_v50  ;;  %v6472_v40 = vpop.eup %6471 }
 0x173   :  { %v1003_v58 = vshrl.u32 %v12601_v55, %v7167_v23  ;;  %v847_v2 = vshrl.u32 %v829_v13, %v845_v24  ;;  %v850_v30 = vadd.s32 127, %v849_v44  ;;  %v731_v51 = vadd.s32 536870912, %v730_v37  ;;  %v6474_v0 = vpop.eup %6473 }
 0x174   :  { %v1007_v33 = vor.u32 %v1006_v7, %v1005_v17  ;;  %v563_v41 = vxor.u32 2147483648, %v6472_v40  ;;  %v1008_v4 = vshll.u32 %v12608_v39, %v7145_v50  ;;  %v1009_v63 = vshrl.u32 %v12609_v60, %v7167_v23 }
 0x175   :  { %vm1011_vm4 = vcmp.lt.s32.totalorder %v7157_v59, 1  ;;  %v560_v3 = vxor.u32 2147483648, %v6474_v0  ;;  %v848_v1 = vor.u32 %v847_v2, %v846_v61  ;;  %v851_v35 = vshll.u32 %v850_v30, 23 }
 0x176   :  { %v732_v42 = vshrl.u32 %v731_v51, 30  ;;  %v564_v56 = vsel %vm562_vm14, %v563_v41, %v6474_v0  ;;  %v987_v5 = vor.u32 8388608, %v986_v54  ;;  %v1004_v26 = vor.u32 %v1003_v58, %v1002_v32 }
 0x177   :  { %vm1014_vm5 = vcmp.lt.s32.totalorder %v7157_v59, 4  ;;  %v561_v49 = vsel %vm559_vm0, %v6472_v40, %v560_v3  ;;  %v852_v50 = vor.u32 4788187, %v851_v35  ;;  %vm1013_vm6 = vcmp.lt.s32.totalorder %v7157_v59, 3 }
 0x178   :  { %v733_v13 = vshll.u32 %v732_v42, 30  ;;  %v565_v16 = vsel %vm558_vm1, %v561_v49, %v564_v56  ;;  %v1010_v38 = vor.u32 %v1009_v63, %v1008_v4  ;;  %v1019_v6 = vsel %vm1011_vm4, %v998_v47, %v1001_v45 }
 0x179   :  { %v1020_v62 = vsel %vm1014_vm5, %v1007_v33, 920167782  ;;  %v566_v17 = vsel %vm556_vm3, nan, %v565_v16  ;;  %v853_v10 = vand.u32 2147483647, %v852_v50  ;;  %v855_v11 = vcvt.s32.f32 %v848_v1 }
 0x17a   :  { %v7935_v54 = vsub.s32 %v730_v37, %v733_v13  ;;  %4281 = vmatmul.mubr.f32.gmra.mrb[2].mxu0 %v566_v17  ;;  %v12627_v7 = vand.u32 2147483647, %v7057_v15  ;;  %v995_v24 = vshrl.u32 %v12603_v48, %v7167_v23  ;;  %vm1012_vm8 = vcmp.lt.s32.totalorder %v7157_v59, 2 }
 0x17b   :  { %v1021_v34 = vsel %vm1013_vm6, %v1004_v26, %v1020_v62  ;;  %v856_v44 = vmul.f32 %v855_v11, %v853_v10  ;;  %v1016_v37 = vsel %vm1014_vm5, %v1004_v26, 2102212464  ;;  %v1023_v32 = vsel %vm1011_vm4, %v1001_v45, %v1004_v26  ;;  %v12633_v11 = vld [vmem:[#allocation15_spill] sm:$0xff] }
 0x17c   :  { %vm7939_vm7 = vcmp.le.f32.partialorder %v12627_v7, 0.7853982  ;;  %v736_v61 = vsub.s32 0, %v7935_v54  ;;  %v7954_v58 = vsub.s32 32, %v7744_v19  ;;  %v1022_v40 = vsel %vm1012_vm8, %v1019_v6, %v1021_v34  ;;  %v12634_v34 = vld [vmem:[#allocation24_spill] sm:$0xff] }
 0x17d   :  { %v862_v23 = vsel %vm7939_vm7, 0, %v7901_v31  ;;  %v1024_v2 = vsel %vm1014_vm5, %v1010_v38, 1326507024  ;;  %v857_v30 = vxor.u32 2147483648, %v856_v44  ;;  %v1027_v41 = vshll.u32 %v987_v5, 8 }
 0x17e   :  { %v5900_v51 = vmin.u32 %v736_v61, %v7935_v54  ;;  %v1025_v0 = vsel %vm1013_vm6, %v1007_v33, %v1024_v2  ;;  %v756_v4 = vsub.s32 4, %v732_v42  ;;  %v1015_v63 = vsel %vm1011_vm4, %v995_v24, %v998_v47 }
 0x17f   :  { %v1017_v31 = vsel %vm1013_vm6, %v1001_v45, %v1016_v37  ;;  %v1026_v3 = vsel %vm1012_vm8, %v1023_v32, %v1025_v0  ;;  %v858_v1 = vsel %vm775_vm13, %v857_v30, %v856_v44  ;;  %v7978_v33 = vsub.s32 32, %v7835_v36  ;;  %v12630_v45 = vld [vmem:[#allocation80_spill] sm:$0xff] }
 0x180   :  { %v738_v35 = vclz %v5900_v51  ;;  %v7974_v56 = vmul.u32.u64.low %v1027_v41, %v1026_v3  ;;  %v7975_v26 = vmul.u32.u64.high %v1027_v41, %v1026_v3, %v7974_v56  ;;  %v861_v47 = vsel %vm7939_vm7, %v7057_v15, %v858_v1 }
 0x181   :  { %v7983_v5 = vmul.u32.u64.low %v1027_v41, %v1022_v40  ;;  %v7984_v49 = vmul.u32.u64.high %v1027_v41, %v1022_v40, %v7983_v5  ;;  %v3351_v50 = vand.u32 2139095040, %v12630_v45  ;;  %6475 = vcosq.f32 %v861_v47 }
 0x182   :  { %v5901_v13 = vadd.s32 4294967294, %v738_v35  ;;  %v1018_v16 = vsel %vm1012_vm8, %v1015_v63, %v1017_v31  ;;  %6477 = vsinq.f32 %v861_v47  ;;  %v7990_v38 = vand.u32 3, %v862_v23 }
 0x183   :  { %vm7994_vm9 = vcmp.le.f32.partialorder %v670_v53, 0.7853982  ;;  %vm672_vm10 = vcmp.lt.s32.totalorder %v7054_v14, 0  ;;  %v726_v62 = vadd.s32 %v7864_v43, %v7854_v20  ;;  %vm1036_vm12 = vc.u32 %v7975_v26, %v7983_v5  ;;  %v12635_v20 = vld [vmem:[#allocation28_spill] sm:$0xff] }
 0x184   :  { %vm5902_vm11 = vcmp.lt.s32.totalorder %v5901_v13, 0  ;;  %v8003_v17 = vsel %vm672_vm10, %v756_v4, %v732_v42  ;;  %v1034_v10 = vmul.u32 %v1027_v41, %v1018_v16  ;;  %v1037_v53 = vadd.s32 1, %v7984_v49 }
 0x185   :  { %v741_v59 = vsel %vm5902_vm11, 0, %v5901_v13  ;;  %v876_v7 = vand.u32 2147483647, %v12633_v11  ;;  %v893_v44 = vshll.u32 %v12603_v48, %v12634_v34  ;;  %v894_v43 = vshrl.u32 %v12606_v9, %v12635_v20 }
 0x186   :  { %v742_v52 = vsub.s32 32, %v741_v59  ;;  %v746_v24 = vsub.s32 4294967266, %v741_v59  ;;  %vm868_vm13 = vcmp.eq.s32.totalorder %v7990_v38, 0  ;;  %v743_v42 = vshll.u32 %v7935_v54, %v741_v59 }
 0x187   :  { %v1038_v61 = vsel %vm1036_vm12, %v1037_v53, %v7984_v49  ;;  %v896_v37 = vshll.u32 %v12606_v9, %v12634_v34  ;;  %v897_v32 = vshrl.u32 %v12607_v27, %v12635_v20  ;;  %vm867_vm14 = vcmp.lt.s32.totalorder %v7990_v38, 2  ;;  %v12636_v53 = vld [vmem:[#allocation27_spill] sm:$0xff] }
 0x188   :  { %v744_v23 = vshrl.u32 %v726_v62, %v742_v52  ;;  %v747_v40 = vadd.s32 127, %v746_v24  ;;  %v1039_v2 = vadd.s32 %v1038_v61, %v1034_v10  ;;  %v902_v30 = vshll.u32 %v12601_v55, %v12634_v34 }
 0x189   :  { %vm865_vm15 = vweird.f32 %v7057_v15  ;;  %vm871_vm0 = vcmp.eq.s32.totalorder %v7990_v38, 2  ;;  %v899_v54 = vshll.u32 %v12607_v27, %v12634_v34  ;;  %v900_v51 = vshrl.u32 %v12601_v55, %v12635_v20 }
 0x18a   :  { %v903_v0 = vshrl.u32 %v12608_v39, %v12635_v20  ;;  %v745_v41 = vor.u32 %v744_v23, %v743_v42  ;;  %v748_v4 = vshll.u32 %v747_v40, 23  ;;  %v759_v63 = vsel %vm7994_vm9, 0, %v8003_v17 }
 0x18b   :  { %v1040_v31 = vadd.s32 536870912, %v1039_v2  ;;  %vm981_vm1 = vcmp.lt.s32.totalorder %v7073_v29, 0  ;;  %v883_v3 = vand.u32 8388607, %v876_v7  ;;  %v905_v35 = vshll.u32 %v12608_v39, %v12634_v34  ;;  %v6476_v47 = vpop.eup %6475 }
 0x18c   :  { %v904_v1 = vor.u32 %v903_v0, %v902_v30  ;;  %v906_v56 = vshrl.u32 %v12609_v60, %v12635_v20  ;;  %v749_v49 = vor.u32 4788187, %v748_v4  ;;  %v895_v16 = vor.u32 %v894_v43, %v893_v44  ;;  %v6478_v59 = vpop.eup %6477 }
 0x18d   :  { %v1041_v13 = vshrl.u32 %v1040_v31, 30  ;;  %v898_v62 = vor.u32 %v897_v32, %v896_v37  ;;  %v872_v17 = vxor.u32 2147483648, %v6476_v47  ;;  %v901_v10 = vor.u32 %v900_v51, %v899_v54 }
 0x18e   :  { %vm908_vm2 = vcmp.lt.s32.totalorder %v12636_v53, 1  ;;  %vm911_vm3 = vcmp.lt.s32.totalorder %v12636_v53, 4  ;;  %v869_v52 = vxor.u32 2147483648, %v6478_v59  ;;  %v750_v24 = vand.u32 2147483647, %v749_v49 }
 0x18f   :  { %v752_v42 = vcvt.s32.f32 %v745_v41  ;;  %v1042_v61 = vshll.u32 %v1041_v13, 30  ;;  %vm2947_vm4 = vcmp.gt.s32.totalorder %v7862_v18, 0  ;;  %v873_v34 = vsel %vm871_vm0, %v872_v17, %v6478_v59 }
 0x190   :  { %vm8048_vm5 = vcmp.le.f32.partialorder %v979_v46, 0.7853982  ;;  %v907_v43 = vor.u32 %v906_v56, %v905_v35  ;;  %vm910_vm6 = vcmp.lt.s32.totalorder %v12636_v53, 3  ;;  %v917_v37 = vsel %vm911_vm3, %v904_v1, 920167782 }
 0x191   :  { %v870_v32 = vsel %vm868_vm13, %v6476_v47, %v869_v52  ;;  %v753_v23 = vmul.f32 %v752_v42, %v750_v24  ;;  %v8057_v40 = vsub.s32 %v1039_v2, %v1042_v61  ;;  %v1065_v30 = vsub.s32 4, %v1041_v13 }
 0x192   :  { %v874_v54 = vsel %vm867_vm14, %v870_v32, %v873_v34  ;;  %v884_v46 = vor.u32 8388608, %v883_v3  ;;  %v892_v51 = vshrl.u32 %v12603_v48, %v12635_v20  ;;  %v916_v0 = vsel %vm908_vm2, %v895_v16, %v898_v62  ;;  %v12639_v32 = vld [vmem:[#allocation81_spill] sm:$0xff] }
 0x193   :  { %v875_v41 = vsel %vm865_vm15, nan, %v874_v54  ;;  %v754_v4 = vxor.u32 2147483648, %v753_v23  ;;  %v1045_v31 = vsub.s32 0, %v8057_v40  ;;  %v918_v2 = vsel %vm910_vm6, %v901_v10, %v917_v37 }
 0x194   :  { %4285 = vmatprep.mubr.f32.mxu0 %v875_v41  ;;  %v8070_v35 = vand.u32 3, %v759_v63  ;;  %vm909_vm7 = vcmp.lt.s32.totalorder %v12636_v53, 2  ;;  %v920_v38 = vsel %vm908_vm2, %v898_v62, %v901_v10  ;;  %v921_v20 = vsel %vm911_vm3, %v907_v43, 1326507024 }
 0x195   :  { %v755_v15 = vsel %vm672_vm10, %v754_v4, %v753_v23  ;;  %v5912_v3 = vmin.u32 %v1045_v31, %v8057_v40  ;;  %v1066_v56 = vsel %vm981_vm1, %v1065_v30, %v1041_v13  ;;  %v913_v63 = vsel %vm911_vm3, %v901_v10, 2102212464  ;;  %v12641_v4 = vld [vmem:[#allocation48_spill] sm:$0xff] }
 0x196   :  { %v758_v47 = vsel %vm7994_vm9, %v7054_v14, %v755_v15  ;;  %v919_v49 = vsel %vm909_vm7, %v916_v0, %v918_v2  ;;  %v922_v59 = vsel %vm910_vm6, %v904_v1, %v921_v20  ;;  %v924_v17 = vshll.u32 %v884_v46, 8 }
 0x197   :  { %6479 = vcosq.f32 %v758_v47  ;;  %v1047_v52 = vclz %v5912_v3  ;;  %v912_v24 = vsel %vm908_vm2, %v892_v51, %v895_v16  ;;  %v923_v13 = vsel %vm909_vm7, %v920_v38, %v922_v59 }
 0x198   :  { %6481 = vsinq.f32 %v758_v47  ;;  %v914_v6 = vsel %vm910_vm6, %v898_v62, %v913_v63  ;;  %v8097_v10 = vmul.u32.u64.low %v924_v17, %v923_v13  ;;  %v8098_v42 = vmul.u32.u64.high %v924_v17, %v923_v13, %v8097_v10  ;;  %v12640_v62 = vld [vmem:[#allocation19_spill] sm:$0xff] }
 0x199   :  { %v5913_v61 = vadd.s32 4294967294, %v1047_v52  ;;  %v1068_v1 = vsel %vm8048_vm5, 0, %v1066_v56  ;;  %v8102_v34 = vmul.u32.u64.low %v924_v17, %v919_v49  ;;  %v8103_v43 = vmul.u32.u64.high %v924_v17, %v919_v49, %v8102_v34 }
 0x19a   :  { %v8107_v16 = vadd.s32 4294967169, %v7873_v22  ;;  %v8110_v37 = vadd.s32 4294967169, %v7877_v57  ;;  %v3454_v23 = vand.u32 2139095040, %v12639_v32  ;;  %v1185_v30 = vand.u32 2147483647, %v12640_v62 }
 0x19b   :  { %v8117_v54 = vsel %vm2947_vm4, %v7862_v18, 0  ;;  %vm768_vm8 = vcmp.eq.s32.totalorder %v8070_v35, 2  ;;  %vm5914_vm9 = vcmp.lt.s32.totalorder %v5913_v61, 0  ;;  %v915_v46 = vsel %vm909_vm7, %v912_v24, %v914_v6 }
 0x19c   :  { %vm765_vm10 = vcmp.eq.s32.totalorder %v8070_v35, 0  ;;  %v1035_v22 = vadd.s32 %v7983_v5, %v7975_v26  ;;  %v1050_v57 = vsel %vm5914_vm9, 0, %v5913_v61  ;;  %v8125_v51 = vand.u32 3, %v1068_v1  ;;  %v12642_v5 = vld [vmem:[#allocation42_spill] sm:$0xff] }
 0x19d   :  { %vm933_vm11 = vc.u32 %v8098_v42, %v8102_v34  ;;  %vm764_vm12 = vcmp.lt.s32.totalorder %v8070_v35, 2  ;;  %v1051_v18 = vsub.s32 32, %v1050_v57  ;;  %v1055_v0 = vsub.s32 4294967266, %v1050_v57 }
 0x19e   :  { %v934_v41 = vadd.s32 1, %v8103_v43  ;;  %v1203_v53 = vshrl.u32 %v12606_v9, %v12641_v4  ;;  %vm762_vm13 = vweird.f32 %v7054_v14  ;;  %v931_v31 = vmul.u32 %v924_v17, %v915_v46 }
 0x19f   :  { %v1192_v26 = vand.u32 8388607, %v1185_v30  ;;  %v1202_v2 = vshll.u32 %v12603_v48, %v12642_v5  ;;  %v1206_v38 = vshrl.u32 %v12607_v27, %v12641_v4  ;;  %v1052_v20 = vshll.u32 %v8057_v40, %v1050_v57 }
 0x1a0   :  { %v1053_v15 = vshrl.u32 %v1035_v22, %v1051_v18  ;;  %v1056_v3 = vadd.s32 127, %v1055_v0  ;;  %v935_v56 = vsel %vm933_vm11, %v934_v41, %v8103_v43  ;;  %v1205_v47 = vshll.u32 %v12606_v9, %v12642_v5 }
 0x1a1   :  { %v936_v63 = vadd.s32 %v935_v56, %v931_v31  ;;  %v1209_v49 = vshrl.u32 %v12601_v55, %v12641_v4  ;;  %v1212_v59 = vshrl.u32 %v12608_v39, %v12641_v4  ;;  %v6480_v17 = vpop.eup %6479  ;;  %v1204_v13 = vor.u32 %v1203_v53, %v1202_v2 }
 0x1a2   :  { %v1054_v52 = vor.u32 %v1053_v15, %v1052_v20  ;;  %v1057_v24 = vshll.u32 %v1056_v3, 23  ;;  %v1215_v40 = vshrl.u32 %v12609_v60, %v12641_v4  ;;  %v6482_v6 = vpop.eup %6481  ;;  %v769_v10 = vxor.u32 2147483648, %v6480_v17 }
 0x1a3   :  { %v937_v61 = vadd.s32 536870912, %v936_v63  ;;  %v1208_v1 = vshll.u32 %v12607_v27, %v12642_v5  ;;  %v1211_v43 = vshll.u32 %v12601_v55, %v12642_v5  ;;  %v766_v46 = vxor.u32 2147483648, %v6482_v6 }
 0x1a4   :  { %v1058_v22 = vor.u32 4788187, %v1057_v24  ;;  %v1207_v57 = vor.u32 %v1206_v38, %v1205_v47  ;;  %v1214_v18 = vshll.u32 %v12608_v39, %v12642_v5  ;;  %vm3050_vm14 = vcmp.gt.s32.totalorder %v7869_v21, 0  ;;  %v12643_v5 = vld [vmem:[#allocation41_spill] sm:$0xff] }
 0x1a5   :  { %v770_v0 = vsel %vm768_vm8, %v769_v10, %v6482_v6  ;;  %v938_v41 = vshrl.u32 %v937_v61, 30  ;;  %v1210_v53 = vor.u32 %v1209_v49, %v1208_v1  ;;  %v1213_v31 = vor.u32 %v1212_v59, %v1211_v43 }
 0x1a6   :  { %v767_v2 = vsel %vm765_vm10, %v6480_v17, %v766_v46  ;;  %v1059_v20 = vand.u32 2147483647, %v1058_v22  ;;  %v1061_v15 = vcvt.s32.f32 %v1054_v52  ;;  %v1216_v3 = vor.u32 %v1215_v40, %v1214_v18 }
 0x1a7   :  { %v771_v38 = vsel %vm764_vm12, %v767_v2, %v770_v0  ;;  %v939_v56 = vshll.u32 %v938_v41, 30  ;;  %v1193_v47 = vor.u32 8388608, %v1192_v26  ;;  %vm1217_vm15 = vcmp.lt.s32.totalorder %v12643_v5, 1 }
 0x1a8   :  { %v772_v24 = vsel %vm762_vm13, nan, %v771_v38  ;;  %v1062_v6 = vmul.f32 %v1061_v15, %v1059_v20  ;;  %vm1219_vm0 = vcmp.lt.s32.totalorder %v12643_v5, 3  ;;  %vm1220_vm2 = vcmp.lt.s32.totalorder %v12643_v5, 4 }
 0x1a9   :  { %4286 = vmatmul.mubr.f32.gmra.mrb[4].mxu0 %v772_v24  ;;  %v8168_v49 = vsub.s32 %v936_v63, %v939_v56  ;;  %v1225_v59 = vsel %vm1217_vm15, %v1204_v13, %v1207_v57  ;;  %v1226_v35 = vsel %vm1220_vm2, %v1213_v31, 920167782  ;;  %v1229_v26 = vsel %vm1217_vm15, %v1207_v57, %v1210_v53  ;;  %v12644_v56 = vld [vmem:[#allocation18_spill] sm:$0xff] }
 0x1aa   :  { %v1063_v17 = vxor.u32 2147483648, %v1062_v6  ;;  %v1222_v52 = vsel %vm1220_vm2, %v1210_v53, 2102212464  ;;  %v1227_v14 = vsel %vm1219_vm0, %v1210_v53, %v1226_v35  ;;  %v1230_v40 = vsel %vm1220_vm2, %v1216_v3, 1326507024 }
 0x1ab   :  { %v942_v10 = vsub.s32 0, %v8168_v49  ;;  %v1201_v61 = vshrl.u32 %v12603_v48, %v12641_v4  ;;  %vm1218_vm3 = vcmp.lt.s32.totalorder %v12643_v5, 2  ;;  %v1231_v63 = vsel %vm1219_vm0, %v1213_v31, %v1230_v40  ;;  %v12646_v5 = vld [vmem:[#allocation47_spill] sm:$0xff] }
 0x1ac   :  { %v1064_v1 = vsel %vm981_vm1, %v1063_v17, %v1062_v6  ;;  %v1228_v43 = vsel %vm1218_vm3, %v1225_v59, %v1227_v14  ;;  %v1232_v46 = vsel %vm1218_vm3, %v1229_v26, %v1231_v63  ;;  %v1233_v22 = vshll.u32 %v1193_v47, 8 }
 0x1ad   :  { %v1067_v18 = vsel %vm8048_vm5, %v7073_v29, %v1064_v1  ;;  %v5908_v4 = vmin.u32 %v942_v10, %v8168_v49  ;;  %v1221_v0 = vsel %vm1217_vm15, %v1201_v61, %v1204_v13  ;;  %v1223_v53 = vsel %vm1219_vm0, %v1207_v57, %v1222_v52  ;;  %v12647_v52 = vld [vmem:[#allocation40_spill] sm:$0xff] }
 0x1ae   :  { %6483 = vcosq.f32 %v1067_v18  ;;  %v962_v31 = vsub.s32 4, %v938_v41  ;;  %v8196_v2 = vmul.u32.u64.low %v1233_v22, %v1232_v46  ;;  %v8197_v20 = vmul.u32.u64.high %v1233_v22, %v1232_v46, %v8196_v2 }
 0x1af   :  { %6485 = vsinq.f32 %v1067_v18  ;;  %v944_v15 = vclz %v5908_v4  ;;  %v8199_v3 = vmul.u32.u64.low %v1233_v22, %v1228_v43  ;;  %v8200_v38 = vmul.u32.u64.high %v1233_v22, %v1228_v43, %v8199_v3 }
 0x1b0   :  { %v8206_v44 = vsel %vm3050_vm14, %v7869_v21, 0  ;;  %v8210_v13 = vshrl.u32 %v3351_v50, 23  ;;  %v1224_v57 = vsel %vm1218_vm3, %v1221_v0, %v1223_v53  ;;  %v12497_v47 = vand.u32 2147483647, %v12644_v56 }
 0x1b1   :  { %v8216_v24 = vshrl.u32 %v8117_v54, 5  ;;  %v8220_v6 = vshrl.u32 %v3454_v23, 23  ;;  %vm878_vm1 = vcmp.lt.s32.totalorder %v12633_v11, 0  ;;  %v5909_v21 = vadd.s32 4294967294, %v944_v15 }
 0x1b2   :  { %vm1077_vm4 = vcmp.eq.s32.totalorder %v8125_v51, 2  ;;  %v932_v50 = vadd.s32 %v8102_v34, %v8098_v42  ;;  %vm1242_vm5 = vc.u32 %v8197_v20, %v8199_v3  ;;  %v1100_v59 = vshrl.u32 %v12606_v9, %v12646_v5 }
 0x1b3   :  { %12645 = vst [vmem:[#allocation15_spill] sm:$0xff] %v8216_v24  ;;  %vm1074_vm6 = vcmp.eq.s32.totalorder %v8125_v51, 0  ;;  %vm5910_vm7 = vcmp.lt.s32.totalorder %v5909_v21, 0  ;;  %v8233_v23 = vsel %vm878_vm1, %v962_v31, %v938_v41  ;;  %v1240_v35 = vmul.u32 %v1233_v22, %v1224_v57 }
 0x1b4   :  { %v1243_v26 = vadd.s32 1, %v8200_v38  ;;  %vm1073_vm8 = vcmp.lt.s32.totalorder %v8125_v51, 2  ;;  %v947_v17 = vsel %vm5910_vm7, 0, %v5909_v21  ;;  %v1089_v42 = vand.u32 8388607, %v12497_v47 }
 0x1b5   :  { %v8241_v34 = vshrl.u32 %v12603_v48, %v12646_v5  ;;  %v1099_v14 = vshll.u32 %v12603_v48, %v12647_v52  ;;  %vm1071_vm9 = vweird.f32 %v7073_v29  ;;  %v948_v41 = vsub.s32 32, %v947_v17 }
 0x1b6   :  { %v952_v40 = vsub.s32 4294967266, %v947_v17  ;;  %v1244_v10 = vsel %vm1242_vm5, %v1243_v26, %v8200_v38  ;;  %v1102_v61 = vshll.u32 %v12606_v9, %v12647_v52  ;;  %v1103_v43 = vshrl.u32 %v12607_v27, %v12646_v5 }
 0x1b7   :  { %v1245_v63 = vadd.s32 %v1244_v10, %v1240_v35  ;;  %v1101_v1 = vor.u32 %v1100_v59, %v1099_v14  ;;  %v1106_v46 = vshrl.u32 %v12601_v55, %v12646_v5  ;;  %v949_v22 = vshll.u32 %v8168_v49, %v947_v17 }
 0x1b8   :  { %v950_v18 = vshrl.u32 %v932_v50, %v948_v41  ;;  %v953_v4 = vadd.s32 127, %v952_v40  ;;  %v1109_v0 = vshrl.u32 %v12608_v39, %v12646_v5  ;;  %v6484_v53 = vpop.eup %6483  ;;  %v1090_v2 = vor.u32 8388608, %v1089_v42 }
 0x1b9   :  { %v1246_v31 = vadd.s32 536870912, %v1245_v63  ;;  %v1105_v15 = vshll.u32 %v12607_v27, %v12647_v52  ;;  %v1108_v38 = vshll.u32 %v12601_v55, %v12647_v52  ;;  %v6486_v57 = vpop.eup %6485  ;;  %v1078_v21 = vxor.u32 2147483648, %v6484_v53 }
 0x1ba   :  { %vm8262_vm10 = vcmp.le.f32.partialorder %v876_v7, 0.7853982  ;;  %v951_v50 = vor.u32 %v950_v18, %v949_v22  ;;  %v954_v59 = vshll.u32 %v953_v4, 23  ;;  %v1112_v35 = vshrl.u32 %v12609_v60, %v12646_v5  ;;  %v12650_v4 = vld [vmem:[#allocation39_spill] sm:$0xff] }
 0x1bb   :  { %v1075_v26 = vxor.u32 2147483648, %v6486_v57  ;;  %v1247_v17 = vshrl.u32 %v1246_v31, 30  ;;  %v1104_v42 = vor.u32 %v1103_v43, %v1102_v61  ;;  %v1107_v14 = vor.u32 %v1106_v46, %v1105_v15 }
 0x1bc   :  { %v1079_v41 = vsel %vm1077_vm4, %v1078_v21, %v6486_v57  ;;  %v955_v40 = vor.u32 4788187, %v954_v59  ;;  %vm1187_vm11 = vcmp.lt.s32.totalorder %v12640_v62, 0  ;;  %v1110_v10 = vor.u32 %v1109_v0, %v1108_v38 }
 0x1bd   :  { %v1111_v7 = vshll.u32 %v12608_v39, %v12647_v52  ;;  %v1076_v22 = vsel %vm1074_vm6, %v6484_v53, %v1075_v26  ;;  %v1248_v18 = vshll.u32 %v1247_v17, 30  ;;  %vm1114_vm12 = vcmp.lt.s32.totalorder %v12650_v4, 1 }
 0x1be   :  { %vm1115_vm13 = vcmp.lt.s32.totalorder %v12650_v4, 2  ;;  %v1080_v5 = vsel %vm1073_vm8, %v1076_v22, %v1079_v41  ;;  %v956_v61 = vand.u32 2147483647, %v955_v40  ;;  %v958_v43 = vcvt.s32.f32 %v951_v50 }
 0x1bf   :  { %v1113_v46 = vor.u32 %v1112_v35, %v1111_v7  ;;  %v1081_v0 = vsel %vm1071_vm9, nan, %v1080_v5  ;;  %v8281_v31 = vsub.s32 %v1245_v63, %v1248_v18  ;;  %vm1117_vm14 = vcmp.lt.s32.totalorder %v12650_v4, 4 }
 0x1c0   :  { %v1122_v52 = vsel %vm1114_vm12, %v1101_v1, %v1104_v42  ;;  %4290 = vmatprep.mubr.f32.mxu0 %v1081_v0  ;;  %v959_v53 = vmul.f32 %v958_v43, %v956_v61  ;;  %vm1116_vm15 = vcmp.lt.s32.totalorder %v12650_v4, 3  ;;  %v1119_v15 = vsel %vm1117_vm14, %v1107_v14, 2102212464 }
 0x1c1   :  { %v1123_v51 = vsel %vm1117_vm14, %v1110_v10, 920167782  ;;  %v1251_v38 = vsub.s32 0, %v8281_v31  ;;  %v1271_v57 = vsub.s32 4, %v1247_v17  ;;  %v1126_v63 = vsel %vm1114_vm12, %v1104_v42, %v1107_v14 }
 0x1c2   :  { %v1124_v29 = vsel %vm1116_vm15, %v1107_v14, %v1123_v51  ;;  %v960_v21 = vxor.u32 2147483648, %v959_v53  ;;  %v1127_v59 = vsel %vm1117_vm14, %v1113_v46, 1326507024  ;;  %v1130_v35 = vshll.u32 %v1090_v2, 8 }
 0x1c3   :  { %v1125_v50 = vsel %vm1115_vm13, %v1122_v52, %v1124_v29  ;;  %v965_v26 = vsel %vm8262_vm10, 0, %v8233_v23  ;;  %v5920_v41 = vmin.u32 %v1251_v38, %v8281_v31  ;;  %v1118_v40 = vsel %vm1114_vm12, %v8241_v34, %v1101_v1  ;;  %v12656_v38 = vld [vmem:[#allocation17_spill] sm:$0xff] }
 0x1c4   :  { %v1120_v7 = vsel %vm1116_vm15, %v1104_v42, %v1119_v15  ;;  %v961_v14 = vsel %vm878_vm1, %v960_v21, %v959_v53  ;;  %v1128_v22 = vsel %vm1116_vm15, %v1110_v10, %v1127_v59  ;;  %v1272_v34 = vsel %vm1187_vm11, %v1271_v57, %v1247_v17  ;;  %v12657_v21 = vld [vmem:[#allocation35_spill] sm:$0xff]  ;;  %v12658_v59 = vld [vmem:[#allocation38_spill] sm:$0xff] }
 0x1c5   :  { %v8307_v2 = vmul.u32.u64.low %v1130_v35, %v1125_v50  ;;  %v8308_v18 = vmul.u32.u64.high %v1130_v35, %v1125_v50, %v8307_v2  ;;  %v964_v23 = vsel %vm8262_vm10, %v12633_v11, %v961_v14  ;;  %v1253_v5 = vclz %v5920_v41 }
 0x1c6   :  { %v1129_v1 = vsel %vm1115_vm13, %v1126_v63, %v1128_v22  ;;  %6487 = vcosq.f32 %v964_v23  ;;  %v8318_v42 = vand.u32 3, %v965_v26  ;;  %vm8325_vm0 = vcmp.le.f32.partialorder %v1185_v30, 0.7853982 }
 0x1c7   :  { %v8320_v61 = vmul.u32.u64.low %v1130_v35, %v1129_v1  ;;  %v8321_v10 = vmul.u32.u64.high %v1130_v35, %v1129_v1, %v8320_v61  ;;  %6489 = vsinq.f32 %v964_v23  ;;  %v5921_v49 = vadd.s32 4294967294, %v1253_v5 }
 0x1c8   :  { %v1121_v17 = vsel %vm1115_vm13, %v1118_v40, %v1120_v7  ;;  %v8332_v46 = vand.u32 31, %v8117_v54  ;;  %v8335_v0 = vshrl.u32 %v8206_v44, 5  ;;  %v1274_v52 = vsel %vm8325_vm0, 0, %v1272_v34 }
 0x1c9   :  { %v1140_v53 = vadd.s32 1, %v8308_v18  ;;  %v8341_v30 = vand.u32 31, %v8206_v44  ;;  %v8344_v15 = vadd.s32 1, %v8107_v16  ;;  %v1241_v4 = vadd.s32 %v8199_v3, %v8197_v20 }
 0x1ca   :  { %12653 = vst [vmem:[#allocation24_spill] sm:$0xff] %v8332_v46  ;;  %12654 = vst [vmem:[#allocation28_spill] sm:$0xff] %v8335_v0  ;;  %vm5922_vm2 = vcmp.lt.s32.totalorder %v5921_v49, 0  ;;  %vm974_vm3 = vcmp.eq.s32.totalorder %v8318_v42, 2  ;;  %v1137_v51 = vmul.u32 %v1130_v35, %v1121_v17  ;;  %vm1139_vm1 = vc.u32 %v8321_v10, %v8307_v2 }
 0x1cb   :  { %12655 = vst [vmem:[#allocation27_spill] sm:$0xff] %v8341_v30  ;;  %v1256_v54 = vsel %vm5922_vm2, 0, %v5921_v49  ;;  %v12496_v57 = vand.u32 2147483647, %v12656_v38  ;;  %vm971_vm4 = vcmp.eq.s32.totalorder %v8318_v42, 0  ;;  %v8353_v63 = vand.u32 3, %v1274_v52 }
 0x1cc   :  { %v1257_v44 = vsub.s32 32, %v1256_v54  ;;  %v1261_v29 = vsub.s32 4294967266, %v1256_v54  ;;  %v1141_v16 = vsel %vm1139_vm1, %v1140_v53, %v8308_v18  ;;  %vm970_vm5 = vcmp.lt.s32.totalorder %v8318_v42, 2 }
 0x1cd   :  { %v1258_v20 = vshll.u32 %v8281_v31, %v1256_v54  ;;  %v1142_v3 = vadd.s32 %v1141_v16, %v1137_v51  ;;  %v1408_v50 = vshll.u32 %v12603_v48, %v12657_v21  ;;  %v1409_v35 = vshrl.u32 %v12606_v9, %v12658_v59 }
 0x1ce   :  { %vm968_vm6 = vweird.f32 %v12633_v11  ;;  %v1259_v26 = vshrl.u32 %v1241_v4, %v1257_v44  ;;  %v1262_v41 = vadd.s32 127, %v1261_v29  ;;  %v1414_v40 = vshll.u32 %v12607_v27, %v12657_v21 }
 0x1cf   :  { %v1415_v7 = vshrl.u32 %v12601_v55, %v12658_v59  ;;  %v1143_v14 = vadd.s32 536870912, %v1142_v3  ;;  %v1398_v31 = vand.u32 8388607, %v12496_v57  ;;  %v1411_v22 = vshll.u32 %v12606_v9, %v12657_v21 }
 0x1d0   :  { %v1412_v18 = vshrl.u32 %v12607_v27, %v12658_v59  ;;  %v1260_v23 = vor.u32 %v1259_v26, %v1258_v20  ;;  %v1263_v5 = vshll.u32 %v1262_v41, 23  ;;  %v1417_v34 = vshll.u32 %v12601_v55, %v12657_v21  ;;  %v6488_v61 = vpop.eup %6487 }
 0x1d1   :  { %v1418_v1 = vshrl.u32 %v12608_v39, %v12658_v59  ;;  %v1144_v49 = vshrl.u32 %v1143_v14, 30  ;;  %v1407_v17 = vshrl.u32 %v12603_v48, %v12658_v59  ;;  %v1410_v52 = vor.u32 %v1409_v35, %v1408_v50  ;;  %v6490_v4 = vpop.eup %6489 }
 0x1d2   :  { %v1420_v53 = vshll.u32 %v12608_v39, %v12657_v21  ;;  %v975_v54 = vxor.u32 2147483648, %v6488_v61  ;;  %v1264_v51 = vor.u32 4788187, %v1263_v5  ;;  %v1416_v44 = vor.u32 %v1415_v7, %v1414_v40  ;;  %v12659_v5 = vld [vmem:[#allocation37_spill] sm:$0xff] }
 0x1d3   :  { %v1421_v29 = vshrl.u32 %v12609_v60, %v12658_v59  ;;  %v972_v16 = vxor.u32 2147483648, %v6490_v4  ;;  %v1145_v20 = vshll.u32 %v1144_v49, 30  ;;  %v1399_v26 = vor.u32 8388608, %v1398_v31 }
 0x1d4   :  { %v1413_v41 = vor.u32 %v1412_v18, %v1411_v22  ;;  %v976_v14 = vsel %vm974_vm3, %v975_v54, %v6490_v4  ;;  %v1265_v57 = vand.u32 2147483647, %v1264_v51  ;;  %v1267_v47 = vcvt.s32.f32 %v1260_v23 }
 0x1d5   :  { %v1419_v50 = vor.u32 %v1418_v1, %v1417_v34  ;;  %v973_v21 = vsel %vm971_vm4, %v6488_v61, %v972_v16  ;;  %v8387_v35 = vsub.s32 %v1142_v3, %v1145_v20  ;;  %vm1423_vm7 = vcmp.lt.s32.totalorder %v12659_v5, 1 }
 0x1d6   :  { %vm1426_vm8 = vcmp.lt.s32.totalorder %v12659_v5, 4  ;;  %v977_v59 = vsel %vm970_vm5, %v973_v21, %v976_v14  ;;  %v1268_v40 = vmul.f32 %v1267_v47, %v1265_v57  ;;  %v1422_v7 = vor.u32 %v1421_v29, %v1420_v53 }
 0x1d7   :  { %v1428_v31 = vsel %vm1426_vm8, %v1416_v44, 2102212464  ;;  %v978_v22 = vsel %vm968_vm6, nan, %v977_v59  ;;  %v1148_v18 = vsub.s32 0, %v8387_v35  ;;  %v1168_v23 = vsub.s32 4, %v1144_v49 }
 0x1d8   :  { %vm1424_vm9 = vcmp.lt.s32.totalorder %v12659_v5, 2  ;;  %4291 = vmatmul.mubr.f32.gmra.mrb[6].mxu0 %v978_v22  ;;  %v1269_v3 = vxor.u32 2147483648, %v1268_v40  ;;  %vm1425_vm10 = vcmp.lt.s32.totalorder %v12659_v5, 3  ;;  %v1431_v42 = vsel %vm1423_vm7, %v1410_v52, %v1413_v41 }
 0x1d9   :  { %v1432_v47 = vsel %vm1426_vm8, %v1419_v50, 920167782  ;;  %v5916_v57 = vmin.u32 %v1148_v18, %v8387_v35  ;;  %v1427_v11 = vsel %vm1423_vm7, %v1407_v17, %v1410_v52  ;;  %v1429_v34 = vsel %vm1425_vm10, %v1413_v41, %v1428_v31 }
 0x1da   :  { %v1435_v1 = vsel %vm1423_vm7, %v1413_v41, %v1416_v44  ;;  %v1270_v61 = vsel %vm1187_vm11, %v1269_v3, %v1268_v40  ;;  %v1433_v53 = vsel %vm1425_vm10, %v1416_v44, %v1432_v47  ;;  %v1436_v4 = vsel %vm1426_vm8, %v1422_v7, 1326507024 }
 0x1db   :  { %v1439_v54 = vshll.u32 %v1399_v26, 8  ;;  %v1273_v51 = vsel %vm8325_vm0, %v12640_v62, %v1270_v61  ;;  %v1150_v29 = vclz %v5916_v57  ;;  %v1434_v17 = vsel %vm1424_vm9, %v1431_v42, %v1433_v53  ;;  %v12665_v42 = vld [vmem:[#allocation16_spill] sm:$0xff] }
 0x1dc   :  { %v1437_v52 = vsel %vm1425_vm10, %v1419_v50, %v1436_v4  ;;  %6491 = vcosq.f32 %v1273_v51  ;;  %v8428_v43 = vadd.s32 1, %v8110_v37  ;;  %v8431_v21 = vadd.s32 4294967169, %v8210_v13  ;;  %v12667_v53 = vld [vmem:[#allocation36_spill] sm:$0xff] }
 0x1dd   :  { %v1438_v16 = vsel %vm1424_vm9, %v1435_v1, %v1437_v52  ;;  %v8420_v20 = vmul.u32.u64.low %v1439_v54, %v1434_v17  ;;  %v8421_v41 = vmul.u32.u64.high %v1439_v54, %v1434_v17, %v8420_v20  ;;  %6493 = vsinq.f32 %v1273_v51  ;;  %v12666_v1 = vld [vmem:[#allocation33_spill] sm:$0xff] }
 0x1de   :  { %v5917_v44 = vadd.s32 4294967294, %v1150_v29  ;;  %v8424_v26 = vmul.u32.u64.low %v1439_v54, %v1438_v16  ;;  %v8425_v14 = vmul.u32.u64.high %v1439_v54, %v1438_v16, %v8424_v26  ;;  %v8434_v50 = vadd.s32 4294967169, %v8220_v6 }
 0x1df   :  { %vm1084_vm11 = vcmp.lt.s32.totalorder %v12644_v56, 0  ;;  %v8438_v59 = vsub.s32 32, %v8332_v46  ;;  %v1430_v7 = vsel %vm1424_vm9, %v1427_v11, %v1429_v34  ;;  %v8445_v37 = vsub.s32 32, %v8341_v30 }
 0x1e0   :  { %vm5918_vm12 = vcmp.lt.s32.totalorder %v5917_v44, 0  ;;  %v1169_v40 = vsel %vm1084_vm11, %v1168_v23, %v1144_v49  ;;  %v12662_v13 = vand.u32 2147483647, %v12644_v56  ;;  %v1449_v22 = vadd.s32 1, %v8421_v41 }
 0x1e1   :  { %12660 = vst [vmem:[#allocation19_spill] sm:$0xff] %v8438_v59  ;;  %12661 = vst [vmem:[#allocation48_spill] sm:$0xff] %v8445_v37  ;;  %v1153_v31 = vsel %vm5918_vm12, 0, %v5917_v44  ;;  %vm1280_vm14 = vcmp.eq.s32.totalorder %v8353_v63, 0  ;;  %vm1283_vm15 = vcmp.eq.s32.totalorder %v8353_v63, 2  ;;  %v1138_v49 = vadd.s32 %v8307_v2, %v8321_v10 }
 0x1e2   :  { %vm8449_vm13 = vcmp.le.f32.partialorder %v12662_v13, 0.7853982  ;;  %v1154_v5 = vsub.s32 32, %v1153_v31  ;;  %v1158_v18 = vsub.s32 4294967266, %v1153_v31  ;;  %vm1279_vm0 = vcmp.lt.s32.totalorder %v8353_v63, 2 }
 0x1e3   :  { %v1171_v23 = vsel %vm8449_vm13, 0, %v1169_v40  ;;  %v1446_v3 = vmul.u32 %v1439_v54, %v1430_v7  ;;  %vm1448_vm2 = vc.u32 %v8425_v14, %v8420_v20  ;;  %v12504_v47 = vand.u32 2147483647, %v12665_v42 }
 0x1e4   :  { %vm1277_vm3 = vweird.f32 %v12640_v62  ;;  %v1155_v57 = vshll.u32 %v8387_v35, %v1153_v31  ;;  %v1156_v11 = vshrl.u32 %v1138_v49, %v1154_v5  ;;  %v1159_v34 = vadd.s32 127, %v1158_v18 }
 0x1e5   :  { %v1450_v2 = vsel %vm1448_vm2, %v1449_v22, %v8421_v41  ;;  %v1305_v61 = vshll.u32 %v12603_v48, %v12666_v1  ;;  %v1306_v4 = vshrl.u32 %v12606_v9, %v12667_v53  ;;  %v1308_v54 = vshll.u32 %v12606_v9, %v12666_v1 }
 0x1e6   :  { %v1451_v10 = vadd.s32 %v1450_v2, %v1446_v3  ;;  %v1157_v51 = vor.u32 %v1156_v11, %v1155_v57  ;;  %v1160_v29 = vshll.u32 %v1159_v34, 23  ;;  %v1309_v17 = vshrl.u32 %v12607_v27, %v12667_v53  ;;  %v6492_v52 = vpop.eup %6491 }
 0x1e7   :  { %v1311_v35 = vshll.u32 %v12607_v27, %v12666_v1  ;;  %v1312_v41 = vshrl.u32 %v12601_v55, %v12667_v53  ;;  %v1314_v44 = vshll.u32 %v12601_v55, %v12666_v1  ;;  %v1315_v26 = vshrl.u32 %v12608_v39, %v12667_v53  ;;  %v6494_v40 = vpop.eup %6493 }
 0x1e8   :  { %v1452_v16 = vadd.s32 536870912, %v1451_v10  ;;  %v1284_v7 = vxor.u32 2147483648, %v6492_v52  ;;  %v1161_v13 = vor.u32 4788187, %v1160_v29  ;;  %v1317_v31 = vshll.u32 %v12608_v39, %v12666_v1 }
 0x1e9   :  { %v1318_v22 = vshrl.u32 %v12609_v60, %v12667_v53  ;;  %v1281_v49 = vxor.u32 2147483648, %v6494_v40  ;;  %v1295_v18 = vand.u32 8388607, %v12504_v47  ;;  %v1307_v3 = vor.u32 %v1306_v4, %v1305_v61 }
 0x1ea   :  { %v8487_v5 = vshrl.u32 %v1452_v16, 30  ;;  %v1285_v57 = vsel %vm1283_vm15, %v1284_v7, %v6494_v40  ;;  %v1162_v11 = vand.u32 2147483647, %v1161_v13  ;;  %v1164_v34 = vcvt.s32.f32 %v1157_v51 }
 0x1eb   :  { %v1310_v2 = vor.u32 %v1309_v17, %v1308_v54  ;;  %v1282_v29 = vsel %vm1280_vm14, %v6492_v52, %v1281_v49  ;;  %v1313_v45 = vor.u32 %v1312_v41, %v1311_v35  ;;  %v1316_v32 = vor.u32 %v1315_v26, %v1314_v44  ;;  %v12668_v35 = vld [vmem:[#allocation34_spill] sm:$0xff] }
 0x1ec   :  { %v1454_v1 = vshll.u32 %v8487_v5, 30  ;;  %v1286_v16 = vsel %vm1279_vm0, %v1282_v29, %v1285_v57  ;;  %v1165_v24 = vmul.f32 %v1164_v34, %v1162_v11  ;;  %v8498_v46 = vand.u32 3, %v1171_v23  ;;  %v12669_v29 = vld [vmem:[#allocation13_spill] sm:$0xff] }
 0x1ed   :  { %v1319_v61 = vor.u32 %v1318_v22, %v1317_v31  ;;  %v1287_v4 = vsel %vm1277_vm3, nan, %v1286_v16  ;;  %v1296_v54 = vor.u32 8388608, %v1295_v18  ;;  %v1304_v51 = vshrl.u32 %v12603_v48, %v12667_v53  ;;  %v187_v31 = vpop.permute.xlu0 %186 }
 0x1ee   :  { %v8502_v40 = vsub.s32 %v1451_v10, %v1454_v1  ;;  %4295 = vmatprep.mubr.f32.mxu0 %v1287_v4  ;;  %v1166_v17 = vxor.u32 2147483648, %v1165_v24  ;;  %vm1320_vm1 = vcmp.lt.s32.totalorder %v12668_v35, 1  ;;  %vm1322_vm4 = vcmp.lt.s32.totalorder %v12668_v35, 3 }
 0x1ef   :  { %vm1323_vm5 = vcmp.lt.s32.totalorder %v12668_v35, 4  ;;  %v1328_v52 = vsel %vm1320_vm1, %v1307_v3, %v1310_v2  ;;  %v1332_v53 = vsel %vm1320_vm1, %v1310_v2, %v1313_v45  ;;  %vm1321_vm6 = vcmp.lt.s32.totalorder %v12668_v35, 2  ;;  %v12674_v35 = vld [vmem:[#allocation60_spill] sm:$0xff] }
 0x1f0   :  { %v1457_v63 = vsub.s32 0, %v8502_v40  ;;  %v1325_v23 = vsel %vm1323_vm5, %v1313_v45, 2102212464  ;;  %v1329_v62 = vsel %vm1323_vm5, %v1316_v32, 920167782  ;;  %v1167_v10 = vsel %vm1084_vm11, %v1166_v17, %v1165_v24 }
 0x1f1   :  { %v1330_v41 = vsel %vm1322_vm4, %v1313_v45, %v1329_v62  ;;  %v1333_v44 = vsel %vm1323_vm5, %v1319_v61, 1326507024  ;;  %v1170_v26 = vsel %vm8449_vm13, %v12644_v56, %v1167_v10  ;;  %v1324_v13 = vsel %vm1320_vm1, %v1304_v51, %v1307_v3 }
 0x1f2   :  { %v5928_v7 = vmin.u32 %v1457_v63, %v8502_v40  ;;  %6495 = vcosq.f32 %v1170_v26  ;;  %v1331_v22 = vsel %vm1321_vm6, %v1328_v52, %v1330_v41  ;;  %v1334_v24 = vsel %vm1322_vm4, %v1316_v32, %v1333_v44  ;;  %v12671_v32 = vld [vmem:[#allocation14_spill] sm:$0xff]  ;;  %v12673_v63 = vld [vmem:[#allocation23_spill] sm:$0xff] }
 0x1f3   :  { %v1336_v49 = vshll.u32 %v1296_v54, 8  ;;  %6497 = vsinq.f32 %v1170_v26  ;;  %v1326_v6 = vsel %vm1322_vm4, %v1310_v2, %v1325_v23  ;;  %v1335_v18 = vsel %vm1321_vm6, %v1332_v53, %v1334_v24  ;;  %v12678_v26 = vld [vmem:[#allocation50_spill] sm:$0xff] }
 0x1f4   :  { %v1459_v45 = vclz %v5928_v7  ;;  %v8535_v1 = vmul.f32 %v12669_v29, %v187_v31  ;;  %v8538_v16 = vmul.f32 %v12671_v32, %v187_v31  ;;  %v1477_v4 = vsub.s32 4, %v8487_v5 }
 0x1f5   :  { %v8527_v57 = vmul.u32.u64.low %v1336_v49, %v1335_v18  ;;  %v8528_v11 = vmul.u32.u64.high %v1336_v49, %v1335_v18, %v8527_v57  ;;  %v8530_v3 = vmul.u32.u64.low %v1336_v49, %v1331_v22  ;;  %v8531_v34 = vmul.u32.u64.high %v1336_v49, %v1331_v22, %v8530_v3 }
 0x1f6   :  { %12670 = vst [vmem:[#allocation42_spill] sm:$0xff] %v8535_v1  ;;  %12672 = vst [vmem:[#allocation41_spill] sm:$0xff] %v8538_v16  ;;  %v5929_v61 = vadd.s32 4294967294, %v1459_v45  ;;  %v8542_v2 = vadd.s32 1, %v8431_v21  ;;  %v8545_v54 = vadd.s32 1, %v8434_v50  ;;  %vm1393_vm7 = vcmp.lt.s32.totalorder %v12656_v38, 0 }
 0x1f7   :  { %v1327_v51 = vsel %vm1321_vm6, %v1324_v13, %v1326_v6  ;;  %vm1177_vm8 = vcmp.eq.s32.totalorder %v8498_v46, 0  ;;  %vm1180_vm9 = vcmp.eq.s32.totalorder %v8498_v46, 2  ;;  %v1447_v17 = vadd.s32 %v8420_v20, %v8425_v14 }
 0x1f8   :  { %vm5930_vm10 = vcmp.lt.s32.totalorder %v5929_v61, 0  ;;  %v12503_v23 = vand.u32 2147483647, %v12673_v63  ;;  %vm1176_vm11 = vcmp.lt.s32.totalorder %v8498_v46, 2  ;;  %vm1345_vm12 = vc.u32 %v8528_v11, %v8530_v3 }
 0x1f9   :  { %v1462_v21 = vsel %vm5930_vm10, 0, %v5929_v61  ;;  %v1346_v50 = vadd.s32 1, %v8531_v34  ;;  %v1615_v52 = vshrl.u32 %v12606_v9, %v12674_v35  ;;  %vm1174_vm13 = vweird.f32 %v12644_v56 }
 0x1fa   :  { %v12675_v62 = vand.u32 2147483647, %v12656_v38  ;;  %v1463_v14 = vsub.s32 32, %v1462_v21  ;;  %v1467_v10 = vsub.s32 4294967266, %v1462_v21  ;;  %v8571_v41 = vsel %vm1393_vm7, %v1477_v4, %v8487_v5 }
 0x1fb   :  { %v1343_v53 = vmul.u32 %v1336_v49, %v1327_v51  ;;  %v1347_v44 = vsel %vm1345_vm12, %v1346_v50, %v8531_v34  ;;  %v1614_v7 = vshll.u32 %v12603_v48, %v12678_v26  ;;  %v1617_v13 = vshll.u32 %v12606_v9, %v12678_v26 }
 0x1fc   :  { %vm8564_vm14 = vcmp.le.f32.partialorder %v12675_v62, 0.7853982  ;;  %v1618_v31 = vshrl.u32 %v12607_v27, %v12674_v35  ;;  %v1464_v22 = vshll.u32 %v8502_v40, %v1462_v21  ;;  %v1465_v24 = vshrl.u32 %v1447_v17, %v1463_v14  ;;  %v6496_v18 = vpop.eup %6495 }
 0x1fd   :  { %v1468_v45 = vadd.s32 127, %v1467_v10  ;;  %v1348_v6 = vadd.s32 %v1347_v44, %v1343_v53  ;;  %v1604_v5 = vand.u32 8388607, %v12503_v23  ;;  %v1616_v49 = vor.u32 %v1615_v52, %v1614_v7  ;;  %v6498_v61 = vpop.eup %6497 }
 0x1fe   :  { %v1621_v57 = vshrl.u32 %v12601_v55, %v12674_v35  ;;  %v1624_v34 = vshrl.u32 %v12608_v39, %v12674_v35  ;;  %v1181_v4 = vxor.u32 2147483648, %v6496_v18  ;;  %v1466_v51 = vor.u32 %v1465_v24, %v1464_v22 }
 0x1ff   :  { %v1469_v50 = vshll.u32 %v1468_v45, 23  ;;  %v1349_v62 = vadd.s32 536870912, %v1348_v6  ;;  %v1178_v40 = vxor.u32 2147483648, %v6498_v61  ;;  %v1620_v17 = vshll.u32 %v12607_v27, %v12678_v26 }
 0x200   :  { %v1623_v21 = vshll.u32 %v12601_v55, %v12678_v26  ;;  %v1627_v52 = vshrl.u32 %v12609_v60, %v12674_v35  ;;  %v1182_v14 = vsel %vm1180_vm9, %v1181_v4, %v6498_v61  ;;  %v1619_v44 = vor.u32 %v1618_v31, %v1617_v13 }
 0x201   :  { %v1470_v10 = vor.u32 4788187, %v1469_v50  ;;  %v1350_v53 = vshrl.u32 %v1349_v62, 30  ;;  %v1179_v7 = vsel %vm1177_vm8, %v6496_v18, %v1178_v40  ;;  %v1622_v22 = vor.u32 %v1621_v57, %v1620_v17 }
 0x202   :  { %v1625_v24 = vor.u32 %v1624_v34, %v1623_v21  ;;  %v1626_v45 = vshll.u32 %v12608_v39, %v12678_v26  ;;  %vm2741_vm15 = vcmp.gt.s32.totalorder %v8344_v15, 0  ;;  %vm2844_vm0 = vcmp.gt.s32.totalorder %v8428_v43, 0 }
 0x203   :  { %v1183_v23 = vsel %vm1176_vm11, %v1179_v7, %v1182_v14  ;;  %v1471_v47 = vand.u32 2147483647, %v1470_v10  ;;  %v1473_v61 = vcvt.s32.f32 %v1466_v51  ;;  %vm1290_vm2 = vcmp.lt.s32.totalorder %v12665_v42, 0  ;;  %v12679_v51 = vld [vmem:[#allocation59_spill] sm:$0xff] }
 0x204   :  { %v1351_v13 = vshll.u32 %v1350_v53, 30  ;;  %v1184_v31 = vsel %vm1174_vm13, nan, %v1183_v23  ;;  %v1480_v18 = vsel %vm8564_vm14, 0, %v8571_v41  ;;  %v1613_v26 = vshrl.u32 %v12603_v48, %v12674_v35 }
 0x205   :  { %v1628_v57 = vor.u32 %v1627_v52, %v1626_v45  ;;  %4296 = vmatmul.mubr.f32.gmra.mrb[8].mxu0 %v1184_v31  ;;  %v1474_v34 = vmul.f32 %v1473_v61, %v1471_v47  ;;  %v1605_v4 = vor.u32 8388608, %v1604_v5  ;;  %vm1632_vm3 = vcmp.lt.s32.totalorder %v12679_v51, 4 }
 0x206   :  { %v8611_v46 = vsub.s32 %v1348_v6, %v1351_v13  ;;  %vm1629_vm1 = vcmp.lt.s32.totalorder %v12679_v51, 1  ;;  %vm1630_vm4 = vcmp.lt.s32.totalorder %v12679_v51, 2  ;;  %v1634_v56 = vsel %vm1632_vm3, %v1622_v22, 2102212464 }
 0x207   :  { %v1638_v23 = vsel %vm1632_vm3, %v1625_v24, 920167782  ;;  %v1475_v50 = vxor.u32 2147483648, %v1474_v34  ;;  %vm1631_vm5 = vcmp.lt.s32.totalorder %v12679_v51, 3  ;;  %v1637_v35 = vsel %vm1629_vm1, %v1616_v49, %v1619_v44 }
 0x208   :  { %v1354_v41 = vsub.s32 0, %v8611_v46  ;;  %v1374_v62 = vsub.s32 4, %v1350_v53  ;;  %v1639_v40 = vsel %vm1631_vm5, %v1622_v22, %v1638_v23  ;;  %v1641_v47 = vsel %vm1629_vm1, %v1619_v44, %v1622_v22 }
 0x209   :  { %v1642_v6 = vsel %vm1632_vm3, %v1628_v57, 1326507024  ;;  %v1476_v5 = vsel %vm1393_vm7, %v1475_v50, %v1474_v34  ;;  %v1633_v21 = vsel %vm1629_vm1, %v1613_v26, %v1616_v49  ;;  %v1635_v52 = vsel %vm1631_vm5, %v1619_v44, %v1634_v56 }
 0x20a   :  { %v5924_v17 = vmin.u32 %v1354_v41, %v8611_v46  ;;  %v1479_v14 = vsel %vm8564_vm14, %v12656_v38, %v1476_v5  ;;  %v1640_v10 = vsel %vm1630_vm4, %v1637_v35, %v1639_v40  ;;  %v1643_v7 = vsel %vm1631_vm5, %v1625_v24, %v1642_v6  ;;  %v12685_v5 = vld [vmem:[#allocation49_spill] sm:$0xff] }
 0x20b   :  { %v1645_v45 = vshll.u32 %v1605_v4, 8  ;;  %6499 = vcosq.f32 %v1479_v14  ;;  %v8626_v61 = vand.u32 3, %v1480_v18  ;;  %v1644_v13 = vsel %vm1630_vm4, %v1641_v47, %v1643_v7  ;;  %v12680_v4 = vld [vmem:[#allocation22_spill] sm:$0xff] }
 0x20c   :  { %v1356_v22 = vclz %v5924_v17  ;;  %6501 = vsinq.f32 %v1479_v14  ;;  %v8632_v49 = vsel %vm1290_vm2, %v1374_v62, %v1350_v53  ;;  %v1636_v24 = vsel %vm1630_vm4, %v1633_v21, %v1635_v52  ;;  %v12684_v47 = vld [vmem:[#allocation58_spill] sm:$0xff] }
 0x20d   :  { %v8634_v44 = vmul.u32.u64.low %v1645_v45, %v1644_v13  ;;  %v8635_v20 = vmul.u32.u64.high %v1645_v45, %v1644_v13, %v8634_v44  ;;  %v8639_v26 = vmul.u32.u64.low %v1645_v45, %v1640_v10  ;;  %v8640_v57 = vmul.u32.u64.high %v1645_v45, %v1640_v10, %v8639_v26 }
 0x20e   :  { %v5925_v31 = vadd.s32 4294967294, %v1356_v22  ;;  %v8646_v18 = vsel %vm2741_vm15, %v8344_v15, 0  ;;  %v8651_v53 = vsel %vm2844_vm0, %v8428_v43, 0  ;;  %v12505_v56 = vand.u32 2147483647, %v12680_v4 }
 0x20f   :  { %vm1489_vm6 = vcmp.eq.s32.totalorder %v8626_v61, 2  ;;  %v12681_v51 = vand.u32 2147483647, %v12665_v42  ;;  %v1344_v15 = vadd.s32 %v8530_v3, %v8528_v11  ;;  %vm1486_vm9 = vcmp.eq.s32.totalorder %v8626_v61, 0 }
 0x210   :  { %vm5926_vm8 = vcmp.lt.s32.totalorder %v5925_v31, 0  ;;  %v1652_v41 = vmul.u32 %v1645_v45, %v1636_v24  ;;  %vm1654_vm10 = vc.u32 %v8635_v20, %v8639_v26  ;;  %vm1485_vm11 = vcmp.lt.s32.totalorder %v8626_v61, 2 }
 0x211   :  { %vm8658_vm7 = vcmp.le.f32.partialorder %v12681_v51, 0.7853982  ;;  %v1359_v43 = vsel %vm5926_vm8, 0, %v5925_v31  ;;  %v1655_v40 = vadd.s32 1, %v8640_v57  ;;  %v1512_v11 = vshrl.u32 %v12606_v9, %v12684_v47 }
 0x212   :  { %v1360_v35 = vsub.s32 32, %v1359_v43  ;;  %v1364_v62 = vsub.s32 4294967266, %v1359_v43  ;;  %vm1483_vm12 = vweird.f32 %v12656_v38  ;;  %v1501_v3 = vand.u32 8388607, %v12505_v56 }
 0x213   :  { %v1510_v6 = vshrl.u32 %v12603_v48, %v12684_v47  ;;  %v1511_v17 = vshll.u32 %v12603_v48, %v12685_v5  ;;  %v1515_v21 = vshrl.u32 %v12607_v27, %v12684_v47  ;;  %v1361_v52 = vshll.u32 %v8611_v46, %v1359_v43 }
 0x214   :  { %v1362_v14 = vshrl.u32 %v1344_v15, %v1360_v35  ;;  %v1365_v10 = vadd.s32 127, %v1364_v62  ;;  %v1656_v7 = vsel %vm1654_vm10, %v1655_v40, %v8640_v57  ;;  %v1514_v22 = vshll.u32 %v12606_v9, %v12685_v5 }
 0x215   :  { %v1657_v45 = vadd.s32 %v1656_v7, %v1652_v41  ;;  %v1518_v13 = vshrl.u32 %v12601_v55, %v12684_v47  ;;  %v1521_v44 = vshrl.u32 %v12608_v39, %v12684_v47  ;;  %v6500_v31 = vpop.eup %6499  ;;  %v1513_v56 = vor.u32 %v1512_v11, %v1511_v17 }
 0x216   :  { %v1363_v24 = vor.u32 %v1362_v14, %v1361_v52  ;;  %v1366_v51 = vshll.u32 %v1365_v10, 23  ;;  %v1524_v46 = vshrl.u32 %v12609_v60, %v12684_v47  ;;  %v6502_v15 = vpop.eup %6501  ;;  %v1490_v43 = vxor.u32 2147483648, %v6500_v31 }
 0x217   :  { %v1658_v57 = vadd.s32 536870912, %v1657_v45  ;;  %v1517_v41 = vshll.u32 %v12607_v27, %v12685_v5  ;;  %v1520_v35 = vshll.u32 %v12601_v55, %v12685_v5  ;;  %v1487_v62 = vxor.u32 2147483648, %v6502_v15 }
 0x218   :  { %v1367_v40 = vor.u32 4788187, %v1366_v51  ;;  %v1516_v7 = vor.u32 %v1515_v21, %v1514_v22  ;;  %v1523_v52 = vshll.u32 %v12608_v39, %v12685_v5  ;;  %v1491_v11 = vsel %vm1489_vm6, %v1490_v43, %v6502_v15  ;;  %v12686_v5 = vld [vmem:[#allocation57_spill] sm:$0xff] }
 0x219   :  { %v1659_v17 = vshrl.u32 %v1658_v57, 30  ;;  %v1519_v47 = vor.u32 %v1518_v13, %v1517_v41  ;;  %v1522_v14 = vor.u32 %v1521_v44, %v1520_v35  ;;  %v1488_v10 = vsel %vm1486_vm9, %v6500_v31, %v1487_v62 }
 0x21a   :  { %v1368_v34 = vand.u32 2147483647, %v1367_v40  ;;  %v1370_v50 = vcvt.s32.f32 %v1363_v24  ;;  %v1525_v59 = vor.u32 %v1524_v46, %v1523_v52  ;;  %v1492_v0 = vsel %vm1485_vm11, %v1488_v10, %v1491_v11 }
 0x21b   :  { %vm1599_vm13 = vcmp.lt.s32.totalorder %v12673_v63, 0  ;;  %v1660_v21 = vshll.u32 %v1659_v17, 30  ;;  %v1502_v22 = vor.u32 8388608, %v1501_v3  ;;  %vm1526_vm14 = vcmp.lt.s32.totalorder %v12686_v5, 1 }
 0x21c   :  { %v1493_v51 = vsel %vm1483_vm12, nan, %v1492_v0  ;;  %v1371_v13 = vmul.f32 %v1370_v50, %v1368_v34  ;;  %vm1528_vm15 = vcmp.lt.s32.totalorder %v12686_v5, 3  ;;  %vm1529_vm0 = vcmp.lt.s32.totalorder %v12686_v5, 4 }
 0x21d   :  { %4300 = vmatprep.mubr.f32.mxu0 %v1493_v51  ;;  %v8711_v44 = vsub.s32 %v1657_v45, %v1660_v21  ;;  %v1534_v61 = vsel %vm1526_vm14, %v1513_v56, %v1516_v7  ;;  %v1535_v31 = vsel %vm1529_vm0, %v1522_v14, 920167782  ;;  %v1538_v3 = vsel %vm1526_vm14, %v1516_v7, %v1519_v47 }
 0x21e   :  { %v1372_v24 = vxor.u32 2147483648, %v1371_v13  ;;  %v1531_v46 = vsel %vm1529_vm0, %v1519_v47, 2102212464  ;;  %v1536_v0 = vsel %vm1528_vm15, %v1519_v47, %v1535_v31  ;;  %v1539_v38 = vsel %vm1529_vm0, %v1525_v59, 1326507024 }
 0x21f   :  { %v1663_v34 = vsub.s32 0, %v8711_v44  ;;  %v1683_v50 = vsub.s32 4, %v1659_v17  ;;  %vm1527_vm3 = vcmp.lt.s32.totalorder %v12686_v5, 2  ;;  %v1540_v45 = vsel %vm1528_vm15, %v1522_v14, %v1539_v38  ;;  %v12694_v38 = vld [vmem:[#allocation56_spill] sm:$0xff] }
 0x220   :  { %v1373_v15 = vsel %vm1290_vm2, %v1372_v24, %v1371_v13  ;;  %v1537_v43 = vsel %vm1527_vm3, %v1534_v61, %v1536_v0  ;;  %v1541_v57 = vsel %vm1527_vm3, %v1538_v3, %v1540_v45  ;;  %v1542_v41 = vshll.u32 %v1502_v22, 8 }
 0x221   :  { %v1376_v59 = vsel %vm8658_vm7, %v12665_v42, %v1373_v15  ;;  %v5936_v35 = vmin.u32 %v1663_v34, %v8711_v44  ;;  %v1530_v62 = vsel %vm1526_vm14, %v1510_v6, %v1513_v56  ;;  %v1532_v40 = vsel %vm1528_vm15, %v1516_v7, %v1531_v46 }
 0x222   :  { %6503 = vcosq.f32 %v1376_v59  ;;  %v12687_v52 = vsel %vm8658_vm7, 0, %v8632_v49  ;;  %v8743_v47 = vmul.u32.u64.low %v1542_v41, %v1541_v57  ;;  %v8744_v14 = vmul.u32.u64.high %v1542_v41, %v1541_v57, %v8743_v47 }
 0x223   :  { %v8741_v11 = vand.u32 3, %v12687_v52  ;;  %6505 = vsinq.f32 %v1376_v59  ;;  %v1665_v10 = vclz %v5936_v35  ;;  %v8751_v56 = vshrl.u32 %v8646_v18, 5 }
 0x224   :  { %v8746_v21 = vmul.u32.u64.low %v1542_v41, %v1537_v43  ;;  %v8747_v22 = vmul.u32.u64.high %v1542_v41, %v1537_v43, %v8746_v21  ;;  %v8756_v23 = vsel %vm1599_vm13, %v1683_v50, %v1659_v17  ;;  %v1533_v49 = vsel %vm1527_vm3, %v1530_v62, %v1532_v40 }
 0x225   :  { %12688 = vst [vmem:[#allocation18_spill] sm:$0xff] %v8751_v56  ;;  %v8761_v7 = vand.u32 31, %v8646_v18  ;;  %v8764_v51 = vshrl.u32 %v8651_v53, 5  ;;  %v12690_v13 = vand.u32 2147483647, %v12673_v63  ;;  %v5937_v31 = vadd.s32 4294967294, %v1665_v10 }
 0x226   :  { %vm1386_vm1 = vcmp.eq.s32.totalorder %v8741_v11, 2  ;;  %v1653_v17 = vadd.s32 %v8639_v26, %v8635_v20  ;;  %vm1551_vm4 = vc.u32 %v8744_v14, %v8746_v21  ;;  %v12693_v18 = vld [vmem:[#allocation21_spill] sm:$0xff]  ;;  %vm1383_vm5 = vcmp.eq.s32.totalorder %v8741_v11, 0  ;;  %v12695_v26 = vld [vmem:[#allocation44_spill] sm:$0xff] }
 0x227   :  { %12689 = vst [vmem:[#allocation47_spill] sm:$0xff] %v8761_v7  ;;  %vm8768_vm2 = vcmp.le.f32.partialorder %v12690_v13, 0.7853982  ;;  %v12508_v5 = vand.u32 2147483647, %v12693_v18  ;;  %vm5938_vm6 = vcmp.lt.s32.totalorder %v5937_v31, 0  ;;  %v1549_v24 = vmul.u32 %v1542_v41, %v1533_v49 }
 0x228   :  { %v1552_v46 = vadd.s32 1, %v8747_v22  ;;  %vm1382_vm7 = vcmp.lt.s32.totalorder %v8741_v11, 2  ;;  %v1668_v0 = vsel %vm5938_vm6, 0, %v5937_v31  ;;  %v1819_v20 = vshrl.u32 %v12603_v48, %v12694_v38 }
 0x229   :  { %v1820_v34 = vshll.u32 %v12603_v48, %v12695_v26  ;;  %v1821_v50 = vshrl.u32 %v12606_v9, %v12694_v38  ;;  %vm1380_vm8 = vweird.f32 %v12665_v42  ;;  %v1669_v45 = vsub.s32 32, %v1668_v0 }
 0x22a   :  { %v1673_v15 = vsub.s32 4294967266, %v1668_v0  ;;  %v1553_v43 = vsel %vm1551_vm4, %v1552_v46, %v8747_v22  ;;  %v1823_v57 = vshll.u32 %v12606_v9, %v12695_v26  ;;  %v1810_v59 = vand.u32 8388607, %v12508_v5 }
 0x22b   :  { %v1554_v41 = vadd.s32 %v1553_v43, %v1549_v24  ;;  %v1824_v35 = vshrl.u32 %v12607_v27, %v12694_v38  ;;  %v1827_v62 = vshrl.u32 %v12601_v55, %v12694_v38  ;;  %v1670_v40 = vshll.u32 %v8711_v44, %v1668_v0 }
 0x22c   :  { %v1671_v52 = vshrl.u32 %v1653_v17, %v1669_v45  ;;  %v1674_v47 = vadd.s32 127, %v1673_v15  ;;  %v1830_v10 = vshrl.u32 %v12608_v39, %v12694_v38  ;;  %v6504_v22 = vpop.eup %6503  ;;  %v1822_v13 = vor.u32 %v1821_v50, %v1820_v34 }
 0x22d   :  { %v1555_v49 = vadd.s32 536870912, %v1554_v41  ;;  %v1826_v31 = vshll.u32 %v12607_v27, %v12695_v26  ;;  %v1829_v24 = vshll.u32 %v12601_v55, %v12695_v26  ;;  %v6506_v46 = vpop.eup %6505  ;;  %v1387_v43 = vxor.u32 2147483648, %v6504_v22 }
 0x22e   :  { %v1672_v5 = vor.u32 %v1671_v52, %v1670_v40  ;;  %v1675_v6 = vshll.u32 %v1674_v47, 23  ;;  %v1833_v44 = vshrl.u32 %v12609_v60, %v12694_v38  ;;  %v1384_v17 = vxor.u32 2147483648, %v6506_v46  ;;  %v12696_v47 = vld [vmem:[#allocation52_spill] sm:$0xff] }
 0x22f   :  { %v1556_v0 = vshrl.u32 %v1555_v49, 30  ;;  %v1825_v45 = vor.u32 %v1824_v35, %v1823_v57  ;;  %v1828_v15 = vor.u32 %v1827_v62, %v1826_v31  ;;  %v1388_v34 = vsel %vm1386_vm1, %v1387_v43, %v6506_v46 }
 0x230   :  { %v1676_v50 = vor.u32 4788187, %v1675_v6  ;;  %v1831_v3 = vor.u32 %v1830_v10, %v1829_v24  ;;  %v1832_v30 = vshll.u32 %v12608_v39, %v12695_v26  ;;  %v1385_v37 = vsel %vm1383_vm5, %v6504_v22, %v1384_v17 }
 0x231   :  { %v1557_v40 = vshll.u32 %v1556_v0, 30  ;;  %v1811_v52 = vor.u32 8388608, %v1810_v59  ;;  %vm1835_vm9 = vcmp.lt.s32.totalorder %v12696_v47, 1  ;;  %v1389_v38 = vsel %vm1382_vm7, %v1385_v37, %v1388_v34 }
 0x232   :  { %v1677_v57 = vand.u32 2147483647, %v1676_v50  ;;  %v1679_v35 = vcvt.s32.f32 %v1672_v5  ;;  %v1834_v62 = vor.u32 %v1833_v44, %v1832_v30  ;;  %v1390_v6 = vsel %vm1380_vm8, nan, %v1389_v38 }
 0x233   :  { %v8820_v10 = vsub.s32 %v1554_v41, %v1557_v40  ;;  %vm1838_vm10 = vcmp.lt.s32.totalorder %v12696_v47, 4  ;;  %v1843_v26 = vsel %vm1835_vm9, %v1822_v13, %v1825_v45  ;;  %4301 = vmatmul.mubr.f32.gmra.mrb[10].mxu0 %v1390_v6  ;;  %vm1837_vm11 = vcmp.lt.s32.totalorder %v12696_v47, 3 }
 0x234   :  { %v1680_v59 = vmul.f32 %v1679_v35, %v1677_v57  ;;  %v1840_v22 = vsel %vm1838_vm10, %v1828_v15, 2102212464  ;;  %v1844_v11 = vsel %vm1838_vm10, %v1831_v3, 920167782  ;;  %vm1836_vm12 = vcmp.lt.s32.totalorder %v12696_v47, 2 }
 0x235   :  { %v1560_v37 = vsub.s32 0, %v8820_v10  ;;  %v1845_v30 = vsel %vm1837_vm11, %v1828_v15, %v1844_v11  ;;  %v1847_v42 = vsel %vm1835_vm9, %v1825_v45, %v1828_v15  ;;  %v1848_v49 = vsel %vm1838_vm10, %v1834_v62, 1326507024 }
 0x236   :  { %v1681_v5 = vxor.u32 2147483648, %v1680_v59  ;;  %v1846_v41 = vsel %vm1836_vm12, %v1843_v26, %v1845_v30  ;;  %v1851_v31 = vshll.u32 %v1811_v52, 8  ;;  %v1580_v46 = vsub.s32 4, %v1556_v0  ;;  %v12699_v26 = vld [vmem:[#allocation20_spill] sm:$0xff] }
 0x237   :  { %v5932_v24 = vmin.u32 %v1560_v37, %v8820_v10  ;;  %v1839_v43 = vsel %vm1835_vm9, %v1819_v20, %v1822_v13  ;;  %v1841_v44 = vsel %vm1837_vm11, %v1825_v45, %v1840_v22  ;;  %v1849_v15 = vsel %vm1837_vm11, %v1831_v3, %v1848_v49 }
 0x238   :  { %v1682_v17 = vsel %vm1599_vm13, %v1681_v5, %v1680_v59  ;;  %v8843_v34 = vmul.u32.u64.low %v1851_v31, %v1846_v41  ;;  %v8844_v50 = vmul.u32.u64.high %v1851_v31, %v1846_v41, %v8843_v34  ;;  %v8848_v40 = vand.u32 31, %v8651_v53 }
 0x239   :  { %v1685_v20 = vsel %vm8768_vm2, %v12673_v63, %v1682_v17  ;;  %v1562_v13 = vclz %v5932_v24  ;;  %v1850_v45 = vsel %vm1836_vm12, %v1847_v42, %v1849_v15  ;;  %v12697_v3 = vsel %vm8768_vm2, 0, %v8756_v23  ;;  %v12707_v24 = vld [vmem:[#allocation51_spill] sm:$0xff] }
 0x23a   :  { %6507 = vcosq.f32 %v1685_v20  ;;  %v8859_v52 = vand.u32 3, %v12697_v3  ;;  %v8861_v38 = vmul.u32.u64.low %v1851_v31, %v1850_v45  ;;  %v8862_v57 = vmul.u32.u64.high %v1851_v31, %v1850_v45, %v8861_v38  ;;  %v12706_v45 = vld [vmem:[#allocation43_spill] sm:$0xff] }
 0x23b   :  { %6509 = vsinq.f32 %v1685_v20  ;;  %vm1496_vm13 = vcmp.lt.s32.totalorder %v12680_v4, 0  ;;  %v5933_v53 = vadd.s32 4294967294, %v1562_v13  ;;  %v1842_v35 = vsel %vm1836_vm12, %v1839_v43, %v1841_v44 }
 0x23c   :  { %v12698_v62 = vand.u32 2139095040, %v8535_v1  ;;  %v8873_v61 = vsel %vm1496_vm13, %v1580_v46, %v1556_v0  ;;  %v1861_v23 = vadd.s32 1, %v8844_v50  ;;  %v12512_v59 = vand.u32 2147483647, %v12699_v26 }
 0x23d   :  { %v8878_v22 = vsub.s32 32, %v8761_v7  ;;  %v12701_v11 = vand.u32 2139095040, %v8538_v16  ;;  %v12702_v47 = vand.u32 2147483647, %v12680_v4  ;;  %vm5934_vm15 = vcmp.lt.s32.totalorder %v5933_v53, 0 }
 0x23e   :  { %v8869_v6 = vshrl.u32 %v12698_v62, 23  ;;  %vm1695_vm0 = vcmp.eq.s32.totalorder %v8859_v52, 2  ;;  %v1550_v0 = vadd.s32 %v8746_v21, %v8744_v14  ;;  %v1565_v42 = vsel %vm5934_vm15, 0, %v5933_v53  ;;  %v12705_v21 = vld [vmem:[#allocation53_spill] sm:$0xff] }
 0x23f   :  { %12700 = vst [vmem:[#allocation40_spill] sm:$0xff] %v8878_v22  ;;  %v8882_v37 = vshrl.u32 %v12701_v11, 23  ;;  %vm8886_vm14 = vcmp.le.f32.partialorder %v12702_v47, 0.7853982  ;;  %v1858_v5 = vmul.u32 %v1851_v31, %v1842_v35  ;;  %vm1860_vm3 = vc.u32 %v8862_v57, %v8843_v34 }
 0x240   :  { %vm1692_vm2 = vcmp.eq.s32.totalorder %v8859_v52, 0  ;;  %v1566_v41 = vsub.s32 32, %v1565_v42  ;;  %v1570_v49 = vsub.s32 4294967266, %v1565_v42  ;;  %v1862_v46 = vsel %vm1860_vm3, %v1861_v23, %v8844_v50 }
 0x241   :  { %vm1691_vm1 = vcmp.lt.s32.totalorder %v8859_v52, 2  ;;  %v1863_v43 = vadd.s32 %v1862_v46, %v1858_v5  ;;  %v1707_v14 = vand.u32 8388607, %v12512_v59  ;;  %v1716_v31 = vshrl.u32 %v12603_v48, %v12705_v21 }
 0x242   :  { %v1718_v44 = vshrl.u32 %v12606_v9, %v12705_v21  ;;  %vm1689_vm4 = vweird.f32 %v12673_v63  ;;  %v1567_v17 = vshll.u32 %v8820_v10, %v1565_v42  ;;  %v1568_v15 = vshrl.u32 %v1550_v0, %v1566_v41 }
 0x243   :  { %v1571_v20 = vadd.s32 127, %v1570_v49  ;;  %v1724_v50 = vshrl.u32 %v12601_v55, %v12705_v21  ;;  %v1864_v13 = vadd.s32 536870912, %v1863_v43  ;;  %v1717_v3 = vshll.u32 %v12603_v48, %v12706_v45 }
 0x244   :  { %v1720_v38 = vshll.u32 %v12606_v9, %v12706_v45  ;;  %v1721_v53 = vshrl.u32 %v12607_v27, %v12705_v21  ;;  %v1569_v35 = vor.u32 %v1568_v15, %v1567_v17  ;;  %v1723_v10 = vshll.u32 %v12607_v27, %v12706_v45  ;;  %v6508_v11 = vpop.eup %6507 }
 0x245   :  { %v1572_v62 = vshll.u32 %v1571_v20, 23  ;;  %v1727_v23 = vshrl.u32 %v12608_v39, %v12705_v21  ;;  %v8921_v47 = vshrl.u32 %v1864_v13, 30  ;;  %v1708_v0 = vor.u32 8388608, %v1707_v14  ;;  %v6510_v41 = vpop.eup %6509 }
 0x246   :  { %v1719_v42 = vor.u32 %v1718_v44, %v1717_v3  ;;  %v1726_v5 = vshll.u32 %v12601_v55, %v12706_v45  ;;  %v1696_v49 = vxor.u32 2147483648, %v6508_v11  ;;  %v1725_v59 = vor.u32 %v1724_v50, %v1723_v10 }
 0x247   :  { %v1573_v46 = vor.u32 4788187, %v1572_v62  ;;  %v1730_v17 = vshrl.u32 %v12609_v60, %v12705_v21  ;;  %vm3359_vm5 = vcmp.gt.s32.totalorder %v8542_v2, 0  ;;  %vm3462_vm6 = vcmp.gt.s32.totalorder %v8545_v54, 0 }
 0x248   :  { %v1693_v15 = vxor.u32 2147483648, %v6510_v41  ;;  %v1866_v20 = vshll.u32 %v8921_v47, 30  ;;  %v1722_v13 = vor.u32 %v1721_v53, %v1720_v38  ;;  %v1729_v14 = vshll.u32 %v12608_v39, %v12706_v45 }
 0x249   :  { %v1697_v44 = vsel %vm1695_vm0, %v1696_v49, %v6510_v41  ;;  %v1574_v3 = vand.u32 2147483647, %v1573_v46  ;;  %v1576_v62 = vcvt.s32.f32 %v1569_v35  ;;  %v1728_v50 = vor.u32 %v1727_v23, %v1726_v5 }
 0x24a   :  { %v1694_v21 = vsel %vm1692_vm2, %v6508_v11, %v1693_v15  ;;  %v8936_v10 = vsub.s32 %v1863_v43, %v1866_v20  ;;  %vm1732_vm7 = vcmp.lt.s32.totalorder %v12707_v24, 1  ;;  %vm1735_vm8 = vcmp.lt.s32.totalorder %v12707_v24, 4 }
 0x24b   :  { %v1698_v38 = vsel %vm1691_vm1, %v1694_v21, %v1697_v44  ;;  %v1577_v53 = vmul.f32 %v1576_v62, %v1574_v3  ;;  %v1731_v45 = vor.u32 %v1730_v17, %v1729_v14  ;;  %v1737_v41 = vsel %vm1735_vm8, %v1725_v59, 2102212464 }
 0x24c   :  { %v1699_v35 = vsel %vm1689_vm4, nan, %v1698_v38  ;;  %v1869_v23 = vsub.s32 0, %v8936_v10  ;;  %v1889_v43 = vsub.s32 4, %v8921_v47  ;;  %vm1733_vm9 = vcmp.lt.s32.totalorder %v12707_v24, 2 }
 0x24d   :  { %4305 = vmatprep.mubr.f32.mxu0 %v1699_v35  ;;  %v1578_v11 = vxor.u32 2147483648, %v1577_v53  ;;  %vm1734_vm10 = vcmp.lt.s32.totalorder %v12707_v24, 3  ;;  %v1740_v52 = vsel %vm1732_vm7, %v1719_v42, %v1722_v13  ;;  %v1741_v5 = vsel %vm1735_vm8, %v1728_v50, 920167782 }
 0x24e   :  { %v5944_v49 = vmin.u32 %v1869_v23, %v8936_v10  ;;  %v1736_v63 = vsel %vm1732_vm7, %v1716_v31, %v1719_v42  ;;  %v1738_v46 = vsel %vm1734_vm10, %v1722_v13, %v1737_v41  ;;  %v1744_v17 = vsel %vm1732_vm7, %v1722_v13, %v1725_v59 }
 0x24f   :  { %v1579_v15 = vsel %vm1496_vm13, %v1578_v11, %v1577_v53  ;;  %v1742_v20 = vsel %vm1734_vm10, %v1725_v59, %v1741_v5  ;;  %v1745_v14 = vsel %vm1735_vm8, %v1731_v45, 1326507024  ;;  %v1748_v44 = vshll.u32 %v1708_v0, 8 }
 0x250   :  { %v1582_v3 = vsel %vm8886_vm14, %v12680_v4, %v1579_v15  ;;  %v1871_v62 = vclz %v5944_v49  ;;  %v1743_v31 = vsel %vm1733_vm9, %v1740_v52, %v1742_v20  ;;  %v1746_v42 = vsel %vm1734_vm10, %v1728_v50, %v1745_v14  ;;  %v12712_v15 = vld [vmem:[#allocation30_spill] sm:$0xff]  ;;  %v12713_v14 = vld [vmem:[#allocation76_spill] sm:$0xff] }
 0x251   :  { %6511 = vcosq.f32 %v1582_v3  ;;  %v1747_v13 = vsel %vm1733_vm9, %v1744_v17, %v1746_v42  ;;  %v8970_v21 = vmul.u32.u64.low %v1748_v44, %v1743_v31  ;;  %v8971_v38 = vmul.u32.u64.high %v1748_v44, %v1743_v31, %v8970_v21 }
 0x252   :  { %6513 = vsinq.f32 %v1582_v3  ;;  %v5945_v59 = vadd.s32 4294967294, %v1871_v62  ;;  %v8974_v0 = vmul.u32.u64.low %v1748_v44, %v1747_v13  ;;  %v8975_v53 = vmul.u32.u64.high %v1748_v44, %v1747_v13, %v8974_v0 }
 0x253   :  { %v8978_v45 = vsub.s32 32, %v8848_v40  ;;  %v8983_v50 = vsel %vm3359_vm5, %v8542_v2, 0  ;;  %v8988_v41 = vsel %vm3462_vm6, %v8545_v54, 0  ;;  %v12708_v35 = vsel %vm8886_vm14, 0, %v8873_v61 }
 0x254   :  { %v1587_v23 = vand.u32 3, %v12708_v35  ;;  %v12709_v11 = vand.u32 2147483647, %v12693_v18  ;;  %vm1805_vm12 = vcmp.lt.s32.totalorder %v12693_v18, 0  ;;  %vm5946_vm13 = vcmp.lt.s32.totalorder %v5945_v59, 0 }
 0x255   :  { %v1739_v2 = vsel %vm1733_vm9, %v1736_v63, %v1738_v46  ;;  %v1859_v54 = vadd.s32 %v8843_v34, %v8862_v57  ;;  %v1874_v5 = vsel %vm5946_vm13, 0, %v5945_v59  ;;  %v1890_v61 = vsel %vm1805_vm12, %v1889_v43, %v8921_v47  ;;  %v12714_v34 = vld [vmem:[#allocation70_spill] sm:$0xff] }
 0x256   :  { %vm8996_vm11 = vcmp.le.f32.partialorder %v12709_v11, 0.7853982  ;;  %v1758_v30 = vadd.s32 1, %v8971_v38  ;;  %v1875_v49 = vsub.s32 32, %v1874_v5  ;;  %v1879_v17 = vsub.s32 4294967266, %v1874_v5 }
 0x257   :  { %v12513_v20 = vand.u32 2147483647, %v12712_v15  ;;  %v2027_v3 = vshrl.u32 %v12606_v9, %v12713_v14  ;;  %vm1588_vm14 = vcmp.lt.s32.totalorder %v1587_v23, 2  ;;  %vm1589_vm15 = vcmp.eq.s32.totalorder %v1587_v23, 0 }
 0x258   :  { %v1755_v24 = vmul.u32 %v1748_v44, %v1739_v2  ;;  %vm1757_vm0 = vc.u32 %v8975_v53, %v8970_v21  ;;  %v2026_v57 = vshll.u32 %v12603_v48, %v12714_v34  ;;  %vm1586_vm3 = vweird.f32 %v12680_v4 }
 0x259   :  { %v1876_v47 = vshll.u32 %v8936_v10, %v1874_v5  ;;  %v1877_v43 = vshrl.u32 %v1859_v54, %v1875_v49  ;;  %v1880_v63 = vadd.s32 127, %v1879_v17  ;;  %v1759_v46 = vsel %vm1757_vm0, %v1758_v30, %v8971_v38 }
 0x25a   :  { %vm1592_vm2 = vcmp.eq.s32.totalorder %v1587_v23, 2  ;;  %v1892_v62 = vsel %vm8996_vm11, 0, %v1890_v61  ;;  %v1760_v31 = vadd.s32 %v1759_v46, %v1755_v24  ;;  %v2030_v44 = vshrl.u32 %v12607_v27, %v12713_v14 }
 0x25b   :  { %v1878_v42 = vor.u32 %v1877_v43, %v1876_v47  ;;  %v1881_v13 = vshll.u32 %v1880_v63, 23  ;;  %v2016_v59 = vand.u32 8388607, %v12513_v20  ;;  %v2028_v0 = vor.u32 %v2027_v3, %v2026_v57  ;;  %v6512_v35 = vpop.eup %6511 }
 0x25c   :  { %v1761_v10 = vadd.s32 536870912, %v1760_v31  ;;  %v2029_v11 = vshll.u32 %v12606_v9, %v12714_v34  ;;  %v2033_v38 = vshrl.u32 %v12601_v55, %v12713_v14  ;;  %v2036_v2 = vshrl.u32 %v12608_v39, %v12713_v14  ;;  %v6514_v54 = vpop.eup %6513 }
 0x25d   :  { %v1593_v5 = vxor.u32 2147483648, %v6512_v35  ;;  %v1882_v61 = vor.u32 4788187, %v1881_v13  ;;  %v2032_v30 = vshll.u32 %v12607_v27, %v12714_v34  ;;  %v2039_v49 = vshrl.u32 %v12609_v60, %v12713_v14 }
 0x25e   :  { %v1590_v17 = vxor.u32 2147483648, %v6514_v54  ;;  %v9035_v3 = vshrl.u32 %v1761_v10, 30  ;;  %v2031_v24 = vor.u32 %v2030_v44, %v2029_v11  ;;  %v2035_v57 = vshll.u32 %v12601_v55, %v12714_v34 }
 0x25f   :  { %v1594_v47 = vsel %vm1592_vm2, %v1593_v5, %v6514_v54  ;;  %v1883_v43 = vand.u32 2147483647, %v1882_v61  ;;  %v1885_v63 = vcvt.s32.f32 %v1878_v42  ;;  %v2038_v46 = vshll.u32 %v12608_v39, %v12714_v34  ;;  %v12715_v61 = vld [vmem:[#allocation69_spill] sm:$0xff] }
 0x260   :  { %v1591_v13 = vsel %vm1589_vm15, %v6512_v35, %v1590_v17  ;;  %v1763_v20 = vshll.u32 %v9035_v3, 30  ;;  %v2034_v1 = vor.u32 %v2033_v38, %v2032_v30  ;;  %v2037_v16 = vor.u32 %v2036_v2, %v2035_v57 }
 0x261   :  { %v1595_v10 = vsel %vm1588_vm14, %v1591_v13, %v1594_v47  ;;  %v1886_v56 = vmul.f32 %v1885_v63, %v1883_v43  ;;  %v9045_v44 = vand.u32 3, %v1892_v62  ;;  %v2040_v11 = vor.u32 %v2039_v49, %v2038_v46 }
 0x262   :  { %v1596_v54 = vsel %vm1586_vm3, nan, %v1595_v10  ;;  %v9049_v5 = vsub.s32 %v1760_v31, %v1763_v20  ;;  %v2017_v42 = vor.u32 8388608, %v2016_v59  ;;  %v2025_v34 = vshrl.u32 %v12603_v48, %v12713_v14 }
 0x263   :  { %4306 = vmatmul.mubr.f32.gmra.mrb[12].mxu0 %v1596_v54  ;;  %v1887_v35 = vxor.u32 2147483648, %v1886_v56  ;;  %vm2041_vm1 = vcmp.lt.s32.totalorder %v12715_v61, 1  ;;  %vm2043_vm4 = vcmp.lt.s32.totalorder %v12715_v61, 3  ;;  %vm2044_vm5 = vcmp.lt.s32.totalorder %v12715_v61, 4 }
 0x264   :  { %v1766_v23 = vsub.s32 0, %v9049_v5  ;;  %v2046_v62 = vsel %vm2044_vm5, %v2034_v1, 2102212464  ;;  %v2049_v38 = vsel %vm2041_vm1, %v2028_v0, %v2031_v24  ;;  %v2050_v4 = vsel %vm2044_vm5, %v2037_v16, 920167782 }
 0x265   :  { %v1888_v20 = vsel %vm1805_vm12, %v1887_v35, %v1886_v56  ;;  %v2051_v31 = vsel %vm2043_vm4, %v2034_v1, %v2050_v4  ;;  %v2053_v14 = vsel %vm2041_vm1, %v2031_v24, %v2034_v1  ;;  %v2054_v59 = vsel %vm2044_vm5, %v2040_v11, 1326507024 }
 0x266   :  { %v1891_v2 = vsel %vm8996_vm11, %v12693_v18, %v1888_v20  ;;  %v5940_v30 = vmin.u32 %v1766_v23, %v9049_v5  ;;  %vm2042_vm6 = vcmp.lt.s32.totalorder %v12715_v61, 2  ;;  %v2045_v49 = vsel %vm2041_vm1, %v2025_v34, %v2028_v0  ;;  %v12720_v34 = vld [vmem:[#allocation29_spill] sm:$0xff]  ;;  %v12721_v61 = vld [vmem:[#allocation75_spill] sm:$0xff] }
 0x267   :  { %6515 = vcosq.f32 %v1891_v2  ;;  %v2052_v17 = vsel %vm2042_vm6, %v2049_v38, %v2051_v31  ;;  %v2055_v56 = vsel %vm2043_vm4, %v2037_v16, %v2054_v59  ;;  %v2057_v57 = vshll.u32 %v2017_v42, 8  ;;  %v12725_v59 = vld [vmem:[#allocation68_spill] sm:$0xff] }
 0x268   :  { %6517 = vsinq.f32 %v1891_v2  ;;  %v1768_v1 = vclz %v5940_v30  ;;  %v2047_v47 = vsel %vm2043_vm4, %v2031_v24, %v2046_v62  ;;  %v2056_v52 = vsel %vm2042_vm6, %v2053_v14, %v2055_v56 }
 0x269   :  { %v9074_v43 = vmul.u32.u64.low %v2057_v57, %v2056_v52  ;;  %v9075_v63 = vmul.u32.u64.high %v2057_v57, %v2056_v52, %v9074_v43  ;;  %v9077_v0 = vmul.u32.u64.low %v2057_v57, %v2052_v17  ;;  %v9078_v46 = vmul.u32.u64.high %v2057_v57, %v2052_v17, %v9077_v0 }
 0x26a   :  { %v9082_v13 = vshrl.u32 %v8983_v50, 5  ;;  %v9085_v16 = vand.u32 31, %v8983_v50  ;;  %v5941_v10 = vadd.s32 4294967294, %v1768_v1  ;;  %v1786_v11 = vsub.s32 4, %v9035_v3 }
 0x26b   :  { %v9089_v24 = vshrl.u32 %v8988_v41, 5  ;;  %v9092_v54 = vand.u32 31, %v8988_v41  ;;  %vm1702_vm7 = vcmp.lt.s32.totalorder %v12699_v26, 0  ;;  %v2048_v42 = vsel %vm2042_vm6, %v2045_v49, %v2047_v47 }
 0x26c   :  { %12716 = vst [vmem:[#allocation39_spill] sm:$0xff] %v9082_v13  ;;  %12717 = vst [vmem:[#allocation17_spill] sm:$0xff] %v9085_v16  ;;  %vm1898_vm8 = vcmp.eq.s32.totalorder %v9045_v44, 0  ;;  %vm1901_vm9 = vcmp.eq.s32.totalorder %v9045_v44, 2  ;;  %v1756_v50 = vadd.s32 %v8970_v21, %v8975_v53  ;;  %vm5942_vm10 = vcmp.lt.s32.totalorder %v5941_v10, 0 }
 0x26d   :  { %12718 = vst [vmem:[#allocation35_spill] sm:$0xff] %v9089_v24  ;;  %12719 = vst [vmem:[#allocation38_spill] sm:$0xff] %v9092_v54  ;;  %v12519_v35 = vand.u32 2147483647, %v12720_v34  ;;  %vm1897_vm11 = vcmp.lt.s32.totalorder %v9045_v44, 2  ;;  %v1771_v23 = vsel %vm5942_vm10, 0, %v5941_v10  ;;  %vm2066_vm12 = vc.u32 %v9075_v63, %v9077_v0 }
 0x26e   :  { %v2067_v41 = vadd.s32 1, %v9078_v46  ;;  %v1924_v62 = vshrl.u32 %v12606_v9, %v12721_v61  ;;  %vm1895_vm13 = vweird.f32 %v12693_v18  ;;  %v12722_v38 = vand.u32 2147483647, %v12699_v26 }
 0x26f   :  { %v1772_v53 = vsub.s32 32, %v1771_v23  ;;  %v1776_v4 = vsub.s32 4294967266, %v1771_v23  ;;  %v9118_v20 = vsel %vm1702_vm7, %v1786_v11, %v9035_v3  ;;  %v2064_v31 = vmul.u32 %v2057_v57, %v2048_v42 }
 0x270   :  { %vm9111_vm14 = vcmp.le.f32.partialorder %v12722_v38, 0.7853982  ;;  %v2068_v14 = vsel %vm2066_vm12, %v2067_v41, %v9078_v46  ;;  %v1923_v2 = vshll.u32 %v12603_v48, %v12725_v59  ;;  %v1926_v30 = vshll.u32 %v12606_v9, %v12725_v59 }
 0x271   :  { %v1927_v49 = vshrl.u32 %v12607_v27, %v12721_v61  ;;  %v1773_v17 = vshll.u32 %v9049_v5, %v1771_v23  ;;  %v1774_v56 = vshrl.u32 %v1756_v50, %v1772_v53  ;;  %v1777_v1 = vadd.s32 127, %v1776_v4  ;;  %v6516_v52 = vpop.eup %6515 }
 0x272   :  { %v2069_v47 = vadd.s32 %v2068_v14, %v2064_v31  ;;  %v1913_v3 = vand.u32 8388607, %v12519_v35  ;;  %v1925_v57 = vor.u32 %v1924_v62, %v1923_v2  ;;  %v1930_v43 = vshrl.u32 %v12601_v55, %v12721_v61  ;;  %v6518_v10 = vpop.eup %6517 }
 0x273   :  { %v1933_v46 = vshrl.u32 %v12608_v39, %v12721_v61  ;;  %v1902_v11 = vxor.u32 2147483648, %v6516_v52  ;;  %v1775_v42 = vor.u32 %v1774_v56, %v1773_v17  ;;  %v1778_v41 = vshll.u32 %v1777_v1, 23 }
 0x274   :  { %v2070_v38 = vadd.s32 536870912, %v2069_v47  ;;  %v1899_v5 = vxor.u32 2147483648, %v6518_v10  ;;  %v1929_v50 = vshll.u32 %v12607_v27, %v12725_v59  ;;  %v1932_v23 = vshll.u32 %v12601_v55, %v12725_v59 }
 0x275   :  { %v1936_v62 = vshrl.u32 %v12609_v60, %v12721_v61  ;;  %v1903_v53 = vsel %vm1901_vm9, %v1902_v11, %v6518_v10  ;;  %v1779_v4 = vor.u32 4788187, %v1778_v41  ;;  %v1928_v14 = vor.u32 %v1927_v49, %v1926_v30 }
 0x276   :  { %v2071_v31 = vshrl.u32 %v2070_v38, 30  ;;  %v1900_v2 = vsel %vm1898_vm8, %v6516_v52, %v1899_v5  ;;  %v1931_v17 = vor.u32 %v1930_v43, %v1929_v50  ;;  %v1934_v56 = vor.u32 %v1933_v46, %v1932_v23  ;;  %v12726_v46 = vld [vmem:[#allocation67_spill] sm:$0xff] }
 0x277   :  { %v1935_v1 = vshll.u32 %v12608_v39, %v12725_v59  ;;  %v1904_v35 = vsel %vm1897_vm11, %v1900_v2, %v1903_v53  ;;  %v1780_v13 = vand.u32 2147483647, %v1779_v4  ;;  %v1782_v24 = vcvt.s32.f32 %v1775_v42  ;;  %v9171_v53 = vpop.permute.xlu1 %201 }
 0x278   :  { %vm2011_vm15 = vcmp.lt.s32.totalorder %v12712_v15, 0  ;;  %v2072_v7 = vshll.u32 %v2071_v31, 30  ;;  %v1905_v10 = vsel %vm1895_vm13, nan, %v1904_v35  ;;  %v1789_v30 = vsel %vm9111_vm14, 0, %v9118_v20 }
 0x279   :  { %v1922_v49 = vshrl.u32 %v12603_v48, %v12721_v61  ;;  %v1937_v52 = vor.u32 %v1936_v62, %v1935_v1  ;;  %4310 = vmatprep.mubr.f32.mxu0 %v1905_v10  ;;  %v1783_v59 = vmul.f32 %v1782_v24, %v1780_v13  ;;  %v1914_v43 = vor.u32 8388608, %v1913_v3 }
 0x27a   :  { %v9156_v44 = vsub.s32 %v2069_v47, %v2072_v7  ;;  %vm1941_vm0 = vcmp.lt.s32.totalorder %v12726_v46, 4  ;;  %vm1938_vm3 = vcmp.lt.s32.totalorder %v12726_v46, 1  ;;  %vm1939_vm2 = vcmp.lt.s32.totalorder %v12726_v46, 2 }
 0x27b   :  { %v1943_v18 = vsel %vm1941_vm0, %v1931_v17, 2102212464  ;;  %v1947_v35 = vsel %vm1941_vm0, %v1934_v56, 920167782  ;;  %v1784_v11 = vxor.u32 2147483648, %v1783_v59  ;;  %vm1940_vm1 = vcmp.lt.s32.totalorder %v12726_v46, 3 }
 0x27c   :  { %v2075_v20 = vsub.s32 0, %v9156_v44  ;;  %v1946_v61 = vsel %vm1938_vm3, %v1925_v57, %v1928_v14  ;;  %v2095_v42 = vsub.s32 4, %v2071_v31  ;;  %v1948_v41 = vsel %vm1940_vm1, %v1931_v17, %v1947_v35 }
 0x27d   :  { %v1950_v13 = vsel %vm1938_vm3, %v1928_v14, %v1931_v17  ;;  %v1951_v7 = vsel %vm1941_vm0, %v1937_v52, 1326507024  ;;  %v1785_v24 = vsel %vm1702_vm7, %v1784_v11, %v1783_v59  ;;  %v1942_v3 = vsel %vm1938_vm3, %v1922_v49, %v1925_v57  ;;  %v12727_v59 = vld [vmem:[#allocation26_spill] sm:$0xff] }
 0x27e   :  { %v5952_v47 = vmin.u32 %v2075_v20, %v9156_v44  ;;  %v1944_v38 = vsel %vm1940_vm1, %v1928_v14, %v1943_v18  ;;  %v1788_v5 = vsel %vm9111_vm14, %v12699_v26, %v1785_v24  ;;  %v1949_v50 = vsel %vm1939_vm2, %v1946_v61, %v1948_v41  ;;  %v12731_v41 = vld [vmem:[#allocation64_spill] sm:$0xff] }
 0x27f   :  { %v1952_v23 = vsel %vm1940_vm1, %v1934_v56, %v1951_v7  ;;  %v1954_v62 = vshll.u32 %v1914_v43, 8  ;;  %6519 = vcosq.f32 %v1788_v5  ;;  %v9173_v4 = vand.u32 3, %v1789_v30  ;;  %v12732_v7 = vld [vmem:[#allocation55_spill] sm:$0xff] }
 0x280   :  { %v2077_v2 = vclz %v5952_v47  ;;  %v1953_v17 = vsel %vm1939_vm2, %v1950_v13, %v1952_v23  ;;  %6521 = vsinq.f32 %v1788_v5  ;;  %v9179_v57 = vsel %vm2011_vm15, %v2095_v42, %v2071_v31 }
 0x281   :  { %v9181_v21 = vmul.u32.u64.low %v1954_v62, %v1953_v17  ;;  %v9182_v14 = vmul.u32.u64.high %v1954_v62, %v1953_v17, %v9181_v21  ;;  %v1945_v56 = vsel %vm1939_vm2, %v1942_v3, %v1944_v38  ;;  %v9191_v30 = vadd.s32 4294967169, %v8869_v6 }
 0x282   :  { %v5953_v1 = vadd.s32 4294967294, %v2077_v2  ;;  %v9186_v10 = vmul.u32.u64.low %v1954_v62, %v1949_v50  ;;  %v9187_v49 = vmul.u32.u64.high %v1954_v62, %v1949_v50, %v9186_v10  ;;  %v9194_v52 = vadd.s32 4294967169, %v8882_v37 }
 0x283   :  { %v9198_v31 = vmul.f32 %v12669_v29, %v9171_v53  ;;  %v12524_v43 = vand.u32 2147483647, %v12727_v59  ;;  %vm1798_vm4 = vcmp.eq.s32.totalorder %v9173_v4, 2  ;;  %v12728_v46 = vand.u32 2147483647, %v12712_v15 }
 0x284   :  { %v2065_v6 = vadd.s32 %v9077_v0, %v9075_v63  ;;  %vm5954_vm6 = vcmp.lt.s32.totalorder %v5953_v1, 0  ;;  %vm1795_vm7 = vcmp.eq.s32.totalorder %v9173_v4, 0  ;;  %v1961_v11 = vmul.u32 %v1954_v62, %v1945_v56 }
 0x285   :  { %vm9204_vm5 = vcmp.le.f32.partialorder %v12728_v46, 0.7853982  ;;  %v2080_v37 = vsel %vm5954_vm6, 0, %v5953_v1  ;;  %vm1963_vm8 = vc.u32 %v9182_v14, %v9186_v10  ;;  %vm1794_vm9 = vcmp.lt.s32.totalorder %v9173_v4, 2 }
 0x286   :  { %v2081_v20 = vsub.s32 32, %v2080_v37  ;;  %v2085_v61 = vsub.s32 4294967266, %v2080_v37  ;;  %v1964_v42 = vadd.s32 1, %v9187_v49  ;;  %v2233_v63 = vshrl.u32 %v12606_v9, %v12731_v41 }
 0x287   :  { %vm1792_vm10 = vweird.f32 %v12699_v26  ;;  %v2222_v0 = vand.u32 8388607, %v12524_v43  ;;  %v2231_v13 = vshrl.u32 %v12603_v48, %v12731_v41  ;;  %v2232_v24 = vshll.u32 %v12603_v48, %v12732_v7 }
 0x288   :  { %v2236_v47 = vshrl.u32 %v12607_v27, %v12731_v41  ;;  %v2082_v3 = vshll.u32 %v9156_v44, %v2080_v37  ;;  %v2083_v38 = vshrl.u32 %v2065_v6, %v2081_v20  ;;  %v2086_v5 = vadd.s32 127, %v2085_v61 }
 0x289   :  { %v1965_v50 = vsel %vm1963_vm8, %v1964_v42, %v9187_v49  ;;  %v2235_v62 = vshll.u32 %v12606_v9, %v12732_v7  ;;  %v2239_v2 = vshrl.u32 %v12601_v55, %v12731_v41  ;;  %v2242_v17 = vshrl.u32 %v12608_v39, %v12731_v41  ;;  %v6520_v21 = vpop.eup %6519 }
 0x28a   :  { %v1966_v23 = vadd.s32 %v1965_v50, %v1961_v11  ;;  %v2084_v1 = vor.u32 %v2083_v38, %v2082_v3  ;;  %v2087_v56 = vshll.u32 %v2086_v5, 23  ;;  %v2234_v46 = vor.u32 %v2233_v63, %v2232_v24  ;;  %v6522_v6 = vpop.eup %6521 }
 0x28b   :  { %v2245_v44 = vshrl.u32 %v12609_v60, %v12731_v41  ;;  %v1799_v37 = vxor.u32 2147483648, %v6520_v21  ;;  %v2238_v11 = vshll.u32 %v12607_v27, %v12732_v7  ;;  %v2241_v20 = vshll.u32 %v12601_v55, %v12732_v7 }
 0x28c   :  { %v1967_v49 = vadd.s32 536870912, %v1966_v23  ;;  %v1796_v61 = vxor.u32 2147483648, %v6522_v6  ;;  %v2088_v42 = vor.u32 4788187, %v2087_v56  ;;  %v2237_v50 = vor.u32 %v2236_v47, %v2235_v62 }
 0x28d   :  { %v2244_v3 = vshll.u32 %v12608_v39, %v12732_v7  ;;  %v1800_v63 = vsel %vm1798_vm4, %v1799_v37, %v6522_v6  ;;  %v2240_v41 = vor.u32 %v2239_v2, %v2238_v11  ;;  %v2243_v38 = vor.u32 %v2242_v17, %v2241_v20  ;;  %v12733_v7 = vld [vmem:[#allocation63_spill] sm:$0xff] }
 0x28e   :  { %v1968_v24 = vshrl.u32 %v1967_v49, 30  ;;  %v1797_v5 = vsel %vm1795_vm7, %v6520_v21, %v1796_v61  ;;  %v2089_v43 = vand.u32 2147483647, %v2088_v42  ;;  %v2091_v35 = vcvt.s32.f32 %v2084_v1 }
 0x28f   :  { %v2246_v22 = vor.u32 %v2245_v44, %v2244_v3  ;;  %v1801_v12 = vsel %vm1794_vm9, %v1797_v5, %v1800_v63  ;;  %vm1908_vm11 = vcmp.lt.s32.totalorder %v12720_v34, 0  ;;  %v2223_v62 = vor.u32 8388608, %v2222_v0  ;;  %v9283_v3 = vpop.permute.xlu0 %196 }
 0x290   :  { %v1969_v47 = vshll.u32 %v1968_v24, 30  ;;  %vm2247_vm12 = vcmp.lt.s32.totalorder %v12733_v7, 1  ;;  %v1802_v56 = vsel %vm1792_vm10, nan, %v1801_v12  ;;  %v2092_v2 = vmul.f32 %v2091_v35, %v2089_v43 }
 0x291   :  { %vm2249_vm13 = vcmp.lt.s32.totalorder %v12733_v7, 3  ;;  %vm2250_vm14 = vcmp.lt.s32.totalorder %v12733_v7, 4  ;;  %4311 = vmatmul.mubr.f32.gmra.mrb[14].mxu0 %v1802_v56  ;;  %v2255_v4 = vsel %vm2247_vm12, %v2234_v46, %v2237_v50  ;;  %v2259_v0 = vsel %vm2247_vm12, %v2237_v50, %v2240_v41 }
 0x292   :  { %v9257_v17 = vsub.s32 %v1966_v23, %v1969_v47  ;;  %v2256_v21 = vsel %vm2250_vm14, %v2243_v38, 920167782  ;;  %v2093_v1 = vxor.u32 2147483648, %v2092_v2  ;;  %v2252_v44 = vsel %vm2250_vm14, %v2240_v41, 2102212464 }
 0x293   :  { %v2257_v12 = vsel %vm2249_vm13, %v2240_v41, %v2256_v21  ;;  %v2260_v26 = vsel %vm2250_vm14, %v2246_v22, 1326507024  ;;  %v1992_v35 = vsub.s32 4, %v1968_v24  ;;  %vm2248_vm0 = vcmp.lt.s32.totalorder %v12733_v7, 2  ;;  %v12740_v7 = vld [vmem:[#allocation25_spill] sm:$0xff] }
 0x294   :  { %v1972_v43 = vsub.s32 0, %v9257_v17  ;;  %v2261_v23 = vsel %vm2249_vm13, %v2243_v38, %v2260_v26  ;;  %v2094_v6 = vsel %vm2011_vm15, %v2093_v1, %v2092_v2  ;;  %v2258_v37 = vsel %vm2248_vm0, %v2255_v4, %v2257_v12 }
 0x295   :  { %v2262_v49 = vsel %vm2248_vm0, %v2259_v0, %v2261_v23  ;;  %v2263_v11 = vshll.u32 %v2223_v62, 8  ;;  %v2097_v22 = vsel %vm9204_vm5, %v12712_v15, %v2094_v6  ;;  %v2251_v61 = vsel %vm2247_vm12, %v2231_v13, %v2234_v46 }
 0x296   :  { %v5948_v20 = vmin.u32 %v1972_v43, %v9257_v17  ;;  %v2253_v42 = vsel %vm2249_vm13, %v2237_v50, %v2252_v44  ;;  %6523 = vcosq.f32 %v2097_v22  ;;  %v12734_v63 = vsel %vm9204_vm5, 0, %v9179_v57  ;;  %v12741_v43 = vld [vmem:[#allocation62_spill] sm:$0xff] }
 0x297   :  { %v9289_v41 = vand.u32 3, %v12734_v63  ;;  %v9291_v38 = vmul.u32.u64.low %v2263_v11, %v2262_v49  ;;  %v9292_v5 = vmul.u32.u64.high %v2263_v11, %v2262_v49, %v9291_v38  ;;  %6525 = vsinq.f32 %v2097_v22 }
 0x298   :  { %v1974_v47 = vclz %v5948_v20  ;;  %v9294_v62 = vmul.u32.u64.low %v2263_v11, %v2258_v37  ;;  %v9295_v56 = vmul.u32.u64.high %v2263_v11, %v2258_v37, %v9294_v62  ;;  %v9299_v13 = vsub.s32 32, %v9085_v16 }
 0x299   :  { %v9303_v46 = vmul.f32 %v12671_v32, %v9171_v53  ;;  %v9307_v57 = vsel %vm1908_vm11, %v1992_v35, %v1968_v24  ;;  %v2254_v18 = vsel %vm2248_vm0, %v2251_v61, %v2253_v42  ;;  %v9312_v50 = vsub.s32 32, %v9092_v54 }
 0x29a   :  { %12735 = vst [vmem:[#allocation37_spill] sm:$0xff] %v9299_v13  ;;  %v9316_v2 = vmul.f32 %v12669_v29, %v9283_v3  ;;  %v12737_v4 = vand.u32 2147483647, %v12720_v34  ;;  %v5949_v53 = vadd.s32 4294967294, %v1974_v47  ;;  %vm2107_vm3 = vcmp.eq.s32.totalorder %v9289_v41, 2 }
 0x29b   :  { %12736 = vst [vmem:[#allocation16_spill] sm:$0xff] %v9312_v50  ;;  %v1962_v24 = vadd.s32 %v9186_v10, %v9182_v14  ;;  %vm2272_vm2 = vc.u32 %v9292_v5, %v9294_v62  ;;  %v12528_v0 = vand.u32 2147483647, %v12740_v7  ;;  %vm2104_vm1 = vcmp.eq.s32.totalorder %v9289_v41, 0  ;;  %v12742_v10 = vld [vmem:[#allocation54_spill] sm:$0xff] }
 0x29c   :  { %vm9320_vm15 = vcmp.le.f32.partialorder %v12737_v4, 0.7853982  ;;  %vm5950_vm4 = vcmp.lt.s32.totalorder %v5949_v53, 0  ;;  %v2270_v44 = vmul.u32 %v2263_v11, %v2254_v18  ;;  %v2273_v12 = vadd.s32 1, %v9295_v56 }
 0x29d   :  { %vm2103_vm5 = vcmp.lt.s32.totalorder %v9289_v41, 2  ;;  %v1977_v26 = vsel %vm5950_vm4, 0, %v5949_v53  ;;  %v2128_v14 = vshrl.u32 %v12603_v48, %v12741_v43  ;;  %v2129_v35 = vshll.u32 %v12603_v48, %v12742_v10 }
 0x29e   :  { %v2130_v23 = vshrl.u32 %v12606_v9, %v12741_v43  ;;  %vm2101_vm6 = vweird.f32 %v12712_v15  ;;  %v1978_v6 = vsub.s32 32, %v1977_v26  ;;  %v1982_v37 = vsub.s32 4294967266, %v1977_v26 }
 0x29f   :  { %v2274_v49 = vsel %vm2272_vm2, %v2273_v12, %v9295_v56  ;;  %v2132_v11 = vshll.u32 %v12606_v9, %v12742_v10  ;;  %v2119_v20 = vand.u32 8388607, %v12528_v0  ;;  %v2133_v61 = vshrl.u32 %v12607_v27, %v12741_v43 }
 0x2a0   :  { %v2275_v22 = vadd.s32 %v2274_v49, %v2270_v44  ;;  %v2136_v42 = vshrl.u32 %v12601_v55, %v12741_v43  ;;  %v1979_v63 = vshll.u32 %v9257_v17, %v1977_v26  ;;  %v1980_v38 = vshrl.u32 %v1962_v24, %v1978_v6  ;;  %v6524_v18 = vpop.eup %6523 }
 0x2a1   :  { %v1983_v47 = vadd.s32 127, %v1982_v37  ;;  %v2139_v56 = vshrl.u32 %v12608_v39, %v12741_v43  ;;  %v2131_v53 = vor.u32 %v2130_v23, %v2129_v35  ;;  %v2135_v44 = vshll.u32 %v12607_v27, %v12742_v10  ;;  %v6526_v49 = vpop.eup %6525 }
 0x2a2   :  { %v2276_v4 = vadd.s32 536870912, %v2275_v22  ;;  %v2138_v12 = vshll.u32 %v12601_v55, %v12742_v10  ;;  %v2108_v0 = vxor.u32 2147483648, %v6524_v18  ;;  %v1981_v1 = vor.u32 %v1980_v38, %v1979_v63 }
 0x2a3   :  { %v1984_v16 = vshll.u32 %v1983_v47, 23  ;;  %v2142_v17 = vshrl.u32 %v12609_v60, %v12741_v43  ;;  %v2105_v24 = vxor.u32 2147483648, %v6526_v49  ;;  %v2134_v6 = vor.u32 %v2133_v61, %v2132_v11  ;;  %v12743_v47 = vld [vmem:[#allocation61_spill] sm:$0xff] }
 0x2a4   :  { %v2277_v26 = vshrl.u32 %v2276_v4, 30  ;;  %v2137_v37 = vor.u32 %v2136_v42, %v2135_v44  ;;  %v2109_v35 = vsel %vm2107_vm3, %v2108_v0, %v6526_v49  ;;  %v2140_v13 = vor.u32 %v2139_v56, %v2138_v12 }
 0x2a5   :  { %v1985_v23 = vor.u32 4788187, %v1984_v16  ;;  %v2141_v54 = vshll.u32 %v12608_v39, %v12742_v10  ;;  %v2106_v50 = vsel %vm2104_vm1, %v6524_v18, %v2105_v24  ;;  %v2120_v38 = vor.u32 8388608, %v2119_v20 }
 0x2a6   :  { %v2278_v63 = vshll.u32 %v2277_v26, 30  ;;  %vm2144_vm7 = vcmp.lt.s32.totalorder %v12743_v47, 1  ;;  %v2110_v43 = vsel %vm2103_vm5, %v2106_v50, %v2109_v35  ;;  %v1988_v61 = vcvt.s32.f32 %v1981_v1 }
 0x2a7   :  { %v1986_v11 = vand.u32 2147483647, %v1985_v23  ;;  %v2143_v42 = vor.u32 %v2142_v17, %v2141_v54  ;;  %v2111_v16 = vsel %vm2101_vm6, nan, %v2110_v43  ;;  %vm2147_vm8 = vcmp.lt.s32.totalorder %v12743_v47, 4 }
 0x2a8   :  { %v9372_v0 = vsub.s32 %v2275_v22, %v2278_v63  ;;  %v2152_v10 = vsel %vm2144_vm7, %v2131_v53, %v2134_v6  ;;  %4315 = vmatprep.mubr.f32.mxu0 %v2111_v16  ;;  %vm2146_vm9 = vcmp.lt.s32.totalorder %v12743_v47, 3  ;;  %v2149_v56 = vsel %vm2147_vm8, %v2137_v37, 2102212464  ;;  %v12745_v16 = vld [vmem:[#allocation46_spill] sm:$0xff] }
 0x2a9   :  { %v1989_v20 = vmul.f32 %v1988_v61, %v1986_v11  ;;  %v2153_v41 = vsel %vm2147_vm8, %v2140_v13, 920167782  ;;  %vm2145_vm10 = vcmp.lt.s32.totalorder %v12743_v47, 2  ;;  %v2156_v54 = vsel %vm2144_vm7, %v2134_v6, %v2137_v37 }
 0x2aa   :  { %v2281_v50 = vsub.s32 0, %v9372_v0  ;;  %v2154_v15 = vsel %vm2146_vm9, %v2137_v37, %v2153_v41  ;;  %v2157_v18 = vsel %vm2147_vm8, %v2143_v42, 1326507024  ;;  %v2160_v4 = vshll.u32 %v2120_v38, 8 }
 0x2ab   :  { %v1990_v1 = vxor.u32 2147483648, %v1989_v20  ;;  %v2155_v22 = vsel %vm2145_vm10, %v2152_v10, %v2154_v15  ;;  %v2301_v12 = vsub.s32 4, %v2277_v26  ;;  %v2148_v49 = vsel %vm2144_vm7, %v2128_v14, %v2131_v53 }
 0x2ac   :  { %v5960_v44 = vmin.u32 %v2281_v50, %v9372_v0  ;;  %v2150_v17 = vsel %vm2146_vm9, %v2134_v6, %v2149_v56  ;;  %v2158_v37 = vsel %vm2146_vm9, %v2140_v13, %v2157_v18  ;;  %v9401_v63 = vmul.f32 %v12671_v32, %v9283_v3 }
 0x2ad   :  { %v1991_v24 = vsel %vm1908_vm11, %v1990_v1, %v1989_v20  ;;  %v9395_v35 = vmul.u32.u64.low %v2160_v4, %v2155_v22  ;;  %v9396_v23 = vmul.u32.u64.high %v2160_v4, %v2155_v22, %v9395_v35  ;;  %v2159_v6 = vsel %vm2145_vm10, %v2156_v54, %v2158_v37 }
 0x2ae   :  { %v1994_v14 = vsel %vm9320_vm15, %v12720_v34, %v1991_v24  ;;  %v2283_v53 = vclz %v5960_v44  ;;  %v12744_v13 = vsel %vm9320_vm15, 0, %v9307_v57  ;;  %vm2217_vm11 = vcmp.lt.s32.totalorder %v12727_v59, 0 }
 0x2af   :  { %6527 = vcosq.f32 %v1994_v14  ;;  %v9412_v38 = vand.u32 3, %v12744_v13  ;;  %v9414_v43 = vmul.u32.u64.low %v2160_v4, %v2159_v6  ;;  %v9415_v11 = vmul.u32.u64.high %v2160_v4, %v2159_v6, %v9414_v43 }
 0x2b0   :  { %6529 = vsinq.f32 %v1994_v14  ;;  %v5961_v3 = vadd.s32 4294967294, %v2283_v53  ;;  %v2151_v61 = vsel %vm2145_vm10, %v2148_v49, %v2150_v17  ;;  %v9421_v42 = vadd.s32 1, %v9191_v30 }
 0x2b1   :  { %v9425_v21 = vsel %vm2217_vm11, %v2301_v12, %v2277_v26  ;;  %v2170_v57 = vadd.s32 1, %v9396_v23  ;;  %v2421_v10 = vand.u32 2147483647, %v12745_v16  ;;  %v9430_v20 = vadd.s32 1, %v9194_v52 }
 0x2b2   :  { %v3763_v56 = vand.u32 2139095040, %v9198_v31  ;;  %v12746_v41 = vand.u32 2147483647, %v12727_v59  ;;  %vm5962_vm13 = vcmp.lt.s32.totalorder %v5961_v3, 0  ;;  %vm2004_vm14 = vcmp.eq.s32.totalorder %v9412_v38, 2 }
 0x2b3   :  { %v2271_v30 = vadd.s32 %v9294_v62, %v9292_v5  ;;  %v2286_v26 = vsel %vm5962_vm13, 0, %v5961_v3  ;;  %v2167_v50 = vmul.u32 %v2160_v4, %v2151_v61  ;;  %vm2169_vm0 = vc.u32 %v9415_v11, %v9395_v35 }
 0x2b4   :  { %vm9435_vm12 = vcmp.le.f32.partialorder %v12746_v41, 0.7853982  ;;  %vm2001_vm15 = vcmp.eq.s32.totalorder %v9412_v38, 0  ;;  %v2287_v52 = vsub.s32 32, %v2286_v26  ;;  %v2291_v15 = vsub.s32 4294967266, %v2286_v26 }
 0x2b5   :  { %v2304_v54 = vsel %vm9435_vm12, 0, %v9425_v21  ;;  %v2171_v1 = vsel %vm2169_vm0, %v2170_v57, %v9396_v23  ;;  %vm2000_vm3 = vcmp.lt.s32.totalorder %v9412_v38, 2  ;;  %v2428_v5 = vand.u32 8388607, %v2421_v10 }
 0x2b6   :  { %v2172_v22 = vadd.s32 %v2171_v1, %v2167_v50  ;;  %v2437_v62 = vshrl.u32 %v12603_v48, %v7978_v33  ;;  %v2439_v18 = vshrl.u32 %v12606_v9, %v7978_v33  ;;  %vm1998_vm2 = vweird.f32 %v12720_v34 }
 0x2b7   :  { %v2288_v4 = vshll.u32 %v9372_v0, %v2286_v26  ;;  %v2289_v44 = vshrl.u32 %v2271_v30, %v2287_v52  ;;  %v2292_v12 = vadd.s32 127, %v2291_v15  ;;  %v2445_v49 = vshrl.u32 %v12601_v55, %v7978_v33 }
 0x2b8   :  { %v2173_v17 = vadd.s32 536870912, %v2172_v22  ;;  %v2438_v24 = vshll.u32 %v12603_v48, %v7835_v36  ;;  %v2441_v37 = vshll.u32 %v12606_v9, %v7835_v36  ;;  %v2442_v23 = vshrl.u32 %v12607_v27, %v7978_v33 }
 0x2b9   :  { %v2290_v14 = vor.u32 %v2289_v44, %v2288_v4  ;;  %v2293_v53 = vshll.u32 %v2292_v12, 23  ;;  %v2444_v0 = vshll.u32 %v12607_v27, %v7835_v36  ;;  %v2448_v6 = vshrl.u32 %v12608_v39, %v7978_v33  ;;  %v6528_v13 = vpop.eup %6527 }
 0x2ba   :  { %v9470_v43 = vshrl.u32 %v2173_v17, 30  ;;  %v2429_v3 = vor.u32 8388608, %v2428_v5  ;;  %v2440_v61 = vor.u32 %v2439_v18, %v2438_v24  ;;  %v2447_v57 = vshll.u32 %v12601_v55, %v7835_v36  ;;  %v6530_v41 = vpop.eup %6529 }
 0x2bb   :  { %v2005_v30 = vxor.u32 2147483648, %v6528_v13  ;;  %v2294_v26 = vor.u32 4788187, %v2293_v53  ;;  %v2446_v50 = vor.u32 %v2445_v49, %v2444_v0  ;;  %v2451_v52 = vshrl.u32 %v12609_v60, %v7978_v33 }
 0x2bc   :  { %v2002_v15 = vxor.u32 2147483648, %v6530_v41  ;;  %v2175_v1 = vshll.u32 %v9470_v43, 30  ;;  %v2443_v4 = vor.u32 %v2442_v23, %v2441_v37  ;;  %v2450_v44 = vshll.u32 %v12608_v39, %v7835_v36 }
 0x2bd   :  { %v2006_v5 = vsel %vm2004_vm14, %v2005_v30, %v6530_v41  ;;  %v2295_v18 = vand.u32 2147483647, %v2294_v26  ;;  %v2297_v12 = vcvt.s32.f32 %v2290_v14  ;;  %v2449_v17 = vor.u32 %v2448_v6, %v2447_v57 }
 0x2be   :  { %v2003_v24 = vsel %vm2001_vm15, %v6528_v13, %v2002_v15  ;;  %v9483_v49 = vsub.s32 %v2172_v22, %v2175_v1  ;;  %vm2453_vm1 = vcmp.lt.s32.totalorder %v7806_v28, 1  ;;  %vm2456_vm4 = vcmp.lt.s32.totalorder %v7806_v28, 4 }
 0x2bf   :  { %v2007_v33 = vsel %vm2000_vm3, %v2003_v24, %v2006_v5  ;;  %v2298_v37 = vmul.f32 %v2297_v12, %v2295_v18  ;;  %v2452_v36 = vor.u32 %v2451_v52, %v2450_v44  ;;  %v2458_v23 = vsel %vm2456_vm4, %v2446_v50, 2102212464 }
 0x2c0   :  { %v2008_v14 = vsel %vm1998_vm2, nan, %v2007_v33  ;;  %v2178_v53 = vsub.s32 0, %v9483_v49  ;;  %v2198_v22 = vsub.s32 4, %v9470_v43  ;;  %vm2454_vm5 = vcmp.lt.s32.totalorder %v7806_v28, 2 }
 0x2c1   :  { %4316 = vmatmul.mubr.f32.gmra.mrb[16].mxu0 %v2008_v14  ;;  %v2299_v0 = vxor.u32 2147483648, %v2298_v37  ;;  %vm2455_vm6 = vcmp.lt.s32.totalorder %v7806_v28, 3  ;;  %v2461_v38 = vsel %vm2453_vm1, %v2440_v61, %v2443_v4  ;;  %v2462_v6 = vsel %vm2456_vm4, %v2449_v17, 920167782 }
 0x2c2   :  { %v5956_v13 = vmin.u32 %v2178_v53, %v9483_v49  ;;  %v2457_v34 = vsel %vm2453_vm1, %v2437_v62, %v2440_v61  ;;  %v2459_v57 = vsel %vm2455_vm6, %v2443_v4, %v2458_v23  ;;  %v2465_v41 = vsel %vm2453_vm1, %v2443_v4, %v2446_v50 }
 0x2c3   :  { %v2300_v30 = vsel %vm2217_vm11, %v2299_v0, %v2298_v37  ;;  %v2463_v26 = vsel %vm2455_vm6, %v2446_v50, %v2462_v6  ;;  %v2466_v52 = vsel %vm2456_vm4, %v2452_v36, 1326507024  ;;  %v2469_v15 = vshll.u32 %v2429_v3, 8  ;;  %v12752_v6 = vld [vmem:[#allocation45_spill] sm:$0xff] }
 0x2c4   :  { %v2303_v1 = vsel %vm9435_vm12, %v12727_v59, %v2300_v30  ;;  %v2180_v44 = vclz %v5956_v13  ;;  %v2464_v62 = vsel %vm2454_vm5, %v2461_v38, %v2463_v26  ;;  %v2467_v61 = vsel %vm2455_vm6, %v2449_v17, %v2466_v52 }
 0x2c5   :  { %6531 = vcosq.f32 %v2303_v1  ;;  %v2468_v4 = vsel %vm2454_vm5, %v2465_v41, %v2467_v61  ;;  %v9517_v5 = vmul.u32.u64.low %v2469_v15, %v2464_v62  ;;  %v9518_v18 = vmul.u32.u64.high %v2469_v15, %v2464_v62, %v9517_v5 }
 0x2c6   :  { %6533 = vsinq.f32 %v2303_v1  ;;  %v5957_v50 = vadd.s32 4294967294, %v2180_v44  ;;  %v9521_v3 = vmul.u32.u64.low %v2469_v15, %v2468_v4  ;;  %v9522_v12 = vmul.u32.u64.high %v2469_v15, %v2468_v4, %v9521_v3 }
 0x2c7   :  { %v3866_v24 = vand.u32 2139095040, %v9303_v46  ;;  %v3557_v33 = vand.u32 2139095040, %v9316_v2  ;;  %v3660_v37 = vand.u32 2139095040, %v9401_v63  ;;  %v2308_v17 = vand.u32 3, %v2304_v54 }
 0x2c8   :  { %v12749_v36 = vand.u32 2147483647, %v12740_v7  ;;  %vm2114_vm8 = vcmp.lt.s32.totalorder %v12740_v7, 0  ;;  %vm5958_vm9 = vcmp.lt.s32.totalorder %v5957_v50, 0  ;;  %v2460_v14 = vsel %vm2454_vm5, %v2457_v34, %v2459_v57 }
 0x2c9   :  { %v2168_v53 = vadd.s32 %v9395_v35, %v9415_v11  ;;  %v2183_v0 = vsel %vm5958_vm9, 0, %v5957_v50  ;;  %v2199_v21 = vsel %vm2114_vm8, %v2198_v22, %v9470_v43  ;;  %v2479_v47 = vadd.s32 1, %v9518_v18 }
 0x2ca   :  { %vm9533_vm7 = vcmp.le.f32.partialorder %v12749_v36, 0.7853982  ;;  %v2184_v54 = vsub.s32 32, %v2183_v0  ;;  %v2188_v38 = vsub.s32 4294967266, %v2183_v0  ;;  %v2318_v13 = vand.u32 2147483647, %v12752_v6 }
 0x2cb   :  { %v2336_v41 = vshrl.u32 %v12606_v9, %v7954_v58  ;;  %vm2309_vm10 = vcmp.lt.s32.totalorder %v2308_v17, 2  ;;  %vm2310_vm11 = vcmp.eq.s32.totalorder %v2308_v17, 0  ;;  %v2476_v28 = vmul.u32 %v2469_v15, %v2460_v14 }
 0x2cc   :  { %vm2478_vm12 = vc.u32 %v9522_v12, %v9517_v5  ;;  %v2335_v35 = vshll.u32 %v12603_v48, %v7744_v19  ;;  %vm2307_vm13 = vweird.f32 %v12727_v59  ;;  %v2185_v11 = vshll.u32 %v9483_v49, %v2183_v0 }
 0x2cd   :  { %v2186_v43 = vshrl.u32 %v2168_v53, %v2184_v54  ;;  %v2189_v22 = vadd.s32 127, %v2188_v38  ;;  %v2480_v34 = vsel %vm2478_vm12, %v2479_v47, %v9518_v18  ;;  %vm2313_vm14 = vcmp.eq.s32.totalorder %v2308_v17, 2 }
 0x2ce   :  { %v2201_v57 = vsel %vm9533_vm7, 0, %v2199_v21  ;;  %v2481_v30 = vadd.s32 %v2480_v34, %v2476_v28  ;;  %v2339_v26 = vshrl.u32 %v12607_v27, %v7954_v58  ;;  %v2325_v1 = vand.u32 8388607, %v2318_v13 }
 0x2cf   :  { %v2187_v52 = vor.u32 %v2186_v43, %v2185_v11  ;;  %v2190_v15 = vshll.u32 %v2189_v22, 23  ;;  %v2337_v44 = vor.u32 %v2336_v41, %v2335_v35  ;;  %v6532_v62 = vpop.eup %6531  ;;  %v2338_v61 = vshll.u32 %v12606_v9, %v7744_v19 }
 0x2d0   :  { %v2482_v49 = vadd.s32 536870912, %v2481_v30  ;;  %v2342_v4 = vshrl.u32 %v12601_v55, %v7954_v58  ;;  %v2345_v18 = vshrl.u32 %v12608_v39, %v7954_v58  ;;  %v6534_v50 = vpop.eup %6533  ;;  %v2314_v3 = vxor.u32 2147483648, %v6532_v62 }
 0x2d1   :  { %v2191_v36 = vor.u32 4788187, %v2190_v15  ;;  %v2341_v14 = vshll.u32 %v12607_v27, %v7744_v19  ;;  %v2348_v53 = vshrl.u32 %v12609_v60, %v7954_v58  ;;  %v2311_v0 = vxor.u32 2147483648, %v6534_v50 }
 0x2d2   :  { %v9572_v21 = vshrl.u32 %v2482_v49, 30  ;;  %v2340_v47 = vor.u32 %v2339_v26, %v2338_v61  ;;  %v2344_v54 = vshll.u32 %v12601_v55, %v7744_v19  ;;  %v2315_v38 = vsel %vm2313_vm14, %v2314_v3, %v6534_v50 }
 0x2d3   :  { %v2192_v41 = vand.u32 2147483647, %v2191_v36  ;;  %v2194_v28 = vcvt.s32.f32 %v2187_v52  ;;  %v2347_v35 = vshll.u32 %v12608_v39, %v7744_v19  ;;  %v2312_v11 = vsel %vm2310_vm11, %v6532_v62, %v2311_v0  ;;  %v207_v0 = vpop.permute.xlu0 %206 }
 0x2d4   :  { %v2484_v43 = vshll.u32 %v9572_v21, 30  ;;  %v2343_v22 = vor.u32 %v2342_v4, %v2341_v14  ;;  %v2346_v34 = vor.u32 %v2345_v18, %v2344_v54  ;;  %v2316_v15 = vsel %vm2309_vm10, %v2312_v11, %v2315_v38 }
 0x2d5   :  { %v2195_v49 = vmul.f32 %v2194_v28, %v2192_v41  ;;  %v9582_v26 = vand.u32 3, %v2201_v57  ;;  %v2349_v61 = vor.u32 %v2348_v53, %v2347_v35  ;;  %v2317_v50 = vsel %vm2307_vm13, nan, %v2316_v15 }
 0x2d6   :  { %v9586_v3 = vsub.s32 %v2481_v30, %v2484_v43  ;;  %v2326_v52 = vor.u32 8388608, %v2325_v1  ;;  %v2334_v19 = vshrl.u32 %v12603_v48, %v7954_v58  ;;  %4320 = vmatprep.mubr.f32.mxu0 %v2317_v50  ;;  %vm2350_vm0 = vcmp.lt.s32.totalorder %v7741_v8, 1 }
 0x2d7   :  { %v2196_v62 = vxor.u32 2147483648, %v2195_v49  ;;  %vm2352_vm15 = vcmp.lt.s32.totalorder %v7741_v8, 3  ;;  %vm2353_vm3 = vcmp.lt.s32.totalorder %v7741_v8, 4  ;;  %v2358_v4 = vsel %vm2350_vm0, %v2337_v44, %v2340_v47 }
 0x2d8   :  { %v2487_v17 = vsub.s32 0, %v9586_v3  ;;  %v2355_v57 = vsel %vm2353_vm3, %v2343_v22, 2102212464  ;;  %v2359_v59 = vsel %vm2353_vm3, %v2346_v34, 920167782  ;;  %v2362_v58 = vsel %vm2350_vm0, %v2340_v47, %v2343_v22 }
 0x2d9   :  { %v2197_v30 = vsel %vm2114_vm8, %v2196_v62, %v2195_v49  ;;  %v2360_v1 = vsel %vm2352_vm15, %v2343_v22, %v2359_v59  ;;  %v2363_v18 = vsel %vm2353_vm3, %v2349_v61, 1326507024  ;;  %vm2351_vm2 = vcmp.lt.s32.totalorder %v7741_v8, 2  ;;  %v12754_v8 = vld [vmem:[#allocation78_spill] sm:$0xff] }
 0x2da   :  { %v2200_v36 = vsel %vm9533_vm7, %v12740_v7, %v2197_v30  ;;  %v5968_v14 = vmin.u32 %v2487_v17, %v9586_v3  ;;  %v2354_v53 = vsel %vm2350_vm0, %v2334_v19, %v2337_v44  ;;  %v2361_v54 = vsel %vm2351_vm2, %v2358_v4, %v2360_v1  ;;  %v12757_v30 = vld [vmem:[#allocation74_spill] sm:$0xff] }
 0x2db   :  { %6535 = vcosq.f32 %v2200_v36  ;;  %v2364_v38 = vsel %vm2352_vm15, %v2346_v34, %v2363_v18  ;;  %v2366_v41 = vshll.u32 %v2326_v52, 8  ;;  %v2356_v23 = vsel %vm2352_vm15, %v2340_v47, %v2355_v57  ;;  %v12753_v52 = vld [vmem:[#allocation32_spill] sm:$0xff] }
 0x2dc   :  { %6537 = vsinq.f32 %v2200_v36  ;;  %v2489_v28 = vclz %v5968_v14  ;;  %v2365_v35 = vsel %vm2351_vm2, %v2362_v58, %v2364_v38  ;;  %v9619_v15 = vmul.f32 %v12669_v29, %v207_v0 }
 0x2dd   :  { %v9611_v11 = vmul.u32.u64.low %v2366_v41, %v2365_v35  ;;  %v9612_v43 = vmul.u32.u64.high %v2366_v41, %v2365_v35, %v9611_v11  ;;  %v9614_v44 = vmul.u32.u64.low %v2366_v41, %v2361_v54  ;;  %v9615_v22 = vmul.u32.u64.high %v2366_v41, %v2361_v54, %v9614_v44 }
 0x2de   :  { %v9622_v34 = vmul.f32 %v12671_v32, %v207_v0  ;;  %v5969_v49 = vadd.s32 4294967294, %v2489_v28  ;;  %v2507_v61 = vsub.s32 4, %v9572_v21  ;;  %v9627_v47 = vshrl.u32 %v3763_v56, 23 }
 0x2df   :  { %v9631_v50 = vshrl.u32 %v3866_v24, 23  ;;  %vm2423_vm1 = vcmp.lt.s32.totalorder %v12745_v16, 0  ;;  %v2357_v29 = vsel %vm2351_vm2, %v2354_v53, %v2356_v23  ;;  %vm2207_vm4 = vcmp.eq.s32.totalorder %v9582_v26, 0 }
 0x2e0   :  { %vm2210_vm5 = vcmp.eq.s32.totalorder %v9582_v26, 2  ;;  %v2477_v32 = vadd.s32 %v9517_v5, %v9522_v12  ;;  %vm5970_vm6 = vcmp.lt.s32.totalorder %v5969_v49, 0  ;;  %v2627_v56 = vand.u32 2147483647, %v12753_v52 }
 0x2e1   :  { %vm2206_vm7 = vcmp.lt.s32.totalorder %v9582_v26, 2  ;;  %v2492_v19 = vsel %vm5970_vm6, 0, %v5969_v49  ;;  %vm2375_vm8 = vc.u32 %v9612_v43, %v9614_v44  ;;  %v2376_v24 = vadd.s32 1, %v9615_v22 }
 0x2e2   :  { %v2645_v62 = vshrl.u32 %v12606_v9, %v12754_v8  ;;  %vm2204_vm9 = vweird.f32 %v12740_v7  ;;  %vm9650_vm10 = vcmp.le.f32.partialorder %v2421_v10, 0.7853982  ;;  %v2493_v12 = vsub.s32 32, %v2492_v19 }
 0x2e3   :  { %v2497_v17 = vsub.s32 4294967266, %v2492_v19  ;;  %v9657_v57 = vsel %vm2423_vm1, %v2507_v61, %v9572_v21  ;;  %v2373_v4 = vmul.u32 %v2366_v41, %v2357_v29  ;;  %v2377_v59 = vsel %vm2375_vm8, %v2376_v24, %v9615_v22 }
 0x2e4   :  { %v2644_v1 = vshll.u32 %v12603_v48, %v12757_v30  ;;  %v2647_v58 = vshll.u32 %v12606_v9, %v12757_v30  ;;  %v2648_v10 = vshrl.u32 %v12607_v27, %v12754_v8  ;;  %v2494_v18 = vshll.u32 %v9586_v3, %v2492_v19 }
 0x2e5   :  { %v2495_v36 = vshrl.u32 %v2477_v32, %v2493_v12  ;;  %v2498_v14 = vadd.s32 127, %v2497_v17  ;;  %v2378_v53 = vadd.s32 %v2377_v59, %v2373_v4  ;;  %v6536_v0 = vpop.eup %6535  ;;  %v2634_v21 = vand.u32 8388607, %v2627_v56 }
 0x2e6   :  { %v2646_v54 = vor.u32 %v2645_v62, %v2644_v1  ;;  %v2651_v38 = vshrl.u32 %v12601_v55, %v12754_v8  ;;  %v2654_v41 = vshrl.u32 %v12608_v39, %v12754_v8  ;;  %v6538_v28 = vpop.eup %6537  ;;  %v2211_v23 = vxor.u32 2147483648, %v6536_v0 }
 0x2e7   :  { %v2496_v35 = vor.u32 %v2495_v36, %v2494_v18  ;;  %v2499_v11 = vshll.u32 %v2498_v14, 23  ;;  %v2379_v22 = vadd.s32 536870912, %v2378_v53  ;;  %v2208_v3 = vxor.u32 2147483648, %v6538_v28 }
 0x2e8   :  { %v2650_v49 = vshll.u32 %v12607_v27, %v12757_v30  ;;  %v2653_v61 = vshll.u32 %v12601_v55, %v12757_v30  ;;  %v2657_v29 = vshrl.u32 %v12609_v60, %v12754_v8  ;;  %v2212_v32 = vsel %vm2210_vm5, %v2211_v23, %v6538_v28  ;;  %v12758_v28 = vld [vmem:[#allocation73_spill] sm:$0xff] }
 0x2e9   :  { %v2500_v19 = vor.u32 4788187, %v2499_v11  ;;  %v2380_v24 = vshrl.u32 %v2379_v22, 30  ;;  %v2649_v62 = vor.u32 %v2648_v10, %v2647_v58  ;;  %v2209_v12 = vsel %vm2207_vm4, %v6536_v0, %v2208_v3 }
 0x2ea   :  { %v2652_v17 = vor.u32 %v2651_v38, %v2650_v49  ;;  %v2655_v4 = vor.u32 %v2654_v41, %v2653_v61  ;;  %v2656_v59 = vshll.u32 %v12608_v39, %v12757_v30  ;;  %vm3153_vm11 = vcmp.gt.s32.totalorder %v9421_v42, 0 }
 0x2eb   :  { %vm3256_vm12 = vcmp.gt.s32.totalorder %v9430_v20, 0  ;;  %v2213_v1 = vsel %vm2206_vm7, %v2209_v12, %v2212_v32  ;;  %v2501_v18 = vand.u32 2147483647, %v2500_v19  ;;  %v2503_v36 = vcvt.s32.f32 %v2496_v35 }
 0x2ec   :  { %vm2320_vm13 = vcmp.lt.s32.totalorder %v12752_v6, 0  ;;  %v2381_v58 = vshll.u32 %v2380_v24, 30  ;;  %v2214_v10 = vsel %vm2204_vm9, nan, %v2213_v1  ;;  %v2510_v14 = vsel %vm9650_vm10, 0, %v9657_v57 }
 0x2ed   :  { %v2643_v30 = vshrl.u32 %v12603_v48, %v12754_v8  ;;  %v2658_v0 = vor.u32 %v2657_v29, %v2656_v59  ;;  %4321 = vmatmul.mubr.f32.gmra.mrb[18].mxu0 %v2214_v10  ;;  %v2504_v38 = vmul.f32 %v2503_v36, %v2501_v18  ;;  %v2635_v41 = vor.u32 8388608, %v2634_v21 }
 0x2ee   :  { %v9697_v26 = vsub.s32 %v2378_v53, %v2381_v58  ;;  %vm2662_vm14 = vcmp.lt.s32.totalorder %v12758_v28, 4  ;;  %vm2659_vm0 = vcmp.lt.s32.totalorder %v12758_v28, 1  ;;  %vm2660_vm15 = vcmp.lt.s32.totalorder %v12758_v28, 2 }
 0x2ef   :  { %v2664_v7 = vsel %vm2662_vm14, %v2652_v17, 2102212464  ;;  %v2668_v23 = vsel %vm2662_vm14, %v2655_v4, 920167782  ;;  %v2505_v35 = vxor.u32 2147483648, %v2504_v38  ;;  %vm2661_vm3 = vcmp.lt.s32.totalorder %v12758_v28, 3 }
 0x2f0   :  { %v2384_v57 = vsub.s32 0, %v9697_v26  ;;  %v2667_v8 = vsel %vm2659_vm0, %v2646_v54, %v2649_v62  ;;  %v2404_v11 = vsub.s32 4, %v2380_v24  ;;  %v2669_v22 = vsel %vm2661_vm3, %v2652_v17, %v2668_v23 }
 0x2f1   :  { %v2671_v3 = vsel %vm2659_vm0, %v2649_v62, %v2652_v17  ;;  %v2672_v53 = vsel %vm2662_vm14, %v2658_v0, 1326507024  ;;  %v2506_v21 = vsel %vm2423_vm1, %v2505_v35, %v2504_v38  ;;  %v2663_v61 = vsel %vm2659_vm0, %v2643_v30, %v2646_v54  ;;  %v12759_v0 = vld [vmem:[#allocation31_spill] sm:$0xff]  ;;  %v12762_v35 = vld [vmem:[#allocation77_spill] sm:$0xff] }
 0x2f2   :  { %v5964_v49 = vmin.u32 %v2384_v57, %v9697_v26  ;;  %v2665_v29 = vsel %vm2661_vm3, %v2649_v62, %v2664_v7  ;;  %v2509_v32 = vsel %vm9650_vm10, %v12745_v16, %v2506_v21  ;;  %v2670_v19 = vsel %vm2660_vm15, %v2667_v8, %v2669_v22  ;;  %v12763_v8 = vld [vmem:[#allocation72_spill] sm:$0xff] }
 0x2f3   :  { %v2673_v12 = vsel %vm2661_vm3, %v2655_v4, %v2672_v53  ;;  %v2675_v59 = vshll.u32 %v2635_v41, 8  ;;  %6539 = vcosq.f32 %v2509_v32  ;;  %v9712_v1 = vand.u32 3, %v2510_v14 }
 0x2f4   :  { %v2386_v17 = vclz %v5964_v49  ;;  %v2674_v18 = vsel %vm2660_vm15, %v2671_v3, %v2673_v12  ;;  %6541 = vsinq.f32 %v2509_v32  ;;  %v9718_v54 = vsel %vm2320_vm13, %v2404_v11, %v2380_v24 }
 0x2f5   :  { %v9720_v62 = vmul.u32.u64.low %v2675_v59, %v2674_v18  ;;  %v9721_v5 = vmul.u32.u64.high %v2675_v59, %v2674_v18, %v9720_v62  ;;  %v2666_v4 = vsel %vm2660_vm15, %v2663_v61, %v2665_v29  ;;  %v9732_v14 = vsel %vm3153_vm11, %v9421_v42, 0 }
 0x2f6   :  { %v5965_v36 = vadd.s32 4294967294, %v2386_v17  ;;  %v9725_v58 = vmul.u32.u64.low %v2675_v59, %v2670_v19  ;;  %v9726_v10 = vmul.u32.u64.high %v2675_v59, %v2670_v19, %v9725_v58  ;;  %v9737_v24 = vsel %vm3256_vm12, %v9430_v20, 0 }
 0x2f7   :  { %v9741_v30 = vshrl.u32 %v3557_v33, 23  ;;  %v12535_v38 = vand.u32 2147483647, %v12759_v0  ;;  %vm2519_vm2 = vcmp.eq.s32.totalorder %v9712_v1, 2  ;;  %vm9747_vm1 = vcmp.le.f32.partialorder %v2318_v13, 0.7853982 }
 0x2f8   :  { %v2374_v42 = vadd.s32 %v9614_v44, %v9612_v43  ;;  %vm5966_vm4 = vcmp.lt.s32.totalorder %v5965_v36, 0  ;;  %vm2516_vm5 = vcmp.eq.s32.totalorder %v9712_v1, 0  ;;  %v2407_v33 = vsel %vm9747_vm1, 0, %v9718_v54 }
 0x2f9   :  { %v2389_v20 = vsel %vm5966_vm4, 0, %v5965_v36  ;;  %v2682_v28 = vmul.u32 %v2675_v59, %v2666_v4  ;;  %vm2684_vm6 = vc.u32 %v9721_v5, %v9725_v58  ;;  %vm2515_vm7 = vcmp.lt.s32.totalorder %v9712_v1, 2 }
 0x2fa   :  { %v2390_v13 = vsub.s32 32, %v2389_v20  ;;  %v2394_v7 = vsub.s32 4294967266, %v2389_v20  ;;  %v2685_v23 = vadd.s32 1, %v9726_v10  ;;  %v2542_v43 = vshrl.u32 %v12606_v9, %v12762_v35 }
 0x2fb   :  { %vm2513_vm8 = vweird.f32 %v12745_v16  ;;  %v2531_v44 = vand.u32 8388607, %v12535_v38  ;;  %v2540_v57 = vshrl.u32 %v12603_v48, %v12762_v35  ;;  %v2541_v11 = vshll.u32 %v12603_v48, %v12763_v8 }
 0x2fc   :  { %v2545_v22 = vshrl.u32 %v12607_v27, %v12762_v35  ;;  %v2391_v3 = vshll.u32 %v9697_v26, %v2389_v20  ;;  %v2392_v53 = vshrl.u32 %v2374_v42, %v2390_v13  ;;  %v2395_v21 = vadd.s32 127, %v2394_v7 }
 0x2fd   :  { %v2686_v49 = vsel %vm2684_vm6, %v2685_v23, %v9726_v10  ;;  %v2544_v29 = vshll.u32 %v12606_v9, %v12763_v8  ;;  %v2548_v32 = vshrl.u32 %v12601_v55, %v12762_v35  ;;  %v2551_v19 = vshrl.u32 %v12608_v39, %v12762_v35  ;;  %v6540_v12 = vpop.eup %6539 }
 0x2fe   :  { %v2687_v61 = vadd.s32 %v2686_v49, %v2682_v28  ;;  %v2393_v59 = vor.u32 %v2392_v53, %v2391_v3  ;;  %v2396_v17 = vshll.u32 %v2395_v21, 23  ;;  %v2543_v18 = vor.u32 %v2542_v43, %v2541_v11  ;;  %v6542_v62 = vpop.eup %6541 }
 0x2ff   :  { %v2554_v26 = vshrl.u32 %v12609_v60, %v12762_v35  ;;  %v2520_v36 = vxor.u32 2147483648, %v6540_v12  ;;  %v2547_v10 = vshll.u32 %v12607_v27, %v12763_v8  ;;  %v2550_v42 = vshll.u32 %v12601_v55, %v12763_v8 }
 0x300   :  { %v2688_v4 = vadd.s32 536870912, %v2687_v61  ;;  %v2517_v20 = vxor.u32 2147483648, %v6542_v62  ;;  %v2397_v28 = vor.u32 4788187, %v2396_v17  ;;  %v2546_v13 = vor.u32 %v2545_v22, %v2544_v29 }
 0x301   :  { %v2553_v7 = vshll.u32 %v12608_v39, %v12763_v8  ;;  %v2521_v23 = vsel %vm2519_vm2, %v2520_v36, %v6542_v62  ;;  %v2549_v35 = vor.u32 %v2548_v32, %v2547_v10  ;;  %v2552_v11 = vor.u32 %v2551_v19, %v2550_v42  ;;  %v12764_v8 = vld [vmem:[#allocation71_spill] sm:$0xff] }
 0x302   :  { %v2689_v43 = vshrl.u32 %v2688_v4, 30  ;;  %v2518_v3 = vsel %vm2516_vm5, %v6540_v12, %v2517_v20  ;;  %v2398_v53 = vand.u32 2147483647, %v2397_v28  ;;  %v2400_v21 = vcvt.s32.f32 %v2393_v59 }
 0x303   :  { %v2555_v49 = vor.u32 %v2554_v26, %v2553_v7  ;;  %v2522_v38 = vsel %vm2515_vm7, %v2518_v3, %v2521_v23  ;;  %vm2629_vm9 = vcmp.lt.s32.totalorder %v12753_v52, 0  ;;  %v2532_v29 = vor.u32 8388608, %v2531_v44 }
 0x304   :  { %v2690_v22 = vshll.u32 %v2689_v43, 30  ;;  %vm2556_vm10 = vcmp.lt.s32.totalorder %v12764_v8, 1  ;;  %v2523_v17 = vsel %vm2513_vm8, nan, %v2522_v38  ;;  %v2401_v32 = vmul.f32 %v2400_v21, %v2398_v53 }
 0x305   :  { %vm2558_vm11 = vcmp.lt.s32.totalorder %v12764_v8, 3  ;;  %vm2559_vm12 = vcmp.lt.s32.totalorder %v12764_v8, 4  ;;  %4325 = vmatprep.mubr.f32.mxu0 %v2523_v17  ;;  %v2564_v1 = vsel %vm2556_vm10, %v2543_v18, %v2546_v13  ;;  %v2568_v44 = vsel %vm2556_vm10, %v2546_v13, %v2549_v35 }
 0x306   :  { %v9800_v19 = vsub.s32 %v2687_v61, %v2690_v22  ;;  %v2565_v12 = vsel %vm2559_vm12, %v2552_v11, 920167782  ;;  %v2402_v59 = vxor.u32 2147483648, %v2401_v32  ;;  %v2561_v26 = vsel %vm2559_vm12, %v2549_v35, 2102212464 }
 0x307   :  { %v2566_v16 = vsel %vm2558_vm11, %v2549_v35, %v2565_v12  ;;  %v2569_v38 = vsel %vm2559_vm12, %v2555_v49, 1326507024  ;;  %v2713_v36 = vsub.s32 4, %v2689_v43  ;;  %vm2557_vm14 = vcmp.lt.s32.totalorder %v12764_v8, 2 }
 0x308   :  { %v2693_v62 = vsub.s32 0, %v9800_v19  ;;  %v2570_v61 = vsel %vm2558_vm11, %v2552_v11, %v2569_v38  ;;  %v2403_v4 = vsel %vm2320_vm13, %v2402_v59, %v2401_v32  ;;  %v2567_v10 = vsel %vm2557_vm14, %v2564_v1, %v2566_v16 }
 0x309   :  { %v2571_v42 = vsel %vm2557_vm14, %v2568_v44, %v2570_v61  ;;  %v2572_v20 = vshll.u32 %v2532_v29, 8  ;;  %v2406_v28 = vsel %vm9747_vm1, %v12752_v6, %v2403_v4  ;;  %v2560_v23 = vsel %vm2556_vm10, %v2540_v57, %v2543_v18 }
 0x30a   :  { %v5976_v7 = vmin.u32 %v2693_v62, %v9800_v19  ;;  %v2562_v35 = vsel %vm2558_vm11, %v2546_v13, %v2561_v26  ;;  %6543 = vcosq.f32 %v2406_v28  ;;  %v9830_v11 = vand.u32 3, %v2407_v33 }
 0x30b   :  { %v9832_v3 = vmul.u32.u64.low %v2572_v20, %v2571_v42  ;;  %v9833_v53 = vmul.u32.u64.high %v2572_v20, %v2571_v42, %v9832_v3  ;;  %6545 = vsinq.f32 %v2406_v28  ;;  %v9840_v57 = vshrl.u32 %v9732_v14, 5 }
 0x30c   :  { %v2695_v21 = vclz %v5976_v7  ;;  %v9835_v49 = vmul.u32.u64.low %v2572_v20, %v2567_v10  ;;  %v9836_v22 = vmul.u32.u64.high %v2572_v20, %v2567_v10, %v9835_v49  ;;  %v9844_v18 = vshrl.u32 %v3660_v37, 23 }
 0x30d   :  { %v9848_v54 = vsel %vm2629_vm9, %v2713_v36, %v2689_v43  ;;  %v2563_v41 = vsel %vm2557_vm14, %v2560_v23, %v2562_v35  ;;  %v9853_v33 = vand.u32 31, %v9732_v14  ;;  %v9856_v13 = vshrl.u32 %v9737_v24, 5 }
 0x30e   :  { %vm9860_vm13 = vcmp.le.f32.partialorder %v2627_v56, 0.7853982  ;;  %v5977_v37 = vadd.s32 4294967294, %v2695_v21  ;;  %vm2416_vm0 = vcmp.eq.s32.totalorder %v9830_v11, 2  ;;  %v2683_v43 = vadd.s32 %v9725_v58, %v9721_v5 }
 0x30f   :  { %vm2581_vm15 = vc.u32 %v9833_v53, %v9835_v49  ;;  %v2833_v14 = vand.u32 2147483647, %v7417_v25  ;;  %vm2413_vm3 = vcmp.eq.s32.totalorder %v9830_v11, 0  ;;  %v2716_v56 = vsel %vm9860_vm13, 0, %v9848_v54 }
 0x310   :  { %vm5978_vm2 = vcmp.lt.s32.totalorder %v5977_v37, 0  ;;  %v2579_v8 = vmul.u32 %v2572_v20, %v2563_v41  ;;  %v2582_v17 = vadd.s32 1, %v9836_v22  ;;  %vm2412_vm1 = vcmp.lt.s32.totalorder %v9830_v11, 2 }
 0x311   :  { %v2698_v32 = vsel %vm5978_vm2, 0, %v5977_v37  ;;  %v2849_v5 = vshrl.u32 %v12603_v48, %v8978_v45  ;;  %v2850_v58 = vshll.u32 %v12603_v48, %v8848_v40  ;;  %v2851_v1 = vshrl.u32 %v12606_v9, %v8978_v45 }
 0x312   :  { %vm2410_vm4 = vweird.f32 %v12752_v6  ;;  %v2699_v12 = vsub.s32 32, %v2698_v32  ;;  %v2703_v44 = vsub.s32 4294967266, %v2698_v32  ;;  %v2583_v59 = vsel %vm2581_vm15, %v2582_v17, %v9836_v22 }
 0x313   :  { %v2853_v26 = vshll.u32 %v12606_v9, %v8848_v40  ;;  %v2584_v16 = vadd.s32 %v2583_v59, %v2579_v8  ;;  %v2840_v38 = vand.u32 8388607, %v2833_v14  ;;  %v2854_v62 = vshrl.u32 %v12607_v27, %v8978_v45 }
 0x314   :  { %v2857_v36 = vshrl.u32 %v12601_v55, %v8978_v45  ;;  %v2700_v61 = vshll.u32 %v9800_v19, %v2698_v32  ;;  %v2701_v4 = vshrl.u32 %v2683_v43, %v2699_v12  ;;  %v2704_v10 = vadd.s32 127, %v2703_v44  ;;  %v6544_v20 = vpop.eup %6543 }
 0x315   :  { %v2860_v42 = vshrl.u32 %v12608_v39, %v8978_v45  ;;  %v2585_v28 = vadd.s32 536870912, %v2584_v16  ;;  %v2852_v7 = vor.u32 %v2851_v1, %v2850_v58  ;;  %v2856_v23 = vshll.u32 %v12607_v27, %v8848_v40  ;;  %v6546_v3 = vpop.eup %6545 }
 0x316   :  { %v2859_v35 = vshll.u32 %v12601_v55, %v8848_v40  ;;  %v2417_v21 = vxor.u32 2147483648, %v6544_v20  ;;  %v2702_v22 = vor.u32 %v2701_v4, %v2700_v61  ;;  %v2705_v41 = vshll.u32 %v2704_v10, 23 }
 0x317   :  { %v2863_v19 = vshrl.u32 %v12609_v60, %v8978_v45  ;;  %v2414_v37 = vxor.u32 2147483648, %v6546_v3  ;;  %v2586_v43 = vshrl.u32 %v2585_v28, 30  ;;  %v2855_v8 = vor.u32 %v2854_v62, %v2853_v26 }
 0x318   :  { %v2858_v17 = vor.u32 %v2857_v36, %v2856_v23  ;;  %v2418_v32 = vsel %vm2416_vm0, %v2417_v21, %v6546_v3  ;;  %v2706_v58 = vor.u32 4788187, %v2705_v41  ;;  %v2861_v1 = vor.u32 %v2860_v42, %v2859_v35 }
 0x319   :  { %v2862_v12 = vshll.u32 %v12608_v39, %v8848_v40  ;;  %v2415_v44 = vsel %vm2413_vm3, %v6544_v20, %v2414_v37  ;;  %v2587_v59 = vshll.u32 %v2586_v43, 30  ;;  %v2841_v61 = vor.u32 8388608, %v2840_v38 }
 0x31a   :  { %vm2865_vm5 = vcmp.lt.s32.totalorder %v8764_v51, 1  ;;  %v2419_v45 = vsel %vm2412_vm1, %v2415_v44, %v2418_v32  ;;  %v2707_v26 = vand.u32 2147483647, %v2706_v58  ;;  %v2709_v62 = vcvt.s32.f32 %v2702_v22 }
 0x31b   :  { %v2864_v36 = vor.u32 %v2863_v19, %v2862_v12  ;;  %v2420_v4 = vsel %vm2410_vm4, nan, %v2419_v45  ;;  %v9912_v10 = vsub.s32 %v2584_v16, %v2587_v59  ;;  %vm2868_vm6 = vcmp.lt.s32.totalorder %v8764_v51, 4 }
 0x31c   :  { %v2873_v40 = vsel %vm2865_vm5, %v2852_v7, %v2855_v8  ;;  %4326 = vmatmul.mubr.f32.gmra.mrb[20].mxu0 %v2420_v4  ;;  %v2710_v38 = vmul.f32 %v2709_v62, %v2707_v26  ;;  %vm2867_vm7 = vcmp.lt.s32.totalorder %v8764_v51, 3  ;;  %v2870_v42 = vsel %vm2868_vm6, %v2858_v17, 2102212464 }
 0x31d   :  { %v2874_v11 = vsel %vm2868_vm6, %v2861_v1, 920167782  ;;  %v2590_v20 = vsub.s32 0, %v9912_v10  ;;  %vm2866_vm8 = vcmp.lt.s32.totalorder %v8764_v51, 2  ;;  %v2877_v16 = vsel %vm2865_vm5, %v2855_v8, %v2858_v17 }
 0x31e   :  { %v2875_v6 = vsel %vm2867_vm7, %v2858_v17, %v2874_v11  ;;  %v2711_v28 = vxor.u32 2147483648, %v2710_v38  ;;  %v2878_v35 = vsel %vm2868_vm6, %v2864_v36, 1326507024  ;;  %v2881_v3 = vshll.u32 %v2841_v61, 8 }
 0x31f   :  { %v2876_v23 = vsel %vm2866_vm8, %v2873_v40, %v2875_v6  ;;  %v5972_v21 = vmin.u32 %v2590_v20, %v9912_v10  ;;  %v2610_v22 = vsub.s32 4, %v2586_v43  ;;  %v2869_v41 = vsel %vm2865_vm5, %v2849_v5, %v2852_v7 }
 0x320   :  { %v2871_v19 = vsel %vm2867_vm7, %v2855_v8, %v2870_v42  ;;  %v2712_v37 = vsel %vm2629_vm9, %v2711_v28, %v2710_v38  ;;  %v2879_v17 = vsel %vm2867_vm7, %v2861_v1, %v2878_v35  ;;  %v9940_v12 = vand.u32 31, %v9737_v24 }
 0x321   :  { %v9935_v32 = vmul.u32.u64.low %v2881_v3, %v2876_v23  ;;  %v9936_v58 = vmul.u32.u64.high %v2881_v3, %v2876_v23, %v9935_v32  ;;  %v2715_v5 = vsel %vm9860_vm13, %v12753_v52, %v2712_v37  ;;  %v2592_v7 = vclz %v5972_v21  ;;  %v12772_v21 = vld [vmem:[#allocation47_spill] sm:$0xff] }
 0x322   :  { %v2880_v8 = vsel %vm2866_vm8, %v2877_v16, %v2879_v17  ;;  %6547 = vcosq.f32 %v2715_v5  ;;  %v9951_v1 = vand.u32 3, %v2716_v56  ;;  %vm2526_vm9 = vcmp.lt.s32.totalorder %v12759_v0, 0  ;;  %v12767_v56 = vld [vmem:[#allocation79_spill] sm:$0xff] }
 0x323   :  { %v9953_v44 = vmul.u32.u64.low %v2881_v3, %v2880_v8  ;;  %v9954_v59 = vmul.u32.u64.high %v2881_v3, %v2880_v8, %v9953_v44  ;;  %6549 = vsinq.f32 %v2715_v5  ;;  %v5973_v24 = vadd.s32 4294967294, %v2592_v7 }
 0x324   :  { %v2872_v61 = vsel %vm2866_vm8, %v2869_v41, %v2871_v19  ;;  %v9960_v45 = vadd.s32 4294967169, %v9627_v47  ;;  %v9964_v29 = vsel %vm2526_vm9, %v2610_v22, %v2586_v43  ;;  %v2891_v54 = vadd.s32 1, %v9936_v58 }
 0x325   :  { %v2730_v26 = vand.u32 2147483647, %v12767_v56  ;;  %v9969_v62 = vadd.s32 4294967169, %v9631_v50  ;;  %v9972_v36 = vadd.s32 4294967169, %v9741_v30  ;;  %v12768_v51 = vand.u32 2147483647, %v12759_v0 }
 0x326   :  { %vm5974_vm11 = vcmp.lt.s32.totalorder %v5973_v24, 0  ;;  %vm2725_vm12 = vcmp.eq.s32.totalorder %v9951_v1, 2  ;;  %v2580_v47 = vadd.s32 %v9835_v49, %v9833_v53  ;;  %v2888_v40 = vmul.u32 %v2881_v3, %v2872_v61  ;;  %v12771_v49 = vld [vmem:[#allocation40_spill] sm:$0xff] }
 0x327   :  { %vm9976_vm10 = vcmp.le.f32.partialorder %v12768_v51, 0.7853982  ;;  %v2595_v43 = vsel %vm5974_vm11, 0, %v5973_v24  ;;  %vm2890_vm14 = vc.u32 %v9954_v59, %v9935_v32  ;;  %vm2722_vm13 = vcmp.eq.s32.totalorder %v9951_v1, 0 }
 0x328   :  { %v2596_v50 = vsub.s32 32, %v2595_v43  ;;  %v2600_v30 = vsub.s32 4294967266, %v2595_v43  ;;  %v2613_v38 = vsel %vm9976_vm10, 0, %v9964_v29  ;;  %v2892_v42 = vsel %vm2890_vm14, %v2891_v54, %v9936_v58 }
 0x329   :  { %vm2721_vm0 = vcmp.lt.s32.totalorder %v9951_v1, 2  ;;  %v2893_v11 = vadd.s32 %v2892_v42, %v2888_v40  ;;  %v2737_v53 = vand.u32 8388607, %v2730_v26  ;;  %v2746_v20 = vshrl.u32 %v12603_v48, %v12771_v49 }
 0x32a   :  { %v2748_v6 = vshrl.u32 %v12606_v9, %v12771_v49  ;;  %vm2719_vm15 = vweird.f32 %v12753_v52  ;;  %v2597_v16 = vshll.u32 %v9912_v10, %v2595_v43  ;;  %v2598_v28 = vshrl.u32 %v2580_v47, %v2596_v50 }
 0x32b   :  { %v2601_v23 = vadd.s32 127, %v2600_v30  ;;  %v2754_v35 = vshrl.u32 %v12601_v55, %v12771_v49  ;;  %v2894_v3 = vadd.s32 536870912, %v2893_v11  ;;  %v2747_v22 = vshll.u32 %v12603_v48, %v12772_v21 }
 0x32c   :  { %v2750_v41 = vshll.u32 %v12606_v9, %v12772_v21  ;;  %v2751_v19 = vshrl.u32 %v12607_v27, %v12771_v49  ;;  %v2599_v37 = vor.u32 %v2598_v28, %v2597_v16  ;;  %v2753_v10 = vshll.u32 %v12607_v27, %v12772_v21  ;;  %v6548_v5 = vpop.eup %6547 }
 0x32d   :  { %v2602_v17 = vshll.u32 %v2601_v23, 23  ;;  %v2757_v58 = vshrl.u32 %v12608_v39, %v12771_v49  ;;  %v10011_v7 = vshrl.u32 %v2894_v3, 30  ;;  %v2738_v8 = vor.u32 8388608, %v2737_v53  ;;  %v6550_v61 = vpop.eup %6549  ;;  %v12773_v3 = vld [vmem:[#allocation18_spill] sm:$0xff] }
 0x32e   :  { %v2749_v44 = vor.u32 %v2748_v6, %v2747_v22  ;;  %v2756_v24 = vshll.u32 %v12601_v55, %v12772_v21  ;;  %v2726_v54 = vxor.u32 2147483648, %v6548_v5  ;;  %v2755_v47 = vor.u32 %v2754_v35, %v2753_v10 }
 0x32f   :  { %v2603_v51 = vor.u32 4788187, %v2602_v17  ;;  %v2760_v43 = vshrl.u32 %v12609_v60, %v12771_v49  ;;  %v2723_v40 = vxor.u32 2147483648, %v6550_v61  ;;  %v2896_v50 = vshll.u32 %v10011_v7, 30 }
 0x330   :  { %v2752_v30 = vor.u32 %v2751_v19, %v2750_v41  ;;  %v2759_v42 = vshll.u32 %v12608_v39, %v12772_v21  ;;  %v2727_v53 = vsel %vm2725_vm12, %v2726_v54, %v6550_v61  ;;  %v2606_v16 = vcvt.s32.f32 %v2599_v37 }
 0x331   :  { %v2604_v6 = vand.u32 2147483647, %v2603_v51  ;;  %v2758_v28 = vor.u32 %v2757_v58, %v2756_v24  ;;  %v2724_v23 = vsel %vm2722_vm13, %v6548_v5, %v2723_v40  ;;  %v10024_v35 = vsub.s32 %v2893_v11, %v2896_v50 }
 0x332   :  { %vm2762_vm3 = vcmp.lt.s32.totalorder %v12773_v3, 1  ;;  %vm2765_vm2 = vcmp.lt.s32.totalorder %v12773_v3, 4  ;;  %v2728_v49 = vsel %vm2721_vm0, %v2724_v23, %v2727_v53  ;;  %v2761_v21 = vor.u32 %v2760_v43, %v2759_v42 }
 0x333   :  { %v2607_v22 = vmul.f32 %v2606_v16, %v2604_v6  ;;  %v2767_v41 = vsel %vm2765_vm2, %v2755_v47, 2102212464  ;;  %v2729_v19 = vsel %vm2719_vm15, nan, %v2728_v49  ;;  %v2899_v37 = vsub.s32 0, %v10024_v35 }
 0x334   :  { %v2919_v11 = vsub.s32 4, %v10011_v7  ;;  %vm2763_vm1 = vcmp.lt.s32.totalorder %v12773_v3, 2  ;;  %4330 = vmatprep.mubr.f32.mxu0 %v2729_v19  ;;  %vm2764_vm4 = vcmp.lt.s32.totalorder %v12773_v3, 3  ;;  %v2770_v1 = vsel %vm2762_vm3, %v2749_v44, %v2752_v30  ;;  %v12776_v19 = vld [vmem:[#allocation66_spill] sm:$0xff] }
 0x335   :  { %v2608_v17 = vxor.u32 2147483648, %v2607_v22  ;;  %v2771_v10 = vsel %vm2765_vm2, %v2758_v28, 920167782  ;;  %v5984_v58 = vmin.u32 %v2899_v37, %v10024_v35  ;;  %v2766_v52 = vsel %vm2762_vm3, %v2746_v20, %v2749_v44 }
 0x336   :  { %v2768_v5 = vsel %vm2764_vm4, %v2752_v30, %v2767_v41  ;;  %v2774_v24 = vsel %vm2762_vm3, %v2752_v30, %v2755_v47  ;;  %v2772_v54 = vsel %vm2764_vm4, %v2755_v47, %v2771_v10  ;;  %v2775_v51 = vsel %vm2765_vm2, %v2761_v21, 1326507024 }
 0x337   :  { %v2609_v61 = vsel %vm2526_vm9, %v2608_v17, %v2607_v22  ;;  %v2778_v43 = vshll.u32 %v2738_v8, 8  ;;  %v2901_v50 = vclz %v5984_v58  ;;  %v2773_v20 = vsel %vm2763_vm1, %v2770_v1, %v2772_v54  ;;  %v12777_v17 = vld [vmem:[#allocation48_spill] sm:$0xff] }
 0x338   :  { %v2612_v40 = vsel %vm9976_vm10, %v12759_v0, %v2609_v61  ;;  %v2776_v44 = vsel %vm2764_vm4, %v2758_v28, %v2775_v51  ;;  %v10066_v16 = vsub.s32 32, %v9853_v33  ;;  %v10069_v23 = vsub.s32 32, %v9940_v12 }
 0x339   :  { %6551 = vcosq.f32 %v2612_v40  ;;  %v2777_v30 = vsel %vm2763_vm1, %v2774_v24, %v2776_v44  ;;  %v10058_v42 = vmul.u32.u64.low %v2778_v43, %v2773_v20  ;;  %v10059_v53 = vmul.u32.u64.high %v2778_v43, %v2773_v20, %v10058_v42 }
 0x33a   :  { %6553 = vsinq.f32 %v2612_v40  ;;  %v5985_v47 = vadd.s32 4294967294, %v2901_v50  ;;  %v10062_v8 = vmul.u32.u64.low %v2778_v43, %v2777_v30  ;;  %v10063_v6 = vmul.u32.u64.high %v2778_v43, %v2777_v30, %v10062_v8 }
 0x33b   :  { %v10072_v28 = vadd.s32 4294967169, %v9844_v18  ;;  %v2617_v49 = vand.u32 3, %v2613_v38  ;;  %vm10080_vm5 = vcmp.le.f32.partialorder %v2833_v14, 0.7853982  ;;  %vm2835_vm6 = vcmp.lt.s32.totalorder %v7417_v25, 0 }
 0x33c   :  { %vm5986_vm7 = vcmp.lt.s32.totalorder %v5985_v47, 0  ;;  %v2769_v21 = vsel %vm2763_vm1, %v2766_v52, %v2768_v5  ;;  %v2889_v18 = vadd.s32 %v9935_v32, %v9954_v59  ;;  %v2920_v29 = vsel %vm2835_vm6, %v2919_v11, %v10011_v7  ;;  %v12778_v32 = vld [vmem:[#allocation27_spill] sm:$0xff] }
 0x33d   :  { %v2904_v41 = vsel %vm5986_vm7, 0, %v5985_v47  ;;  %v2788_v4 = vadd.s32 1, %v10059_v53  ;;  %v3039_v37 = vand.u32 2147483647, %v12776_v19  ;;  %v3057_v1 = vshrl.u32 %v12606_v9, %v12777_v17 }
 0x33e   :  { %v2905_v14 = vsub.s32 32, %v2904_v41  ;;  %v2909_v38 = vsub.s32 4294967266, %v2904_v41  ;;  %vm2618_vm8 = vcmp.lt.s32.totalorder %v2617_v49, 2  ;;  %vm2619_vm9 = vcmp.eq.s32.totalorder %v2617_v49, 0 }
 0x33f   :  { %v2785_v3 = vmul.u32 %v2778_v43, %v2769_v21  ;;  %vm2787_vm10 = vc.u32 %v10063_v6, %v10058_v42  ;;  %v3056_v59 = vshll.u32 %v12603_v48, %v12778_v32  ;;  %vm2616_vm11 = vweird.f32 %v12759_v0 }
 0x340   :  { %v2906_v7 = vshll.u32 %v10024_v35, %v2904_v41  ;;  %v2907_v11 = vshrl.u32 %v2889_v18, %v2905_v14  ;;  %v2910_v10 = vadd.s32 127, %v2909_v38  ;;  %v2789_v58 = vsel %vm2787_vm10, %v2788_v4, %v10059_v53 }
 0x341   :  { %vm2622_vm12 = vcmp.eq.s32.totalorder %v2617_v49, 2  ;;  %v2922_v52 = vsel %vm10080_vm5, 0, %v2920_v29  ;;  %v2790_v5 = vadd.s32 %v2789_v58, %v2785_v3  ;;  %v3060_v24 = vshrl.u32 %v12607_v27, %v12777_v17 }
 0x342   :  { %v2908_v61 = vor.u32 %v2907_v11, %v2906_v7  ;;  %v2911_v54 = vshll.u32 %v2910_v10, 23  ;;  %v3046_v51 = vand.u32 8388607, %v3039_v37  ;;  %v3058_v43 = vor.u32 %v3057_v1, %v3056_v59 }
 0x343   :  { %v6552_v40 = vpop.eup %6551  ;;  %v2791_v35 = vadd.s32 536870912, %v2790_v5  ;;  %v3059_v50 = vshll.u32 %v12606_v9, %v12778_v32  ;;  %v3063_v20 = vshrl.u32 %v12601_v55, %v12777_v17  ;;  %v3066_v44 = vshrl.u32 %v12608_v39, %v12777_v17 }
 0x344   :  { %v6554_v30 = vpop.eup %6553  ;;  %v2623_v53 = vxor.u32 2147483648, %v6552_v40  ;;  %v2912_v47 = vor.u32 4788187, %v2911_v54  ;;  %v3062_v8 = vshll.u32 %v12607_v27, %v12778_v32  ;;  %v3069_v21 = vshrl.u32 %v12609_v60, %v12777_v17 }
 0x345   :  { %v2620_v18 = vxor.u32 2147483648, %v6554_v30  ;;  %v10119_v41 = vshrl.u32 %v2791_v35, 30  ;;  %v3061_v29 = vor.u32 %v3060_v24, %v3059_v50  ;;  %v3065_v4 = vshll.u32 %v12601_v55, %v12778_v32 }
 0x346   :  { %v2624_v14 = vsel %vm2622_vm12, %v2623_v53, %v6554_v30  ;;  %v2913_v38 = vand.u32 2147483647, %v2912_v47  ;;  %v2915_v1 = vcvt.s32.f32 %v2908_v61  ;;  %v3068_v3 = vshll.u32 %v12608_v39, %v12778_v32  ;;  %v12779_v53 = vld [vmem:[#allocation28_spill] sm:$0xff] }
 0x347   :  { %v2621_v59 = vsel %vm2619_vm9, %v6552_v40, %v2620_v18  ;;  %v2793_v7 = vshll.u32 %v10119_v41, 30  ;;  %v3064_v11 = vor.u32 %v3063_v20, %v3062_v8  ;;  %v3067_v10 = vor.u32 %v3066_v44, %v3065_v4 }
 0x348   :  { %v2625_v58 = vsel %vm2618_vm8, %v2621_v59, %v2624_v14  ;;  %v2916_v54 = vmul.f32 %v2915_v1, %v2913_v38  ;;  %v10129_v24 = vand.u32 3, %v2922_v52  ;;  %v3070_v35 = vor.u32 %v3069_v21, %v3068_v3 }
 0x349   :  { %v2626_v50 = vsel %vm2616_vm11, nan, %v2625_v58  ;;  %v10133_v30 = vsub.s32 %v2790_v5, %v2793_v7  ;;  %v3047_v61 = vor.u32 8388608, %v3046_v51  ;;  %v3055_v32 = vshrl.u32 %v12603_v48, %v12777_v17 }
 0x34a   :  { %4331 = vmatmul.mubr.f32.gmra.mrb[22].mxu0 %v2626_v50  ;;  %v2917_v40 = vxor.u32 2147483648, %v2916_v54  ;;  %vm3071_vm14 = vcmp.lt.s32.totalorder %v12779_v53, 1  ;;  %vm3073_vm13 = vcmp.lt.s32.totalorder %v12779_v53, 3  ;;  %vm3074_vm0 = vcmp.lt.s32.totalorder %v12779_v53, 4 }
 0x34b   :  { %v2796_v49 = vsub.s32 0, %v10133_v30  ;;  %v3076_v52 = vsel %vm3074_vm0, %v3064_v11, 2102212464  ;;  %v3079_v20 = vsel %vm3071_vm14, %v3058_v43, %v3061_v29  ;;  %v3080_v0 = vsel %vm3074_vm0, %v3067_v10, 920167782 }
 0x34c   :  { %v2918_v5 = vsel %vm2835_vm6, %v2917_v40, %v2916_v54  ;;  %v3081_v51 = vsel %vm3073_vm13, %v3064_v11, %v3080_v0  ;;  %v3083_v17 = vsel %vm3071_vm14, %v3061_v29, %v3064_v11  ;;  %v3084_v44 = vsel %vm3074_vm0, %v3070_v35, 1326507024 }
 0x34d   :  { %v2921_v47 = vsel %vm10080_vm5, %v7417_v25, %v2918_v5  ;;  %v5980_v8 = vmin.u32 %v2796_v49, %v10133_v30  ;;  %vm3072_vm15 = vcmp.lt.s32.totalorder %v12779_v53, 2  ;;  %v3075_v21 = vsel %vm3071_vm14, %v3055_v32, %v3058_v43  ;;  %v12780_v32 = vld [vmem:[#allocation65_spill] sm:$0xff]  ;;  %v12781_v53 = vld [vmem:[#allocation19_spill] sm:$0xff] }
 0x34e   :  { %6555 = vcosq.f32 %v2921_v47  ;;  %v3082_v18 = vsel %vm3072_vm15, %v3079_v20, %v3081_v51  ;;  %v3085_v4 = vsel %vm3073_vm13, %v3067_v10, %v3084_v44  ;;  %v3087_v14 = vshll.u32 %v3047_v61, 8  ;;  %v12784_v51 = vld [vmem:[#allocation24_spill] sm:$0xff] }
 0x34f   :  { %6557 = vsinq.f32 %v2921_v47  ;;  %v2798_v38 = vclz %v5980_v8  ;;  %v3077_v1 = vsel %vm3073_vm13, %v3061_v29, %v3076_v52  ;;  %v3086_v22 = vsel %vm3072_vm15, %v3083_v17, %v3085_v4 }
 0x350   :  { %v10158_v3 = vmul.u32.u64.low %v3087_v14, %v3086_v22  ;;  %v10159_v59 = vmul.u32.u64.high %v3087_v14, %v3086_v22, %v10158_v3  ;;  %v10161_v43 = vmul.u32.u64.low %v3087_v14, %v3082_v18  ;;  %v10162_v7 = vmul.u32.u64.high %v3087_v14, %v3082_v18, %v10161_v43 }
 0x351   :  { %v3969_v11 = vand.u32 2139095040, %v9619_v15  ;;  %v5981_v58 = vadd.s32 4294967294, %v2798_v38  ;;  %v2816_v54 = vsub.s32 4, %v10119_v41  ;;  %v10169_v35 = vadd.s32 1, %v9960_v45 }
 0x352   :  { %v10172_v29 = vadd.s32 1, %v9969_v62  ;;  %vm2732_vm3 = vcmp.lt.s32.totalorder %v12767_v56, 0  ;;  %v3078_v50 = vsel %vm3072_vm15, %v3075_v21, %v3077_v1  ;;  %vm2928_vm2 = vcmp.eq.s32.totalorder %v10129_v24, 0 }
 0x353   :  { %vm2931_vm1 = vcmp.eq.s32.totalorder %v10129_v24, 2  ;;  %v2786_v61 = vadd.s32 %v10058_v42, %v10063_v6  ;;  %vm5982_vm4 = vcmp.lt.s32.totalorder %v5981_v58, 0  ;;  %v12536_v40 = vand.u32 2147483647, %v12780_v32 }
 0x354   :  { %vm2927_vm5 = vcmp.lt.s32.totalorder %v10129_v24, 2  ;;  %v2801_v45 = vsel %vm5982_vm4, 0, %v5981_v58  ;;  %vm3096_vm6 = vc.u32 %v10159_v59, %v10161_v43  ;;  %v3097_v62 = vadd.s32 1, %v10162_v7 }
 0x355   :  { %v2954_v49 = vshrl.u32 %v12606_v9, %v12781_v53  ;;  %vm2925_vm7 = vweird.f32 %v7417_v25  ;;  %vm10191_vm8 = vcmp.le.f32.partialorder %v2730_v26, 0.7853982  ;;  %v2802_v6 = vsub.s32 32, %v2801_v45 }
 0x356   :  { %v2806_v52 = vsub.s32 4294967266, %v2801_v45  ;;  %v10198_v20 = vsel %vm2732_vm3, %v2816_v54, %v10119_v41  ;;  %v3094_v0 = vmul.u32 %v3087_v14, %v3078_v50  ;;  %v3098_v5 = vsel %vm3096_vm6, %v3097_v62, %v10162_v7 }
 0x357   :  { %v2953_v17 = vshll.u32 %v12603_v48, %v12784_v51  ;;  %v2956_v44 = vshll.u32 %v12606_v9, %v12784_v51  ;;  %v2957_v26 = vshrl.u32 %v12607_v27, %v12781_v53  ;;  %v2803_v47 = vshll.u32 %v10133_v30, %v2801_v45 }
 0x358   :  { %v2804_v8 = vshrl.u32 %v2786_v61, %v2802_v6  ;;  %v2807_v21 = vadd.s32 127, %v2806_v52  ;;  %v3099_v18 = vadd.s32 %v3098_v5, %v3094_v0  ;;  %v6556_v4 = vpop.eup %6555  ;;  %v2943_v41 = vand.u32 8388607, %v12536_v40 }
 0x359   :  { %v2955_v14 = vor.u32 %v2954_v49, %v2953_v17  ;;  %v2960_v38 = vshrl.u32 %v12601_v55, %v12781_v53  ;;  %v2963_v1 = vshrl.u32 %v12608_v39, %v12781_v53  ;;  %v6558_v22 = vpop.eup %6557  ;;  %v2932_v3 = vxor.u32 2147483648, %v6556_v4 }
 0x35a   :  { %v2805_v7 = vor.u32 %v2804_v8, %v2803_v47  ;;  %v2808_v58 = vshll.u32 %v2807_v21, 23  ;;  %v3100_v54 = vadd.s32 536870912, %v3099_v18  ;;  %v2929_v30 = vxor.u32 2147483648, %v6558_v22 }
 0x35b   :  { %v2959_v50 = vshll.u32 %v12607_v27, %v12784_v51  ;;  %v2962_v61 = vshll.u32 %v12601_v55, %v12784_v51  ;;  %v2966_v45 = vshrl.u32 %v12609_v60, %v12781_v53  ;;  %v2933_v62 = vsel %vm2931_vm1, %v2932_v3, %v6558_v22 }
 0x35c   :  { %v2809_v49 = vor.u32 4788187, %v2808_v58  ;;  %v3101_v6 = vshrl.u32 %v3100_v54, 30  ;;  %v2958_v52 = vor.u32 %v2957_v26, %v2956_v44  ;;  %v2930_v0 = vsel %vm2928_vm2, %v6556_v4, %v2929_v30 }
 0x35d   :  { %v2961_v5 = vor.u32 %v2960_v38, %v2959_v50  ;;  %v2964_v17 = vor.u32 %v2963_v1, %v2962_v61  ;;  %v2965_v47 = vshll.u32 %v12608_v39, %v12784_v51  ;;  %v2934_v8 = vsel %vm2927_vm5, %v2930_v0, %v2933_v62  ;;  %v12785_v1 = vld [vmem:[#allocation15_spill] sm:$0xff] }
 0x35e   :  { %v2810_v21 = vand.u32 2147483647, %v2809_v49  ;;  %v2812_v40 = vcvt.s32.f32 %v2805_v7  ;;  %vm3041_vm9 = vcmp.lt.s32.totalorder %v12776_v19, 0  ;;  %v3102_v10 = vshll.u32 %v3101_v6, 30 }
 0x35f   :  { %v2935_v22 = vsel %vm2925_vm7, nan, %v2934_v8  ;;  %v2819_v44 = vsel %vm10191_vm8, 0, %v10198_v20  ;;  %v2952_v26 = vshrl.u32 %v12603_v48, %v12781_v53  ;;  %v2967_v4 = vor.u32 %v2966_v45, %v2965_v47 }
 0x360   :  { %4335 = vmatprep.mubr.f32.mxu0 %v2935_v22  ;;  %v2813_v51 = vmul.f32 %v2812_v40, %v2810_v21  ;;  %v10236_v24 = vsub.s32 %v3099_v18, %v3102_v10  ;;  %v2944_v38 = vor.u32 8388608, %v2943_v41  ;;  %vm2971_vm10 = vcmp.lt.s32.totalorder %v12785_v1, 4 }
 0x361   :  { %vm2968_vm11 = vcmp.lt.s32.totalorder %v12785_v1, 1  ;;  %vm2969_vm12 = vcmp.lt.s32.totalorder %v12785_v1, 2  ;;  %v2973_v25 = vsel %vm2971_vm10, %v2961_v5, 2102212464  ;;  %v2977_v3 = vsel %vm2971_vm10, %v2964_v17, 920167782 }
 0x362   :  { %v2814_v7 = vxor.u32 2147483648, %v2813_v51  ;;  %v3105_v20 = vsub.s32 0, %v10236_v24  ;;  %vm2970_vm14 = vcmp.lt.s32.totalorder %v12785_v1, 3  ;;  %v2976_v53 = vsel %vm2968_vm11, %v2955_v14, %v2958_v52 }
 0x363   :  { %v3125_v58 = vsub.s32 4, %v3101_v6  ;;  %v2978_v54 = vsel %vm2970_vm14, %v2961_v5, %v2977_v3  ;;  %v2980_v40 = vsel %vm2968_vm11, %v2958_v52, %v2961_v5  ;;  %v2981_v10 = vsel %vm2971_vm10, %v2967_v4, 1326507024  ;;  %v12786_v4 = vld [vmem:[#allocation41_spill] sm:$0xff] }
 0x364   :  { %v2815_v18 = vsel %vm2732_vm3, %v2814_v7, %v2813_v51  ;;  %v5992_v41 = vmin.u32 %v3105_v20, %v10236_v24  ;;  %v2972_v30 = vsel %vm2968_vm11, %v2952_v26, %v2955_v14  ;;  %v2974_v50 = vsel %vm2970_vm14, %v2958_v52, %v2973_v25 }
 0x365   :  { %v2818_v61 = vsel %vm10191_vm8, %v12767_v56, %v2815_v18  ;;  %v2979_v45 = vsel %vm2969_vm12, %v2976_v53, %v2978_v54  ;;  %v2982_v62 = vsel %vm2970_vm14, %v2964_v17, %v2981_v10  ;;  %v2984_v49 = vshll.u32 %v2944_v38, 8 }
 0x366   :  { %6559 = vcosq.f32 %v2818_v61  ;;  %v10251_v0 = vand.u32 3, %v2819_v44  ;;  %v3107_v5 = vclz %v5992_v41  ;;  %v2983_v47 = vsel %vm2969_vm12, %v2980_v40, %v2982_v62 }
 0x367   :  { %6561 = vsinq.f32 %v2818_v61  ;;  %v10257_v14 = vsel %vm3041_vm9, %v3125_v58, %v3101_v6  ;;  %v10259_v52 = vmul.u32.u64.low %v2984_v49, %v2983_v47  ;;  %v10260_v42 = vmul.u32.u64.high %v2984_v49, %v2983_v47, %v10259_v52 }
 0x368   :  { %v5993_v8 = vadd.s32 4294967294, %v3107_v5  ;;  %v2975_v17 = vsel %vm2969_vm12, %v2972_v30, %v2974_v50  ;;  %v10264_v21 = vmul.u32.u64.low %v2984_v49, %v2979_v45  ;;  %v10265_v22 = vmul.u32.u64.high %v2984_v49, %v2979_v45, %v10264_v21 }
 0x369   :  { %v10269_v44 = vadd.s32 1, %v9972_v36  ;;  %v10272_v26 = vadd.s32 1, %v10072_v28  ;;  %v10276_v6 = vshrl.u32 %v3969_v11, 23  ;;  %v3245_v51 = vand.u32 2147483647, %v12786_v4 }
 0x36a   :  { %vm2828_vm13 = vcmp.eq.s32.totalorder %v10251_v0, 2  ;;  %vm10282_vm0 = vcmp.le.f32.partialorder %v3039_v37, 0.7853982  ;;  %v3095_v36 = vadd.s32 %v10161_v43, %v10159_v59  ;;  %vm5994_vm15 = vcmp.lt.s32.totalorder %v5993_v8, 0 }
 0x36b   :  { %vm2825_vm3 = vcmp.eq.s32.totalorder %v10251_v0, 0  ;;  %v3110_v28 = vsel %vm5994_vm15, 0, %v5993_v8  ;;  %v3128_v11 = vsel %vm10282_vm0, 0, %v10257_v14  ;;  %v2991_v1 = vmul.u32 %v2984_v49, %v2975_v17 }
 0x36c   :  { %vm2993_vm2 = vc.u32 %v10260_v42, %v10264_v21  ;;  %vm2824_vm1 = vcmp.lt.s32.totalorder %v10251_v0, 2  ;;  %v3111_v37 = vsub.s32 32, %v3110_v28  ;;  %v3115_v25 = vsub.s32 4294967266, %v3110_v28 }
 0x36d   :  { %v2994_v3 = vadd.s32 1, %v10265_v22  ;;  %v3263_v59 = vshrl.u32 %v12606_v9, %v10069_v23  ;;  %vm2822_vm4 = vweird.f32 %v12767_v56  ;;  %v10301_v43 = vand.u32 8388607, %v3245_v51 }
 0x36e   :  { %v10305_v7 = vshrl.u32 %v12603_v48, %v10069_v23  ;;  %v3262_v20 = vshll.u32 %v12603_v48, %v9940_v12  ;;  %v3266_v53 = vshrl.u32 %v12607_v27, %v10069_v23  ;;  %v3112_v58 = vshll.u32 %v10236_v24, %v3110_v28 }
 0x36f   :  { %v3113_v54 = vshrl.u32 %v3095_v36, %v3111_v37  ;;  %v3116_v40 = vadd.s32 127, %v3115_v25  ;;  %v2995_v10 = vsel %vm2993_vm2, %v2994_v3, %v10265_v22  ;;  %v3265_v41 = vshll.u32 %v12606_v9, %v9940_v12 }
 0x370   :  { %v2996_v18 = vadd.s32 %v2995_v10, %v2991_v1  ;;  %v3269_v30 = vshrl.u32 %v12601_v55, %v10069_v23  ;;  %v3272_v50 = vshrl.u32 %v12608_v39, %v10069_v23  ;;  %v6560_v61 = vpop.eup %6559  ;;  %v3264_v49 = vor.u32 %v3263_v59, %v3262_v20 }
 0x371   :  { %v3114_v45 = vor.u32 %v3113_v54, %v3112_v58  ;;  %v3117_v62 = vshll.u32 %v3116_v40, 23  ;;  %v3275_v24 = vshrl.u32 %v12609_v60, %v10069_v23  ;;  %v6562_v5 = vpop.eup %6561  ;;  %v2829_v47 = vxor.u32 2147483648, %v6560_v61 }
 0x372   :  { %v2997_v52 = vadd.s32 536870912, %v2996_v18  ;;  %v3268_v8 = vshll.u32 %v12607_v27, %v9940_v12  ;;  %v3271_v17 = vshll.u32 %v12601_v55, %v9940_v12  ;;  %v2826_v22 = vxor.u32 2147483648, %v6562_v5 }
 0x373   :  { %v3118_v36 = vor.u32 4788187, %v3117_v62  ;;  %v3267_v28 = vor.u32 %v3266_v53, %v3265_v41  ;;  %v3274_v1 = vshll.u32 %v12608_v39, %v9940_v12  ;;  %vm3771_vm5 = vcmp.gt.s32.totalorder %v10169_v35, 0 }
 0x374   :  { %v2830_v23 = vsel %vm2828_vm13, %v2829_v47, %v6562_v5  ;;  %v2998_v37 = vshrl.u32 %v2997_v52, 30  ;;  %v3270_v25 = vor.u32 %v3269_v30, %v3268_v8  ;;  %v3273_v3 = vor.u32 %v3272_v50, %v3271_v17 }
 0x375   :  { %vm3874_vm6 = vcmp.gt.s32.totalorder %v10172_v29, 0  ;;  %vm3565_vm7 = vcmp.gt.s32.totalorder %v10269_v44, 0  ;;  %v2827_v59 = vsel %vm2825_vm3, %v6560_v61, %v2826_v22  ;;  %v3119_v20 = vand.u32 2147483647, %v3118_v36 }
 0x376   :  { %v3121_v53 = vcvt.s32.f32 %v3114_v45  ;;  %v3276_v58 = vor.u32 %v3275_v24, %v3274_v1  ;;  %v2831_v12 = vsel %vm2824_vm1, %v2827_v59, %v2830_v23  ;;  %vm2938_vm8 = vcmp.lt.s32.totalorder %v12780_v32, 0 }
 0x377   :  { %v2999_v54 = vshll.u32 %v2998_v37, 30  ;;  %v3253_v40 = vor.u32 8388608, %v10301_v43  ;;  %vm3277_vm10 = vcmp.lt.s32.totalorder %v9856_v13, 1  ;;  %v2832_v10 = vsel %vm2822_vm4, nan, %v2831_v12 }
 0x378   :  { %v3122_v41 = vmul.f32 %v3121_v53, %v3119_v20  ;;  %vm3279_vm11 = vcmp.lt.s32.totalorder %v9856_v13, 3  ;;  %vm3280_vm12 = vcmp.lt.s32.totalorder %v9856_v13, 4  ;;  %4336 = vmatmul.mubr.f32.gmra.mrb[24].mxu0 %v2832_v10  ;;  %v3285_v0 = vsel %vm3277_vm10, %v3264_v49, %v3267_v28 }
 0x379   :  { %v10343_v30 = vsub.s32 %v2996_v18, %v2999_v54  ;;  %v3286_v50 = vsel %vm3280_vm12, %v3273_v3, 920167782  ;;  %v3289_v43 = vsel %vm3277_vm10, %v3267_v28, %v3270_v25  ;;  %v3282_v45 = vsel %vm3280_vm12, %v3270_v25, 2102212464 }
 0x37a   :  { %v3123_v61 = vxor.u32 2147483648, %v3122_v41  ;;  %v3287_v56 = vsel %vm3279_vm11, %v3270_v25, %v3286_v50  ;;  %v3290_v62 = vsel %vm3280_vm12, %v3276_v58, 1326507024  ;;  %v3022_v5 = vsub.s32 4, %v2998_v37 }
 0x37b   :  { %v3002_v24 = vsub.s32 0, %v10343_v30  ;;  %vm3278_vm14 = vcmp.lt.s32.totalorder %v9856_v13, 2  ;;  %v3291_v18 = vsel %vm3279_vm11, %v3273_v3, %v3290_v62  ;;  %v3293_v17 = vshll.u32 %v3253_v40, 8 }
 0x37c   :  { %v3124_v47 = vsel %vm3041_vm9, %v3123_v61, %v3122_v41  ;;  %v3288_v52 = vsel %vm3278_vm14, %v3285_v0, %v3287_v56  ;;  %v3292_v8 = vsel %vm3278_vm14, %v3289_v43, %v3291_v18  ;;  %v3281_v1 = vsel %vm3277_vm10, %v10305_v7, %v3264_v49 }
 0x37d   :  { %v3127_v22 = vsel %vm10282_vm0, %v12776_v19, %v3124_v47  ;;  %v5988_v36 = vmin.u32 %v3002_v24, %v10343_v30  ;;  %v3283_v23 = vsel %vm3279_vm11, %v3267_v28, %v3282_v45  ;;  %v10374_v25 = vand.u32 3, %v3128_v11 }
 0x37e   :  { %6563 = vcosq.f32 %v3127_v22  ;;  %v10376_v3 = vmul.u32.u64.low %v3293_v17, %v3292_v8  ;;  %v10377_v59 = vmul.u32.u64.high %v3293_v17, %v3292_v8, %v10376_v3  ;;  %v10386_v7 = vsel %vm3771_vm5, %v10169_v35, 0 }
 0x37f   :  { %6565 = vsinq.f32 %v3127_v22  ;;  %v3004_v20 = vclz %v5988_v36  ;;  %v10379_v53 = vmul.u32.u64.low %v3293_v17, %v3288_v52  ;;  %v10380_v58 = vmul.u32.u64.high %v3293_v17, %v3288_v52, %v10379_v53 }
 0x380   :  { %v12789_v38 = vand.u32 2139095040, %v9622_v34  ;;  %v10394_v14 = vsel %vm2938_vm8, %v3022_v5, %v2998_v37  ;;  %v3284_v11 = vsel %vm3278_vm14, %v3281_v1, %v3283_v23  ;;  %v10401_v28 = vsel %vm3874_vm6, %v10172_v29, 0  ;;  %v12793_v29 = vld [vmem:[#allocation42_spill] sm:$0xff] }
 0x381   :  { %v10406_v35 = vsel %vm3565_vm7, %v10269_v44, 0  ;;  %v12790_v12 = vand.u32 2147483647, %v12780_v32  ;;  %v5989_v37 = vadd.s32 4294967294, %v3004_v20  ;;  %vm3137_vm13 = vcmp.eq.s32.totalorder %v10374_v25, 2 }
 0x382   :  { %v10390_v49 = vshrl.u32 %v12789_v38, 23  ;;  %v2992_v13 = vadd.s32 %v10264_v21, %v10260_v42  ;;  %vm3302_vm0 = vc.u32 %v10377_v59, %v10379_v53  ;;  %v3142_v40 = vand.u32 2147483647, %v12793_v29 }
 0x383   :  { %vm10410_vm9 = vcmp.le.f32.partialorder %v12790_v12, 0.7853982  ;;  %vm3134_vm15 = vcmp.eq.s32.totalorder %v10374_v25, 0  ;;  %vm5990_vm3 = vcmp.lt.s32.totalorder %v5989_v37, 0  ;;  %v3300_v10 = vmul.u32 %v3293_v17, %v3284_v11 }
 0x384   :  { %v3025_v44 = vsel %vm10410_vm9, 0, %v10394_v14  ;;  %v3303_v41 = vadd.s32 1, %v10380_v58  ;;  %vm3133_vm2 = vcmp.lt.s32.totalorder %v10374_v25, 2  ;;  %v3007_v0 = vsel %vm5990_vm3, 0, %v5989_v37 }
 0x385   :  { %v10428_v42 = vshrl.u32 %v12603_v48, %v10066_v16  ;;  %v3159_v21 = vshll.u32 %v12603_v48, %v9853_v33  ;;  %v3160_v50 = vshrl.u32 %v12606_v9, %v10066_v16  ;;  %vm3131_vm1 = vweird.f32 %v12776_v19 }
 0x386   :  { %v3008_v43 = vsub.s32 32, %v3007_v0  ;;  %v3012_v61 = vsub.s32 4294967266, %v3007_v0  ;;  %v3304_v45 = vsel %vm3302_vm0, %v3303_v41, %v10380_v58  ;;  %v3162_v56 = vshll.u32 %v12606_v9, %v9853_v33 }
 0x387   :  { %v3305_v62 = vadd.s32 %v3304_v45, %v3300_v10  ;;  %v3149_v24 = vand.u32 8388607, %v3142_v40  ;;  %v3163_v5 = vshrl.u32 %v12607_v27, %v10066_v16  ;;  %v3166_v18 = vshrl.u32 %v12601_v55, %v10066_v16 }
 0x388   :  { %v3009_v47 = vshll.u32 %v10343_v30, %v3007_v0  ;;  %v3010_v52 = vshrl.u32 %v2992_v13, %v3008_v43  ;;  %v3013_v8 = vadd.s32 127, %v3012_v61  ;;  %v3169_v17 = vshrl.u32 %v12608_v39, %v10066_v16  ;;  %v6564_v22 = vpop.eup %6563 }
 0x389   :  { %v3306_v36 = vadd.s32 536870912, %v3305_v62  ;;  %v3161_v1 = vor.u32 %v3160_v50, %v3159_v21  ;;  %v3165_v23 = vshll.u32 %v12607_v27, %v9853_v33  ;;  %v3168_v3 = vshll.u32 %v12601_v55, %v9853_v33  ;;  %v6566_v20 = vpop.eup %6565 }
 0x38a   :  { %vm3668_vm4 = vcmp.gt.s32.totalorder %v10272_v26, 0  ;;  %v3138_v58 = vxor.u32 2147483648, %v6564_v22  ;;  %v3011_v38 = vor.u32 %v3010_v52, %v3009_v47  ;;  %v3014_v30 = vshll.u32 %v3013_v8, 23 }
 0x38b   :  { %v3172_v11 = vshrl.u32 %v12609_v60, %v10066_v16  ;;  %v3135_v12 = vxor.u32 2147483648, %v6566_v20  ;;  %v3307_v37 = vshrl.u32 %v3306_v36, 30  ;;  %v3164_v13 = vor.u32 %v3163_v5, %v3162_v56 }
 0x38c   :  { %v3167_v10 = vor.u32 %v3166_v18, %v3165_v23  ;;  %v3139_v41 = vsel %vm3137_vm13, %v3138_v58, %v6566_v20  ;;  %v3015_v0 = vor.u32 4788187, %v3014_v30  ;;  %v3170_v21 = vor.u32 %v3169_v17, %v3168_v3 }
 0x38d   :  { %v3171_v50 = vshll.u32 %v12608_v39, %v9853_v33  ;;  %v3136_v43 = vsel %vm3134_vm15, %v6564_v22, %v3135_v12  ;;  %v3308_v61 = vshll.u32 %v3307_v37, 30  ;;  %v3150_v45 = vor.u32 8388608, %v3149_v24 }
 0x38e   :  { %vm3174_vm5 = vcmp.lt.s32.totalorder %v9840_v57, 1  ;;  %v3140_v16 = vsel %vm3133_vm2, %v3136_v43, %v3139_v41  ;;  %v3016_v56 = vand.u32 2147483647, %v3015_v0  ;;  %v3018_v5 = vcvt.s32.f32 %v3011_v38 }
 0x38f   :  { %v3173_v18 = vor.u32 %v3172_v11, %v3171_v50  ;;  %v3141_v47 = vsel %vm3131_vm1, nan, %v3140_v16  ;;  %v10465_v52 = vsub.s32 %v3305_v62, %v3308_v61  ;;  %vm3177_vm6 = vcmp.lt.s32.totalorder %v9840_v57, 4 }
 0x390   :  { %v3182_v33 = vsel %vm3174_vm5, %v3161_v1, %v3164_v13  ;;  %4340 = vmatprep.mubr.f32.mxu0 %v3141_v47  ;;  %v3019_v24 = vmul.f32 %v3018_v5, %v3016_v56  ;;  %vm3176_vm7 = vcmp.lt.s32.totalorder %v9840_v57, 3  ;;  %v3179_v8 = vsel %vm3177_vm6, %v3167_v10, 2102212464 }
 0x391   :  { %v3183_v25 = vsel %vm3177_vm6, %v3170_v21, 920167782  ;;  %v3311_v17 = vsub.s32 0, %v10465_v52  ;;  %vm3175_vm10 = vcmp.lt.s32.totalorder %v9840_v57, 2  ;;  %v3186_v62 = vsel %vm3174_vm5, %v3164_v13, %v3167_v10 }
 0x392   :  { %v3184_v19 = vsel %vm3176_vm7, %v3167_v10, %v3183_v25  ;;  %v3020_v22 = vxor.u32 2147483648, %v3019_v24  ;;  %v3187_v23 = vsel %vm3177_vm6, %v3173_v18, 1326507024  ;;  %v3190_v3 = vshll.u32 %v3150_v45, 8 }
 0x393   :  { %v3185_v36 = vsel %vm3175_vm10, %v3182_v33, %v3184_v19  ;;  %v6000_v20 = vmin.u32 %v3311_v17, %v10465_v52  ;;  %v3331_v58 = vsub.s32 4, %v3307_v37  ;;  %v3178_v38 = vsel %vm3174_vm5, %v10428_v42, %v3161_v1 }
 0x394   :  { %v3180_v30 = vsel %vm3176_vm7, %v3164_v13, %v3179_v8  ;;  %v3021_v11 = vsel %vm2938_vm8, %v3020_v22, %v3019_v24  ;;  %v3188_v12 = vsel %vm3176_vm7, %v3170_v21, %v3187_v23  ;;  %v10496_v0 = vsel %vm3668_vm4, %v10272_v26, 0 }
 0x395   :  { %v10489_v10 = vmul.u32.u64.low %v3190_v3, %v3185_v36  ;;  %v10490_v41 = vmul.u32.u64.high %v3190_v3, %v3185_v36, %v10489_v10  ;;  %v3024_v42 = vsel %vm10410_vm9, %v12780_v32, %v3021_v11  ;;  %v3313_v1 = vclz %v6000_v20 }
 0x396   :  { %v3189_v13 = vsel %vm3175_vm10, %v3186_v62, %v3188_v12  ;;  %6567 = vcosq.f32 %v3024_v42  ;;  %v10507_v21 = vand.u32 3, %v3025_v44  ;;  %vm3247_vm8 = vcmp.lt.s32.totalorder %v12786_v4, 0  ;;  %v12794_v44 = vld [vmem:[#allocation81_spill] sm:$0xff] }
 0x397   :  { %v10509_v50 = vmul.u32.u64.low %v3190_v3, %v3189_v13  ;;  %v10510_v43 = vmul.u32.u64.high %v3190_v3, %v3189_v13, %v10509_v50  ;;  %6569 = vsinq.f32 %v3024_v42  ;;  %v6001_v26 = vadd.s32 4294967294, %v3313_v1 }
 0x398   :  { %v3181_v61 = vsel %vm3175_vm10, %v3178_v38, %v3180_v30  ;;  %v10516_v45 = vshrl.u32 %v10386_v7, 5  ;;  %v10520_v54 = vsel %vm3247_vm8, %v3331_v58, %v3307_v37  ;;  %v3200_v14 = vadd.s32 1, %v10490_v41 }
 0x399   :  { %v3451_v16 = vand.u32 2147483647, %v12794_v44  ;;  %v10525_v56 = vand.u32 31, %v10386_v7  ;;  %v10528_v5 = vand.u32 31, %v10496_v0  ;;  %vm10532_vm11 = vcmp.le.f32.partialorder %v3245_v51, 0.7853982 }
 0x39a   :  { %vm6002_vm12 = vcmp.lt.s32.totalorder %v6001_v26, 0  ;;  %vm3034_vm14 = vcmp.eq.s32.totalorder %v10507_v21, 2  ;;  %v3301_v37 = vadd.s32 %v10379_v53, %v10377_v59  ;;  %v3197_v47 = vmul.u32 %v3190_v3, %v3181_v61  ;;  %v12797_v53 = vld [vmem:[#allocation16_spill] sm:$0xff]  ;;  %v12798_v3 = vld [vmem:[#allocation38_spill] sm:$0xff] }
 0x39b   :  { %v3316_v18 = vsel %vm6002_vm12, 0, %v6001_v26  ;;  %vm3199_vm9 = vc.u32 %v10510_v43, %v10489_v10  ;;  %vm3031_vm13 = vcmp.eq.s32.totalorder %v10507_v21, 0  ;;  %v3334_v51 = vsel %vm10532_vm11, 0, %v10520_v54 }
 0x39c   :  { %v3317_v7 = vsub.s32 32, %v3316_v18  ;;  %v3321_v33 = vsub.s32 4294967266, %v3316_v18  ;;  %v3201_v24 = vsel %vm3199_vm9, %v3200_v14, %v10490_v41  ;;  %vm3030_vm0 = vcmp.lt.s32.totalorder %v10507_v21, 2 }
 0x39d   :  { %v3202_v8 = vadd.s32 %v3201_v24, %v3197_v47  ;;  %v3458_v59 = vand.u32 8388607, %v3451_v16  ;;  %v3467_v25 = vshrl.u32 %v12603_v48, %v12797_v53  ;;  %v3469_v17 = vshrl.u32 %v12606_v9, %v12797_v53 }
 0x39e   :  { %vm3028_vm15 = vweird.f32 %v12780_v32  ;;  %v3318_v19 = vshll.u32 %v10465_v52, %v3316_v18  ;;  %v3319_v62 = vshrl.u32 %v3301_v37, %v3317_v7  ;;  %v3322_v22 = vadd.s32 127, %v3321_v33 }
 0x39f   :  { %v3475_v36 = vshrl.u32 %v12601_v55, %v12797_v53  ;;  %v3203_v23 = vadd.s32 536870912, %v3202_v8  ;;  %v3468_v20 = vshll.u32 %v12603_v48, %v12798_v3  ;;  %v3471_v58 = vshll.u32 %v12606_v9, %v12798_v3 }
 0x3a0   :  { %v3472_v38 = vshrl.u32 %v12607_v27, %v12797_v53  ;;  %v3320_v30 = vor.u32 %v3319_v62, %v3318_v19  ;;  %v3323_v11 = vshll.u32 %v3322_v22, 23  ;;  %v3474_v52 = vshll.u32 %v12607_v27, %v12798_v3  ;;  %v6568_v41 = vpop.eup %6567 }
 0x3a1   :  { %v3478_v12 = vshrl.u32 %v12608_v39, %v12797_v53  ;;  %v10567_v42 = vshrl.u32 %v3203_v23, 30  ;;  %v3459_v1 = vor.u32 8388608, %v3458_v59  ;;  %v3470_v13 = vor.u32 %v3469_v17, %v3468_v20  ;;  %v6570_v26 = vpop.eup %6569  ;;  %v12799_v23 = vld [vmem:[#allocation35_spill] sm:$0xff] }
 0x3a2   :  { %v3477_v50 = vshll.u32 %v12601_v55, %v12798_v3  ;;  %v3035_v61 = vxor.u32 2147483648, %v6568_v41  ;;  %v3324_v14 = vor.u32 4788187, %v3323_v11  ;;  %v3476_v37 = vor.u32 %v3475_v36, %v3474_v52 }
 0x3a3   :  { %v3481_v18 = vshrl.u32 %v12609_v60, %v12797_v53  ;;  %v3032_v47 = vxor.u32 2147483648, %v6570_v26  ;;  %v3205_v7 = vshll.u32 %v10567_v42, 30  ;;  %v3473_v33 = vor.u32 %v3472_v38, %v3471_v58 }
 0x3a4   :  { %v3480_v24 = vshll.u32 %v12608_v39, %v12798_v3  ;;  %v3036_v59 = vsel %vm3034_vm14, %v3035_v61, %v6570_v26  ;;  %v3325_v17 = vand.u32 2147483647, %v3324_v14  ;;  %v3327_v19 = vcvt.s32.f32 %v3320_v30 }
 0x3a5   :  { %v3479_v62 = vor.u32 %v3478_v12, %v3477_v50  ;;  %v3033_v22 = vsel %vm3031_vm13, %v6568_v41, %v3032_v47  ;;  %v10580_v36 = vsub.s32 %v3202_v8, %v3205_v7  ;;  %vm3483_vm3 = vcmp.lt.s32.totalorder %v12799_v23, 1 }
 0x3a6   :  { %vm3486_vm2 = vcmp.lt.s32.totalorder %v12799_v23, 4  ;;  %v3037_v53 = vsel %vm3030_vm0, %v3033_v22, %v3036_v59  ;;  %v3328_v20 = vmul.f32 %v3327_v19, %v3325_v17  ;;  %v3482_v3 = vor.u32 %v3481_v18, %v3480_v24 }
 0x3a7   :  { %v3488_v58 = vsel %vm3486_vm2, %v3476_v37, 2102212464  ;;  %v3038_v38 = vsel %vm3028_vm15, nan, %v3037_v53  ;;  %v3208_v30 = vsub.s32 0, %v10580_v36  ;;  %v3228_v8 = vsub.s32 4, %v10567_v42 }
 0x3a8   :  { %vm3484_vm1 = vcmp.lt.s32.totalorder %v12799_v23, 2  ;;  %4341 = vmatmul.mubr.f32.gmra.mrb[26].mxu0 %v3038_v38  ;;  %v3329_v11 = vxor.u32 2147483648, %v3328_v20  ;;  %vm3485_vm4 = vcmp.lt.s32.totalorder %v12799_v23, 3  ;;  %v3491_v21 = vsel %vm3483_vm3, %v3470_v13, %v3473_v33 }
 0x3a9   :  { %v3492_v52 = vsel %vm3486_vm2, %v3479_v62, 920167782  ;;  %v5996_v12 = vmin.u32 %v3208_v30, %v10580_v36  ;;  %v3487_v32 = vsel %vm3483_vm3, %v3467_v25, %v3470_v13  ;;  %v3489_v41 = vsel %vm3485_vm4, %v3473_v33, %v3488_v58  ;;  %v12802_v30 = vld [vmem:[#allocation80_spill] sm:$0xff] }
 0x3aa   :  { %v3495_v50 = vsel %vm3483_vm3, %v3473_v33, %v3476_v37  ;;  %v3330_v26 = vsel %vm3247_vm8, %v3329_v11, %v3328_v20  ;;  %v3493_v61 = vsel %vm3485_vm4, %v3476_v37, %v3492_v52  ;;  %v3496_v14 = vsel %vm3486_vm2, %v3482_v3, 1326507024 }
 0x3ab   :  { %v3499_v18 = vshll.u32 %v3459_v1, 8  ;;  %v3333_v47 = vsel %vm10532_vm11, %v12786_v4, %v3330_v26  ;;  %v3210_v7 = vclz %v5996_v12  ;;  %v3494_v25 = vsel %vm3484_vm1, %v3491_v21, %v3493_v61  ;;  %v12803_v21 = vld [vmem:[#allocation37_spill] sm:$0xff] }
 0x3ac   :  { %v3497_v13 = vsel %vm3485_vm4, %v3479_v62, %v3496_v14  ;;  %6571 = vcosq.f32 %v3333_v47  ;;  %v10622_v19 = vand.u32 31, %v10401_v28  ;;  %v10625_v22 = vand.u32 31, %v10406_v35 }
 0x3ad   :  { %v3498_v33 = vsel %vm3484_vm1, %v3495_v50, %v3497_v13  ;;  %v10614_v24 = vmul.u32.u64.low %v3499_v18, %v3494_v25  ;;  %v10615_v59 = vmul.u32.u64.high %v3499_v18, %v3494_v25, %v10614_v24  ;;  %6573 = vsinq.f32 %v3333_v47 }
 0x3ae   :  { %v5997_v37 = vadd.s32 4294967294, %v3210_v7  ;;  %v10618_v1 = vmul.u32.u64.low %v3499_v18, %v3498_v33  ;;  %v10619_v17 = vmul.u32.u64.high %v3499_v18, %v3498_v33, %v10618_v1  ;;  %v10628_v62 = vsub.s32 32, %v10528_v5 }
 0x3af   :  { %v3338_v53 = vand.u32 3, %v3334_v51  ;;  %vm10636_vm5 = vcmp.le.f32.partialorder %v3142_v40, 0.7853982  ;;  %vm3144_vm6 = vcmp.lt.s32.totalorder %v12793_v29, 0  ;;  %v3490_v3 = vsel %vm3484_vm1, %v3487_v32, %v3489_v41 }
 0x3b0   :  { %vm5998_vm7 = vcmp.lt.s32.totalorder %v5997_v37, 0  ;;  %v3198_v58 = vadd.s32 %v10489_v10, %v10510_v43  ;;  %v3229_v54 = vsel %vm3144_vm6, %v3228_v8, %v10567_v42  ;;  %v3509_v57 = vadd.s32 1, %v10615_v59  ;;  %v12804_v10 = vld [vmem:[#allocation17_spill] sm:$0xff] }
 0x3b1   :  { %v3213_v38 = vsel %vm5998_vm7, 0, %v5997_v37  ;;  %v3348_v11 = vand.u32 2147483647, %v12802_v30  ;;  %v3366_v52 = vshrl.u32 %v12606_v9, %v12803_v21  ;;  %vm3339_vm10 = vcmp.lt.s32.totalorder %v3338_v53, 2 }
 0x3b2   :  { %v3214_v40 = vsub.s32 32, %v3213_v38  ;;  %v3218_v51 = vsub.s32 4294967266, %v3213_v38  ;;  %vm3340_vm8 = vcmp.eq.s32.totalorder %v3338_v53, 0  ;;  %v3506_v23 = vmul.u32 %v3499_v18, %v3490_v3 }
 0x3b3   :  { %vm3508_vm11 = vc.u32 %v10619_v17, %v10614_v24  ;;  %v3365_v43 = vshll.u32 %v12603_v48, %v12804_v10  ;;  %vm3337_vm12 = vweird.f32 %v12786_v4  ;;  %v3215_v42 = vshll.u32 %v10580_v36, %v3213_v38 }
 0x3b4   :  { %v3216_v8 = vshrl.u32 %v3198_v58, %v3214_v40  ;;  %v3219_v12 = vadd.s32 127, %v3218_v51  ;;  %v3510_v32 = vsel %vm3508_vm11, %v3509_v57, %v10615_v59  ;;  %vm3343_vm14 = vcmp.eq.s32.totalorder %v3338_v53, 2 }
 0x3b5   :  { %v3231_v41 = vsel %vm10636_vm5, 0, %v3229_v54  ;;  %v3511_v50 = vadd.s32 %v3510_v32, %v3506_v23  ;;  %v3369_v26 = vshrl.u32 %v12607_v27, %v12803_v21  ;;  %v3355_v18 = vand.u32 8388607, %v3348_v11 }
 0x3b6   :  { %v3217_v61 = vor.u32 %v3216_v8, %v3215_v42  ;;  %v3220_v14 = vshll.u32 %v3219_v12, 23  ;;  %v3367_v47 = vor.u32 %v3366_v52, %v3365_v43  ;;  %v6572_v7 = vpop.eup %6571  ;;  %v3368_v25 = vshll.u32 %v12606_v9, %v12804_v10 }
 0x3b7   :  { %v3512_v36 = vadd.s32 536870912, %v3511_v50  ;;  %v3372_v13 = vshrl.u32 %v12601_v55, %v12803_v21  ;;  %v3375_v33 = vshrl.u32 %v12608_v39, %v12803_v21  ;;  %v6574_v59 = vpop.eup %6573  ;;  %v3344_v37 = vxor.u32 2147483648, %v6572_v7 }
 0x3b8   :  { %v3221_v1 = vor.u32 4788187, %v3220_v14  ;;  %v3371_v3 = vshll.u32 %v12607_v27, %v12804_v10  ;;  %v3378_v58 = vshrl.u32 %v12609_v60, %v12803_v21  ;;  %v3341_v38 = vxor.u32 2147483648, %v6574_v59 }
 0x3b9   :  { %v10675_v54 = vshrl.u32 %v3512_v36, 30  ;;  %v3370_v57 = vor.u32 %v3369_v26, %v3368_v25  ;;  %v3374_v40 = vshll.u32 %v12601_v55, %v12804_v10  ;;  %v3345_v51 = vsel %vm3343_vm14, %v3344_v37, %v6574_v59 }
 0x3ba   :  { %v3222_v52 = vand.u32 2147483647, %v3221_v1  ;;  %v3224_v23 = vcvt.s32.f32 %v3217_v61  ;;  %v3377_v43 = vshll.u32 %v12608_v39, %v12804_v10  ;;  %v3342_v42 = vsel %vm3340_vm8, %v6572_v7, %v3341_v38  ;;  %v12805_v1 = vld [vmem:[#allocation39_spill] sm:$0xff] }
 0x3bb   :  { %v3514_v8 = vshll.u32 %v10675_v54, 30  ;;  %v3373_v12 = vor.u32 %v3372_v13, %v3371_v3  ;;  %v3376_v32 = vor.u32 %v3375_v33, %v3374_v40  ;;  %v3346_v14 = vsel %vm3339_vm10, %v3342_v42, %v3345_v51 }
 0x3bc   :  { %v3225_v36 = vmul.f32 %v3224_v23, %v3222_v52  ;;  %v10685_v26 = vand.u32 3, %v3231_v41  ;;  %v3379_v25 = vor.u32 %v3378_v58, %v3377_v43  ;;  %v3347_v59 = vsel %vm3337_vm12, nan, %v3346_v14 }
 0x3bd   :  { %v10689_v37 = vsub.s32 %v3511_v50, %v3514_v8  ;;  %v3356_v61 = vor.u32 8388608, %v3355_v18  ;;  %v3364_v10 = vshrl.u32 %v12603_v48, %v12803_v21  ;;  %4345 = vmatprep.mubr.f32.mxu0 %v3347_v59  ;;  %vm3380_vm9 = vcmp.lt.s32.totalorder %v12805_v1, 1 }
 0x3be   :  { %v3226_v7 = vxor.u32 2147483648, %v3225_v36  ;;  %vm3382_vm13 = vcmp.lt.s32.totalorder %v12805_v1, 3  ;;  %vm3383_vm0 = vcmp.lt.s32.totalorder %v12805_v1, 4  ;;  %v3388_v13 = vsel %vm3380_vm9, %v3367_v47, %v3370_v57 }
 0x3bf   :  { %v3517_v53 = vsub.s32 0, %v10689_v37  ;;  %v3385_v41 = vsel %vm3383_vm0, %v3373_v12, 2102212464  ;;  %v3389_v4 = vsel %vm3383_vm0, %v3376_v32, 920167782  ;;  %v3392_v21 = vsel %vm3380_vm9, %v3370_v57, %v3373_v12 }
 0x3c0   :  { %v3227_v50 = vsel %vm3144_vm6, %v3226_v7, %v3225_v36  ;;  %v3390_v18 = vsel %vm3382_vm13, %v3373_v12, %v3389_v4  ;;  %v3393_v33 = vsel %vm3383_vm0, %v3379_v25, 1326507024  ;;  %vm3381_vm15 = vcmp.lt.s32.totalorder %v12805_v1, 2 }
 0x3c1   :  { %v3230_v3 = vsel %vm10636_vm5, %v12793_v29, %v3227_v50  ;;  %v6008_v58 = vmin.u32 %v3517_v53, %v10689_v37  ;;  %v3384_v38 = vsel %vm3380_vm9, %v3364_v10, %v3367_v47  ;;  %v3391_v40 = vsel %vm3381_vm15, %v3388_v13, %v3390_v18 }
 0x3c2   :  { %6575 = vcosq.f32 %v3230_v3  ;;  %v3394_v51 = vsel %vm3382_vm13, %v3376_v32, %v3393_v33  ;;  %v3396_v52 = vshll.u32 %v3356_v61, 8  ;;  %v3386_v43 = vsel %vm3382_vm13, %v3370_v57, %v3385_v41 }
 0x3c3   :  { %6577 = vsinq.f32 %v3230_v3  ;;  %v3519_v23 = vclz %v6008_v58  ;;  %v3395_v20 = vsel %vm3381_vm15, %v3392_v21, %v3394_v51  ;;  %v10722_v14 = vshrl.u32 %v10496_v0, 5 }
 0x3c4   :  { %v10714_v42 = vmul.u32.u64.low %v3396_v52, %v3395_v20  ;;  %v10715_v8 = vmul.u32.u64.high %v3396_v52, %v3395_v20, %v10714_v42  ;;  %v10717_v47 = vmul.u32.u64.low %v3396_v52, %v3391_v40  ;;  %v10718_v12 = vmul.u32.u64.high %v3396_v52, %v3391_v40, %v10717_v47 }
 0x3c5   :  { %v10725_v32 = vadd.s32 4294967169, %v10276_v6  ;;  %v6009_v36 = vadd.s32 4294967294, %v3519_v23  ;;  %v3537_v25 = vsub.s32 4, %v10675_v54  ;;  %v10729_v57 = vsub.s32 32, %v10625_v22 }
 0x3c6   :  { %v10732_v59 = vadd.s32 4294967169, %v10390_v49  ;;  %vm3453_vm3 = vcmp.lt.s32.totalorder %v12794_v44, 0  ;;  %v3387_v61 = vsel %vm3381_vm15, %v3384_v38, %v3386_v43  ;;  %vm3237_vm2 = vcmp.eq.s32.totalorder %v10685_v26, 0 }
 0x3c7   :  { %vm3240_vm1 = vcmp.eq.s32.totalorder %v10685_v26, 2  ;;  %v3507_v6 = vadd.s32 %v10614_v24, %v10619_v17  ;;  %vm6010_vm4 = vcmp.lt.s32.totalorder %v6009_v36, 0  ;;  %v3657_v0 = vand.u32 2147483647, %v9401_v63 }
 0x3c8   :  { %vm3236_vm5 = vcmp.lt.s32.totalorder %v10685_v26, 2  ;;  %v3522_v10 = vsel %vm6010_vm4, 0, %v6009_v36  ;;  %vm3405_vm6 = vc.u32 %v10715_v8, %v10717_v47  ;;  %v3406_v49 = vadd.s32 1, %v10718_v12 }
 0x3c9   :  { %v3675_v7 = vshrl.u32 %v12606_v9, %v10628_v62  ;;  %vm3234_vm7 = vweird.f32 %v12793_v29  ;;  %vm10751_vm10 = vcmp.le.f32.partialorder %v3451_v16, 0.7853982  ;;  %v3523_v17 = vsub.s32 32, %v3522_v10 }
 0x3ca   :  { %v3527_v1 = vsub.s32 4294967266, %v3522_v10  ;;  %v10758_v53 = vsel %vm3453_vm3, %v3537_v25, %v10675_v54  ;;  %v3403_v41 = vmul.u32 %v3396_v52, %v3387_v61  ;;  %v3407_v13 = vsel %vm3405_vm6, %v3406_v49, %v10718_v12 }
 0x3cb   :  { %v3674_v4 = vshll.u32 %v12603_v48, %v10528_v5  ;;  %v3677_v50 = vshll.u32 %v12606_v9, %v10528_v5  ;;  %v3678_v16 = vshrl.u32 %v12607_v27, %v10628_v62  ;;  %v3524_v18 = vshll.u32 %v10689_v37, %v3522_v10 }
 0x3cc   :  { %v3525_v21 = vshrl.u32 %v3507_v6, %v3523_v17  ;;  %v3528_v33 = vadd.s32 127, %v3527_v1  ;;  %v3408_v3 = vadd.s32 %v3407_v13, %v3403_v41  ;;  %v6576_v58 = vpop.eup %6575  ;;  %v3664_v54 = vand.u32 8388607, %v3657_v0 }
 0x3cd   :  { %v3676_v38 = vor.u32 %v3675_v7, %v3674_v4  ;;  %v3681_v40 = vshrl.u32 %v12601_v55, %v10628_v62  ;;  %v3684_v51 = vshrl.u32 %v12608_v39, %v10628_v62  ;;  %v6578_v52 = vpop.eup %6577  ;;  %v3241_v23 = vxor.u32 2147483648, %v6576_v58 }
 0x3ce   :  { %v3526_v43 = vor.u32 %v3525_v21, %v3524_v18  ;;  %v3529_v20 = vshll.u32 %v3528_v33, 23  ;;  %v3409_v42 = vadd.s32 536870912, %v3408_v3  ;;  %v3238_v37 = vxor.u32 2147483648, %v6578_v52 }
 0x3cf   :  { %v3680_v12 = vshll.u32 %v12607_v27, %v10528_v5  ;;  %v3683_v36 = vshll.u32 %v12601_v55, %v10528_v5  ;;  %v3687_v25 = vshrl.u32 %v12609_v60, %v10628_v62  ;;  %v3242_v61 = vsel %vm3240_vm1, %v3241_v23, %v6578_v52 }
 0x3d0   :  { %v3530_v6 = vor.u32 4788187, %v3529_v20  ;;  %v3410_v10 = vshrl.u32 %v3409_v42, 30  ;;  %v3679_v49 = vor.u32 %v3678_v16, %v3677_v50  ;;  %v3239_v7 = vsel %vm3237_vm2, %v6576_v58, %v3238_v37 }
 0x3d1   :  { %v3682_v17 = vor.u32 %v3681_v40, %v3680_v12  ;;  %v3685_v1 = vor.u32 %v3684_v51, %v3683_v36  ;;  %v3686_v41 = vshll.u32 %v12608_v39, %v10528_v5  ;;  %v3243_v13 = vsel %vm3236_vm5, %v3239_v7, %v3242_v61 }
 0x3d2   :  { %v3531_v4 = vand.u32 2147483647, %v3530_v6  ;;  %v3533_v18 = vcvt.s32.f32 %v3526_v43  ;;  %vm3350_vm8 = vcmp.lt.s32.totalorder %v12802_v30, 0  ;;  %v3411_v21 = vshll.u32 %v3410_v10, 30 }
 0x3d3   :  { %v3244_v33 = vsel %vm3234_vm7, nan, %v3243_v13  ;;  %v3540_v50 = vsel %vm10751_vm10, 0, %v10758_v53  ;;  %v3673_v16 = vshrl.u32 %v12603_v48, %v10628_v62  ;;  %v3688_v58 = vor.u32 %v3687_v25, %v3686_v41 }
 0x3d4   :  { %4346 = vmatmul.mubr.f32.gmra.mrb[28].mxu0 %v3244_v33  ;;  %v3534_v5 = vmul.f32 %v3533_v18, %v3531_v4  ;;  %v10796_v26 = vsub.s32 %v3408_v3, %v3411_v21  ;;  %v3665_v40 = vor.u32 8388608, %v3664_v54  ;;  %vm3692_vm11 = vcmp.lt.s32.totalorder %v10722_v14, 4 }
 0x3d5   :  { %vm3689_vm12 = vcmp.lt.s32.totalorder %v10722_v14, 1  ;;  %vm3690_vm14 = vcmp.lt.s32.totalorder %v10722_v14, 2  ;;  %v3694_v29 = vsel %vm3692_vm11, %v3682_v17, 2102212464  ;;  %v3698_v51 = vsel %vm3692_vm11, %v3685_v1, 920167782 }
 0x3d6   :  { %v3535_v52 = vxor.u32 2147483648, %v3534_v5  ;;  %v3414_v53 = vsub.s32 0, %v10796_v26  ;;  %vm3691_vm9 = vcmp.lt.s32.totalorder %v10722_v14, 3  ;;  %v3697_v62 = vsel %vm3689_vm12, %v3676_v38, %v3679_v49 }
 0x3d7   :  { %v3434_v23 = vsub.s32 4, %v3410_v10  ;;  %v3699_v43 = vsel %vm3691_vm9, %v3682_v17, %v3698_v51  ;;  %v3701_v20 = vsel %vm3689_vm12, %v3679_v49, %v3682_v17  ;;  %v3702_v3 = vsel %vm3692_vm11, %v3688_v58, 1326507024 }
 0x3d8   :  { %v3536_v54 = vsel %vm3453_vm3, %v3535_v52, %v3534_v5  ;;  %v6004_v42 = vmin.u32 %v3414_v53, %v10796_v26  ;;  %v3693_v37 = vsel %vm3689_vm12, %v3673_v16, %v3676_v38  ;;  %v3695_v12 = vsel %vm3691_vm9, %v3679_v49, %v3694_v29 }
 0x3d9   :  { %v3539_v36 = vsel %vm10751_vm10, %v12794_v44, %v3536_v54  ;;  %v3700_v25 = vsel %vm3690_vm14, %v3697_v62, %v3699_v43  ;;  %v3703_v61 = vsel %vm3691_vm9, %v3685_v1, %v3702_v3  ;;  %v3705_v6 = vshll.u32 %v3665_v40, 8 }
 0x3da   :  { %6579 = vcosq.f32 %v3539_v36  ;;  %v10811_v7 = vand.u32 3, %v3540_v50  ;;  %v3416_v17 = vclz %v6004_v42  ;;  %v3704_v41 = vsel %vm3690_vm14, %v3701_v20, %v3703_v61 }
 0x3db   :  { %6581 = vsinq.f32 %v3539_v36  ;;  %v10817_v38 = vsel %vm3350_vm8, %v3434_v23, %v3410_v10  ;;  %v10819_v49 = vmul.u32.u64.low %v3705_v6, %v3704_v41  ;;  %v10820_v24 = vmul.u32.u64.high %v3705_v6, %v3704_v41, %v10819_v49 }
 0x3dc   :  { %v6005_v13 = vadd.s32 4294967294, %v3416_v17  ;;  %v3696_v1 = vsel %vm3690_vm14, %v3693_v37, %v3695_v12  ;;  %v10824_v4 = vmul.u32.u64.low %v3705_v6, %v3700_v25  ;;  %v10825_v18 = vmul.u32.u64.high %v3705_v6, %v3700_v25, %v10824_v4 }
 0x3dd   :  { %v10829_v21 = vshrl.u32 %v10406_v35, 5  ;;  %v10832_v33 = vadd.s32 1, %v10725_v32  ;;  %v10835_v10 = vadd.s32 1, %v10732_v59  ;;  %v3554_v50 = vand.u32 2147483647, %v9316_v2 }
 0x3de   :  { %vm3549_vm13 = vcmp.eq.s32.totalorder %v10811_v7, 2  ;;  %vm10841_vm0 = vcmp.le.f32.partialorder %v3348_v11, 0.7853982  ;;  %v3404_v35 = vadd.s32 %v10717_v47, %v10715_v8  ;;  %vm6006_vm15 = vcmp.lt.s32.totalorder %v6005_v13, 0 }
 0x3df   :  { %vm3546_vm3 = vcmp.eq.s32.totalorder %v10811_v7, 0  ;;  %v3419_v32 = vsel %vm6006_vm15, 0, %v6005_v13  ;;  %v3437_v59 = vsel %vm10841_vm0, 0, %v10817_v38  ;;  %v3712_v16 = vmul.u32 %v3705_v6, %v3696_v1 }
 0x3e0   :  { %vm3714_vm2 = vc.u32 %v10820_v24, %v10824_v4  ;;  %vm3545_vm1 = vcmp.lt.s32.totalorder %v10811_v7, 2  ;;  %v3420_v11 = vsub.s32 32, %v3419_v32  ;;  %v3424_v58 = vsub.s32 4294967266, %v3419_v32 }
 0x3e1   :  { %v3715_v5 = vadd.s32 1, %v10825_v18  ;;  %v3572_v8 = vshrl.u32 %v12606_v9, %v10729_v57  ;;  %vm3543_vm4 = vweird.f32 %v12794_v44  ;;  %v3561_v47 = vand.u32 8388607, %v3554_v50 }
 0x3e2   :  { %v10862_v40 = vshrl.u32 %v12603_v48, %v10729_v57  ;;  %v3571_v29 = vshll.u32 %v12603_v48, %v10625_v22  ;;  %v3575_v51 = vshrl.u32 %v12607_v27, %v10729_v57  ;;  %v3421_v52 = vshll.u32 %v10796_v26, %v3419_v32 }
 0x3e3   :  { %v3422_v53 = vshrl.u32 %v3404_v35, %v3420_v11  ;;  %v3425_v62 = vadd.s32 127, %v3424_v58  ;;  %v3716_v23 = vsel %vm3714_vm2, %v3715_v5, %v10825_v18  ;;  %v3574_v20 = vshll.u32 %v12606_v9, %v10625_v22 }
 0x3e4   :  { %v3717_v43 = vadd.s32 %v3716_v23, %v3712_v16  ;;  %v3578_v3 = vshrl.u32 %v12601_v55, %v10729_v57  ;;  %v3581_v54 = vshrl.u32 %v12608_v39, %v10729_v57  ;;  %v6580_v42 = vpop.eup %6579  ;;  %v3573_v36 = vor.u32 %v3572_v8, %v3571_v29 }
 0x3e5   :  { %v3423_v37 = vor.u32 %v3422_v53, %v3421_v52  ;;  %v3426_v12 = vshll.u32 %v3425_v62, 23  ;;  %v3584_v26 = vshrl.u32 %v12609_v60, %v10729_v57  ;;  %v6582_v25 = vpop.eup %6581  ;;  %v3550_v61 = vxor.u32 2147483648, %v6580_v42 }
 0x3e6   :  { %v3718_v6 = vadd.s32 536870912, %v3717_v43  ;;  %v3577_v17 = vshll.u32 %v12607_v27, %v10625_v22  ;;  %v3580_v41 = vshll.u32 %v12601_v55, %v10625_v22  ;;  %v3547_v49 = vxor.u32 2147483648, %v6582_v25 }
 0x3e7   :  { %v3427_v13 = vor.u32 4788187, %v3426_v12  ;;  %v3576_v1 = vor.u32 %v3575_v51, %v3574_v20  ;;  %v3583_v18 = vshll.u32 %v12608_v39, %v10625_v22  ;;  %v3551_v35 = vsel %vm3549_vm13, %v3550_v61, %v6582_v25 }
 0x3e8   :  { %v3719_v32 = vshrl.u32 %v3718_v6, 30  ;;  %v3579_v57 = vor.u32 %v3578_v3, %v3577_v17  ;;  %v3582_v16 = vor.u32 %v3581_v54, %v3580_v41  ;;  %vm3977_vm5 = vcmp.gt.s32.totalorder %v10832_v33, 0 }
 0x3e9   :  { %vm4080_vm6 = vcmp.gt.s32.totalorder %v10835_v10, 0  ;;  %v3548_v11 = vsel %vm3546_vm3, %v6580_v42, %v3547_v49  ;;  %v3428_v58 = vand.u32 2147483647, %v3427_v13  ;;  %v3430_v5 = vcvt.s32.f32 %v3423_v37 }
 0x3ea   :  { %v3585_v8 = vor.u32 %v3584_v26, %v3583_v18  ;;  %v3552_v29 = vsel %vm3545_vm1, %v3548_v11, %v3551_v35  ;;  %vm3659_vm7 = vcmp.lt.s32.totalorder %v9401_v63, 0  ;;  %v3720_v22 = vshll.u32 %v3719_v32, 30 }
 0x3eb   :  { %v3562_v51 = vor.u32 8388608, %v3561_v47  ;;  %vm3586_vm10 = vcmp.lt.s32.totalorder %v10829_v21, 1  ;;  %v3553_v52 = vsel %vm3543_vm4, nan, %v3552_v29  ;;  %v3431_v53 = vmul.f32 %v3430_v5, %v3428_v58 }
 0x3ec   :  { %vm3588_vm11 = vcmp.lt.s32.totalorder %v10829_v21, 3  ;;  %vm3589_vm12 = vcmp.lt.s32.totalorder %v10829_v21, 4  ;;  %4350 = vmatprep.mubr.f32.mxu0 %v3553_v52  ;;  %v10898_v62 = vsub.s32 %v3717_v43, %v3720_v22  ;;  %v3594_v7 = vsel %vm3586_vm10, %v3573_v36, %v3576_v1 }
 0x3ed   :  { %v3595_v23 = vsel %vm3589_vm12, %v3582_v16, 920167782  ;;  %v3598_v47 = vsel %vm3586_vm10, %v3576_v1, %v3579_v57  ;;  %v3432_v20 = vxor.u32 2147483648, %v3431_v53  ;;  %v3591_v3 = vsel %vm3589_vm12, %v3579_v57, 2102212464 }
 0x3ee   :  { %v3596_v44 = vsel %vm3588_vm11, %v3579_v57, %v3595_v23  ;;  %v3599_v54 = vsel %vm3589_vm12, %v3585_v8, 1326507024  ;;  %v3723_v42 = vsub.s32 0, %v10898_v62  ;;  %v3743_v37 = vsub.s32 4, %v3719_v32 }
 0x3ef   :  { %vm3587_vm14 = vcmp.lt.s32.totalorder %v10829_v21, 2  ;;  %v3600_v43 = vsel %vm3588_vm11, %v3582_v16, %v3599_v54  ;;  %v3433_v12 = vsel %vm3350_vm8, %v3432_v20, %v3431_v53  ;;  %v3602_v61 = vshll.u32 %v3562_v51, 8 }
 0x3f0   :  { %v3597_v26 = vsel %vm3587_vm14, %v3594_v7, %v3596_v44  ;;  %v3601_v25 = vsel %vm3587_vm14, %v3598_v47, %v3600_v43  ;;  %v3436_v6 = vsel %vm10841_vm0, %v12802_v30, %v3433_v12  ;;  %v6016_v17 = vmin.u32 %v3723_v42, %v10898_v62 }
 0x3f1   :  { %v3590_v41 = vsel %vm3586_vm10, %v10862_v40, %v3573_v36  ;;  %v3592_v49 = vsel %vm3588_vm11, %v3576_v1, %v3591_v3  ;;  %6583 = vcosq.f32 %v3436_v6  ;;  %v10929_v13 = vand.u32 3, %v3437_v59 }
 0x3f2   :  { %v10931_v18 = vmul.u32.u64.low %v3602_v61, %v3601_v25  ;;  %v10932_v35 = vmul.u32.u64.high %v3602_v61, %v3601_v25, %v10931_v18  ;;  %6585 = vsinq.f32 %v3436_v6  ;;  %v3725_v57 = vclz %v6016_v17 }
 0x3f3   :  { %v10934_v16 = vmul.u32.u64.low %v3602_v61, %v3597_v26  ;;  %v10935_v11 = vmul.u32.u64.high %v3602_v61, %v3597_v26, %v10934_v16  ;;  %v10939_v40 = vshrl.u32 %v10401_v28, 5  ;;  %v3878_v36 = vsub.s32 32, %v10622_v19 }
 0x3f4   :  { %v10944_v14 = vsel %vm3659_vm7, %v3743_v37, %v3719_v32  ;;  %v3593_v38 = vsel %vm3587_vm14, %v3590_v41, %v3592_v49  ;;  %v10951_v59 = vsel %vm3977_vm5, %v10832_v33, 0  ;;  %v10956_v1 = vsel %vm4080_vm6, %v10835_v10, 0 }
 0x3f5   :  { %vm10960_vm8 = vcmp.le.f32.partialorder %v3657_v0, 0.7853982  ;;  %v6017_v32 = vadd.s32 4294967294, %v3725_v57  ;;  %vm3446_vm9 = vcmp.eq.s32.totalorder %v10929_v13, 2  ;;  %v3713_v21 = vadd.s32 %v10824_v4, %v10820_v24 }
 0x3f6   :  { %vm3611_vm13 = vc.u32 %v10932_v35, %v10934_v16  ;;  %v3863_v33 = vand.u32 2147483647, %v9303_v46  ;;  %vm3443_vm0 = vcmp.eq.s32.totalorder %v10929_v13, 0  ;;  %v3746_v0 = vsel %vm10960_vm8, 0, %v10944_v14 }
 0x3f7   :  { %vm6018_vm15 = vcmp.lt.s32.totalorder %v6017_v32, 0  ;;  %v3609_v10 = vmul.u32 %v3602_v61, %v3593_v38  ;;  %v3612_v58 = vadd.s32 1, %v10935_v11  ;;  %vm3442_vm3 = vcmp.lt.s32.totalorder %v10929_v13, 2 }
 0x3f8   :  { %v3728_v5 = vsel %vm6018_vm15, 0, %v6017_v32  ;;  %v3879_v24 = vshrl.u32 %v12603_v48, %v3878_v36  ;;  %v3880_v4 = vshll.u32 %v12603_v48, %v10622_v19  ;;  %v3881_v8 = vshrl.u32 %v12606_v9, %v3878_v36 }
 0x3f9   :  { %vm3440_vm2 = vweird.f32 %v12802_v30  ;;  %v3729_v29 = vsub.s32 32, %v3728_v5  ;;  %v3733_v22 = vsub.s32 4294967266, %v3728_v5  ;;  %v3613_v51 = vsel %vm3611_vm13, %v3612_v58, %v10935_v11 }
 0x3fa   :  { %v3883_v52 = vshll.u32 %v12606_v9, %v10622_v19  ;;  %v3614_v53 = vadd.s32 %v3613_v51, %v3609_v10  ;;  %v3870_v7 = vand.u32 8388607, %v3863_v33  ;;  %v3884_v23 = vshrl.u32 %v12607_v27, %v3878_v36 }
 0x3fb   :  { %v3887_v47 = vshrl.u32 %v12601_v55, %v3878_v36  ;;  %v3730_v20 = vshll.u32 %v10898_v62, %v3728_v5  ;;  %v3731_v3 = vshrl.u32 %v3713_v21, %v3729_v29  ;;  %v3734_v44 = vadd.s32 127, %v3733_v22  ;;  %v6584_v42 = vpop.eup %6583 }
 0x3fc   :  { %v3890_v54 = vshrl.u32 %v12608_v39, %v3878_v36  ;;  %v3615_v37 = vadd.s32 536870912, %v3614_v53  ;;  %v3882_v43 = vor.u32 %v3881_v8, %v3880_v4  ;;  %v3886_v12 = vshll.u32 %v12607_v27, %v10622_v19  ;;  %v6586_v25 = vpop.eup %6585 }
 0x3fd   :  { %v3889_v26 = vshll.u32 %v12601_v55, %v10622_v19  ;;  %v3447_v61 = vxor.u32 2147483648, %v6584_v42  ;;  %v3732_v6 = vor.u32 %v3731_v3, %v3730_v20  ;;  %v3735_v17 = vshll.u32 %v3734_v44, 23 }
 0x3fe   :  { %v3893_v41 = vshrl.u32 %v12609_v60, %v3878_v36  ;;  %v3444_v62 = vxor.u32 2147483648, %v6586_v25  ;;  %v3616_v49 = vshrl.u32 %v3615_v37, 30  ;;  %v3885_v18 = vor.u32 %v3884_v23, %v3883_v52 }
 0x3ff   :  { %v3888_v57 = vor.u32 %v3887_v47, %v3886_v12  ;;  %v3448_v11 = vsel %vm3446_vm9, %v3447_v61, %v6586_v25  ;;  %v3736_v38 = vor.u32 4788187, %v3735_v17  ;;  %v3891_v32 = vor.u32 %v3890_v54, %v3889_v26 }
 0x400   :  { %v3892_v21 = vshll.u32 %v12608_v39, %v10622_v19  ;;  %v3445_v10 = vsel %vm3443_vm0, %v6584_v42, %v3444_v62  ;;  %v3617_v58 = vshll.u32 %v3616_v49, 30  ;;  %v3871_v5 = vor.u32 8388608, %v3870_v7  ;;  %v11041_v62 = vpop.f32.mrb[0].mxu0 }
 0x401   :  { %vm3895_vm1 = vcmp.lt.s32.totalorder %v10939_v40, 1  ;;  %v3449_v36 = vsel %vm3442_vm3, %v3445_v10, %v3448_v11  ;;  %v3737_v4 = vand.u32 2147483647, %v3736_v38  ;;  %v3739_v8 = vcvt.s32.f32 %v3732_v6  ;;  %v4279_v38 = vpop.f32.mrb[1].mxu0 }
 0x402   :  { %v3894_v29 = vor.u32 %v3893_v41, %v3892_v21  ;;  %v3450_v22 = vsel %vm3440_vm2, nan, %v3449_v36  ;;  %v11006_v51 = vsub.s32 %v3614_v53, %v3617_v58  ;;  %vm3898_vm4 = vcmp.lt.s32.totalorder %v10939_v40, 4  ;;  %v11055_v10 = vpop.f32.mrb[2].mxu0 }
 0x403   :  { %v3903_v19 = vsel %vm3895_vm1, %v3882_v43, %v3885_v18  ;;  %4351 = vmatmul.mubr.f32.gmra.mrb[30].mxu0 %v3450_v22  ;;  %v3740_v52 = vmul.f32 %v3739_v8, %v3737_v4  ;;  %vm3897_vm5 = vcmp.lt.s32.totalorder %v10939_v40, 3  ;;  %v3900_v7 = vsel %vm3898_vm4, %v3888_v57, 2102212464 }
 0x404   :  { %v3904_v13 = vsel %vm3898_vm4, %v3891_v32, 920167782  ;;  %v3620_v23 = vsub.s32 0, %v11006_v51  ;;  %vm3896_vm6 = vcmp.lt.s32.totalorder %v10939_v40, 2  ;;  %v3907_v53 = vsel %vm3895_vm1, %v3885_v18, %v3888_v57 }
 0x405   :  { %v3905_v30 = vsel %vm3897_vm5, %v3888_v57, %v3904_v13  ;;  %v3741_v47 = vxor.u32 2147483648, %v3740_v52  ;;  %v3908_v3 = vsel %vm3898_vm4, %v3894_v29, 1326507024  ;;  %v3911_v44 = vshll.u32 %v3871_v5, 8  ;;  %v4284_v5 = vpop.f32.mrb[3].mxu0 }
 0x406   :  { %v3906_v20 = vsel %vm3896_vm6, %v3903_v19, %v3905_v30  ;;  %v6012_v54 = vmin.u32 %v3620_v23, %v11006_v51  ;;  %v3640_v42 = vsub.s32 4, %v3616_v49  ;;  %v3899_v37 = vsel %vm3895_vm1, %v3879_v24, %v3882_v43 }
 0x407   :  { %v3901_v12 = vsel %vm3897_vm5, %v3885_v18, %v3900_v7  ;;  %v3742_v26 = vsel %vm3659_vm7, %v3741_v47, %v3740_v52  ;;  %v3909_v25 = vsel %vm3897_vm5, %v3891_v32, %v3908_v3  ;;  %v11034_v17 = vand.u32 31, %v10956_v1 }
 0x408   :  { %v11029_v61 = vmul.u32.u64.low %v3911_v44, %v3906_v20  ;;  %v11030_v6 = vmul.u32.u64.high %v3911_v44, %v3906_v20, %v11029_v61  ;;  %v3745_v24 = vsel %vm10960_vm8, %v9401_v63, %v3742_v26  ;;  %v3622_v43 = vclz %v6012_v54 }
 0x409   :  { %v3910_v41 = vsel %vm3896_vm6, %v3907_v53, %v3909_v25  ;;  %6587 = vcosq.f32 %v3745_v24  ;;  %v11047_v18 = vand.u32 3, %v3746_v0  ;;  %vm3556_vm7 = vcmp.lt.s32.totalorder %v9316_v2, 0 }
 0x40a   :  { %v11049_v57 = vmul.u32.u64.low %v3911_v44, %v3910_v41  ;;  %v11050_v11 = vmul.u32.u64.high %v3911_v44, %v3910_v41, %v11049_v57  ;;  %6589 = vsinq.f32 %v3745_v24  ;;  %v6013_v32 = vadd.s32 4294967294, %v3622_v43 }
 0x40b   :  { %v3902_v21 = vsel %vm3896_vm6, %v3899_v37, %v3901_v12  ;;  %v3775_v58 = vsub.s32 32, %v10525_v56  ;;  %v11060_v14 = vsel %vm3556_vm7, %v3640_v42, %v3616_v49  ;;  %v3921_v28 = vadd.s32 1, %v11030_v6  ;;  %v11076_v49 = vpop.f32.mrb[4].mxu0 }
 0x40c   :  { %v3760_v0 = vand.u32 2147483647, %v9198_v31  ;;  %v11065_v36 = vand.u32 31, %v10951_v59  ;;  %v11068_v4 = vsub.s32 32, %v11034_v17  ;;  %vm11072_vm10 = vcmp.le.f32.partialorder %v3554_v50, 0.7853982 }
 0x40d   :  { %vm6014_vm11 = vcmp.lt.s32.totalorder %v6013_v32, 0  ;;  %vm3755_vm12 = vcmp.eq.s32.totalorder %v11047_v18, 2  ;;  %v3610_v8 = vadd.s32 %v10934_v16, %v10932_v35  ;;  %v3918_v22 = vmul.u32 %v3911_v44, %v3902_v21  ;;  %v4289_v19 = vpop.f32.mrb[5].mxu0 }
 0x40e   :  { %v3625_v29 = vsel %vm6014_vm11, 0, %v6013_v32  ;;  %vm3920_vm14 = vc.u32 %v11050_v11, %v11029_v61  ;;  %vm3752_vm8 = vcmp.eq.s32.totalorder %v11047_v18, 0  ;;  %v3643_v7 = vsel %vm11072_vm10, 0, %v11060_v14  ;;  %v11088_v23 = vpop.f32.mrb[6].mxu0 }
 0x40f   :  { %v3626_v50 = vsub.s32 32, %v3625_v29  ;;  %v3630_v52 = vsub.s32 4294967266, %v3625_v29  ;;  %v3922_v13 = vsel %vm3920_vm14, %v3921_v28, %v11030_v6  ;;  %vm3751_vm9 = vcmp.lt.s32.totalorder %v11047_v18, 2  ;;  %v4294_v47 = vpop.f32.mrb[7].mxu0 }
 0x410   :  { %v3923_v35 = vadd.s32 %v3922_v13, %v3918_v22  ;;  %v11093_v16 = vand.u32 8388607, %v3760_v0  ;;  %v11096_v30 = vshrl.u32 %v12603_v48, %v3775_v58  ;;  %v3778_v53 = vshrl.u32 %v12606_v9, %v3775_v58  ;;  %v11102_v42 = vpop.f32.mrb[8].mxu0 }
 0x411   :  { %vm3749_vm13 = vweird.f32 %v9401_v63  ;;  %v3627_v20 = vshll.u32 %v11006_v51, %v3625_v29  ;;  %v3628_v3 = vshrl.u32 %v3610_v8, %v3626_v50  ;;  %v3631_v44 = vadd.s32 127, %v3630_v52  ;;  %v4299_v6 = vpop.f32.mrb[9].mxu0 }
 0x412   :  { %v3784_v54 = vshrl.u32 %v12601_v55, %v3775_v58  ;;  %v3924_v37 = vadd.s32 536870912, %v3923_v35  ;;  %v3777_v12 = vshll.u32 %v12603_v48, %v10525_v56  ;;  %v3780_v26 = vshll.u32 %v12606_v9, %v10525_v56  ;;  %v11112_v57 = vpop.f32.mrb[10].mxu0 }
 0x413   :  { %v3781_v25 = vshrl.u32 %v12607_v27, %v3775_v58  ;;  %v3629_v24 = vor.u32 %v3628_v3, %v3627_v20  ;;  %v3632_v43 = vshll.u32 %v3631_v44, 23  ;;  %v3783_v51 = vshll.u32 %v12607_v27, %v10525_v56  ;;  %v6588_v38 = vpop.eup %6587  ;;  %v4304_v8 = vpop.f32.mrb[11].mxu0 }
 0x414   :  { %v3787_v41 = vshrl.u32 %v12608_v39, %v3775_v58  ;;  %v11114_v32 = vshrl.u32 %v3924_v37, 30  ;;  %v3768_v21 = vor.u32 8388608, %v11093_v16  ;;  %v3779_v28 = vor.u32 %v3778_v53, %v3777_v12  ;;  %v6590_v29 = vpop.eup %6589  ;;  %v11120_v13 = vpop.f32.mrb[12].mxu0 }
 0x415   :  { %v3786_v5 = vshll.u32 %v12601_v55, %v10525_v56  ;;  %v3756_v22 = vxor.u32 2147483648, %v6588_v38  ;;  %v3633_v19 = vor.u32 4788187, %v3632_v43  ;;  %v3785_v50 = vor.u32 %v3784_v54, %v3783_v51  ;;  %v4309_v53 = vpop.f32.mrb[13].mxu0 }
 0x416   :  { %v3790_v52 = vshrl.u32 %v12609_v60, %v3775_v58  ;;  %v3753_v47 = vxor.u32 2147483648, %v6590_v29  ;;  %v3926_v20 = vshll.u32 %v11114_v32, 30  ;;  %v3782_v3 = vor.u32 %v3781_v25, %v3780_v26  ;;  %v11127_v43 = vpop.f32.mrb[14].mxu0 }
 0x417   :  { %v3789_v16 = vshll.u32 %v12608_v39, %v10525_v56  ;;  %v3757_v44 = vsel %vm3755_vm12, %v3756_v22, %v6590_v29  ;;  %v3634_v37 = vand.u32 2147483647, %v3633_v19  ;;  %v3636_v12 = vcvt.s32.f32 %v3629_v24  ;;  %v4314_v26 = vpop.f32.mrb[15].mxu0 }
 0x418   :  { %v3788_v6 = vor.u32 %v3787_v41, %v3786_v5  ;;  %v3754_v58 = vsel %vm3752_vm8, %v6588_v38, %v3753_v47  ;;  %v11131_v54 = vsub.s32 %v3923_v35, %v3926_v20  ;;  %vm3792_vm0 = vcmp.lt.s32.totalorder %v10516_v45, 1  ;;  %v11139_v41 = vpop.f32.mrb[16].mxu0 }
 0x419   :  { %vm3795_vm15 = vcmp.lt.s32.totalorder %v10516_v45, 4  ;;  %v3758_v56 = vsel %vm3751_vm9, %v3754_v58, %v3757_v44  ;;  %v3637_v25 = vmul.f32 %v3636_v12, %v3634_v37  ;;  %v3791_v51 = vor.u32 %v3790_v52, %v3789_v16  ;;  %v4319_v8 = vpop.f32.mrb[17].mxu0 }
 0x41a   :  { %v3797_v24 = vsel %vm3795_vm15, %v3785_v50, 2102212464  ;;  %v3759_v38 = vsel %vm3749_vm13, nan, %v3758_v56  ;;  %v3929_v35 = vsub.s32 0, %v11131_v54  ;;  %v3949_v5 = vsub.s32 4, %v11114_v32  ;;  %v11151_v19 = vpop.f32.mrb[18].mxu0 }
 0x41b   :  { %vm3793_vm3 = vcmp.lt.s32.totalorder %v10516_v45, 2  ;;  %4355 = vmatprep.mubr.f32.mxu0 %v3759_v38  ;;  %v3638_v18 = vxor.u32 2147483648, %v3637_v25  ;;  %vm3794_vm2 = vcmp.lt.s32.totalorder %v10516_v45, 3  ;;  %v3800_v29 = vsel %vm3792_vm0, %v3779_v28, %v3782_v3  ;;  %v4324_v16 = vpop.f32.mrb[19].mxu0 }
 0x41c   :  { %v3801_v22 = vsel %vm3795_vm15, %v3788_v6, 920167782  ;;  %v6024_v63 = vmin.u32 %v3929_v35, %v11131_v54  ;;  %v3796_v52 = vsel %vm3792_vm0, %v11096_v30, %v3779_v28  ;;  %v3798_v47 = vsel %vm3794_vm2, %v3782_v3, %v3797_v24  ;;  %v11167_v58 = vpop.f32.mrb[20].mxu0 }
 0x41d   :  { %v3804_v20 = vsel %vm3792_vm0, %v3782_v3, %v3785_v50  ;;  %v3639_v53 = vsel %vm3556_vm7, %v3638_v18, %v3637_v25  ;;  %v3802_v44 = vsel %vm3794_vm2, %v3785_v50, %v3801_v22  ;;  %v3805_v37 = vsel %vm3795_vm15, %v3791_v51, 1326507024  ;;  %v4329_v56 = vpop.f32.mrb[21].mxu0 }
 0x41e   :  { %v3808_v12 = vshll.u32 %v3768_v21, 8  ;;  %v3642_v30 = vsel %vm11072_vm10, %v9316_v2, %v3639_v53  ;;  %v3931_v28 = vclz %v6024_v63  ;;  %v3803_v3 = vsel %vm3793_vm3, %v3800_v29, %v3802_v44  ;;  %v11224_v44 = vpop.f32.mrb[22].mxu0 }
 0x41f   :  { %v3806_v26 = vsel %vm3794_vm2, %v3788_v6, %v3805_v37  ;;  %6591 = vcosq.f32 %v3642_v30  ;;  %v11186_v35 = vsub.s32 32, %v11065_v36  ;;  %v11189_v8 = vshrl.u32 %v10956_v1, 5 }
 0x420   :  { %v3807_v50 = vsel %vm3793_vm3, %v3804_v20, %v3806_v26  ;;  %v11178_v25 = vmul.u32.u64.low %v3808_v12, %v3803_v3  ;;  %v11179_v21 = vmul.u32.u64.high %v3808_v12, %v3803_v3, %v11178_v25  ;;  %6593 = vsinq.f32 %v3642_v30 }
 0x421   :  { %v6025_v51 = vadd.s32 4294967294, %v3931_v28  ;;  %v11182_v24 = vmul.u32.u64.low %v3808_v12, %v3807_v50  ;;  %v11183_v38 = vmul.u32.u64.high %v3808_v12, %v3807_v50, %v11182_v24  ;;  %v3647_v6 = vand.u32 3, %v3643_v7  ;;  %v4334_v28 = vpop.f32.mrb[23].mxu0 }
 0x422   :  { %vm11197_vm1 = vcmp.le.f32.partialorder %v3863_v33, 0.7853982  ;;  %vm3865_vm4 = vcmp.lt.s32.totalorder %v9303_v46, 0  ;;  %v3799_v29 = vsel %vm3793_vm3, %v3796_v52, %v3798_v47  ;;  %v3919_v1 = vadd.s32 %v11029_v61, %v11050_v11 }
 0x423   :  { %vm6026_vm5 = vcmp.lt.s32.totalorder %v6025_v51, 0  ;;  %v3950_v14 = vsel %vm3865_vm4, %v3949_v5, %v11114_v32  ;;  %v3818_v40 = vadd.s32 1, %v11179_v21  ;;  %v4069_v63 = vand.u32 2147483647, %v9622_v34 }
 0x424   :  { %v3934_v22 = vsel %vm6026_vm5, 0, %v6025_v51  ;;  %v4087_v20 = vshrl.u32 %v12606_v9, %v11068_v4  ;;  %vm3648_vm6 = vcmp.lt.s32.totalorder %v3647_v6, 2  ;;  %vm3649_vm7 = vcmp.eq.s32.totalorder %v3647_v6, 0 }
 0x425   :  { %v3935_v33 = vsub.s32 32, %v3934_v22  ;;  %v3939_v7 = vsub.s32 4294967266, %v3934_v22  ;;  %v3815_v45 = vmul.u32 %v3808_v12, %v3799_v29  ;;  %vm3817_vm10 = vc.u32 %v11183_v38, %v11178_v25 }
 0x426   :  { %v4086_v61 = vshll.u32 %v12603_v48, %v11034_v17  ;;  %vm3646_vm11 = vweird.f32 %v9316_v2  ;;  %v3936_v11 = vshll.u32 %v11131_v54, %v3934_v22  ;;  %v3819_v52 = vsel %vm3817_vm10, %v3818_v40, %v11179_v21 }
 0x427   :  { %v3937_v32 = vshrl.u32 %v3919_v1, %v3935_v33  ;;  %v3940_v5 = vadd.s32 127, %v3939_v7  ;;  %vm3652_vm12 = vcmp.eq.s32.totalorder %v3647_v6, 2  ;;  %v3952_v47 = vsel %vm11197_vm1, 0, %v3950_v14 }
 0x428   :  { %v3820_v16 = vadd.s32 %v3819_v52, %v3815_v45  ;;  %v4090_v53 = vshrl.u32 %v12607_v27, %v11068_v4  ;;  %v4076_v30 = vand.u32 8388607, %v4069_v63  ;;  %v4088_v54 = vor.u32 %v4087_v20, %v4086_v61 }
 0x429   :  { %v3938_v37 = vor.u32 %v3937_v32, %v3936_v11  ;;  %v3941_v12 = vshll.u32 %v3940_v5, 23  ;;  %v6592_v3 = vpop.eup %6591  ;;  %v4089_v56 = vshll.u32 %v12606_v9, %v11034_v17  ;;  %v4093_v50 = vshrl.u32 %v12601_v55, %v11068_v4 }
 0x42a   :  { %v3821_v26 = vadd.s32 536870912, %v3820_v16  ;;  %v4096_v21 = vshrl.u32 %v12608_v39, %v11068_v4  ;;  %v6594_v51 = vpop.eup %6593  ;;  %v3653_v24 = vxor.u32 2147483648, %v6592_v3  ;;  %v4092_v1 = vshll.u32 %v12607_v27, %v11034_v17 }
 0x42b   :  { %v3942_v29 = vor.u32 4788187, %v3941_v12  ;;  %v4099_v22 = vshrl.u32 %v12609_v60, %v11068_v4  ;;  %v3650_v14 = vxor.u32 2147483648, %v6594_v51  ;;  %v4091_v33 = vor.u32 %v4090_v53, %v4089_v56 }
 0x42c   :  { %v11238_v40 = vshrl.u32 %v3821_v26, 30  ;;  %v4095_v7 = vshll.u32 %v12601_v55, %v11034_v17  ;;  %v3654_v20 = vsel %vm3652_vm12, %v3653_v24, %v6594_v51  ;;  %v3945_v61 = vcvt.s32.f32 %v3938_v37 }
 0x42d   :  { %v3943_v45 = vand.u32 2147483647, %v3942_v29  ;;  %v4098_v11 = vshll.u32 %v12608_v39, %v11034_v17  ;;  %v3651_v32 = vsel %vm3649_vm7, %v6592_v3, %v3650_v14  ;;  %v4094_v52 = vor.u32 %v4093_v50, %v4092_v1 }
 0x42e   :  { %v3823_v5 = vshll.u32 %v11238_v40, 30  ;;  %v4097_v12 = vor.u32 %v4096_v21, %v4095_v7  ;;  %v3655_v28 = vsel %vm3648_vm6, %v3651_v32, %v3654_v20  ;;  %v11248_v53 = vand.u32 3, %v3952_v47 }
 0x42f   :  { %v3946_v26 = vmul.f32 %v3945_v61, %v3943_v45  ;;  %v4100_v56 = vor.u32 %v4099_v22, %v4098_v11  ;;  %v3656_v51 = vsel %vm3646_vm11, nan, %v3655_v28  ;;  %v4077_v37 = vor.u32 8388608, %v4076_v30 }
 0x430   :  { %v11252_v24 = vsub.s32 %v3820_v16, %v3823_v5  ;;  %v4085_v17 = vshrl.u32 %v12603_v48, %v11068_v4  ;;  %4356 = vmatmul.mubr.f32.gmra.mrb[32].mxu0 %v3656_v51  ;;  %vm4101_vm14 = vcmp.lt.s32.totalorder %v11189_v8, 1  ;;  %vm4103_vm8 = vcmp.lt.s32.totalorder %v11189_v8, 3 }
 0x431   :  { %v3947_v3 = vxor.u32 2147483648, %v3946_v26  ;;  %vm4104_vm9 = vcmp.lt.s32.totalorder %v11189_v8, 4  ;;  %v4109_v50 = vsel %vm4101_vm14, %v4088_v54, %v4091_v33  ;;  %v4113_v4 = vsel %vm4101_vm14, %v4091_v33, %v4094_v52 }
 0x432   :  { %v3826_v6 = vsub.s32 0, %v11252_v24  ;;  %v4106_v47 = vsel %vm4104_vm9, %v4094_v52, 2102212464  ;;  %v4110_v2 = vsel %vm4104_vm9, %v4097_v12, 920167782  ;;  %vm4102_vm13 = vcmp.lt.s32.totalorder %v11189_v8, 2 }
 0x433   :  { %v3948_v16 = vsel %vm3865_vm4, %v3947_v3, %v3946_v26  ;;  %v4111_v30 = vsel %vm4103_vm8, %v4094_v52, %v4110_v2  ;;  %v4114_v21 = vsel %vm4104_vm9, %v4100_v56, 1326507024  ;;  %v4105_v22 = vsel %vm4101_vm14, %v4085_v17, %v4088_v54 }
 0x434   :  { %v3951_v29 = vsel %vm11197_vm1, %v9303_v46, %v3948_v16  ;;  %v6020_v1 = vmin.u32 %v3826_v6, %v11252_v24  ;;  %v4112_v14 = vsel %vm4102_vm13, %v4109_v50, %v4111_v30  ;;  %v4115_v7 = vsel %vm4103_vm8, %v4097_v12, %v4114_v21 }
 0x435   :  { %6595 = vcosq.f32 %v3951_v29  ;;  %v4117_v20 = vshll.u32 %v4077_v37, 8  ;;  %v4107_v61 = vsel %vm4103_vm8, %v4091_v33, %v4106_v47  ;;  %v4116_v11 = vsel %vm4102_vm13, %v4113_v4, %v4115_v7 }
 0x436   :  { %6597 = vsinq.f32 %v3951_v29  ;;  %v3828_v45 = vclz %v6020_v1  ;;  %v11281_v28 = vshrl.u32 %v10951_v59, 5  ;;  %v4108_v26 = vsel %vm4102_vm13, %v4105_v22, %v4107_v61 }
 0x437   :  { %v11273_v32 = vmul.u32.u64.low %v4117_v20, %v4116_v11  ;;  %v11274_v18 = vmul.u32.u64.high %v4117_v20, %v4116_v11, %v11273_v32  ;;  %v11276_v5 = vmul.u32.u64.low %v4117_v20, %v4112_v14  ;;  %v11277_v52 = vmul.u32.u64.high %v4117_v20, %v4112_v14, %v11276_v5 }
 0x438   :  { %v6021_v54 = vadd.s32 4294967294, %v3828_v45  ;;  %vm3958_vm0 = vcmp.eq.s32.totalorder %v11248_v53, 0  ;;  %vm3961_vm15 = vcmp.eq.s32.totalorder %v11248_v53, 2  ;;  %v3966_v8 = vand.u32 2147483647, %v9619_v15 }
 0x439   :  { %vm3957_vm2 = vcmp.lt.s32.totalorder %v11248_v53, 2  ;;  %vm4126_vm1 = vc.u32 %v11274_v18, %v11276_v5  ;;  %v4127_v12 = vadd.s32 1, %v11277_v52  ;;  %v3984_v59 = vshrl.u32 %v12606_v9, %v11186_v35 }
 0x43a   :  { %vm6022_vm3 = vcmp.lt.s32.totalorder %v6021_v54, 0  ;;  %vm3955_vm4 = vweird.f32 %v9303_v46  ;;  %v3816_v56 = vadd.s32 %v11178_v25, %v11183_v38  ;;  %v4124_v17 = vmul.u32 %v4117_v20, %v4108_v26 }
 0x43b   :  { %v3831_v33 = vsel %vm6022_vm3, 0, %v6021_v54  ;;  %vm3762_vm5 = vcmp.lt.s32.totalorder %v9198_v31, 0  ;;  %v3846_v3 = vsub.s32 4, %v11238_v40  ;;  %v4128_v6 = vsel %vm4126_vm1, %v4127_v12, %v11277_v52 }
 0x43c   :  { %v3832_v51 = vsub.s32 32, %v3831_v33  ;;  %v3836_v37 = vsub.s32 4294967266, %v3831_v33  ;;  %v3983_v47 = vshll.u32 %v12603_v48, %v11065_v36  ;;  %v3987_v50 = vshrl.u32 %v12607_v27, %v11186_v35 }
 0x43d   :  { %v3833_v2 = vshll.u32 %v11252_v24, %v3831_v33  ;;  %v4129_v25 = vadd.s32 %v4128_v6, %v4124_v17  ;;  %v3973_v4 = vand.u32 8388607, %v3966_v8  ;;  %v3986_v29 = vshll.u32 %v12606_v9, %v11065_v36 }
 0x43e   :  { %v3834_v16 = vshrl.u32 %v3816_v56, %v3832_v51  ;;  %v3837_v30 = vadd.s32 127, %v3836_v37  ;;  %v3985_v21 = vor.u32 %v3984_v59, %v3983_v47  ;;  %v3993_v1 = vshrl.u32 %v12608_v39, %v11186_v35 }
 0x43f   :  { %v6596_v38 = vpop.eup %6595  ;;  %v4130_v45 = vadd.s32 536870912, %v4129_v25  ;;  %v3990_v61 = vshrl.u32 %v12601_v55, %v11186_v35  ;;  %v3992_v11 = vshll.u32 %v12601_v55, %v11065_v36  ;;  %v3996_v32 = vshrl.u32 %v12609_v60, %v11186_v35 }
 0x440   :  { %v6598_v22 = vpop.eup %6597  ;;  %v3962_v14 = vxor.u32 2147483648, %v6596_v38  ;;  %v3835_v7 = vor.u32 %v3834_v16, %v3833_v2  ;;  %v3838_v20 = vshll.u32 %v3837_v30, 23  ;;  %v3988_v26 = vor.u32 %v3987_v50, %v3986_v29  ;;  %v11356_v29 = vld [vmem:[%s12360_s4] ss:$0 sm:$0xff] }
 0x441   :  { %v3959_v24 = vxor.u32 2147483648, %v6598_v22  ;;  %v11317_v54 = vshrl.u32 %v4130_v45, 30  ;;  %v3989_v12 = vshll.u32 %v12607_v27, %v11065_v36  ;;  %v3994_v59 = vor.u32 %v3993_v1, %v3992_v11 }
 0x442   :  { %v3963_v9 = vsel %vm3961_vm15, %v3962_v14, %v6598_v22  ;;  %v3839_v52 = vor.u32 4788187, %v3838_v20  ;;  %v3995_v55 = vshll.u32 %v12608_v39, %v11065_v36  ;;  %v3842_v51 = vcvt.s32.f32 %v3835_v7 }
 0x443   :  { %v3960_v33 = vsel %vm3958_vm0, %v6596_v38, %v3959_v24  ;;  %v4132_v37 = vshll.u32 %v11317_v54, 30  ;;  %vm11332_vm6 = vcmp.le.f32.partialorder %v3760_v0, 0.7853982  ;;  %v3991_v27 = vor.u32 %v3990_v61, %v3989_v12 }
 0x444   :  { %v3964_v60 = vsel %vm3957_vm2, %v3960_v33, %v3963_v9  ;;  %v3840_v56 = vand.u32 2147483647, %v3839_v52  ;;  %v3997_v47 = vor.u32 %v3996_v32, %v3995_v55  ;;  %v3847_v36 = vsel %vm3762_vm5, %v3846_v3, %v11238_v40 }
 0x445   :  { %v3965_v17 = vsel %vm3955_vm4, nan, %v3964_v60  ;;  %v11339_v53 = vsub.s32 %v4129_v25, %v4132_v37  ;;  %vm4001_vm7 = vcmp.lt.s32.totalorder %v11281_v28, 4  ;;  %v3974_v46 = vor.u32 8388608, %v3973_v4 }
 0x446   :  { %4360 = vmatprep.mubr.f32.mxu0 %v3965_v17  ;;  %v3843_v39 = vmul.f32 %v3842_v51, %v3840_v56  ;;  %v3982_v50 = vshrl.u32 %v12603_v48, %v11186_v35  ;;  %vm3998_vm10 = vcmp.lt.s32.totalorder %v11281_v28, 1  ;;  %v4007_v0 = vsel %vm4001_vm7, %v3994_v59, 920167782 }
 0x447   :  { %v4135_v16 = vsub.s32 0, %v11339_v53  ;;  %vm4000_vm11 = vcmp.lt.s32.totalorder %v11281_v28, 3  ;;  %v4006_v30 = vsel %vm3998_vm10, %v3985_v21, %v3988_v26  ;;  %v4003_v38 = vsel %vm4001_vm7, %v3991_v27, 2102212464 }
 0x448   :  { %v3844_v2 = vxor.u32 2147483648, %v3843_v39  ;;  %v4008_v40 = vsel %vm4000_vm11, %v3991_v27, %v4007_v0  ;;  %v4010_v3 = vsel %vm3998_vm10, %v3988_v26, %v3991_v27  ;;  %v4011_v25 = vsel %vm4001_vm7, %v3997_v47, 1326507024 }
 0x449   :  { %v6032_v48 = vmin.u32 %v4135_v16, %v11339_v53  ;;  %vm3999_vm12 = vcmp.lt.s32.totalorder %v11281_v28, 2  ;;  %v4002_v35 = vsel %vm3998_vm10, %v3982_v50, %v3985_v21  ;;  %v4012_v14 = vsel %vm4000_vm11, %v3994_v59, %v4011_v25 }
 0x44a   :  { %v3845_v4 = vsel %vm3762_vm5, %v3844_v2, %v3843_v39  ;;  %v4009_v22 = vsel %vm3999_vm12, %v4006_v30, %v4008_v40  ;;  %v4014_v7 = vshll.u32 %v3974_v46, 8  ;;  %v4004_v21 = vsel %vm4000_vm11, %v3988_v26, %v4003_v38 }
 0x44b   :  { %v3848_v1 = vsel %vm11332_vm6, %v9198_v31, %v3845_v4  ;;  %v4137_v20 = vclz %v6032_v48  ;;  %v4013_v45 = vsel %vm3999_vm12, %v4010_v3, %v4012_v14  ;;  %v4278_v11 = vadd.f32 %v11356_v29, %v11041_v62 }
 0x44c   :  { %6599 = vcosq.f32 %v3848_v1  ;;  %v11369_v24 = vmul.u32.u64.low %v4014_v7, %v4013_v45  ;;  %v11370_v61 = vmul.u32.u64.high %v4014_v7, %v4013_v45, %v11369_v24  ;;  %v4283_v33 = vadd.f32 %v11356_v29, %v11055_v10 }
 0x44d   :  { %6601 = vsinq.f32 %v3848_v1  ;;  %v6033_v32 = vadd.s32 4294967294, %v4137_v20  ;;  %v11374_v9 = vmul.u32.u64.low %v4014_v7, %v4009_v22  ;;  %v11375_v52 = vmul.u32.u64.high %v4014_v7, %v4009_v22, %v11374_v9 }
 0x44e   :  { %v11380_v12 = vmax.f32 %v4278_v11, 0.0  ;;  %v4288_v26 = vadd.f32 %v11356_v29, %v11076_v49  ;;  %v3849_v59 = vsel %vm11332_vm6, 0, %v3847_v36  ;;  %v4005_v62 = vsel %vm3999_vm12, %v4002_v35, %v4004_v21 }
 0x44f   :  { %vm6034_vm14 = vcmp.lt.s32.totalorder %v6033_v32, 0  ;;  %v11388_v55 = vmax.f32 %v4283_v33, 0.0  ;;  %vm4023_vm8 = vc.u32 %v11370_v61, %v11374_v9  ;;  %v4293_v49 = vadd.f32 %v11356_v29, %v11088_v23 }
 0x450   :  { %v4140_v60 = vsel %vm6034_vm14, 0, %v6033_v32  ;;  %4392 = vadd.xlane.f32.xlu1 %v11380_v12  ;;  %v4450_v10 = vmul.f32 %v11380_v12, %v11380_v12  ;;  %v4125_v56 = vadd.s32 %v11276_v5, %v11274_v18  ;;  %v4024_v37 = vadd.s32 1, %v11375_v52  ;;  %v11409_v18 = vpop.f32.mrb[24].mxu0 }
 0x451   :  { %v4141_v51 = vsub.s32 32, %v4140_v60  ;;  %v4145_v28 = vsub.s32 4294967266, %v4140_v60  ;;  %v3853_v17 = vand.u32 3, %v3849_v59  ;;  %v4021_v6 = vmul.u32 %v4014_v7, %v4005_v62 }
 0x452   :  { %4469 = vadd.xlane.f32.xlu0 %v4450_v10  ;;  %v11400_v27 = vmax.f32 %v4288_v26, 0.0  ;;  %v4451_v47 = vmul.f32 %v11388_v55, %v11388_v55  ;;  %v4142_v39 = vshll.u32 %v11339_v53, %v4140_v60  ;;  %v4025_v23 = vsel %vm4023_vm8, %v4024_v37, %v11375_v52  ;;  %v4339_v53 = vpop.f32.mrb[25].mxu0 }
 0x453   :  { %v4143_v36 = vshrl.u32 %v4125_v56, %v4141_v51  ;;  %v4146_v46 = vadd.s32 127, %v4145_v28  ;;  %v4026_v5 = vadd.s32 %v4025_v23, %v4021_v6  ;;  %v11411_v50 = vmax.f32 %v4293_v49, 0.0 }
 0x454   :  { %4471 = vadd.xlane.f32.xlu1 %v4451_v47  ;;  %v4452_v0 = vmul.f32 %v11400_v27, %v11400_v27  ;;  %v4298_v2 = vadd.f32 %v11356_v29, %v11102_v42  ;;  %vm3855_vm9 = vcmp.eq.s32.totalorder %v3853_v17, 0  ;;  %vm3858_vm13 = vcmp.eq.s32.totalorder %v3853_v17, 2 }
 0x455   :  { %v4144_v30 = vor.u32 %v4143_v36, %v4142_v39  ;;  %v4147_v38 = vshll.u32 %v4146_v46, 23  ;;  %v4027_v25 = vadd.s32 536870912, %v4026_v5  ;;  %v4303_v35 = vadd.f32 %v11356_v29, %v11112_v57 }
 0x456   :  { %v6600_v16 = vpop.eup %6599  ;;  %4394 = vadd.xlane.f32.xlu0 %v11388_v55  ;;  %v11422_v42 = vmax.f32 %v4298_v2, 0.0  ;;  %v4453_v14 = vmul.f32 %v11411_v50, %v11411_v50  ;;  %vm3854_vm0 = vcmp.lt.s32.totalorder %v3853_v17, 2  ;;  %vm3852_vm15 = vweird.f32 %v9198_v31 }
 0x457   :  { %v6602_v40 = vpop.eup %6601  ;;  %v3859_v3 = vxor.u32 2147483648, %v6600_v16  ;;  %v4148_v48 = vor.u32 4788187, %v4147_v38  ;;  %v11420_v22 = vshrl.u32 %v4027_v25, 30  ;;  %v4151_v21 = vcvt.s32.f32 %v4144_v30 }
 0x458   :  { %v3856_v4 = vxor.u32 2147483648, %v6602_v40  ;;  %4473 = vadd.xlane.f32.xlu1 %v4452_v0  ;;  %v4308_v32 = vadd.f32 %v11356_v29, %v11120_v13  ;;  %v11431_v33 = vmax.f32 %v4303_v35, 0.0  ;;  %v4454_v26 = vmul.f32 %v11422_v42, %v11422_v42 }
 0x459   :  { %v3860_v1 = vsel %vm3858_vm13, %v3859_v3, %v6602_v40  ;;  %v4149_v20 = vand.u32 2147483647, %v4148_v48  ;;  %v4029_v24 = vshll.u32 %v11420_v22, 30  ;;  %vm4071_vm3 = vcmp.lt.s32.totalorder %v9622_v34, 0 }
 0x45a   :  { %v3857_v7 = vsel %vm3855_vm9, %v6600_v16, %v3856_v4  ;;  %4396 = vadd.xlane.f32.xlu0 %v11400_v27  ;;  %vm11439_vm2 = vcmp.le.f32.partialorder %v4069_v63, 0.7853982  ;;  %v4155_v60 = vsub.s32 4, %v11317_v54  ;;  %v11446_v10 = vmax.f32 %v4308_v32, 0.0 }
 0x45b   :  { %v3861_v45 = vsel %vm3854_vm0, %v3857_v7, %v3860_v1  ;;  %v4152_v11 = vmul.f32 %v4151_v21, %v4149_v20  ;;  %v4030_v52 = vsub.s32 %v4026_v5, %v4029_v24  ;;  %v4455_v51 = vmul.f32 %v11431_v33, %v11431_v33 }
 0x45c   :  { %v3862_v57 = vsel %vm3852_vm15, nan, %v3861_v45  ;;  %4475 = vadd.xlane.f32.xlu1 %v4453_v14  ;;  %v4313_v63 = vadd.f32 %v11356_v29, %v11127_v43  ;;  %v4156_v37 = vsel %vm4071_vm3, %v4155_v60, %v11317_v54  ;;  %v4456_v47 = vmul.f32 %v11446_v10, %v11446_v10 }
 0x45d   :  { %4361 = vmatmul.mubr.f32.gmra.mrb[34].mxu0 %v3862_v57  ;;  %v4153_v59 = vxor.u32 2147483648, %v4152_v11  ;;  %v4032_v31 = vsub.s32 0, %v4030_v52  ;;  %v4318_v39 = vadd.f32 %v11356_v29, %v11139_v41  ;;  %v4158_v43 = vsel %vm11439_vm2, 0, %v4156_v37 }
 0x45e   :  { %4398 = vadd.xlane.f32.xlu0 %v11411_v50  ;;  %v11459_v6 = vmax.f32 %v4313_v63, 0.0  ;;  %v4022_v36 = vadd.s32 %v11374_v9, %v11370_v61  ;;  %v4323_v46 = vadd.f32 %v11356_v29, %v11151_v19  ;;  %v4162_v2 = vand.u32 3, %v4158_v43 }
 0x45f   :  { %v4154_v13 = vsel %vm4071_vm3, %v4153_v59, %v4152_v11  ;;  %v6028_v56 = vmin.u32 %v4032_v31, %v4030_v52  ;;  %v11472_v0 = vmax.f32 %v4318_v39, 0.0  ;;  %v4328_v19 = vadd.f32 %v11356_v29, %v11167_v58 }
 0x460   :  { %v4157_v49 = vsel %vm11439_vm2, %v9622_v34, %v4154_v13  ;;  %4477 = vadd.xlane.f32.xlu1 %v4454_v26  ;;  %v4457_v41 = vmul.f32 %v11459_v6, %v11459_v6  ;;  %v11477_v61 = vmax.f32 %v4323_v46, 0.0  ;;  %vm4167_vm4 = vcmp.eq.s32.totalorder %v4162_v2, 2 }
 0x461   :  { %6603 = vcosq.f32 %v4157_v49  ;;  %v4034_v28 = vclz %v6028_v56  ;;  %v4458_v4 = vmul.f32 %v11472_v0, %v11472_v0  ;;  %vm4161_vm5 = vweird.f32 %v9622_v34 }
 0x462   :  { %6605 = vsinq.f32 %v4157_v49  ;;  %4400 = vadd.xlane.f32.xlu0 %v11422_v42  ;;  %vm4164_vm6 = vcmp.eq.s32.totalorder %v4162_v2, 0  ;;  %vm4163_vm7 = vcmp.lt.s32.totalorder %v4162_v2, 2  ;;  %v11485_v58 = vmax.f32 %v4328_v19, 0.0 }
 0x463   :  { %v6029_v17 = vadd.s32 4294967294, %v4034_v28  ;;  %v4333_v7 = vadd.f32 %v11356_v29, %v11224_v44  ;;  %v4459_v24 = vmul.f32 %v11477_v61, %v11477_v61  ;;  %v4338_v44 = vadd.f32 %v11356_v29, %v11409_v18 }
 0x464   :  { %4479 = vadd.xlane.f32.xlu1 %v4455_v51  ;;  %vm3968_vm10 = vcmp.lt.s32.totalorder %v9619_v15, 0  ;;  %vm11501_vm11 = vcmp.le.f32.partialorder %v3966_v8, 0.7853982  ;;  %v4052_v31 = vsub.s32 4, %v11420_v22  ;;  %vm4058_vm9 = vweird.f32 %v9619_v15 }
 0x465   :  { %vm6030_vm1 = vcmp.lt.s32.totalorder %v6029_v17, 0  ;;  %v11492_v32 = vmax.f32 %v4333_v7, 0.0  ;;  %v11510_v18 = vmax.f32 %v4338_v44, 0.0  ;;  %vm6834_vm13 = vmmov 0  }
 0x466   :  { %4402 = vadd.xlane.f32.xlu0 %v11431_v33  ;;  %v4037_v54 = vsel %vm6030_vm1, 0, %v6029_v17  ;;  %v4053_v8 = vsel %vm3968_vm10, %v4052_v31, %v11420_v22  ;;  %v4715_v31 = vld [vmem:[#allocation5 + $0x30] sm:$0xff] }
 0x467   :  { %v4038_v23 = vsub.s32 32, %v4037_v54  ;;  %v4042_v5 = vsub.s32 4294967266, %v4037_v54  ;;  %v4039_v53 = vshll.u32 %v4030_v52, %v4037_v54  ;;  %v4460_v52 = vmul.f32 %v11485_v58, %v11485_v58 }
 0x468   :  { %4481 = vadd.xlane.f32.xlu1 %v4456_v47  ;;  %v4461_v13 = vmul.f32 %v11492_v32, %v11492_v32  ;;  %v4462_v60 = vmul.f32 %v11510_v18, %v11510_v18  ;;  %v4055_v49 = vsel %vm11501_vm11, 0, %v4053_v8 }
 0x469   :  { %v4040_v16 = vshrl.u32 %v4022_v36, %v4038_v23  ;;  %v4043_v30 = vadd.s32 127, %v4042_v5  ;;  %v4059_v56 = vand.u32 3, %v4055_v49 }
 0x46a   :  { %4404 = vadd.xlane.f32.xlu0 %v11446_v10 }
 0x46b   :  { %v6604_v38 = vpop.eup %6603  ;;  %v4041_v3 = vor.u32 %v4040_v16, %v4039_v53  ;;  %v4044_v25 = vshll.u32 %v4043_v30, 23  ;;  %vm4064_vm12 = vcmp.eq.s32.totalorder %v4059_v56, 2  ;;  %vm4061_vm14 = vcmp.eq.s32.totalorder %v4059_v56, 0 }
 0x46c   :  { %v6606_v9 = vpop.eup %6605  ;;  %v4168_v40 = vxor.u32 2147483648, %v6604_v38  ;;  %4483 = vadd.xlane.f32.xlu1 %v4457_v41  ;;  %vm4060_vm8 = vcmp.lt.s32.totalorder %v4059_v56, 2 }
 0x46d   :  { %v4165_v48 = vxor.u32 2147483648, %v6606_v9  ;;  %v4045_v1 = vor.u32 4788187, %v4044_v25  ;;  %v4048_v45 = vcvt.s32.f32 %v4041_v3  ;;  %v4710_v3 = vld [vmem:[#allocation5 + $0x8] sm:$0xff]  ;;  %v4711_v25 = vld [vmem:[#allocation5 + $0x10] sm:$0xff] }
 0x46e   :  { %v4169_v35 = vsel %vm4167_vm4, %v4168_v40, %v6606_v9  ;;  %4406 = vadd.xlane.f32.xlu0 %v11459_v6  ;;  %v4709_v40 = vld [vmem:[#allocation5] sm:$0xff] }
 0x46f   :  { %v4166_v14 = vsel %vm4164_vm6, %v6604_v38, %v4165_v48  ;;  %v4046_v21 = vand.u32 2147483647, %v4045_v1  ;;  %v4712_v1 = vld [vmem:[#allocation5 + $0x18] sm:$0xff] }
 0x470   :  { %v4170_v20 = vsel %vm4163_vm7, %v4166_v14, %v4169_v35  ;;  %4485 = vadd.xlane.f32.xlu1 %v4458_v4  ;;  %v6216_v35 = vpack.c.bf16 %v4710_v3, %v4709_v40 }
 0x471   :  { %v4171_v34 = vsel %vm4161_vm5, nan, %v4170_v20  ;;  %v4049_v57 = vmul.f32 %v4048_v45, %v4046_v21  ;;  %v6835_v20 = vmov 0.0   ;;  %v6219_v21 = vpack.c.bf16 %v4712_v1, %v4711_v25  ;;  %v4721_v1 = vld [vmem:[#allocation5 + $0x60] sm:$0xff] }
 0x472   :  { %4365 = vmatprep.mubr.f32.mxu0 %v4171_v34  ;;  %4408 = vadd.xlane.f32.xlu0 %v11472_v0  ;;  %v4713_v34 = vld [vmem:[#allocation5 + $0x20] sm:$0xff] }
 0x473   :  { %v4050_v11 = vxor.u32 2147483648, %v4049_v57  ;;  %6125 = vmatprep.mubr.msk.f32.mxu1 %vm6834_vm13, %v6835_v20  ;;  %6217 = vmatpush3.bf16.msra.mxu0 %v6216_v35 }
 0x474   :  { %4487 = vadd.xlane.f32.xlu1 %v4459_v24  ;;  %6279 = vmatpush3.bf16.msra.mxu1 %v6216_v35  ;;  %v12822_v24 = vmov 0.0|0.0  }
 0x475   :  { %v4051_v59 = vsel %vm3968_vm10, %v4050_v11, %v4049_v57  ;;  %6218 = vmatprep.subr.bf16.mxu0 %v12822_v24  ;;  %v4714_v57 = vld [vmem:[#allocation5 + $0x28] sm:$0xff]  ;;  %6272 = vmatprep.subr.bf16.mxu1 %v12822_v24 }
 0x476   :  { %4410 = vadd.xlane.f32.xlu0 %v11477_v61  ;;  %v4054_v62 = vsel %vm11501_vm11, %v9619_v15, %v4051_v59  ;;  %v6222_v59 = vpack.c.bf16 %v4714_v57, %v4713_v34 }
 0x477   :  { %6607 = vcosq.f32 %v4054_v62  ;;  %6220 = vmatpush3.bf16.msra.mxu0 %v6219_v21 }
 0x478   :  { %4489 = vadd.xlane.f32.xlu1 %v4460_v52  ;;  %6609 = vsinq.f32 %v4054_v62  ;;  %v4716_v62 = vld [vmem:[#allocation5 + $0x38] sm:$0xff]  ;;  %6280 = vmatpush3.bf16.msra.mxu1 %v6219_v21 }
 0x479   :  { %6221 = vmatprep.subr.bf16.mxu0 %v12822_v24  ;;  %6273 = vmatprep.subr.bf16.mxu1 %v12822_v24 }
 0x47a   :  { %4412 = vadd.xlane.f32.xlu0 %v11485_v58 }
 0x47b   :  { %v4342_v51 = vpop.f32.mrb[26].mxu0  ;;  %6223 = vmatpush3.bf16.msra.mxu0 %v6222_v59 }
 0x47c   :  { %4491 = vadd.xlane.f32.xlu1 %v4461_v13  ;;  %v4343_v63 = vadd.f32 %v11356_v29, %v4342_v51  ;;  %v4344_v28 = vpop.f32.mrb[27].mxu0  ;;  %6281 = vmatpush3.bf16.msra.mxu1 %v6222_v59 }
 0x47d   :  { %6224 = vmatprep.subr.bf16.mxu0 %v12822_v24  ;;  %6274 = vmatprep.subr.bf16.mxu1 %v12822_v24 }
 0x47e   :  { %4414 = vadd.xlane.f32.xlu0 %v11492_v32  ;;  %v11523_v47 = vmax.f32 %v4343_v63, 0.0 }
 0x480   :  { %4493 = vadd.xlane.f32.xlu1 %v4462_v60  ;;  %v4463_v36 = vmul.f32 %v11523_v47, %v11523_v47 }
 0x481   :  { %v6608_v37 = vpop.eup %6607 }
 0x482   :  { %4416 = vadd.xlane.f32.xlu0 %v11510_v18  ;;  %v6610_v22 = vpop.eup %6609  ;;  %v4065_v17 = vxor.u32 2147483648, %v6608_v37 }
 0x483   :  { %v4062_v39 = vxor.u32 2147483648, %v6610_v22 }
 0x484   :  { %v4066_v43 = vsel %vm4064_vm12, %v4065_v17, %v6610_v22  ;;  %4495 = vadd.xlane.f32.xlu1 %v4463_v36  ;;  %v4717_v22 = vld [vmem:[#allocation5 + $0x40] sm:$0xff]  ;;  %v4718_v17 = vld [vmem:[#allocation5 + $0x48] sm:$0xff] }
 0x485   :  { %v4063_v54 = vsel %vm4061_vm14, %v6608_v37, %v4062_v39  ;;  %v6225_v37 = vpack.c.bf16 %v4716_v62, %v4715_v31 }
 0x486   :  { %4418 = vadd.xlane.f32.xlu0 %v11523_v47  ;;  %v4067_v46 = vsel %vm4060_vm8, %v4063_v54, %v4066_v43 }
 0x487   :  { %v4068_v23 = vsel %vm4058_vm9, nan, %v4067_v46  ;;  %6226 = vmatpush3.bf16.msra.mxu0 %v6225_v37  ;;  %6282 = vmatpush3.bf16.msra.mxu1 %v6225_v37 }
 0x488   :  { %4366 = vmatmul.mubr.f32.gmra.mrb[36].mxu0 %v4068_v23  ;;  %6227 = vmatprep.subr.bf16.mxu0 %v12822_v24 }
 0x489   :  { %6110 = vmatprep.mubr.msk.f32.mxu0 %vm6834_vm13, %v6835_v20  ;;  %6275 = vmatprep.subr.bf16.mxu1 %v12822_v24 }
 0x4a7   :  { %v4347_v5 = vpop.f32.mrb[28].mxu0 }
 0x4a8   :  { %v4348_v41 = vadd.f32 %v11356_v29, %v4347_v5  ;;  %v4349_v2 = vpop.f32.mrb[29].mxu0 }
 0x4a9   :  { %v6228_v2 = vpack.c.bf16 %v4718_v17, %v4717_v22 }
 0x4aa   :  { %v11530_v53 = vmax.f32 %v4348_v41, 0.0 }
 0x4ab   :  { %6229 = vmatpush3.bf16.msra.mxu0 %v6228_v2  ;;  %6283 = vmatpush3.bf16.msra.mxu1 %v6228_v2 }
 0x4ac   :  { %4420 = vadd.xlane.f32.xlu0 %v11530_v53  ;;  %v4464_v16 = vmul.f32 %v11530_v53, %v11530_v53  ;;  %6230 = vmatprep.subr.bf16.mxu0 %v12822_v24 }
 0x4ad   :  { %6276 = vmatprep.subr.bf16.mxu1 %v12822_v24 }
 0x4ae   :  { %4497 = vadd.xlane.f32.xlu1 %v4464_v16  ;;  %v4719_v16 = vld [vmem:[#allocation5 + $0x50] sm:$0xff] }
 0x4d6   :  { %v4352_v30 = vpop.f32.mrb[30].mxu0 }
 0x4d7   :  { %v4353_v38 = vadd.f32 %v11356_v29, %v4352_v30  ;;  %v4354_v15 = vpop.f32.mrb[31].mxu0  ;;  %v4720_v30 = vld [vmem:[#allocation5 + $0x58] sm:$0xff] }
 0x4d8   :  { %v6231_v35 = vpack.c.bf16 %v4720_v30, %v4719_v16 }
 0x4d9   :  { %v11536_v19 = vmax.f32 %v4353_v38, 0.0 }
 0x4da   :  { %6232 = vmatpush3.bf16.msra.mxu0 %v6231_v35  ;;  %6284 = vmatpush3.bf16.msra.mxu1 %v6231_v35 }
 0x4db   :  { %4422 = vadd.xlane.f32.xlu0 %v11536_v19  ;;  %v4465_v9 = vmul.f32 %v11536_v19, %v11536_v19  ;;  %6233 = vmatprep.subr.bf16.mxu0 %v12822_v24 }
 0x4dc   :  { %6277 = vmatprep.subr.bf16.mxu1 %v12822_v24 }
 0x4dd   :  { %4499 = vadd.xlane.f32.xlu1 %v4465_v9  ;;  %v4393_v4 = vpop.xlane.xlu1 %4392 }
 0x4de   :  { %v11541_v14 = vmul.f32 0.0078125, %v4393_v4 }
 0x4df   :  { %v4470_v48 = vpop.xlane.xlu0 %4469 }
 0x4e0   :  { %v4507_v7 = vmul.f32 0.0078125, %v4470_v48  ;;  %v4526_v45 = vmul.f32 %v11541_v14, %v11541_v14  ;;  %v4583_v57 = vsub.f32 %v11380_v12, %v11541_v14  ;;  %v11584_v14 = vld [vmem:[%s12361_s5] ss:$0 sm:$0xff] }
 0x4e1   :  { %v4472_v11 = vpop.xlane.xlu1 %4471 }
 0x4e2   :  { %v4545_v44 = vsub.f32 %v4507_v7, %v4526_v45  ;;  %v4508_v8 = vmul.f32 0.0078125, %v4472_v11  ;;  %v4722_v7 = vld [vmem:[#allocation5 + $0x68] sm:$0xff] }
 0x4e3   :  { %v4395_v52 = vpop.xlane.xlu0 %4394 }
 0x4e4   :  { %v11551_v26 = vmul.f32 0.0078125, %v4395_v52  ;;  %v4564_v13 = vmax.f32 %v4545_v44, 0.0 }
 0x4e5   :  { %v4474_v49 = vpop.xlane.xlu1 %4473 }
 0x4e6   :  { %v4527_v60 = vmul.f32 %v11551_v26, %v11551_v26  ;;  %v4602_v51 = vadd.f32 1e-05, %v4564_v13  ;;  %v4509_v43 = vmul.f32 0.0078125, %v4474_v49  ;;  %v6234_v13 = vpack.c.bf16 %v4722_v7, %v4721_v1  ;;  %v4723_v49 = vld [vmem:[#allocation5 + $0x70] sm:$0xff] }
 0x4e7   :  { %v4397_v56 = vpop.xlane.xlu0 %4396 }
 0x4e8   :  { %v4546_v63 = vsub.f32 %v4508_v8, %v4527_v60  ;;  %v11557_v28 = vmul.f32 0.0078125, %v4397_v56  ;;  %6611 = vrsqrt.f32 %v4602_v51  ;;  %v4724_v56 = vld [vmem:[#allocation5 + $0x78] sm:$0xff]  ;;  %6235 = vmatpush3.bf16.msra.mxu0 %v6234_v13  ;;  %6285 = vmatpush3.bf16.msra.mxu1 %v6234_v13 }
 0x4e9   :  { %v4476_v54 = vpop.xlane.xlu1 %4475  ;;  %6236 = vmatprep.subr.bf16.mxu0 %v12822_v24  ;;  %6278 = vmatprep.subr.bf16.mxu1 %v12822_v24 }
 0x4ea   :  { %v4565_v39 = vmax.f32 %v4546_v63, 0.0  ;;  %v4528_v36 = vmul.f32 %v11557_v28, %v11557_v28  ;;  %v4510_v15 = vmul.f32 0.0078125, %v4476_v54  ;;  %v4584_v63 = vsub.f32 %v11388_v55, %v11551_v26  ;;  %v11598_v26 = vld [vmem:[%s12362_s6] ss:$0 sm:$0xff] }
 0x4eb   :  { %v4399_v46 = vpop.xlane.xlu0 %4398  ;;  %v4585_v16 = vsub.f32 %v11400_v27, %v11557_v28 }
 0x4ec   :  { %v4603_v23 = vadd.f32 1e-05, %v4565_v39  ;;  %v4547_v5 = vsub.f32 %v4509_v43, %v4528_v36  ;;  %v11563_v41 = vmul.f32 0.0078125, %v4399_v46  ;;  %v6237_v46 = vpack.c.bf16 %v4724_v56, %v4723_v49 }
 0x4ed   :  { %v4478_v40 = vpop.xlane.xlu1 %4477 }
 0x4ee   :  { %6613 = vrsqrt.f32 %v4603_v23  ;;  %v4566_v38 = vmax.f32 %v4547_v5, 0.0  ;;  %v4529_v9 = vmul.f32 %v11563_v41, %v11563_v41  ;;  %v4511_v45 = vmul.f32 0.0078125, %v4478_v40  ;;  %6238 = vmatpush3.bf16.msra.mxu0 %v6237_v46  ;;  %6286 = vmatpush3.bf16.msra.mxu1 %v6237_v46 }
 0x4ef   :  { %v4401_v3 = vpop.xlane.xlu0 %4400  ;;  %v4586_v24 = vsub.f32 %v11411_v50, %v11563_v41 }
 0x4f0   :  { %v4604_v25 = vadd.f32 1e-05, %v4566_v38  ;;  %v4548_v4 = vsub.f32 %v4510_v15, %v4529_v9  ;;  %v11569_v48 = vmul.f32 0.0078125, %v4401_v3 }
 0x4f1   :  { %v4480_v11 = vpop.xlane.xlu1 %4479 }
 0x4f2   :  { %6615 = vrsqrt.f32 %v4604_v25  ;;  %v4567_v21 = vmax.f32 %v4548_v4, 0.0  ;;  %v4530_v34 = vmul.f32 %v11569_v48, %v11569_v48  ;;  %v6612_v44 = vpop.eup %6611  ;;  %v4512_v51 = vmul.f32 0.0078125, %v4480_v11 }
 0x4f3   :  { %v4403_v52 = vpop.xlane.xlu0 %4402  ;;  %v4640_v8 = vmul.f32 %v6612_v44, %v4583_v57  ;;  %v4587_v50 = vsub.f32 %v11422_v42, %v11569_v48 }
 0x4f4   :  { %v4605_v59 = vadd.f32 1e-05, %v4567_v21  ;;  %v4549_v31 = vsub.f32 %v4511_v45, %v4530_v34  ;;  %v11577_v62 = vmul.f32 0.0078125, %v4403_v52 }
 0x4f5   :  { %v4482_v37 = vpop.xlane.xlu1 %4481  ;;  %v4665_v23 = vmul.f32 %v11584_v14, %v4640_v8 }
 0x4f6   :  { %6617 = vrsqrt.f32 %v4605_v59  ;;  %v4568_v60 = vmax.f32 %v4549_v31, 0.0  ;;  %v4531_v12 = vmul.f32 %v11577_v62, %v11577_v62  ;;  %v4513_v2 = vmul.f32 0.0078125, %v4482_v37 }
 0x4f7   :  { %v4405_v22 = vpop.xlane.xlu0 %4404  ;;  %v4690_v4 = vadd.f32 %v11598_v26, %v4665_v23  ;;  %v4588_v42 = vsub.f32 %v11431_v33, %v11577_v62 }
 0x4f8   :  { %v6614_v17 = vpop.eup %6613  ;;  %v4606_v39 = vadd.f32 1e-05, %v4568_v60  ;;  %v4550_v43 = vsub.f32 %v4512_v51, %v4531_v12  ;;  %v11590_v36 = vmul.f32 0.0078125, %v4405_v22 }
 0x4f9   :  { %v4641_v54 = vmul.f32 %v6614_v17, %v4584_v63  ;;  %v4484_v30 = vpop.xlane.xlu1 %4483  ;;  %6111 = vmatmul.mubr.f32.vlgmr.msra.gmra.mrb[38].mxu0 %v4690_v4 }
 0x4fa   :  { %6619 = vrsqrt.f32 %v4606_v39  ;;  %v4569_v5 = vmax.f32 %v4550_v43, 0.0  ;;  %v4532_v55 = vmul.f32 %v11590_v36, %v11590_v36  ;;  %v4514_v27 = vmul.f32 0.0078125, %v4484_v30  ;;  %6113 = vmatprep.mubr.msk.f32.mxu0 %vm6834_vm13, %v6835_v20 }
 0x4fb   :  { %v4407_v38 = vpop.xlane.xlu0 %4406  ;;  %v4666_v35 = vmul.f32 %v11584_v14, %v4641_v54 }
 0x4fc   :  { %v6616_v15 = vpop.eup %6615  ;;  %v4607_v9 = vadd.f32 1e-05, %v4569_v5  ;;  %v4551_v40 = vsub.f32 %v4513_v2, %v4532_v55  ;;  %v11604_v3 = vmul.f32 0.0078125, %v4407_v38 }
 0x4fd   :  { %v4642_v25 = vmul.f32 %v6616_v15, %v4585_v16  ;;  %v4486_v21 = vpop.xlane.xlu1 %4485  ;;  %v4691_v31 = vadd.f32 %v11598_v26, %v4666_v35 }
 0x4fe   :  { %6621 = vrsqrt.f32 %v4607_v9  ;;  %v4570_v1 = vmax.f32 %v4551_v40, 0.0  ;;  %v4533_v28 = vmul.f32 %v11604_v3, %v11604_v3  ;;  %v4515_v41 = vmul.f32 0.0078125, %v4486_v21 }
 0x4ff   :  { %v4409_v44 = vpop.xlane.xlu0 %4408  ;;  %v4667_v8 = vmul.f32 %v11584_v14, %v4642_v25  ;;  %6114 = vmatmul.mubr.f32.gmra.mrb[40].mxu0 %v4691_v31  ;;  %v4589_v9 = vsub.f32 %v11446_v10, %v11590_v36 }
 0x500   :  { %v6618_v45 = vpop.eup %6617  ;;  %v4608_v11 = vadd.f32 1e-05, %v4570_v1  ;;  %v4552_v52 = vsub.f32 %v4514_v27, %v4533_v28  ;;  %v4439_v13 = vmul.f32 0.0078125, %v4409_v44  ;;  %6116 = vmatprep.mubr.msk.f32.mxu0 %vm6834_vm13, %v6835_v20  ;;  %v4590_v27 = vsub.f32 %v11459_v6, %v11604_v3 }
 0x501   :  { %v4643_v59 = vmul.f32 %v6618_v45, %v4586_v24  ;;  %v4488_v37 = vpop.xlane.xlu1 %4487  ;;  %v4692_v54 = vadd.f32 %v11598_v26, %v4667_v8 }
 0x502   :  { %6623 = vrsqrt.f32 %v4608_v11  ;;  %v4571_v49 = vmax.f32 %v4552_v52, 0.0  ;;  %v4534_v56 = vmul.f32 %v4439_v13, %v4439_v13  ;;  %v4516_v23 = vmul.f32 0.0078125, %v4488_v37 }
 0x503   :  { %v4357_v7 = vpop.f32.mrb[32].mxu0  ;;  %v4411_v22 = vpop.xlane.xlu0 %4410  ;;  %v4668_v17 = vmul.f32 %v11584_v14, %v4643_v59  ;;  %6117 = vmatmul.mubr.f32.gmra.mrb[42].mxu0 %v4692_v54  ;;  %v4591_v24 = vsub.f32 %v11472_v0, %v4439_v13 }
 0x504   :  { %v4358_v34 = vadd.f32 %v11356_v29, %v4357_v7  ;;  %v4359_v57 = vpop.f32.mrb[33].mxu0  ;;  %v6620_v51 = vpop.eup %6619  ;;  %v4609_v63 = vadd.f32 1e-05, %v4571_v49  ;;  %v4553_v43 = vsub.f32 %v4515_v41, %v4534_v56  ;;  %v4440_v46 = vmul.f32 0.0078125, %v4411_v22  ;;  %6119 = vmatprep.mubr.msk.f32.mxu0 %vm6834_vm13, %v6835_v20 }
 0x505   :  { %v4644_v39 = vmul.f32 %v6620_v51, %v4587_v50  ;;  %v4693_v55 = vadd.f32 %v11598_v26, %v4668_v17  ;;  %v4490_v13 = vpop.xlane.xlu1 %4489 }
 0x506   :  { %v11615_v60 = vmax.f32 %v4358_v34, 0.0  ;;  %6625 = vrsqrt.f32 %v4609_v63  ;;  %v4572_v48 = vmax.f32 %v4553_v43, 0.0  ;;  %v4535_v5 = vmul.f32 %v4440_v46, %v4440_v46 }
 0x507   :  { %v4669_v15 = vmul.f32 %v11584_v14, %v4644_v39  ;;  %6120 = vmatmul.mubr.f32.gmra.mrb[44].mxu0 %v4693_v55  ;;  %v4592_v34 = vsub.f32 %v11477_v61, %v4440_v46  ;;  %v4413_v57 = vpop.xlane.xlu0 %4412  ;;  %v4517_v49 = vmul.f32 0.0078125, %v4490_v13 }
 0x508   :  { %4424 = vadd.xlane.f32.xlu0 %v11615_v60  ;;  %v4466_v12 = vmul.f32 %v11615_v60, %v11615_v60  ;;  %v6622_v2 = vpop.eup %6621  ;;  %v4610_v30 = vadd.f32 1e-05, %v4572_v48  ;;  %v4554_v38 = vsub.f32 %v4516_v23, %v4535_v5  ;;  %6122 = vmatprep.mubr.msk.f32.mxu0 %vm6834_vm13, %v6835_v20  ;;  %v4441_v59 = vmul.f32 0.0078125, %v4413_v57 }
 0x509   :  { %v4645_v16 = vmul.f32 %v6622_v2, %v4588_v42  ;;  %v4694_v35 = vadd.f32 %v11598_v26, %v4669_v15  ;;  %v4492_v23 = vpop.xlane.xlu1 %4491 }
 0x50a   :  { %4501 = vadd.xlane.f32.xlu1 %v4466_v12  ;;  %6627 = vrsqrt.f32 %v4610_v30  ;;  %v4573_v33 = vmax.f32 %v4554_v38, 0.0  ;;  %v4536_v8 = vmul.f32 %v4441_v59, %v4441_v59  ;;  %v4593_v39 = vsub.f32 %v11485_v58, %v4441_v59 }
 0x50b   :  { %v4670_v40 = vmul.f32 %v11584_v14, %v4645_v16  ;;  %6123 = vmatmul.mubr.f32.gmra.mrb[46].mxu0 %v4694_v35  ;;  %v4415_v42 = vpop.xlane.xlu0 %4414  ;;  %v4518_v2 = vmul.f32 0.0078125, %v4492_v23 }
 0x50c   :  { %v6624_v62 = vpop.eup %6623  ;;  %v4611_v4 = vadd.f32 1e-05, %v4573_v33  ;;  %v4555_v50 = vsub.f32 %v4517_v49, %v4536_v8  ;;  %v4442_v48 = vmul.f32 0.0078125, %v4415_v42 }
 0x50d   :  { %v4646_v25 = vmul.f32 %v6624_v62, %v4589_v9  ;;  %v4695_v1 = vadd.f32 %v11598_v26, %v4670_v40  ;;  %v4494_v38 = vpop.xlane.xlu1 %4493 }
 0x50e   :  { %6629 = vrsqrt.f32 %v4611_v4  ;;  %v4574_v41 = vmax.f32 %v4555_v50, 0.0  ;;  %v4537_v5 = vmul.f32 %v4442_v48, %v4442_v48 }
 0x50f   :  { %6126 = vmatmul.mubr.f32.vlgmr.msra.gmra.mrb[0].mxu1 %v4695_v1  ;;  %v4671_v36 = vmul.f32 %v11584_v14, %v4646_v25  ;;  %v4417_v16 = vpop.xlane.xlu0 %4416 }
 0x510   :  { %v6626_v10 = vpop.eup %6625  ;;  %6128 = vmatprep.mubr.msk.f32.mxu1 %vm6834_vm13, %v6835_v20  ;;  %v4612_v51 = vadd.f32 1e-05, %v4574_v41  ;;  %v4556_v55 = vsub.f32 %v4518_v2, %v4537_v5  ;;  %v4443_v40 = vmul.f32 0.0078125, %v4417_v16 }
 0x511   :  { %v4647_v28 = vmul.f32 %v6626_v10, %v4590_v27  ;;  %v4696_v7 = vadd.f32 %v11598_v26, %v4671_v36  ;;  %v4496_v4 = vpop.xlane.xlu1 %4495 }
 0x512   :  { %6631 = vrsqrt.f32 %v4612_v51  ;;  %v4575_v30 = vmax.f32 %v4556_v55, 0.0  ;;  %v4538_v10 = vmul.f32 %v4443_v40, %v4443_v40 }
 0x513   :  { %6129 = vmatmul.mubr.f32.gmra.mrb[2].mxu1 %v4696_v7  ;;  %v4672_v21 = vmul.f32 %v11584_v14, %v4647_v28  ;;  %v4419_v15 = vpop.xlane.xlu0 %4418  ;;  %v4519_v7 = vmul.f32 0.0078125, %v4494_v38 }
 0x514   :  { %v6628_v45 = vpop.eup %6627  ;;  %6131 = vmatprep.mubr.msk.f32.mxu1 %vm6834_vm13, %v6835_v20  ;;  %v4613_v9 = vadd.f32 1e-05, %v4575_v30  ;;  %v4444_v35 = vmul.f32 0.0078125, %v4419_v15 }
 0x515   :  { %v4648_v6 = vmul.f32 %v6628_v45, %v4591_v24  ;;  %v4697_v3 = vadd.f32 %v11598_v26, %v4672_v21  ;;  %v4520_v24 = vmul.f32 0.0078125, %v4496_v4  ;;  %v4557_v21 = vsub.f32 %v4519_v7, %v4538_v10 }
 0x516   :  { %6633 = vrsqrt.f32 %v4613_v9  ;;  %v4539_v36 = vmul.f32 %v4444_v35, %v4444_v35 }
 0x517   :  { %6132 = vmatmul.mubr.f32.gmra.mrb[4].mxu1 %v4697_v3  ;;  %v4673_v11 = vmul.f32 %v11584_v14, %v4648_v6 }
 0x518   :  { %v6630_v52 = vpop.eup %6629  ;;  %6134 = vmatprep.mubr.msk.f32.mxu1 %vm6834_vm13, %v6835_v20  ;;  %v4558_v45 = vsub.f32 %v4520_v24, %v4539_v36 }
 0x519   :  { %v4649_v0 = vmul.f32 %v6630_v52, %v4592_v34  ;;  %v4698_v44 = vadd.f32 %v11598_v26, %v4673_v11  ;;  %v4576_v11 = vmax.f32 %v4557_v21, 0.0 }
 0x51b   :  { %6135 = vmatmul.mubr.f32.gmra.mrb[6].mxu1 %v4698_v44  ;;  %v4674_v31 = vmul.f32 %v11584_v14, %v4649_v0  ;;  %v4594_v0 = vsub.f32 %v11492_v32, %v4442_v48  ;;  %v4577_v44 = vmax.f32 %v4558_v45, 0.0  ;;  %v4614_v49 = vadd.f32 1e-05, %v4576_v11 }
 0x51c   :  { %6137 = vmatprep.mubr.msk.f32.mxu1 %vm6834_vm13, %v6835_v20  ;;  %v6632_v17 = vpop.eup %6631 }
 0x51d   :  { %v4699_v61 = vadd.f32 %v11598_v26, %v4674_v31  ;;  %v4650_v43 = vmul.f32 %v6632_v17, %v4593_v39  ;;  %v4615_v50 = vadd.f32 1e-05, %v4577_v44  ;;  %6635 = vrsqrt.f32 %v4614_v49 }
 0x51f   :  { %6138 = vmatmul.mubr.f32.gmra.mrb[8].mxu1 %v4699_v61  ;;  %v4675_v54 = vmul.f32 %v11584_v14, %v4650_v43  ;;  %6637 = vrsqrt.f32 %v4615_v50  ;;  %v4595_v43 = vsub.f32 %v11510_v18, %v4443_v40 }
 0x520   :  { %6140 = vmatprep.mubr.msk.f32.mxu1 %vm6834_vm13, %v6835_v20  ;;  %v6634_v57 = vpop.eup %6633 }
 0x521   :  { %v4700_v46 = vadd.f32 %v11598_v26, %v4675_v54  ;;  %v4651_v61 = vmul.f32 %v6634_v57, %v4594_v0  ;;  %v4596_v54 = vsub.f32 %v11523_v47, %v4444_v35  ;;  %v11714_v0 = vld [vmem:[%s12364_s8] ss:$0 sm:$0xff] }
 0x523   :  { %6141 = vmatmul.mubr.f32.gmra.mrb[10].mxu1 %v4700_v46  ;;  %v4676_v51 = vmul.f32 %v11584_v14, %v4651_v61 }
 0x524   :  { %6143 = vmatprep.mubr.msk.f32.mxu1 %vm6834_vm13, %v6835_v20 }
 0x527   :  { %v6636_v17 = vpop.eup %6635 }
 0x528   :  { %v4652_v46 = vmul.f32 %v6636_v17, %v4595_v43 }
 0x529   :  { %v6638_v39 = vpop.eup %6637 }
 0x52a   :  { %v4653_v42 = vmul.f32 %v6638_v39, %v4596_v54  ;;  %v4677_v2 = vmul.f32 %v11584_v14, %v4652_v46 }
 0x52c   :  { %v4678_v55 = vmul.f32 %v11584_v14, %v4653_v42  ;;  %v4702_v38 = vadd.f32 %v11598_v26, %v4677_v2 }
 0x52e   :  { %v4703_v18 = vadd.f32 %v11598_v26, %v4678_v55 }
 0x530   :  { %v4362_v56 = vpop.f32.mrb[34].mxu0 }
 0x531   :  { %v4363_v12 = vadd.f32 %v11356_v29, %v4362_v56  ;;  %v4364_v63 = vpop.f32.mrb[35].mxu0 }
 0x533   :  { %v11664_v37 = vmax.f32 %v4363_v12, 0.0 }
 0x535   :  { %4426 = vadd.xlane.f32.xlu0 %v11664_v37  ;;  %v4467_v22 = vmul.f32 %v11664_v37, %v11664_v37 }
 0x537   :  { %4503 = vadd.xlane.f32.xlu1 %v4467_v22  ;;  %v4701_v22 = vadd.f32 %v11598_v26, %v4676_v51 }
 0x539   :  { %v4421_v1 = vpop.xlane.xlu0 %4420  ;;  %6144 = vmatmul.mubr.f32.gmra.mrb[12].mxu1 %v4701_v22 }
 0x53a   :  { %v4445_v28 = vmul.f32 0.0078125, %v4421_v1  ;;  %6146 = vmatprep.mubr.msk.f32.mxu1 %vm6834_vm13, %v6835_v20 }
 0x53c   :  { %v4540_v6 = vmul.f32 %v4445_v28, %v4445_v28  ;;  %v4597_v23 = vsub.f32 %v11530_v53, %v4445_v28 }
 0x53d   :  { %6147 = vmatmul.mubr.f32.gmra.mrb[14].mxu1 %v4702_v38 }
 0x53e   :  { %6149 = vmatprep.mubr.msk.f32.mxu1 %vm6834_vm13, %v6835_v20 }
 0x541   :  { %6150 = vmatmul.mubr.f32.gmra.mrb[16].mxu1 %v4703_v18 }
 0x542   :  { %6152 = vmatprep.mubr.msk.f32.mxu1 %vm6834_vm13, %v6835_v20 }
 0x55b   :  { %v4367_v58 = vpop.f32.mrb[36].mxu0 }
 0x55c   :  { %v4368_v33 = vadd.f32 %v11356_v29, %v4367_v58  ;;  %v4369_v62 = vpop.f32.mrb[37].mxu0  ;;  %v4498_v29 = vpop.xlane.xlu1 %4497 }
 0x55d   :  { %v4521_v3 = vmul.f32 0.0078125, %v4498_v29 }
 0x55e   :  { %v11675_v25 = vmax.f32 %v4368_v33, 0.0 }
 0x55f   :  { %v4559_v59 = vsub.f32 %v4521_v3, %v4540_v6 }
 0x560   :  { %4428 = vadd.xlane.f32.xlu0 %v11675_v25  ;;  %v4468_v27 = vmul.f32 %v11675_v25, %v11675_v25 }
 0x561   :  { %v4578_v41 = vmax.f32 %v4559_v59, 0.0 }
 0x562   :  { %4505 = vadd.xlane.f32.xlu1 %v4468_v27 }
 0x563   :  { %v4616_v12 = vadd.f32 1e-05, %v4578_v41 }
 0x565   :  { %6639 = vrsqrt.f32 %v4616_v12 }
 0x568   :  { %v4423_v34 = vpop.xlane.xlu0 %4422 }
 0x569   :  { %v4446_v52 = vmul.f32 0.0078125, %v4423_v34 }
 0x56a   :  { %v4500_v31 = vpop.xlane.xlu1 %4499 }
 0x56b   :  { %v4541_v13 = vmul.f32 %v4446_v52, %v4446_v52  ;;  %v4522_v8 = vmul.f32 0.0078125, %v4500_v31  ;;  %v4598_v30 = vsub.f32 %v11536_v19, %v4446_v52 }
 0x56d   :  { %v4560_v56 = vsub.f32 %v4522_v8, %v4541_v13 }
 0x56f   :  { %v4579_v63 = vmax.f32 %v4560_v56, 0.0  ;;  %v6640_v48 = vpop.eup %6639 }
 0x570   :  { %v4654_v5 = vmul.f32 %v6640_v48, %v4597_v23 }
 0x571   :  { %v4617_v32 = vadd.f32 1e-05, %v4579_v63 }
 0x572   :  { %v4679_v47 = vmul.f32 %v11584_v14, %v4654_v5 }
 0x573   :  { %6641 = vrsqrt.f32 %v4617_v32 }
 0x574   :  { %v4704_v53 = vadd.f32 %v11598_v26, %v4679_v47 }
 0x576   :  { %6153 = vmatmul.mubr.f32.gmra.mrb[18].mxu1 %v4704_v53 }
 0x577   :  { %6155 = vmatprep.mubr.msk.f32.mxu1 %vm6834_vm13, %v6835_v20 }
 0x57d   :  { %v6642_v16 = vpop.eup %6641 }
 0x57e   :  { %v4655_v15 = vmul.f32 %v6642_v16, %v4598_v30 }
 0x580   :  { %v4680_v58 = vmul.f32 %v11584_v14, %v4655_v15 }
 0x582   :  { %v4705_v19 = vadd.f32 %v11598_v26, %v4680_v58 }
 0x584   :  { %6156 = vmatmul.mubr.f32.gmra.mrb[20].mxu1 %v4705_v19 }
 0x585   :  { %6158 = vmatprep.mubr.msk.f32.mxu1 %vm6834_vm13, %v6835_v20 }
 0x595   :  { %v4425_v9 = vpop.xlane.xlu0 %4424 }
 0x596   :  { %v4447_v33 = vmul.f32 0.0078125, %v4425_v9 }
 0x597   :  { %v4502_v62 = vpop.xlane.xlu1 %4501 }
 0x598   :  { %v4523_v40 = vmul.f32 0.0078125, %v4502_v62  ;;  %v4542_v4 = vmul.f32 %v4447_v33, %v4447_v33  ;;  %v4599_v10 = vsub.f32 %v11615_v60, %v4447_v33 }
 0x59a   :  { %v4561_v35 = vsub.f32 %v4523_v40, %v4542_v4 }
 0x59c   :  { %v4580_v1 = vmax.f32 %v4561_v35, 0.0 }
 0x59e   :  { %v4618_v27 = vadd.f32 1e-05, %v4580_v1 }
 0x5a0   :  { %6643 = vrsqrt.f32 %v4618_v27 }
 0x5aa   :  { %v6644_v36 = vpop.eup %6643 }
 0x5ab   :  { %v4656_v28 = vmul.f32 %v6644_v36, %v4599_v10 }
 0x5ad   :  { %v4681_v7 = vmul.f32 %v11584_v14, %v4656_v28 }
 0x5af   :  { %v4706_v24 = vadd.f32 %v11598_v26, %v4681_v7 }
 0x5b1   :  { %6159 = vmatmul.mubr.f32.gmra.mrb[22].mxu1 %v4706_v24 }
 0x5b2   :  { %6161 = vmatprep.mubr.msk.f32.mxu1 %vm6834_vm13, %v6835_v20 }
 0x5c2   :  { %v4427_v29 = vpop.xlane.xlu0 %4426 }
 0x5c3   :  { %v4448_v21 = vmul.f32 0.0078125, %v4427_v29 }
 0x5c4   :  { %v4504_v45 = vpop.xlane.xlu1 %4503 }
 0x5c5   :  { %v4524_v6 = vmul.f32 0.0078125, %v4504_v45  ;;  %v4543_v3 = vmul.f32 %v4448_v21, %v4448_v21  ;;  %v4600_v60 = vsub.f32 %v11664_v37, %v4448_v21 }
 0x5c7   :  { %v4562_v34 = vsub.f32 %v4524_v6, %v4543_v3 }
 0x5c9   :  { %v4581_v57 = vmax.f32 %v4562_v34, 0.0 }
 0x5cb   :  { %v4619_v11 = vadd.f32 1e-05, %v4581_v57 }
 0x5cc   :  { %v4798_v59 = vpop.f32.mrb[38].mxu0 }
 0x5cd   :  { %6645 = vrsqrt.f32 %v4619_v11  ;;  %v4799_v13 = vadd.f32 %v11714_v0, %v4798_v59  ;;  %v6112_v61 = vpop.f32.mrb[39].mxu0 }
 0x5cf   :  { %v11719_v49 = vmax.f32 %v4799_v13, 0.0 }
 0x5d1   :  { %4913 = vadd.xlane.f32.xlu0 %v11719_v49  ;;  %v4970_v41 = vmul.f32 %v11719_v49, %v11719_v49 }
 0x5d2   :  { %v4803_v50 = vpop.f32.mrb[40].mxu0 }
 0x5d3   :  { %v4804_v37 = vadd.f32 %v11714_v0, %v4803_v50  ;;  %v6115_v56 = vpop.f32.mrb[41].mxu0  ;;  %4989 = vadd.xlane.f32.xlu1 %v4970_v41 }
 0x5d5   :  { %v11727_v51 = vmax.f32 %v4804_v37, 0.0 }
 0x5d6   :  { %v4808_v12 = vpop.f32.mrb[42].mxu0 }
 0x5d7   :  { %v6646_v52 = vpop.eup %6645  ;;  %v4809_v63 = vadd.f32 %v11714_v0, %v4808_v12  ;;  %4915 = vadd.xlane.f32.xlu0 %v11727_v51  ;;  %v6118_v22 = vpop.f32.mrb[43].mxu0  ;;  %v4971_v32 = vmul.f32 %v11727_v51, %v11727_v51 }
 0x5d8   :  { %v4657_v44 = vmul.f32 %v6646_v52, %v4600_v60 }
 0x5d9   :  { %v11733_v17 = vmax.f32 %v4809_v63, 0.0  ;;  %4991 = vadd.xlane.f32.xlu1 %v4971_v32 }
 0x5da   :  { %v4682_v31 = vmul.f32 %v11584_v14, %v4657_v44  ;;  %v4813_v39 = vpop.f32.mrb[44].mxu0 }
 0x5db   :  { %v4814_v43 = vadd.f32 %v11714_v0, %v4813_v39  ;;  %4917 = vadd.xlane.f32.xlu0 %v11733_v17  ;;  %v6121_v54 = vpop.f32.mrb[45].mxu0  ;;  %v4972_v46 = vmul.f32 %v11733_v17, %v11733_v17 }
 0x5dc   :  { %v4707_v8 = vadd.f32 %v11598_v26, %v4682_v31 }
 0x5dd   :  { %v11739_v42 = vmax.f32 %v4814_v43, 0.0  ;;  %4993 = vadd.xlane.f32.xlu1 %v4972_v46 }
 0x5de   :  { %6162 = vmatmul.mubr.f32.gmra.mrb[24].mxu1 %v4707_v8  ;;  %v4818_v23 = vpop.f32.mrb[46].mxu0 }
 0x5df   :  { %6164 = vmatprep.mubr.msk.f32.mxu1 %vm6834_vm13, %v6835_v20  ;;  %v4819_v55 = vadd.f32 %v11714_v0, %v4818_v23  ;;  %4919 = vadd.xlane.f32.xlu0 %v11739_v42  ;;  %v6124_v16 = vpop.f32.mrb[47].mxu0  ;;  %v4973_v30 = vmul.f32 %v11739_v42, %v11739_v42 }
 0x5e1   :  { %v11746_v38 = vmax.f32 %v4819_v55, 0.0  ;;  %4995 = vadd.xlane.f32.xlu1 %v4973_v30 }
 0x5e2   :  { %v4823_v48 = vpop.f32.mrb[0].mxu1 }
 0x5e3   :  { %v4824_v5 = vadd.f32 %v11714_v0, %v4823_v48  ;;  %v6127_v2 = vpop.f32.mrb[1].mxu1  ;;  %4921 = vadd.xlane.f32.xlu0 %v11746_v38  ;;  %v4974_v58 = vmul.f32 %v11746_v38, %v11746_v38 }
 0x5e5   :  { %v11748_v15 = vmax.f32 %v4824_v5, 0.0  ;;  %4997 = vadd.xlane.f32.xlu1 %v4974_v58 }
 0x5e6   :  { %v4828_v18 = vpop.f32.mrb[2].mxu1 }
 0x5e7   :  { %v4829_v47 = vadd.f32 %v11714_v0, %v4828_v18  ;;  %v6130_v53 = vpop.f32.mrb[3].mxu1  ;;  %v4975_v62 = vmul.f32 %v11748_v15, %v11748_v15  ;;  %4923 = vadd.xlane.f32.xlu0 %v11748_v15 }
 0x5e9   :  { %v11754_v33 = vmax.f32 %v4829_v47, 0.0  ;;  %4999 = vadd.xlane.f32.xlu1 %v4975_v62 }
 0x5ea   :  { %v4833_v40 = vpop.f32.mrb[4].mxu1 }
 0x5eb   :  { %v4834_v35 = vadd.f32 %v11714_v0, %v4833_v40  ;;  %v6133_v1 = vpop.f32.mrb[5].mxu1  ;;  %v4976_v7 = vmul.f32 %v11754_v33, %v11754_v33  ;;  %4925 = vadd.xlane.f32.xlu0 %v11754_v33 }
 0x5ed   :  { %v4429_v19 = vpop.xlane.xlu0 %4428  ;;  %v11760_v28 = vmax.f32 %v4834_v35, 0.0  ;;  %5001 = vadd.xlane.f32.xlu1 %v4976_v7 }
 0x5ee   :  { %v4449_v9 = vmul.f32 0.0078125, %v4429_v19  ;;  %v4838_v24 = vpop.f32.mrb[6].mxu1 }
 0x5ef   :  { %v4506_v4 = vpop.xlane.xlu1 %4505  ;;  %v4839_v29 = vadd.f32 %v11714_v0, %v4838_v24  ;;  %v6136_v21 = vpop.f32.mrb[7].mxu1  ;;  %v4977_v34 = vmul.f32 %v11760_v28, %v11760_v28  ;;  %4927 = vadd.xlane.f32.xlu0 %v11760_v28 }
 0x5f0   :  { %v4525_v27 = vmul.f32 0.0078125, %v4506_v4  ;;  %v4544_v10 = vmul.f32 %v4449_v9, %v4449_v9  ;;  %v4601_v31 = vsub.f32 %v11675_v25, %v4449_v9 }
 0x5f1   :  { %v11766_v3 = vmax.f32 %v4839_v29, 0.0  ;;  %5003 = vadd.xlane.f32.xlu1 %v4977_v34 }
 0x5f2   :  { %v4563_v36 = vsub.f32 %v4525_v27, %v4544_v10  ;;  %v4843_v57 = vpop.f32.mrb[8].mxu1 }
 0x5f3   :  { %v4844_v11 = vadd.f32 %v11714_v0, %v4843_v57  ;;  %v6139_v60 = vpop.f32.mrb[9].mxu1  ;;  %v4978_v44 = vmul.f32 %v11766_v3, %v11766_v3  ;;  %4929 = vadd.xlane.f32.xlu0 %v11766_v3 }
 0x5f4   :  { %v4582_v45 = vmax.f32 %v4563_v36, 0.0 }
 0x5f5   :  { %v11772_v52 = vmax.f32 %v4844_v11, 0.0  ;;  %5005 = vadd.xlane.f32.xlu1 %v4978_v44 }
 0x5f6   :  { %v4620_v6 = vadd.f32 1e-05, %v4582_v45  ;;  %v4848_v37 = vpop.f32.mrb[10].mxu1 }
 0x5f7   :  { %v4979_v59 = vmul.f32 %v11772_v52, %v11772_v52  ;;  %4931 = vadd.xlane.f32.xlu0 %v11772_v52  ;;  %v4849_v41 = vadd.f32 %v11714_v0, %v4848_v37  ;;  %v6142_v56 = vpop.f32.mrb[11].mxu1 }
 0x5f8   :  { %6647 = vrsqrt.f32 %v4620_v6 }
 0x5f9   :  { %5007 = vadd.xlane.f32.xlu1 %v4979_v59  ;;  %v11785_v12 = vmax.f32 %v4849_v41, 0.0 }
 0x5fb   :  { %4933 = vadd.xlane.f32.xlu0 %v11785_v12  ;;  %v4980_v25 = vmul.f32 %v11785_v12, %v11785_v12 }
 0x5fd   :  { %5009 = vadd.xlane.f32.xlu1 %v4980_v25 }
 0x602   :  { %v6648_v13 = vpop.eup %6647 }
 0x603   :  { %v4658_v61 = vmul.f32 %v6648_v13, %v4601_v31 }
 0x605   :  { %v4683_v8 = vmul.f32 %v11584_v14, %v4658_v61 }
 0x607   :  { %v4708_v50 = vadd.f32 %v11598_v26, %v4683_v8 }
 0x609   :  { %6165 = vmatmul.mubr.f32.gmra.mrb[26].mxu1 %v4708_v50 }
 0x60a   :  { %5712 = vmatprep.mubr.f32.mxu1 %v6835_v20 }
 0x60c   :  { %v4853_v63 = vpop.f32.mrb[12].mxu1 }
 0x60d   :  { %v4854_v14 = vadd.f32 %v11714_v0, %v4853_v63  ;;  %v6145_v22 = vpop.f32.mrb[13].mxu1 }
 0x60f   :  { %v11791_v26 = vmax.f32 %v4854_v14, 0.0 }
 0x610   :  { %v4858_v39 = vpop.f32.mrb[14].mxu1 }
 0x611   :  { %4935 = vadd.xlane.f32.xlu0 %v11791_v26  ;;  %v4981_v32 = vmul.f32 %v11791_v26, %v11791_v26  ;;  %v4859_v43 = vadd.f32 %v11714_v0, %v4858_v39  ;;  %v6148_v54 = vpop.f32.mrb[15].mxu1 }
 0x613   :  { %5011 = vadd.xlane.f32.xlu1 %v4981_v32  ;;  %v11797_v46 = vmax.f32 %v4859_v43, 0.0 }
 0x614   :  { %v4863_v48 = vpop.f32.mrb[16].mxu1 }
 0x615   :  { %v4864_v23 = vadd.f32 %v11714_v0, %v4863_v48  ;;  %4937 = vadd.xlane.f32.xlu0 %v11797_v46  ;;  %v6151_v5 = vpop.f32.mrb[17].mxu1  ;;  %v4982_v2 = vmul.f32 %v11797_v46, %v11797_v46 }
 0x617   :  { %v11803_v55 = vmax.f32 %v4864_v23, 0.0  ;;  %5013 = vadd.xlane.f32.xlu1 %v4982_v2 }
 0x619   :  { %4939 = vadd.xlane.f32.xlu0 %v11803_v55  ;;  %v4983_v47 = vmul.f32 %v11803_v55, %v11803_v55 }
 0x61b   :  { %5015 = vadd.xlane.f32.xlu1 %v4983_v47 }
 0x649   :  { %v4868_v16 = vpop.f32.mrb[18].mxu1 }
 0x64a   :  { %v4869_v30 = vadd.f32 %v11714_v0, %v4868_v16  ;;  %v6154_v18 = vpop.f32.mrb[19].mxu1 }
 0x64c   :  { %v11809_v53 = vmax.f32 %v4869_v30, 0.0 }
 0x64e   :  { %4941 = vadd.xlane.f32.xlu0 %v11809_v53  ;;  %v4984_v62 = vmul.f32 %v11809_v53, %v11809_v53 }
 0x650   :  { %5017 = vadd.xlane.f32.xlu1 %v4984_v62 }
 0x657   :  { %v4873_v58 = vpop.f32.mrb[20].mxu1 }
 0x658   :  { %v4874_v19 = vadd.f32 %v11714_v0, %v4873_v58  ;;  %v6157_v9 = vpop.f32.mrb[21].mxu1 }
 0x65a   :  { %v11815_v40 = vmax.f32 %v4874_v19, 0.0 }
 0x65c   :  { %4943 = vadd.xlane.f32.xlu0 %v11815_v40  ;;  %v4985_v4 = vmul.f32 %v11815_v40, %v11815_v40 }
 0x65e   :  { %5019 = vadd.xlane.f32.xlu1 %v4985_v4  ;;  %v4914_v7 = vpop.xlane.xlu0 %4913 }
 0x65f   :  { %v11826_v11 = vmul.f32 0.0078125, %v4914_v7 }
 0x660   :  { %v4990_v24 = vpop.xlane.xlu1 %4989 }
 0x661   :  { %v5046_v13 = vmul.f32 %v11826_v11, %v11826_v11  ;;  %v5027_v61 = vmul.f32 0.0078125, %v4990_v24 }
 0x663   :  { %v5065_v25 = vsub.f32 %v5027_v61, %v5046_v13 }
 0x664   :  { %v4916_v29 = vpop.xlane.xlu0 %4915 }
 0x665   :  { %v11831_v8 = vmul.f32 0.0078125, %v4916_v29  ;;  %v5084_v39 = vmax.f32 %v5065_v25, 0.0  ;;  %v5103_v25 = vsub.f32 %v11719_v49, %v11826_v11 }
 0x666   :  { %v4992_v21 = vpop.xlane.xlu1 %4991 }
 0x667   :  { %v5047_v63 = vmul.f32 %v11831_v8, %v11831_v8  ;;  %v5028_v14 = vmul.f32 0.0078125, %v4992_v21  ;;  %v5122_v2 = vadd.f32 1e-05, %v5084_v39  ;;  %v5104_v49 = vsub.f32 %v11727_v51, %v11831_v8 }
 0x668   :  { %v4918_v45 = vpop.xlane.xlu0 %4917 }
 0x669   :  { %v11840_v22 = vmul.f32 0.0078125, %v4918_v45  ;;  %v5066_v43 = vsub.f32 %v5028_v14, %v5047_v63  ;;  %6649 = vrsqrt.f32 %v5122_v2 }
 0x66a   :  { %v4994_v6 = vpop.xlane.xlu1 %4993 }
 0x66b   :  { %v5048_v54 = vmul.f32 %v11840_v22, %v11840_v22  ;;  %v5029_v48 = vmul.f32 0.0078125, %v4994_v6  ;;  %v5085_v16 = vmax.f32 %v5066_v43, 0.0  ;;  %v5105_v8 = vsub.f32 %v11733_v17, %v11840_v22 }
 0x66c   :  { %v4920_v34 = vpop.xlane.xlu0 %4919 }
 0x66d   :  { %v11844_v23 = vmul.f32 0.0078125, %v4920_v34  ;;  %v5067_v47 = vsub.f32 %v5029_v48, %v5048_v54  ;;  %v5123_v62 = vadd.f32 1e-05, %v5085_v16  ;;  %v11871_v16 = vld [vmem:[%s12365_s9] ss:$0 sm:$0xff] }
 0x66e   :  { %v4996_v57 = vpop.xlane.xlu1 %4995 }
 0x66f   :  { %v5049_v58 = vmul.f32 %v11844_v23, %v11844_v23  ;;  %v5030_v19 = vmul.f32 0.0078125, %v4996_v57  ;;  %6651 = vrsqrt.f32 %v5123_v62  ;;  %v5106_v17 = vsub.f32 %v11739_v42, %v11844_v23 }
 0x670   :  { %v4922_v60 = vpop.xlane.xlu0 %4921 }
 0x671   :  { %v11846_v30 = vmul.f32 0.0078125, %v4922_v60 }
 0x672   :  { %v4998_v50 = vpop.xlane.xlu1 %4997 }
 0x673   :  { %v5050_v4 = vmul.f32 %v11846_v30, %v11846_v30 }
 0x674   :  { %v4924_v56 = vpop.xlane.xlu0 %4923 }
 0x676   :  { %v5000_v32 = vpop.xlane.xlu1 %4999 }
 0x677   :  { %v5032_v34 = vmul.f32 0.0078125, %v5000_v32 }
 0x678   :  { %v4926_v5 = vpop.xlane.xlu0 %4925 }
 0x679   :  { %v11854_v7 = vmul.f32 0.0078125, %v4926_v5 }
 0x67a   :  { %v5002_v18 = vpop.xlane.xlu1 %5001 }
 0x67b   :  { %v5052_v60 = vmul.f32 %v11854_v7, %v11854_v7 }
 0x67c   :  { %v4928_v9 = vpop.xlane.xlu0 %4927 }
 0x67e   :  { %v5004_v24 = vpop.xlane.xlu1 %5003 }
 0x67f   :  { %v5034_v14 = vmul.f32 0.0078125, %v5004_v24 }
 0x680   :  { %v4930_v57 = vpop.xlane.xlu0 %4929 }
 0x681   :  { %v11866_v43 = vmul.f32 0.0078125, %v4930_v57 }
 0x682   :  { %v5006_v13 = vpop.xlane.xlu1 %5005 }
 0x684   :  { %v4878_v35 = vpop.f32.mrb[22].mxu1  ;;  %v4932_v32 = vpop.xlane.xlu0 %4931 }
 0x685   :  { %v4879_v1 = vadd.f32 %v11714_v0, %v4878_v35  ;;  %v6160_v27 = vpop.f32.mrb[23].mxu1  ;;  %v5031_v35 = vmul.f32 0.0078125, %v4998_v50 }
 0x686   :  { %v5068_v27 = vsub.f32 %v5030_v19, %v5049_v58  ;;  %v5035_v58 = vmul.f32 0.0078125, %v5006_v13  ;;  %v11877_v19 = vmul.f32 0.0078125, %v4932_v32  ;;  %v5229_v32 = vld [vmem:[%s12358_s2] sm:$0xff] }
 0x687   :  { %v11821_v10 = vmax.f32 %v4879_v1, 0.0  ;;  %v5086_v1 = vmax.f32 %v5067_v47, 0.0  ;;  %v5069_v29 = vsub.f32 %v5031_v35, %v5050_v4  ;;  %v5054_v47 = vmul.f32 %v11866_v43, %v11866_v43 }
 0x688   :  { %v5087_v45 = vmax.f32 %v5068_v27, 0.0  ;;  %v4934_v4 = vpop.xlane.xlu0 %4933 }
 0x689   :  { %4945 = vadd.xlane.f32.xlu0 %v11821_v10  ;;  %v4986_v36 = vmul.f32 %v11821_v10, %v11821_v10  ;;  %v5124_v21 = vadd.f32 1e-05, %v5086_v1  ;;  %v11883_v1 = vld [vmem:[%s12366_s10] ss:$0 sm:$0xff] }
 0x68a   :  { %v5125_v61 = vadd.f32 1e-05, %v5087_v45 }
 0x68b   :  { %5021 = vadd.xlane.f32.xlu1 %v4986_v36  ;;  %v11852_v36 = vmul.f32 0.0078125, %v4924_v56  ;;  %6653 = vrsqrt.f32 %v5124_v21  ;;  %v5055_v21 = vmul.f32 %v11877_v19, %v11877_v19 }
 0x68c   :  { %6655 = vrsqrt.f32 %v5125_v61 }
 0x68d   :  { %v5051_v6 = vmul.f32 %v11852_v36, %v11852_v36 }
 0x68f   :  { %v5070_v50 = vsub.f32 %v5032_v34, %v5051_v6  ;;  %v11889_v6 = vmul.f32 0.0078125, %v4934_v4 }
 0x691   :  { %v5089_v54 = vmax.f32 %v5070_v50, 0.0  ;;  %v5056_v50 = vmul.f32 %v11889_v6, %v11889_v6 }
 0x6b1   :  { %v4883_v44 = vpop.f32.mrb[24].mxu1 }
 0x6b2   :  { %v4884_v59 = vadd.f32 %v11714_v0, %v4883_v44  ;;  %v6163_v31 = vpop.f32.mrb[25].mxu1  ;;  %v5033_v44 = vmul.f32 0.0078125, %v5002_v18  ;;  %v5008_v18 = vpop.xlane.xlu1 %5007 }
 0x6b3   :  { %v5088_v31 = vmax.f32 %v5069_v29, 0.0  ;;  %v5073_v29 = vsub.f32 %v5035_v58, %v5054_v47  ;;  %v5036_v45 = vmul.f32 0.0078125, %v5008_v18 }
 0x6b4   :  { %v11833_v37 = vmax.f32 %v4884_v59, 0.0  ;;  %v11860_v59 = vmul.f32 0.0078125, %v4928_v9  ;;  %v5071_v56 = vsub.f32 %v5033_v44, %v5052_v60  ;;  %v5127_v9 = vadd.f32 1e-05, %v5089_v54 }
 0x6b5   :  { %v5126_v39 = vadd.f32 1e-05, %v5088_v31  ;;  %v5092_v13 = vmax.f32 %v5073_v29, 0.0  ;;  %v5074_v61 = vsub.f32 %v5036_v45, %v5055_v21 }
 0x6b6   :  { %4947 = vadd.xlane.f32.xlu0 %v11833_v37  ;;  %v4987_v41 = vmul.f32 %v11833_v37, %v11833_v37  ;;  %v5053_v63 = vmul.f32 %v11860_v59, %v11860_v59  ;;  %v5090_v2 = vmax.f32 %v5071_v56, 0.0  ;;  %v5010_v34 = vpop.xlane.xlu1 %5009  ;;  %v4936_v56 = vpop.xlane.xlu0 %4935 }
 0x6b7   :  { %6657 = vrsqrt.f32 %v5126_v39 }
 0x6b8   :  { %5023 = vadd.xlane.f32.xlu1 %v4987_v41  ;;  %v6650_v41 = vpop.eup %6649  ;;  %v5072_v11 = vsub.f32 %v5034_v14, %v5053_v63  ;;  %v5128_v35 = vadd.f32 1e-05, %v5090_v2  ;;  %6659 = vrsqrt.f32 %v5127_v9  ;;  %v11897_v63 = vmul.f32 0.0078125, %v4936_v56 }
 0x6b9   :  { %v5160_v48 = vmul.f32 %v6650_v41, %v5103_v25  ;;  %v6652_v5 = vpop.eup %6651  ;;  %v5037_v41 = vmul.f32 0.0078125, %v5010_v34  ;;  %v5109_v34 = vsub.f32 %v11754_v33, %v11854_v7 }
 0x6ba   :  { %v5161_v27 = vmul.f32 %v6652_v5, %v5104_v49  ;;  %v6654_v51 = vpop.eup %6653  ;;  %v5091_v24 = vmax.f32 %v5072_v11, 0.0  ;;  %6661 = vrsqrt.f32 %v5128_v35  ;;  %v5012_v54 = vpop.xlane.xlu1 %5011  ;;  %v5107_v5 = vsub.f32 %v11746_v38, %v11846_v30 }
 0x6bb   :  { %v5185_v62 = vmul.f32 %v11871_v16, %v5160_v48  ;;  %v5162_v44 = vmul.f32 %v6654_v51, %v5105_v8  ;;  %v6656_v31 = vpop.eup %6655  ;;  %v5130_v49 = vadd.f32 1e-05, %v5092_v13  ;;  %v5093_v11 = vmax.f32 %v5074_v61, 0.0  ;;  %v5230_v8 = vld [vmem:[%s12358_s2 + $0x8] sm:$0xff] }
 0x6bc   :  { %v5186_v60 = vmul.f32 %v11871_v16, %v5161_v27  ;;  %v5129_v22 = vadd.f32 1e-05, %v5091_v24  ;;  %v5163_v23 = vmul.f32 %v6656_v31, %v5106_v17  ;;  %v5075_v47 = vsub.f32 %v5037_v41, %v5056_v50 }
 0x6bd   :  { %v5210_v57 = vadd.f32 %v11883_v1, %v5185_v62  ;;  %v5187_v42 = vmul.f32 %v11871_v16, %v5162_v44  ;;  %v5057_v9 = vmul.f32 %v11897_v63, %v11897_v63  ;;  %v5038_v62 = vmul.f32 0.0078125, %v5012_v54 }
 0x6be   :  { %v5211_v39 = vadd.f32 %v11883_v1, %v5186_v60  ;;  %6663 = vrsqrt.f32 %v5129_v22  ;;  %v5188_v38 = vmul.f32 %v11871_v16, %v5163_v23  ;;  %v5131_v21 = vadd.f32 1e-05, %v5093_v11  ;;  %v5231_v22 = vld [vmem:[%s12358_s2 + $0x10] sm:$0xff]  ;;  %v4938_v11 = vpop.xlane.xlu0 %4937 }
 0x6bf   :  { %v5248_v25 = vmax.f32 %v5210_v57, 0.0  ;;  %v5212_v51 = vadd.f32 %v11883_v1, %v5187_v42  ;;  %6665 = vrsqrt.f32 %v5130_v49  ;;  %v5094_v45 = vmax.f32 %v5075_v47, 0.0 }
 0x6c0   :  { %v5249_v27 = vmax.f32 %v5211_v39, 0.0  ;;  %v5213_v31 = vadd.f32 %v11883_v1, %v5188_v38  ;;  %6667 = vrsqrt.f32 %v5131_v21  ;;  %v5110_v61 = vsub.f32 %v11760_v28, %v11860_v59  ;;  %v5232_v39 = vld [vmem:[%s12358_s2 + $0x18] sm:$0xff] }
 0x6c1   :  { %v6658_v14 = vpop.eup %6657  ;;  %v11907_v58 = vmul.f32 %v5248_v25, %v5229_v32  ;;  %v5250_v44 = vmax.f32 %v5212_v51, 0.0  ;;  %v5132_v33 = vadd.f32 1e-05, %v5094_v45  ;;  %v5111_v49 = vsub.f32 %v11766_v3, %v11866_v43 }
 0x6c2   :  { %v5164_v4 = vmul.f32 %v6658_v14, %v5107_v5  ;;  %v6660_v30 = vpop.eup %6659  ;;  %v11928_v60 = vmul.f32 %v5249_v27, %v5230_v8  ;;  %v5251_v14 = vmax.f32 %v5213_v31, 0.0  ;;  %v5014_v27 = vpop.xlane.xlu1 %5013  ;;  %v5112_v8 = vsub.f32 %v11772_v52, %v11877_v19 }
 0x6c3   :  { %v5345_v57 = vmul.f32 %v11907_v58, %v11907_v58  ;;  %v11940_v25 = vmul.f32 %v5250_v44, %v5231_v22  ;;  %6669 = vrsqrt.f32 %v5132_v33  ;;  %v5039_v43 = vmul.f32 0.0078125, %v5014_v27 }
 0x6c4   :  { %v6662_v24 = vpop.eup %6661  ;;  %v5346_v56 = vmul.f32 %v11928_v60, %v11928_v60  ;;  %v11950_v5 = vmul.f32 %v5251_v14, %v5232_v39 }
 0x6c5   :  { %v5166_v13 = vmul.f32 %v6662_v24, %v5109_v34  ;;  %v5234_v24 = vld [vmem:[%s12358_s2 + $0x28] sm:$0xff] }
 0x6c6   :  { %v5016_v19 = vpop.xlane.xlu1 %5015 }
 0x6c7   :  { %v5191_v42 = vmul.f32 %v11871_v16, %v5166_v13  ;;  %v5040_v33 = vmul.f32 0.0078125, %v5016_v19 }
 0x6c8   :  { %v6664_v7 = vpop.eup %6663 }
 0x6c9   :  { %v5167_v28 = vmul.f32 %v6664_v7, %v5110_v61  ;;  %v6666_v54 = vpop.eup %6665  ;;  %v5216_v47 = vadd.f32 %v11883_v1, %v5191_v42  ;;  %v5113_v7 = vsub.f32 %v11785_v12, %v11889_v6  ;;  %v5236_v42 = vld [vmem:[%s12358_s2 + $0x38] sm:$0xff] }
 0x6ca   :  { %v5168_v51 = vmul.f32 %v6666_v54, %v5111_v49  ;;  %v6668_v38 = vpop.eup %6667 }
 0x6cb   :  { %v5254_v21 = vmax.f32 %v5216_v47, 0.0  ;;  %v5169_v44 = vmul.f32 %v6668_v38, %v5112_v8 }
 0x6cd   :  { %v6670_v31 = vpop.eup %6669 }
 0x6ce   :  { %v5170_v12 = vmul.f32 %v6670_v31, %v5113_v7  ;;  %v5238_v31 = vld [vmem:[%s12358_s2 + $0x48] sm:$0xff] }
 0x6dc   :  { %v4888_v48 = vpop.f32.mrb[26].mxu1 }
 0x6dd   :  { %v4889_v2 = vadd.f32 %v11714_v0, %v4888_v48  ;;  %v6166_v18 = vpop.f32.mrb[27].mxu1  ;;  %v5108_v0 = vsub.f32 %v11748_v15, %v11852_v36  ;;  %v5076_v15 = vsub.f32 %v5038_v62, %v5057_v9  ;;  %v5189_v36 = vmul.f32 %v11871_v16, %v5164_v4  ;;  %v5018_v39 = vpop.xlane.xlu1 %5017 }
 0x6de   :  { %v5347_v48 = vmul.f32 %v11940_v25, %v11940_v25  ;;  %v11960_v9 = vmul.f32 0.0078125, %v4938_v11  ;;  %v5192_v62 = vmul.f32 %v11871_v16, %v5167_v28  ;;  %v5114_v11 = vsub.f32 %v11791_v26, %v11897_v63 }
 0x6df   :  { %v11911_v35 = vmax.f32 %v4889_v2, 0.0  ;;  %v5165_v17 = vmul.f32 %v6660_v30, %v5108_v0  ;;  %v5095_v50 = vmax.f32 %v5076_v15, 0.0  ;;  %v5214_v41 = vadd.f32 %v11883_v1, %v5189_v36  ;;  %v5233_v2 = vld [vmem:[%s12358_s2 + $0x20] sm:$0xff] }
 0x6e0   :  { %v5348_v30 = vmul.f32 %v11950_v5, %v11950_v5  ;;  %v5058_v3 = vmul.f32 %v11960_v9, %v11960_v9  ;;  %v5217_v15 = vadd.f32 %v11883_v1, %v5192_v62  ;;  %v5193_v36 = vmul.f32 %v11871_v16, %v5168_v51 }
 0x6e1   :  { %4949 = vadd.xlane.f32.xlu0 %v11911_v35  ;;  %v4988_v29 = vmul.f32 %v11911_v35, %v11911_v35  ;;  %v5190_v32 = vmul.f32 %v11871_v16, %v5165_v17  ;;  %v5133_v59 = vadd.f32 1e-05, %v5095_v50  ;;  %v5252_v23 = vmax.f32 %v5214_v41, 0.0 }
 0x6e2   :  { %v5077_v45 = vsub.f32 %v5039_v43, %v5058_v3  ;;  %v5218_v28 = vadd.f32 %v11883_v1, %v5193_v36  ;;  %v5195_v43 = vmul.f32 %v11871_v16, %v5170_v12 }
 0x6e3   :  { %5025 = vadd.xlane.f32.xlu1 %v4988_v29  ;;  %v5215_v18 = vadd.f32 %v11883_v1, %v5190_v32  ;;  %6671 = vrsqrt.f32 %v5133_v59  ;;  %v11963_v4 = vmul.f32 %v5252_v23, %v5233_v2  ;;  %v4940_v29 = vpop.xlane.xlu0 %4939  ;;  %v5255_v32 = vmax.f32 %v5217_v15, 0.0 }
 0x6e4   :  { %v11975_v34 = vmul.f32 0.0078125, %v4940_v29  ;;  %v5096_v17 = vmax.f32 %v5077_v45, 0.0  ;;  %v5194_v59 = vmul.f32 %v11871_v16, %v5169_v44  ;;  %v5041_v2 = vmul.f32 0.0078125, %v5018_v39 }
 0x6e5   :  { %5288 = vadd.xlane.f32.xlu0 %v11907_v58  ;;  %v5253_v0 = vmax.f32 %v5215_v18, 0.0  ;;  %v5349_v52 = vmul.f32 %v11963_v4, %v11963_v4  ;;  %v12009_v62 = vmul.f32 %v5255_v32, %v5236_v42  ;;  %v5115_v44 = vsub.f32 %v11797_v46, %v11960_v9  ;;  %v5239_v46 = vld [vmem:[%s12358_s2 + $0x50] sm:$0xff] }
 0x6e6   :  { %v5059_v13 = vmul.f32 %v11975_v34, %v11975_v34  ;;  %v5134_v41 = vadd.f32 1e-05, %v5096_v17  ;;  %v5219_v3 = vadd.f32 %v11883_v1, %v5194_v59 }
 0x6e7   :  { %5364 = vadd.xlane.f32.xlu1 %v5345_v57  ;;  %v5235_v57 = vld [vmem:[%s12358_s2 + $0x30] sm:$0xff]  ;;  %v11984_v22 = vmul.f32 %v5253_v0, %v5234_v24  ;;  %v4942_v50 = vpop.xlane.xlu0 %4941  ;;  %v5237_v24 = vld [vmem:[%s12358_s2 + $0x40] sm:$0xff]  ;;  %v5352_v45 = vmul.f32 %v12009_v62, %v12009_v62 }
 0x6e8   :  { %v11990_v61 = vmul.f32 %v5254_v21, %v5235_v57  ;;  %v11993_v14 = vmul.f32 0.0078125, %v4942_v50  ;;  %6673 = vrsqrt.f32 %v5134_v41  ;;  %v5220_v57 = vadd.f32 %v11883_v1, %v5195_v43 }
 0x6e9   :  { %5290 = vadd.xlane.f32.xlu0 %v11928_v60  ;;  %v5350_v23 = vmul.f32 %v11984_v22, %v11984_v22  ;;  %v5257_v19 = vmax.f32 %v5219_v3, 0.0 }
 0x6ea   :  { %v5060_v54 = vmul.f32 %v11993_v14, %v11993_v14  ;;  %v5351_v18 = vmul.f32 %v11990_v61, %v11990_v61 }
 0x6eb   :  { %5366 = vadd.xlane.f32.xlu1 %v5346_v56  ;;  %v5078_v56 = vsub.f32 %v5040_v33, %v5059_v13  ;;  %v4944_v49 = vpop.xlane.xlu0 %4943  ;;  %v5020_v38 = vpop.xlane.xlu1 %5019  ;;  %v5258_v33 = vmax.f32 %v5220_v57, 0.0  ;;  %v12035_v41 = vmul.f32 %v5257_v19, %v5238_v31  ;;  %v5608_v19 = vld [vmem:[#allocation7 + $0x20] sm:$0xff] }
 0x6ec   :  { %v12011_v27 = vmul.f32 0.0078125, %v4944_v49  ;;  %v5079_v51 = vsub.f32 %v5041_v2, %v5060_v54  ;;  %v5042_v26 = vmul.f32 0.0078125, %v5020_v38 }
 0x6ed   :  { %5292 = vadd.xlane.f32.xlu0 %v11940_v25  ;;  %v5097_v6 = vmax.f32 %v5078_v56, 0.0  ;;  %v5116_v56 = vsub.f32 %v11803_v55, %v11975_v34  ;;  %v12045_v42 = vmul.f32 %v5258_v33, %v5239_v46  ;;  %v5354_v59 = vmul.f32 %v12035_v41, %v12035_v41 }
 0x6ee   :  { %v5061_v0 = vmul.f32 %v12011_v27, %v12011_v27  ;;  %v5098_v8 = vmax.f32 %v5079_v51, 0.0  ;;  %v5117_v34 = vsub.f32 %v11809_v53, %v11993_v14  ;;  %v5241_v53 = vld [vmem:[%s12358_s2 + $0x60] sm:$0xff] }
 0x6ef   :  { %5368 = vadd.xlane.f32.xlu1 %v5347_v48  ;;  %v6672_v48 = vpop.eup %6671  ;;  %v5135_v47 = vadd.f32 1e-05, %v5097_v6 }
 0x6f0   :  { %v5171_v63 = vmul.f32 %v6672_v48, %v5114_v11  ;;  %v5080_v29 = vsub.f32 %v5042_v26, %v5061_v0  ;;  %v5136_v21 = vadd.f32 1e-05, %v5098_v8  ;;  %v5355_v48 = vmul.f32 %v12045_v42, %v12045_v42  ;;  %v5605_v26 = vld [vmem:[#allocation7 + $0x8] sm:$0xff]  ;;  %v5604_v8 = vld [vmem:[#allocation7] sm:$0xff] }
 0x6f1   :  { %5294 = vadd.xlane.f32.xlu0 %v11950_v5  ;;  %6675 = vrsqrt.f32 %v5135_v47  ;;  %v5118_v47 = vsub.f32 %v11815_v40, %v12011_v27  ;;  %v5242_v40 = vld [vmem:[%s12358_s2 + $0x68] sm:$0xff] }
 0x6f2   :  { %v5099_v15 = vmax.f32 %v5080_v29, 0.0  ;;  %v5196_v36 = vmul.f32 %v11871_v16, %v5171_v63  ;;  %6677 = vrsqrt.f32 %v5136_v21  ;;  %v6674_v17 = vpop.eup %6673  ;;  %v5607_v63 = vld [vmem:[#allocation7 + $0x18] sm:$0xff]  ;;  %v5606_v29 = vld [vmem:[#allocation7 + $0x10] sm:$0xff]  ;;  %v5609_v21 = vld [vmem:[#allocation7 + $0x28] sm:$0xff] }
 0x6f3   :  { %5370 = vadd.xlane.f32.xlu1 %v5348_v30  ;;  %v5256_v30 = vmax.f32 %v5218_v28, 0.0  ;;  %v5172_v7 = vmul.f32 %v6674_v17, %v5115_v44  ;;  %v6241_v57 = vpack.c.bf16 %v5606_v29, %v5604_v8  ;;  %v5613_v44 = vld [vmem:[#allocation7 + $0x48] sm:$0xff]  ;;  %v5627_v29 = vld [vmem:[#allocation7 + $0xb8] sm:$0xff] }
 0x6f4   :  { %v5137_v13 = vadd.f32 1e-05, %v5099_v15  ;;  %v5221_v9 = vadd.f32 %v11883_v1, %v5196_v36  ;;  %v5610_v36 = vld [vmem:[#allocation7 + $0x30] sm:$0xff] }
 0x6f5   :  { %5296 = vadd.xlane.f32.xlu0 %v11963_v4  ;;  %v5197_v32 = vmul.f32 %v11871_v16, %v5172_v7  ;;  %v5615_v7 = vld [vmem:[#allocation7 + $0x58] sm:$0xff]  ;;  %v6245_v46 = vpack.c.bf16 %v5610_v36, %v5608_v19  ;;  %v5626_v19 = vld [vmem:[#allocation7 + $0xb0] sm:$0xff]  ;;  %v5629_v36 = vld [vmem:[#allocation7 + $0xc8] sm:$0xff] }
 0x6f6   :  { %6679 = vrsqrt.f32 %v5137_v13  ;;  %v5259_v12 = vmax.f32 %v5221_v9, 0.0 }
 0x6f7   :  { %5372 = vadd.xlane.f32.xlu1 %v5349_v52  ;;  %v12024_v52 = vmul.f32 %v5256_v30, %v5237_v24  ;;  %v5222_v6 = vadd.f32 %v11883_v1, %v5197_v32  ;;  %v6239_v24 = vpack.c.bf16 %v5607_v63, %v5605_v26  ;;  %v5612_v32 = vld [vmem:[#allocation7 + $0x40] sm:$0xff]  ;;  %v5622_v63 = vld [vmem:[#allocation7 + $0x90] sm:$0xff] }
 0x6f8   :  { %v5620_v26 = vld [vmem:[#allocation7 + $0x80] sm:$0xff] }
 0x6f9   :  { %5298 = vadd.xlane.f32.xlu0 %v11984_v22  ;;  %v5353_v50 = vmul.f32 %v12024_v52, %v12024_v52  ;;  %6240 = vmatprep.subr.bf16.mxu1 %v6239_v24  ;;  %v5625_v24 = vld [vmem:[#allocation7 + $0xa8] sm:$0xff] }
 0x6fa   :  { %6242 = vmatpush1.bf16.msra.mxu1 %v6241_v57  ;;  %v6259_v57 = vpack.c.bf16 %v5627_v29, %v5625_v24 }
 0x6fb   :  { %5374 = vadd.xlane.f32.xlu1 %v5350_v23  ;;  %v6676_v39 = vpop.eup %6675  ;;  %v5240_v23 = vld [vmem:[%s12358_s2 + $0x58] sm:$0xff] }
 0x6fc   :  { %v5173_v28 = vmul.f32 %v6676_v39, %v5116_v56  ;;  %v6678_v54 = vpop.eup %6677  ;;  %v12059_v2 = vmul.f32 %v5259_v12, %v5240_v23  ;;  %v6247_v56 = vpack.c.bf16 %v5615_v7, %v5613_v44  ;;  %v5614_v39 = vld [vmem:[#allocation7 + $0x50] sm:$0xff]  ;;  %v5619_v12 = vld [vmem:[#allocation7 + $0x78] sm:$0xff] }
 0x6fd   :  { %5300 = vadd.xlane.f32.xlu0 %v11990_v61  ;;  %v5174_v11 = vmul.f32 %v6678_v54, %v5117_v34  ;;  %v5631_v44 = vld [vmem:[#allocation7 + $0xd8] sm:$0xff]  ;;  %v5630_v7 = vld [vmem:[#allocation7 + $0xd0] sm:$0xff] }
 0x6fe   :  { %v5198_v55 = vmul.f32 %v11871_v16, %v5173_v28  ;;  %v5356_v30 = vmul.f32 %v12059_v2, %v12059_v2 }
 0x6ff   :  { %5376 = vadd.xlane.f32.xlu1 %v5351_v18  ;;  %v5260_v18 = vmax.f32 %v5222_v6, 0.0  ;;  %v5199_v51 = vmul.f32 %v11871_v16, %v5174_v11 }
 0x700   :  { %v5223_v49 = vadd.f32 %v11883_v1, %v5198_v55  ;;  %v6680_v14 = vpop.eup %6679 }
 0x701   :  { %5302 = vadd.xlane.f32.xlu0 %v12009_v62  ;;  %v5175_v38 = vmul.f32 %v6680_v14, %v5118_v47  ;;  %v12071_v3 = vmul.f32 %v5260_v18, %v5241_v53  ;;  %v5224_v43 = vadd.f32 %v11883_v1, %v5199_v51  ;;  %v5244_v18 = vld [vmem:[%s12358_s2 + $0x78] sm:$0xff]  ;;  %v5618_v53 = vld [vmem:[#allocation7 + $0x70] sm:$0xff]  ;;  %v5621_v51 = vld [vmem:[#allocation7 + $0x88] sm:$0xff] }
 0x702   :  { %v5261_v27 = vmax.f32 %v5223_v49, 0.0  ;;  %v6249_v49 = vpack.c.bf16 %v5614_v39, %v5612_v32  ;;  %v5616_v47 = vld [vmem:[#allocation7 + $0x60] sm:$0xff] }
 0x703   :  { %5378 = vadd.xlane.f32.xlu1 %v5352_v45  ;;  %v5200_v0 = vmul.f32 %v11871_v16, %v5175_v38  ;;  %v5611_v45 = vld [vmem:[#allocation7 + $0x38] sm:$0xff]  ;;  %v5357_v31 = vmul.f32 %v12071_v3, %v12071_v3  ;;  %v5262_v13 = vmax.f32 %v5224_v43, 0.0  ;;  %v6253_v43 = vpack.c.bf16 %v5618_v53, %v5616_v47  ;;  %v5632_v39 = vld [vmem:[#allocation7 + $0xe0] sm:$0xff] }
 0x704   :  { %v6243_v15 = vpack.c.bf16 %v5611_v45, %v5609_v21  ;;  %v12081_v17 = vmul.f32 %v5261_v27, %v5242_v40  ;;  %v5623_v38 = vld [vmem:[#allocation7 + $0x98] sm:$0xff]  ;;  %v6257_v45 = vpack.c.bf16 %v5622_v63, %v5620_v26 }
 0x705   :  { %5304 = vadd.xlane.f32.xlu0 %v12024_v52  ;;  %v5225_v33 = vadd.f32 %v11883_v1, %v5200_v0  ;;  %v6255_v0 = vpack.c.bf16 %v5623_v38, %v5621_v51 }
 0x706   :  { %6244 = vmatprep.subr.bf16.mxu1 %v6243_v15  ;;  %v5358_v23 = vmul.f32 %v12081_v17, %v12081_v17  ;;  %v5624_v15 = vld [vmem:[#allocation7 + $0xa0] sm:$0xff] }
 0x707   :  { %5380 = vadd.xlane.f32.xlu1 %v5353_v50  ;;  %v5243_v50 = vld [vmem:[%s12358_s2 + $0x70] sm:$0xff]  ;;  %v5263_v34 = vmax.f32 %v5225_v33, 0.0  ;;  %6246 = vmatpush1.bf16.msra.mxu1 %v6245_v46  ;;  %v5628_v33 = vld [vmem:[#allocation7 + $0xc0] sm:$0xff] }
 0x708   :  { %v12092_v55 = vmul.f32 %v5262_v13, %v5243_v50  ;;  %6248 = vmatprep.subr.bf16.mxu1 %v6247_v56  ;;  %v6263_v13 = vpack.c.bf16 %v5631_v44, %v5629_v36  ;;  %v5633_v50 = vld [vmem:[#allocation7 + $0xe8] sm:$0xff]  ;;  %v5635_v46 = vld [vmem:[#allocation7 + $0xf8] sm:$0xff] }
 0x709   :  { %5306 = vadd.xlane.f32.xlu0 %v12035_v41  ;;  %v12102_v40 = vmul.f32 %v5263_v34, %v5244_v18  ;;  %v6267_v32 = vpack.c.bf16 %v5635_v46, %v5633_v50 }
 0x70b   :  { %5382 = vadd.xlane.f32.xlu1 %v5354_v59  ;;  %v5617_v59 = vld [vmem:[#allocation7 + $0x68] sm:$0xff]  ;;  %6250 = vmatpush1.bf16.msra.mxu1 %v6249_v49  ;;  %v5360_v21 = vmul.f32 %v12102_v40, %v12102_v40 }
 0x70c   :  { %v6251_v11 = vpack.c.bf16 %v5619_v12, %v5617_v59  ;;  %v5634_v59 = vld [vmem:[#allocation7 + $0xf0] sm:$0xff] }
 0x70d   :  { %5308 = vadd.xlane.f32.xlu0 %v12045_v42 }
 0x70e   :  { %6252 = vmatprep.subr.bf16.mxu1 %v6251_v11 }
 0x70f   :  { %5384 = vadd.xlane.f32.xlu1 %v5355_v48  ;;  %6254 = vmatpush1.bf16.msra.mxu1 %v6253_v43 }
 0x710   :  { %6256 = vmatprep.subr.bf16.mxu1 %v6255_v0 }
 0x711   :  { %5310 = vadd.xlane.f32.xlu0 %v12059_v2 }
 0x713   :  { %5386 = vadd.xlane.f32.xlu1 %v5356_v30  ;;  %v5359_v30 = vmul.f32 %v12092_v55, %v12092_v55  ;;  %6258 = vmatpush1.bf16.msra.mxu1 %v6257_v45 }
 0x714   :  { %6260 = vmatprep.subr.bf16.mxu1 %v6259_v57 }
 0x715   :  { %5312 = vadd.xlane.f32.xlu0 %v12071_v3 }
 0x716   :  { %v4946_v9 = vpop.xlane.xlu0 %4945 }
 0x717   :  { %v12088_v28 = vmul.f32 0.0078125, %v4946_v9  ;;  %5388 = vadd.xlane.f32.xlu1 %v5357_v31  ;;  %v6261_v31 = vpack.c.bf16 %v5626_v19, %v5624_v15  ;;  %v6265_v9 = vpack.c.bf16 %v5630_v7, %v5628_v33 }
 0x718   :  { %v5022_v6 = vpop.xlane.xlu1 %5021 }
 0x719   :  { %v5062_v54 = vmul.f32 %v12088_v28, %v12088_v28  ;;  %v5043_v48 = vmul.f32 0.0078125, %v5022_v6  ;;  %5314 = vadd.xlane.f32.xlu0 %v12081_v17  ;;  %6262 = vmatpush1.bf16.msra.mxu1 %v6261_v31  ;;  %v5119_v56 = vsub.f32 %v11821_v10, %v12088_v28 }
 0x71a   :  { %6264 = vmatprep.subr.bf16.mxu1 %v6263_v13 }
 0x71b   :  { %v5081_v14 = vsub.f32 %v5043_v48, %v5062_v54  ;;  %5390 = vadd.xlane.f32.xlu1 %v5358_v23  ;;  %v6269_v23 = vpack.c.bf16 %v5634_v59, %v5632_v39  ;;  %v5245_v48 = vld [vmem:[%s12358_s2 + $0x80] sm:$0xff] }
 0x71d   :  { %v5100_v27 = vmax.f32 %v5081_v14, 0.0  ;;  %5316 = vadd.xlane.f32.xlu0 %v12092_v55  ;;  %6266 = vmatpush1.bf16.msra.mxu1 %v6265_v9 }
 0x71e   :  { %6268 = vmatprep.subr.bf16.mxu1 %v6267_v32 }
 0x71f   :  { %v5138_v8 = vadd.f32 1e-05, %v5100_v27  ;;  %5392 = vadd.xlane.f32.xlu1 %v5359_v30 }
 0x721   :  { %6681 = vrsqrt.f32 %v5138_v8  ;;  %5318 = vadd.xlane.f32.xlu0 %v12102_v40  ;;  %6270 = vmatpush1.bf16.msra.mxu1 %v6269_v23  ;;  %v5246_v8 = vld [vmem:[%s12358_s2 + $0x88] sm:$0xff] }
 0x723   :  { %5394 = vadd.xlane.f32.xlu1 %v5360_v21 }
 0x72b   :  { %v6682_v12 = vpop.eup %6681 }
 0x72c   :  { %v5176_v6 = vmul.f32 %v6682_v12, %v5119_v56 }
 0x72e   :  { %v5201_v34 = vmul.f32 %v11871_v16, %v5176_v6 }
 0x730   :  { %v5226_v54 = vadd.f32 %v11883_v1, %v5201_v34 }
 0x732   :  { %v5264_v18 = vmax.f32 %v5226_v54, 0.0 }
 0x734   :  { %v12115_v10 = vmul.f32 %v5264_v18, %v5245_v48 }
 0x736   :  { %5320 = vadd.xlane.f32.xlu0 %v12115_v10  ;;  %v5361_v28 = vmul.f32 %v12115_v10, %v12115_v10 }
 0x738   :  { %5396 = vadd.xlane.f32.xlu1 %v5361_v28 }
 0x743   :  { %v4948_v49 = vpop.xlane.xlu0 %4947 }
 0x744   :  { %v4968_v11 = vmul.f32 0.0078125, %v4948_v49 }
 0x745   :  { %v5024_v47 = vpop.xlane.xlu1 %5023 }
 0x746   :  { %v5063_v53 = vmul.f32 %v4968_v11, %v4968_v11  ;;  %v5044_v14 = vmul.f32 0.0078125, %v5024_v47  ;;  %v5120_v27 = vsub.f32 %v11833_v37, %v4968_v11 }
 0x748   :  { %v5082_v51 = vsub.f32 %v5044_v14, %v5063_v53 }
 0x74a   :  { %v5101_v38 = vmax.f32 %v5082_v51, 0.0 }
 0x74c   :  { %v5139_v30 = vadd.f32 1e-05, %v5101_v38 }
 0x74e   :  { %6683 = vrsqrt.f32 %v5139_v30 }
 0x758   :  { %v6684_v43 = vpop.eup %6683 }
 0x759   :  { %v5177_v0 = vmul.f32 %v6684_v43, %v5120_v27 }
 0x75b   :  { %v5202_v26 = vmul.f32 %v11871_v16, %v5177_v0 }
 0x75d   :  { %v5227_v63 = vadd.f32 %v11883_v1, %v5202_v26 }
 0x75f   :  { %v5265_v24 = vmax.f32 %v5227_v63, 0.0 }
 0x761   :  { %v12126_v29 = vmul.f32 %v5265_v24, %v5246_v8 }
 0x763   :  { %5322 = vadd.xlane.f32.xlu0 %v12126_v29  ;;  %v5362_v21 = vmul.f32 %v12126_v29, %v12126_v29 }
 0x765   :  { %5398 = vadd.xlane.f32.xlu1 %v5362_v21 }
 0x76e   :  { %v4950_v37 = vpop.xlane.xlu0 %4949 }
 0x76f   :  { %v4969_v45 = vmul.f32 0.0078125, %v4950_v37 }
 0x770   :  { %v5026_v57 = vpop.xlane.xlu1 %5025 }
 0x771   :  { %v5064_v15 = vmul.f32 %v4969_v45, %v4969_v45  ;;  %v5045_v19 = vmul.f32 0.0078125, %v5026_v57  ;;  %v5121_v0 = vsub.f32 %v11911_v35, %v4969_v45 }
 0x772   :  { %v5289_v36 = vpop.xlane.xlu0 %5288 }
 0x773   :  { %v5083_v44 = vsub.f32 %v5045_v19, %v5064_v15  ;;  %v5326_v31 = vmul.f32 0.0078125, %v5289_v36 }
 0x774   :  { %v5365_v13 = vpop.xlane.xlu1 %5364 }
 0x775   :  { %v5102_v33 = vmax.f32 %v5083_v44, 0.0  ;;  %v5421_v7 = vmul.f32 %v5326_v31, %v5326_v31  ;;  %v5402_v50 = vmul.f32 0.0078125, %v5365_v13  ;;  %v5478_v44 = vsub.f32 %v11907_v58, %v5326_v31 }
 0x776   :  { %v5291_v46 = vpop.xlane.xlu0 %5290 }
 0x777   :  { %v5140_v9 = vadd.f32 1e-05, %v5102_v33  ;;  %v5440_v56 = vsub.f32 %v5402_v50, %v5421_v7  ;;  %v12131_v32 = vmul.f32 0.0078125, %v5291_v46  ;;  %v12155_v50 = vld [vmem:[%s12367_s11] ss:$0 sm:$0xff] }
 0x778   :  { %v5367_v39 = vpop.xlane.xlu1 %5366 }
 0x779   :  { %6685 = vrsqrt.f32 %v5140_v9  ;;  %v5459_v59 = vmax.f32 %v5440_v56, 0.0  ;;  %v5422_v12 = vmul.f32 %v12131_v32, %v12131_v32  ;;  %v5403_v6 = vmul.f32 0.0078125, %v5367_v39 }
 0x77a   :  { %v5293_v23 = vpop.xlane.xlu0 %5292 }
 0x77b   :  { %v5497_v34 = vadd.f32 1e-05, %v5459_v59  ;;  %v12135_v54 = vmul.f32 0.0078125, %v5293_v23  ;;  %v5441_v48 = vsub.f32 %v5403_v6, %v5422_v12  ;;  %v12166_v59 = vld [vmem:[%s12368_s12] ss:$0 sm:$0xff]  ;;  %s6836_s12 = smov [#allocation8]  }
 0x77c   :  { %v5369_v18 = vpop.xlane.xlu1 %5368 }
 0x77d   :  { %6687 = vrsqrt.f32 %v5497_v34  ;;  %v5423_v28 = vmul.f32 %v12135_v54, %v12135_v54  ;;  %v5404_v49 = vmul.f32 0.0078125, %v5369_v18  ;;  %v5460_v11 = vmax.f32 %v5441_v48, 0.0 }
 0x77e   :  { %v5295_v47 = vpop.xlane.xlu0 %5294 }
 0x77f   :  { %v5442_v53 = vsub.f32 %v5404_v49, %v5423_v28  ;;  %v12139_v14 = vmul.f32 0.0078125, %v5295_v47  ;;  %v5498_v51 = vadd.f32 1e-05, %v5460_v11  ;;  %v5479_v49 = vsub.f32 %v11928_v60, %v12131_v32 }
 0x780   :  { %v5371_v38 = vpop.xlane.xlu1 %5370 }
 0x781   :  { %v5461_v30 = vmax.f32 %v5442_v53, 0.0  ;;  %v5424_v27 = vmul.f32 %v12139_v14, %v12139_v14  ;;  %v5405_v43 = vmul.f32 0.0078125, %v5371_v38  ;;  %6689 = vrsqrt.f32 %v5498_v51 }
 0x782   :  { %v5297_v26 = vpop.xlane.xlu0 %5296 }
 0x783   :  { %v6686_v63 = vpop.eup %6685  ;;  %v5499_v8 = vadd.f32 1e-05, %v5461_v30  ;;  %v5443_v24 = vsub.f32 %v5405_v43, %v5424_v27  ;;  %v12144_v21 = vmul.f32 0.0078125, %v5297_v26  ;;  %v5480_v43 = vsub.f32 %v11940_v25, %v12135_v54 }
 0x784   :  { %v5178_v37 = vmul.f32 %v6686_v63, %v5121_v0  ;;  %v5373_v57 = vpop.xlane.xlu1 %5372  ;;  %v5481_v54 = vsub.f32 %v11950_v5, %v12139_v14 }
 0x785   :  { %6691 = vrsqrt.f32 %v5499_v8  ;;  %v5462_v15 = vmax.f32 %v5443_v24, 0.0  ;;  %v5425_v19 = vmul.f32 %v12144_v21, %v12144_v21  ;;  %v5406_v13 = vmul.f32 0.0078125, %v5373_v57 }
 0x786   :  { %v5203_v36 = vmul.f32 %v11871_v16, %v5178_v37  ;;  %v5299_v35 = vpop.xlane.xlu0 %5298  ;;  %v5247_v16 = vld [vmem:[%s12358_s2 + $0x90] sm:$0xff] }
 0x787   :  { %v6688_v45 = vpop.eup %6687  ;;  %v5500_v33 = vadd.f32 1e-05, %v5462_v15  ;;  %v12150_v7 = vmul.f32 0.0078125, %v5299_v35  ;;  %v5444_v56 = vsub.f32 %v5406_v13, %v5425_v19 }
 0x788   :  { %v5228_v46 = vadd.f32 %v11883_v1, %v5203_v36  ;;  %v5535_v9 = vmul.f32 %v6688_v45, %v5478_v44  ;;  %v5375_v39 = vpop.xlane.xlu1 %5374 }
 0x789   :  { %6693 = vrsqrt.f32 %v5500_v33  ;;  %v5426_v58 = vmul.f32 %v12150_v7, %v12150_v7  ;;  %v5407_v31 = vmul.f32 0.0078125, %v5375_v39  ;;  %v5463_v6 = vmax.f32 %v5444_v56, 0.0 }
 0x78a   :  { %v5266_v12 = vmax.f32 %v5228_v46, 0.0  ;;  %v5301_v1 = vpop.xlane.xlu0 %5300  ;;  %v5560_v23 = vmul.f32 %v12155_v50, %v5535_v9 }
 0x78b   :  { %v5445_v34 = vsub.f32 %v5407_v31, %v5426_v58  ;;  %v12169_v48 = vmul.f32 0.0078125, %v5301_v1  ;;  %v6690_v18 = vpop.eup %6689  ;;  %v5501_v11 = vadd.f32 1e-05, %v5463_v6 }
 0x78c   :  { %v12171_v28 = vmul.f32 %v5266_v12, %v5247_v16  ;;  %v5377_v47 = vpop.xlane.xlu1 %5376  ;;  %v5585_v53 = vadd.f32 %v12166_v59, %v5560_v23  ;;  %v5536_v32 = vmul.f32 %v6690_v18, %v5479_v49  ;;  %v5482_v23 = vsub.f32 %v11963_v4, %v12144_v21 }
 0x78d   :  { %v5464_v51 = vmax.f32 %v5445_v34, 0.0  ;;  %v5427_v38 = vmul.f32 %v12169_v48, %v12169_v48  ;;  %v5408_v30 = vmul.f32 0.0078125, %v5377_v47  ;;  %6695 = vrsqrt.f32 %v5501_v11 }
 0x78e   :  { %5324 = vadd.xlane.f32.xlu0 %v12171_v28  ;;  %v5363_v27 = vmul.f32 %v12171_v28, %v12171_v28  ;;  %5713 = vmatmul.mubr.f32.vlgmr.msra.gmra.mrb[28].mxu1 %v5585_v53  ;;  %v5303_v60 = vpop.xlane.xlu0 %5302  ;;  %v5561_v37 = vmul.f32 %v12155_v50, %v5536_v32 }
 0x78f   :  { %v6692_v0 = vpop.eup %6691  ;;  %v5502_v26 = vadd.f32 1e-05, %v5464_v51  ;;  %v5446_v63 = vsub.f32 %v5408_v30, %v5427_v38  ;;  %v12183_v8 = vmul.f32 0.0078125, %v5303_v60  ;;  %5718 = vmatprep.mubr.f32.mxu1 %v6835_v20  ;;  %v5483_v51 = vsub.f32 %v11984_v22, %v12150_v7 }
 0x790   :  { %5400 = vadd.xlane.f32.xlu1 %v5363_v27  ;;  %v5379_v24 = vpop.xlane.xlu1 %5378  ;;  %v5537_v57 = vmul.f32 %v6692_v0, %v5480_v43  ;;  %v5586_v36 = vadd.f32 %v12166_v59, %v5561_v37  ;;  %v5484_v22 = vsub.f32 %v11990_v61, %v12169_v48 }
 0x791   :  { %6697 = vrsqrt.f32 %v5502_v26  ;;  %v5465_v15 = vmax.f32 %v5446_v63, 0.0  ;;  %v5428_v25 = vmul.f32 %v12183_v8, %v12183_v8  ;;  %v5409_v19 = vmul.f32 0.0078125, %v5379_v24 }
 0x792   :  { %v5305_v44 = vpop.xlane.xlu0 %5304  ;;  %v5562_v13 = vmul.f32 %v12155_v50, %v5537_v57  ;;  %5719 = vmatmul.mubr.f32.gmra.mrb[30].mxu1 %v5586_v36 }
 0x793   :  { %v6694_v35 = vpop.eup %6693  ;;  %v5503_v45 = vadd.f32 1e-05, %v5465_v15  ;;  %v12193_v33 = vmul.f32 0.0078125, %v5305_v44  ;;  %v5447_v46 = vsub.f32 %v5409_v19, %v5428_v25  ;;  %5724 = vmatprep.mubr.f32.mxu1 %v6835_v20 }
 0x794   :  { %v5381_v9 = vpop.xlane.xlu1 %5380  ;;  %v5587_v56 = vadd.f32 %v12166_v59, %v5562_v13  ;;  %v5538_v39 = vmul.f32 %v6694_v35, %v5481_v54 }
 0x795   :  { %6699 = vrsqrt.f32 %v5503_v45  ;;  %v5429_v5 = vmul.f32 %v12193_v33, %v12193_v33  ;;  %v5410_v14 = vmul.f32 0.0078125, %v5381_v9  ;;  %v5466_v16 = vmax.f32 %v5447_v46, 0.0 }
 0x796   :  { %v5307_v58 = vpop.xlane.xlu0 %5306  ;;  %v5563_v31 = vmul.f32 %v12155_v50, %v5538_v39  ;;  %5725 = vmatmul.mubr.f32.gmra.mrb[32].mxu1 %v5587_v56 }
 0x797   :  { %v5448_v12 = vsub.f32 %v5410_v14, %v5429_v5  ;;  %v12200_v6 = vmul.f32 0.0078125, %v5307_v58  ;;  %v6696_v1 = vpop.eup %6695  ;;  %v5504_v34 = vadd.f32 1e-05, %v5466_v16  ;;  %5730 = vmatprep.mubr.f32.mxu1 %v6835_v20  ;;  %v5485_v5 = vsub.f32 %v12009_v62, %v12183_v8 }
 0x798   :  { %v5383_v18 = vpop.xlane.xlu1 %5382  ;;  %v5588_v49 = vadd.f32 %v12166_v59, %v5563_v31  ;;  %v5539_v30 = vmul.f32 %v6696_v1, %v5482_v23  ;;  %v5486_v23 = vsub.f32 %v12024_v52, %v12193_v33 }
 0x799   :  { %v5467_v11 = vmax.f32 %v5448_v12, 0.0  ;;  %v5430_v47 = vmul.f32 %v12200_v6, %v12200_v6  ;;  %v5411_v53 = vmul.f32 0.0078125, %v5383_v18  ;;  %6701 = vrsqrt.f32 %v5504_v34 }
 0x79a   :  { %v5309_v38 = vpop.xlane.xlu0 %5308  ;;  %5731 = vmatmul.mubr.f32.gmra.mrb[34].mxu1 %v5588_v49  ;;  %v5564_v32 = vmul.f32 %v12155_v50, %v5539_v30  ;;  %v5487_v52 = vsub.f32 %v12035_v41, %v12200_v6 }
 0x79b   :  { %v6698_v27 = vpop.eup %6697  ;;  %v5505_v4 = vadd.f32 1e-05, %v5467_v11  ;;  %v5449_v21 = vsub.f32 %v5411_v53, %v5430_v47  ;;  %v12210_v43 = vmul.f32 0.0078125, %v5309_v38  ;;  %5736 = vmatprep.mubr.f32.mxu1 %v6835_v20 }
 0x79c   :  { %v5385_v60 = vpop.xlane.xlu1 %5384  ;;  %v5540_v0 = vmul.f32 %v6698_v27, %v5483_v51  ;;  %v5589_v24 = vadd.f32 %v12166_v59, %v5564_v32 }
 0x79d   :  { %6703 = vrsqrt.f32 %v5505_v4  ;;  %v5468_v26 = vmax.f32 %v5449_v21, 0.0  ;;  %v5431_v63 = vmul.f32 %v12210_v43, %v12210_v43  ;;  %v5412_v7 = vmul.f32 0.0078125, %v5385_v60 }
 0x79e   :  { %v5311_v37 = vpop.xlane.xlu0 %5310  ;;  %v5565_v57 = vmul.f32 %v12155_v50, %v5540_v0  ;;  %5737 = vmatmul.mubr.f32.gmra.mrb[36].mxu1 %v5589_v24 }
 0x79f   :  { %v6700_v15 = vpop.eup %6699  ;;  %v5506_v25 = vadd.f32 1e-05, %v5468_v26  ;;  %v12220_v54 = vmul.f32 0.0078125, %v5311_v37  ;;  %v5450_v19 = vsub.f32 %v5412_v7, %v5431_v63  ;;  %5742 = vmatprep.mubr.f32.mxu1 %v6835_v20 }
 0x7a0   :  { %v5387_v36 = vpop.xlane.xlu1 %5386  ;;  %v5590_v44 = vadd.f32 %v12166_v59, %v5565_v57  ;;  %v5541_v13 = vmul.f32 %v6700_v15, %v5484_v22 }
 0x7a1   :  { %6705 = vrsqrt.f32 %v5506_v25  ;;  %v5432_v61 = vmul.f32 %v12220_v54, %v12220_v54  ;;  %v5413_v48 = vmul.f32 0.0078125, %v5387_v36  ;;  %v5469_v35 = vmax.f32 %v5450_v19, 0.0 }
 0x7a2   :  { %v5313_v45 = vpop.xlane.xlu0 %5312  ;;  %v5566_v46 = vmul.f32 %v12155_v50, %v5541_v13  ;;  %5743 = vmatmul.mubr.f32.gmra.mrb[38].mxu1 %v5590_v44  ;;  %v5488_v36 = vsub.f32 %v12045_v42, %v12210_v43 }
 0x7a3   :  { %v5451_v9 = vsub.f32 %v5413_v48, %v5432_v61  ;;  %v12227_v56 = vmul.f32 0.0078125, %v5313_v45  ;;  %v6702_v39 = vpop.eup %6701  ;;  %v5507_v14 = vadd.f32 1e-05, %v5469_v35  ;;  %5748 = vmatprep.mubr.f32.mxu1 %v6835_v20 }
 0x7a4   :  { %v5389_v16 = vpop.xlane.xlu1 %5388  ;;  %v5591_v58 = vadd.f32 %v12166_v59, %v5566_v46  ;;  %v5542_v18 = vmul.f32 %v6702_v39, %v5485_v5  ;;  %v5489_v46 = vsub.f32 %v12059_v2, %v12220_v54 }
 0x7a5   :  { %v5470_v31 = vmax.f32 %v5451_v9, 0.0  ;;  %v5433_v12 = vmul.f32 %v12227_v56, %v12227_v56  ;;  %v5414_v1 = vmul.f32 0.0078125, %v5389_v16  ;;  %6707 = vrsqrt.f32 %v5507_v14 }
 0x7a6   :  { %v5315_v34 = vpop.xlane.xlu0 %5314  ;;  %5749 = vmatmul.mubr.f32.gmra.mrb[40].mxu1 %v5591_v58  ;;  %v5567_v53 = vmul.f32 %v12155_v50, %v5542_v18  ;;  %v5490_v58 = vsub.f32 %v12071_v3, %v12227_v56 }
 0x7a7   :  { %v6704_v49 = vpop.eup %6703  ;;  %v5508_v62 = vadd.f32 1e-05, %v5470_v31  ;;  %v5452_v8 = vsub.f32 %v5414_v1, %v5433_v12  ;;  %v12237_v11 = vmul.f32 0.0078125, %v5315_v34  ;;  %5754 = vmatprep.mubr.f32.mxu1 %v6835_v20 }
 0x7a8   :  { %v5391_v47 = vpop.xlane.xlu1 %5390  ;;  %v5543_v51 = vmul.f32 %v6704_v49, %v5486_v23  ;;  %v5592_v27 = vadd.f32 %v12166_v59, %v5567_v53 }
 0x7a9   :  { %6709 = vrsqrt.f32 %v5508_v62  ;;  %v5471_v38 = vmax.f32 %v5452_v8, 0.0  ;;  %v5434_v30 = vmul.f32 %v12237_v11, %v12237_v11  ;;  %v5415_v33 = vmul.f32 0.0078125, %v5391_v47 }
 0x7aa   :  { %v5317_v4 = vpop.xlane.xlu0 %5316  ;;  %v5568_v21 = vmul.f32 %v12155_v50, %v5543_v51  ;;  %5755 = vmatmul.mubr.f32.gmra.mrb[42].mxu1 %v5592_v27  ;;  %v5491_v18 = vsub.f32 %v12081_v17, %v12237_v11 }
 0x7ab   :  { %v6706_v60 = vpop.eup %6705  ;;  %v5509_v32 = vadd.f32 1e-05, %v5471_v38  ;;  %v5340_v0 = vmul.f32 0.0078125, %v5317_v4  ;;  %v5453_v26 = vsub.f32 %v5415_v33, %v5434_v30  ;;  %5760 = vmatprep.mubr.f32.mxu1 %v6835_v20 }
 0x7ac   :  { %v5393_v63 = vpop.xlane.xlu1 %5392  ;;  %v5593_v22 = vadd.f32 %v12166_v59, %v5568_v21  ;;  %v5544_v7 = vmul.f32 %v6706_v60, %v5487_v52 }
 0x7ad   :  { %6711 = vrsqrt.f32 %v5509_v32  ;;  %v5435_v24 = vmul.f32 %v5340_v0, %v5340_v0  ;;  %v5416_v37 = vmul.f32 0.0078125, %v5393_v63  ;;  %v5472_v41 = vmax.f32 %v5453_v26, 0.0 }
 0x7ae   :  { %v5319_v6 = vpop.xlane.xlu0 %5318  ;;  %v5569_v57 = vmul.f32 %v12155_v50, %v5544_v7  ;;  %5761 = vmatmul.mubr.f32.gmra.mrb[44].mxu1 %v5593_v22  ;;  %v5492_v62 = vsub.f32 %v12092_v55, %v5340_v0 }
 0x7af   :  { %v5454_v15 = vsub.f32 %v5416_v37, %v5435_v24  ;;  %v5341_v25 = vmul.f32 0.0078125, %v5319_v6  ;;  %v6708_v19 = vpop.eup %6707  ;;  %v5510_v44 = vadd.f32 1e-05, %v5472_v41  ;;  %5766 = vmatprep.mubr.f32.mxu1 %v6835_v20 }
 0x7b0   :  { %v5395_v13 = vpop.xlane.xlu1 %5394  ;;  %v5594_v61 = vadd.f32 %v12166_v59, %v5569_v57  ;;  %v5545_v9 = vmul.f32 %v6708_v19, %v5488_v36 }
 0x7b1   :  { %v5473_v48 = vmax.f32 %v5454_v15, 0.0  ;;  %v5436_v35 = vmul.f32 %v5341_v25, %v5341_v25  ;;  %v5417_v45 = vmul.f32 0.0078125, %v5395_v13  ;;  %6713 = vrsqrt.f32 %v5510_v44 }
 0x7b2   :  { %5767 = vmatmul.mubr.f32.gmra.mrb[46].mxu1 %v5594_v61  ;;  %v5570_v42 = vmul.f32 %v12155_v50, %v5545_v9  ;;  %v5493_v17 = vsub.f32 %v12102_v40, %v5341_v25 }
 0x7b3   :  { %v6710_v39 = vpop.eup %6709  ;;  %v5511_v5 = vadd.f32 1e-05, %v5473_v48  ;;  %v5455_v14 = vsub.f32 %v5417_v45, %v5436_v35  ;;  %5772 = vmatprep.mubr.f32.mxu1 %v6835_v20 }
 0x7b4   :  { %v5546_v43 = vmul.f32 %v6710_v39, %v5489_v46  ;;  %v5595_v31 = vadd.f32 %v12166_v59, %v5570_v42 }
 0x7b5   :  { %6715 = vrsqrt.f32 %v5511_v5  ;;  %v5474_v16 = vmax.f32 %v5455_v14, 0.0 }
 0x7b6   :  { %v5571_v2 = vmul.f32 %v12155_v50, %v5546_v43  ;;  %5773 = vmatmul.mubr.f32.gmra.mrb[48].mxu1 %v5595_v31 }
 0x7b7   :  { %v6712_v54 = vpop.eup %6711  ;;  %v5512_v12 = vadd.f32 1e-05, %v5474_v16  ;;  %5778 = vmatprep.mubr.f32.mxu1 %v6835_v20 }
 0x7b8   :  { %v5596_v1 = vadd.f32 %v12166_v59, %v5571_v2  ;;  %v5547_v23 = vmul.f32 %v6712_v54, %v5490_v58  ;;  %v12823_v54 = vld [vmem:[#allocation12_spill] sm:$0xff] }
 0x7b9   :  { %6717 = vrsqrt.f32 %v5512_v12  ;;  %v12824_v12 = vsub.s32 0, %v12823_v54 }
 0x7ba   :  { %v5572_v34 = vmul.f32 %v12155_v50, %v5547_v23  ;;  %5779 = vmatmul.mubr.f32.gmra.mrb[50].mxu1 %v5596_v1  ;;  %v12825_v23 = vsub.s32 1, %v12823_v54 }
 0x7bb   :  { %v6714_v49 = vpop.eup %6713  ;;  %5784 = vmatprep.mubr.f32.mxu1 %v6835_v20 }
 0x7bc   :  { %v5597_v3 = vadd.f32 %v12166_v59, %v5572_v34  ;;  %v5548_v56 = vmul.f32 %v6714_v49, %v5491_v18 }
 0x7be   :  { %v5573_v47 = vmul.f32 %v12155_v50, %v5548_v56  ;;  %5785 = vmatmul.mubr.f32.gmra.mrb[52].mxu1 %v5597_v3 }
 0x7bf   :  { %v6716_v8 = vpop.eup %6715  ;;  %5790 = vmatprep.mubr.f32.mxu1 %v6835_v20 }
 0x7c0   :  { %v5549_v53 = vmul.f32 %v6716_v8, %v5492_v62  ;;  %v5598_v51 = vadd.f32 %v12166_v59, %v5573_v47 }
 0x7c2   :  { %v5574_v38 = vmul.f32 %v12155_v50, %v5549_v53  ;;  %5791 = vmatmul.mubr.f32.gmra.mrb[54].mxu1 %v5598_v51 }
 0x7c3   :  { %v5321_v11 = vpop.xlane.xlu0 %5320  ;;  %v6718_v30 = vpop.eup %6717  ;;  %5796 = vmatprep.mubr.f32.mxu1 %v6835_v20 }
 0x7c4   :  { %v5342_v52 = vmul.f32 0.0078125, %v5321_v11  ;;  %v5599_v55 = vadd.f32 %v12166_v59, %v5574_v38  ;;  %v5550_v27 = vmul.f32 %v6718_v30, %v5493_v17 }
 0x7c5   :  { %v5397_v33 = vpop.xlane.xlu1 %5396 }
 0x7c6   :  { %v5437_v4 = vmul.f32 %v5342_v52, %v5342_v52  ;;  %v5418_v21 = vmul.f32 0.0078125, %v5397_v33  ;;  %v5575_v60 = vmul.f32 %v12155_v50, %v5550_v27  ;;  %5797 = vmatmul.mubr.f32.gmra.mrb[56].mxu1 %v5599_v55  ;;  %v5494_v63 = vsub.f32 %v12115_v10, %v5342_v52 }
 0x7c7   :  { %5802 = vmatprep.mubr.f32.mxu1 %v6835_v20 }
 0x7c8   :  { %v5456_v32 = vsub.f32 %v5418_v21, %v5437_v4  ;;  %v5600_v40 = vadd.f32 %v12166_v59, %v5575_v60 }
 0x7ca   :  { %v5475_v0 = vmax.f32 %v5456_v32, 0.0  ;;  %5803 = vmatmul.mubr.f32.gmra.mrb[58].mxu1 %v5600_v40 }
 0x7cb   :  { %5808 = vmatprep.mubr.f32.mxu1 %v6835_v20 }
 0x7cc   :  { %v5513_v26 = vadd.f32 1e-05, %v5475_v0 }
 0x7ce   :  { %6719 = vrsqrt.f32 %v5513_v26 }
 0x7d8   :  { %v6720_v22 = vpop.eup %6719 }
 0x7d9   :  { %v5551_v7 = vmul.f32 %v6720_v22, %v5494_v63 }
 0x7db   :  { %v5576_v24 = vmul.f32 %v12155_v50, %v5551_v7 }
 0x7dd   :  { %v5601_v37 = vadd.f32 %v12166_v59, %v5576_v24 }
 0x7df   :  { %5809 = vmatmul.mubr.f32.gmra.mrb[60].mxu1 %v5601_v37 }
 0x7e0   :  { %5814 = vmatprep.mubr.f32.mxu1 %v6835_v20 }
 0x7f0   :  { %v5323_v41 = vpop.xlane.xlu0 %5322 }
 0x7f1   :  { %v5343_v6 = vmul.f32 0.0078125, %v5323_v41 }
 0x7f2   :  { %v5399_v57 = vpop.xlane.xlu1 %5398 }
 0x7f3   :  { %v5438_v15 = vmul.f32 %v5343_v6, %v5343_v6  ;;  %v5419_v25 = vmul.f32 0.0078125, %v5399_v57  ;;  %v5495_v10 = vsub.f32 %v12126_v29, %v5343_v6 }
 0x7f5   :  { %v5457_v19 = vsub.f32 %v5419_v25, %v5438_v15 }
 0x7f7   :  { %v5476_v36 = vmax.f32 %v5457_v19, 0.0 }
 0x7f9   :  { %v5514_v44 = vadd.f32 1e-05, %v5476_v36 }
 0x7fb   :  { %6721 = vrsqrt.f32 %v5514_v44 }
 0x805   :  { %v6722_v13 = vpop.eup %6721 }
 0x806   :  { %v5552_v61 = vmul.f32 %v6722_v13, %v5495_v10 }
 0x808   :  { %v5577_v48 = vmul.f32 %v12155_v50, %v5552_v61 }
 0x80a   :  { %v5602_v35 = vadd.f32 %v12166_v59, %v5577_v48 }
 0x80c   :  { %5815 = vmatmul.mubr.f32.gmra.mrb[62].mxu1 %v5602_v35 }
 0x80d   :  { %5820 = vmatprep.mubr.f32.mxu1 %v6835_v20  ;;  %v5636_v20 = vld [vmem:[%s12370_s14] sm:$0x3]  ;;  %s5870_s14 = sshll.u32 %s6836_s12, 4  ;;  %s5871_s14 = int_to_ptr.vmem [resolvable:$true] %s5870_s14 }
 0x80e   :  { %v12297_v1 = vrot.slane %v5636_v20, %v12824_v12  ;;  %v12301_v34 = vrot.slane %v5636_v20, %v12825_v23  ;;  %s6791_s6 = scalar_lea.vmem %s5871_s14, 4864  ;;  %p6796_p11 = scmp.lt.s32.totalorder %s5871_s14, %s5871_s14 }
 0x80f   :  { %p6792_p10 = scmp.ne.s32.totalorder %s5871_s14, %s6791_s6  ;;  %p6797_p12 = scmp.lt.s32.totalorder %s6791_s6, %s6791_s6 }
 0x811   :  { %p6798_p13 = por %p6797_p12, %p6796_p11 }
 0x813   :  { %p6799_p0 = pnand %p6798_p13, %p6792_p10 }
 0x81b   :  { %v5325_v45 = vpop.xlane.xlu0 %5324 }
 0x81c   :  { %v5344_v46 = vmul.f32 0.0078125, %v5325_v45 }
 0x81d   :  { %v5401_v9 = vpop.xlane.xlu1 %5400 }
 0x81e   :  { %v5439_v39 = vmul.f32 %v5344_v46, %v5344_v46  ;;  %v5420_v5 = vmul.f32 0.0078125, %v5401_v9  ;;  %v5496_v29 = vsub.f32 %v12171_v28, %v5344_v46 }
 0x820   :  { %v5458_v14 = vsub.f32 %v5420_v5, %v5439_v39 }
 0x822   :  { %v5477_v42 = vmax.f32 %v5458_v14, 0.0 }
 0x824   :  { %v5515_v43 = vadd.f32 1e-05, %v5477_v42 }
 0x826   :  { %6723 = vrsqrt.f32 %v5515_v43 }
 0x830   :  { %v6724_v16 = vpop.eup %6723 }
 0x831   :  { %v5553_v58 = vmul.f32 %v6724_v16, %v5496_v29 }
 0x833   :  { %v5578_v31 = vmul.f32 %v12155_v50, %v5553_v58 }
 0x835   :  { %v5603_v2 = vadd.f32 %v12166_v59, %v5578_v31 }
 0x837   :  { %5821 = vmatmul.mubr.f32.gmra.mrb[64].mxu1 %v5603_v2 }
 0x861   :  { %v5714_v28 = vpop.f32.mrb[28].mxu1 }
 0x862   :  { %v5715_v18 = vadd.f32 %v5714_v28, %v12297_v1  ;;  %v5716_v49 = vpop.f32.mrb[29].mxu1 }
 0x863   :  { %v5717_v50 = vadd.f32 %v5716_v49, %v12301_v34 }
 0x864   :  { %5827 = vst [vmem:[#allocation8] sm:$0xff] %v5715_v18 }
 0x865   :  { %5828 = vst [vmem:[#allocation8 + $0x8] sm:$0xff] %v5717_v50  ;;  %v5720_v59 = vpop.f32.mrb[30].mxu1 }
 0x866   :  { %v5721_v3 = vadd.f32 %v5720_v59, %v12297_v1  ;;  %v5722_v56 = vpop.f32.mrb[31].mxu1 }
 0x867   :  { %v5723_v62 = vadd.f32 %v5722_v56, %v12301_v34 }
 0x868   :  { %5829 = vst [vmem:[#allocation8 + $0x10] sm:$0xff] %v5721_v3 }
 0x869   :  { %5830 = vst [vmem:[#allocation8 + $0x18] sm:$0xff] %v5723_v62  ;;  %v5726_v8 = vpop.f32.mrb[32].mxu1 }
 0x86a   :  { %v5727_v47 = vadd.f32 %v5726_v8, %v12297_v1  ;;  %v5728_v53 = vpop.f32.mrb[33].mxu1 }
 0x86b   :  { %v5729_v51 = vadd.f32 %v5728_v53, %v12301_v34 }
 0x86c   :  { %5831 = vst [vmem:[#allocation8 + $0x20] sm:$0xff] %v5727_v47 }
 0x86d   :  { %5832 = vst [vmem:[#allocation8 + $0x28] sm:$0xff] %v5729_v51  ;;  %v5732_v17 = vpop.f32.mrb[34].mxu1 }
 0x86e   :  { %v5733_v11 = vadd.f32 %v5732_v17, %v12297_v1  ;;  %v5734_v38 = vpop.f32.mrb[35].mxu1 }
 0x86f   :  { %v5735_v30 = vadd.f32 %v5734_v38, %v12301_v34 }
 0x870   :  { %5833 = vst [vmem:[#allocation8 + $0x30] sm:$0xff] %v5733_v11 }
 0x871   :  { %5834 = vst [vmem:[#allocation8 + $0x38] sm:$0xff] %v5735_v30  ;;  %v5738_v52 = vpop.f32.mrb[36].mxu1 }
 0x872   :  { %v5739_v33 = vadd.f32 %v5738_v52, %v12297_v1  ;;  %v5740_v55 = vpop.f32.mrb[37].mxu1 }
 0x873   :  { %v5741_v27 = vadd.f32 %v5740_v55, %v12301_v34 }
 0x874   :  { %5835 = vst [vmem:[#allocation8 + $0x40] sm:$0xff] %v5739_v33 }
 0x875   :  { %5836 = vst [vmem:[#allocation8 + $0x48] sm:$0xff] %v5741_v27  ;;  %v5744_v4 = vpop.f32.mrb[38].mxu1 }
 0x876   :  { %v5745_v21 = vadd.f32 %v5744_v4, %v12297_v1  ;;  %v5746_v60 = vpop.f32.mrb[39].mxu1 }
 0x877   :  { %v5747_v32 = vadd.f32 %v5746_v60, %v12301_v34 }
 0x878   :  { %5837 = vst [vmem:[#allocation8 + $0x50] sm:$0xff] %v5745_v21 }
 0x879   :  { %5838 = vst [vmem:[#allocation8 + $0x58] sm:$0xff] %v5747_v32  ;;  %v5750_v40 = vpop.f32.mrb[40].mxu1 }
 0x87a   :  { %v5751_v0 = vadd.f32 %v5750_v40, %v12297_v1  ;;  %v5752_v26 = vpop.f32.mrb[41].mxu1 }
 0x87b   :  { %v5753_v63 = vadd.f32 %v5752_v26, %v12301_v34 }
 0x87c   :  { %5839 = vst [vmem:[#allocation8 + $0x60] sm:$0xff] %v5751_v0 }
 0x87d   :  { %5840 = vst [vmem:[#allocation8 + $0x68] sm:$0xff] %v5753_v63  ;;  %v5756_v22 = vpop.f32.mrb[42].mxu1 }
 0x87e   :  { %v5757_v7 = vadd.f32 %v5756_v22, %v12297_v1  ;;  %v5758_v24 = vpop.f32.mrb[43].mxu1 }
 0x87f   :  { %v5759_v37 = vadd.f32 %v5758_v24, %v12301_v34 }
 0x880   :  { %5841 = vst [vmem:[#allocation8 + $0x70] sm:$0xff] %v5757_v7 }
 0x881   :  { %5842 = vst [vmem:[#allocation8 + $0x78] sm:$0xff] %v5759_v37  ;;  %v5762_v41 = vpop.f32.mrb[44].mxu1 }
 0x882   :  { %v5763_v6 = vadd.f32 %v5762_v41, %v12297_v1  ;;  %v5764_v57 = vpop.f32.mrb[45].mxu1 }
 0x883   :  { %v5765_v15 = vadd.f32 %v5764_v57, %v12301_v34 }
 0x884   :  { %5843 = vst [vmem:[#allocation8 + $0x80] sm:$0xff] %v5763_v6 }
 0x885   :  { %5844 = vst [vmem:[#allocation8 + $0x88] sm:$0xff] %v5765_v15  ;;  %v5768_v25 = vpop.f32.mrb[46].mxu1 }
 0x886   :  { %v5769_v19 = vadd.f32 %v5768_v25, %v12297_v1  ;;  %v5770_v36 = vpop.f32.mrb[47].mxu1 }
 0x887   :  { %v5771_v44 = vadd.f32 %v5770_v36, %v12301_v34 }
 0x888   :  { %5845 = vst [vmem:[#allocation8 + $0x90] sm:$0xff] %v5769_v19 }
 0x889   :  { %5846 = vst [vmem:[#allocation8 + $0x98] sm:$0xff] %v5771_v44  ;;  %v5774_v10 = vpop.f32.mrb[48].mxu1 }
 0x88a   :  { %v5775_v13 = vadd.f32 %v5774_v10, %v12297_v1  ;;  %v5776_v61 = vpop.f32.mrb[49].mxu1 }
 0x88b   :  { %v5777_v48 = vadd.f32 %v5776_v61, %v12301_v34 }
 0x88c   :  { %5847 = vst [vmem:[#allocation8 + $0xa0] sm:$0xff] %v5775_v13 }
 0x88d   :  { %5848 = vst [vmem:[#allocation8 + $0xa8] sm:$0xff] %v5777_v48  ;;  %v5780_v35 = vpop.f32.mrb[50].mxu1 }
 0x88e   :  { %v5781_v45 = vadd.f32 %v5780_v35, %v12297_v1  ;;  %v5782_v46 = vpop.f32.mrb[51].mxu1 }
 0x88f   :  { %v5783_v9 = vadd.f32 %v5782_v46, %v12301_v34 }
 0x890   :  { %5849 = vst [vmem:[#allocation8 + $0xb0] sm:$0xff] %v5781_v45 }
 0x891   :  { %5850 = vst [vmem:[#allocation8 + $0xb8] sm:$0xff] %v5783_v9  ;;  %v5786_v39 = vpop.f32.mrb[52].mxu1 }
 0x892   :  { %v5787_v5 = vadd.f32 %v5786_v39, %v12297_v1  ;;  %v5788_v14 = vpop.f32.mrb[53].mxu1 }
 0x893   :  { %v5789_v42 = vadd.f32 %v5788_v14, %v12301_v34 }
 0x894   :  { %5851 = vst [vmem:[#allocation8 + $0xc0] sm:$0xff] %v5787_v5 }
 0x895   :  { %5852 = vst [vmem:[#allocation8 + $0xc8] sm:$0xff] %v5789_v42  ;;  %v5792_v43 = vpop.f32.mrb[54].mxu1 }
 0x896   :  { %v5793_v29 = vadd.f32 %v5792_v43, %v12297_v1  ;;  %v5794_v16 = vpop.f32.mrb[55].mxu1 }
 0x897   :  { %v5795_v58 = vadd.f32 %v5794_v16, %v12301_v34 }
 0x898   :  { %5853 = vst [vmem:[#allocation8 + $0xd0] sm:$0xff] %v5793_v29 }
 0x899   :  { %5854 = vst [vmem:[#allocation8 + $0xd8] sm:$0xff] %v5795_v58  ;;  %v5798_v31 = vpop.f32.mrb[56].mxu1 }
 0x89a   :  { %v5799_v2 = vadd.f32 %v5798_v31, %v12297_v1  ;;  %v5800_v20 = vpop.f32.mrb[57].mxu1 }
 0x89b   :  { %v5801_v54 = vadd.f32 %v5800_v20, %v12301_v34 }
 0x89c   :  { %5855 = vst [vmem:[#allocation8 + $0xe0] sm:$0xff] %v5799_v2 }
 0x89d   :  { %5856 = vst [vmem:[#allocation8 + $0xe8] sm:$0xff] %v5801_v54  ;;  %v5804_v12 = vpop.f32.mrb[58].mxu1 }
 0x89e   :  { %v5805_v23 = vadd.f32 %v5804_v12, %v12297_v1  ;;  %v5806_v28 = vpop.f32.mrb[59].mxu1 }
 0x89f   :  { %v5807_v18 = vadd.f32 %v5806_v28, %v12301_v34 }
 0x8a0   :  { %5857 = vst [vmem:[#allocation8 + $0xf0] sm:$0xff] %v5805_v23 }
 0x8a1   :  { %5858 = vst [vmem:[#allocation8 + $0xf8] sm:$0xff] %v5807_v18 }
 0x8b2   :  { %v5810_v49 = vpop.f32.mrb[60].mxu1 }
 0x8b3   :  { %v5811_v50 = vadd.f32 %v5810_v49, %v12297_v1  ;;  %v5812_v59 = vpop.f32.mrb[61].mxu1 }
 0x8b4   :  { %v5813_v3 = vadd.f32 %v5812_v59, %v12301_v34 }
 0x8b5   :  { %5859 = vst [vmem:[#allocation8 + $0x100] sm:$0xff] %v5811_v50 }
 0x8b6   :  { %5860 = vst [vmem:[#allocation8 + $0x108] sm:$0xff] %v5813_v3 }
 0x8df   :  { %v5816_v56 = vpop.f32.mrb[62].mxu1 }
 0x8e0   :  { %v5817_v62 = vadd.f32 %v5816_v56, %v12297_v1  ;;  %v5818_v8 = vpop.f32.mrb[63].mxu1 }
 0x8e1   :  { %v5819_v47 = vadd.f32 %v5818_v8, %v12301_v34 }
 0x8e2   :  { %5861 = vst [vmem:[#allocation8 + $0x110] sm:$0xff] %v5817_v62 }
 0x8e3   :  { %5862 = vst [vmem:[#allocation8 + $0x118] sm:$0xff] %v5819_v47 }
 0x90a   :  { %v5822_v53 = vpop.f32.mrb[64].mxu1 }
 0x90b   :  { %v5823_v51 = vadd.f32 %v5822_v53, %v12297_v1  ;;  %v5824_v17 = vpop.f32.mrb[65].mxu1 }
 0x90c   :  { %v5825_v11 = vadd.f32 %v5824_v17, %v12301_v34 }
 0x90d   :  { %5863 = vst [vmem:[#allocation8 + $0x120] sm:$0xff] %v5823_v51 }
 0x90e   :  { %5864 = vst [vmem:[#allocation8 + $0x128] sm:$0xff] %v5825_v11 }
 0x90f   :  { %6802 = shalt.err (!%p6799_p0)
}
 0x910   :  { %s6803_s25 = scalar_lea.hbm %s12371_s15, 4864 }
 0x911   :  { %p6804_p1 = scmp.ne.s32.totalorder %s12371_s15, %s6803_s25  ;;  %p6807_p2 = scmp.lt.u32.totalorder %s6803_s25, %s12371_s15 }
 0x913   :  { %p6809_p3 = pnand %p6807_p2, %p6804_p1 }
 0x915   :  { %6812 = shalt.err (!%p6809_p3)
}
 0x916   :  { %5876 = dma.vmem_to_hbm [thread:$0]  %s5871_s14, 4864, %s12371_s15, [#allocation4], %s6824_s3, %s6824_s3, %s6825_s21  }
 0x917   :  { %6817 = dma.done.wait [#allocation4], 4864  }
 0x918   :  { %6818 = vsyncadd [#allocation4], 4294962432 }
 0x919   :  { %5880 = vsyncpa [#allocation3], 1 }
 0x91a   :  { %5881 = vsyncpa [#allocation6], 1 }
 0x91b   :  { %5882 = vsyncpa [#allocation4], 1 }

</bundles_post_ra>
